<compile_context>
chip_gen: v5e
topology: v5e:2x2
jax: 0.10.0
libtpu: 0.0.40
codegen_flags: <defaults>
</compile_context>

<pallas_src>
import functools

import numpy as np
import jax
import jax.numpy as jnp
from jax import lax
from jax.experimental import pallas as pl
from jax.experimental.pallas import tpu as pltpu


def _vmem():
    return pl.BlockSpec(memory_space=pltpu.MemorySpace.VMEM)


def _smem():
    return pl.BlockSpec(memory_space=pltpu.MemorySpace.SMEM)


def _identity(n):
    rows = lax.broadcasted_iota(jnp.int32, (n, n), 0)
    cols = lax.broadcasted_iota(jnp.int32, (n, n), 1)
    return (rows == cols).astype(jnp.float32)


def _affinity(sq, gram, eye, inv_sigma):
    # exp(-||xi - xj||^2 / sigma) from row norms + Gram.  The diagonal distance
    # is forced to exactly 0 (matches torch.norm(x_i - x_i) == 0, so the
    # diagonal affinity is exactly 1 as in the reference).
    d2 = jnp.maximum(sq + sq.T - 2.0 * gram, 0.0) * (1.0 - eye)
    return jnp.exp(-d2 * inv_sigma)


def _topk_row_mask(adj_e, eye, k):
    # Per-row top-k mask (k is a tiny static int, unrolled at trace time):
    # k passes of row-wise max give the k-th-largest threshold; keep entries
    # >= threshold, then zero the diagonal (matching torch.topk + diag-zero).
    # TODO(synk): exact value ties (duplicate feature rows) can keep more than
    # k neighbours, unlike torch.topk's index tie-break.
    work = adj_e
    kth = None
    for _ in range(k):
        kth = jnp.max(work, axis=1, keepdims=True)
        work = jnp.where(work >= kth, -jnp.inf, work)
    mask = jnp.where(adj_e >= kth, 1.0, 0.0)
    return mask * (1.0 - eye)


# ---------------------------------------------------------------------------
# Fused kernel: affinity(9) -> adjacency polynomial -> collapsed GCN ->
# affinity(30) -> system matrix -> in-kernel Gauss-Jordan solve.
# ---------------------------------------------------------------------------
def _fused_forward_kernel(aifa_ref, alpha_ref, x_ref, g_ref, lbl_ref, out_ref,
                          *, k, num_classes, eps_val):
    n = x_ref.shape[0]
    c = num_classes
    x = x_ref[...].astype(jnp.float32)                               # [N, D]
    eye = _identity(n)

    # ---- MultiAdjacencyCompute (sigma = 9) on raw features ----
    gram_x = lax.dot_general(x, x, (((1,), (1,)), ((), ())),
                             preferred_element_type=jnp.float32)     # [N, N]
    adj_e = _affinity(jnp.sum(x * x, axis=1, keepdims=True), gram_x, eye,
                      1.0 / 9.0)
    mask = _topk_row_mask(adj_e, eye, k)
    adj = eye + mask * adj_e
    inv_sqrt_d = lax.rsqrt(jnp.sum(adj, axis=1, keepdims=True))      # EUP rsqrt
    adjn = adj * inv_sqrt_d * inv_sqrt_d.T                           # D^-1/2 A D^-1/2
    adjn2 = jnp.dot(adjn, adjn, preferred_element_type=jnp.float32)
    a_comb = aifa_ref[0] * eye + aifa_ref[1] * adjn + aifa_ref[2] * adjn2

    # ---- GCN + AdjacencyCompute (sigma = 30), H = 1000 collapsed via G=W@W.T ----
    z = jnp.dot(a_comb, x, preferred_element_type=jnp.float32)       # [N, D]
    zg = jnp.dot(z, g_ref[...], preferred_element_type=jnp.float32)  # [N, D]
    gram_z = lax.dot_general(zg, z, (((1,), (1,)), ((), ())),
                             preferred_element_type=jnp.float32)     # [N, N]
    adj_e2 = _affinity(jnp.sum(zg * z, axis=1, keepdims=True), gram_z, eye,
                       1.0 / 30.0)
    mask2 = _topk_row_mask(adj_e2, eye, k)

    # ---- propagation system  M = I - alpha*(I + mask*adj_e2) + eps ----
    alpha = alpha_ref[0]
    m = (1.0 - alpha) * eye - alpha * (mask2 * adj_e2) + eps_val     # [N, N]

    # ---- one-hot support labels (query rows carry label -1 -> zero rows) ----
    cls_iota = lax.broadcasted_iota(jnp.int32, (n, c), 1)
    y = (lbl_ref[...] == cls_iota).astype(jnp.float32)               # [N, C]

    # ---- in-kernel Gauss-Jordan with partial (row) pivoting: solve M F = y ----
    rows_i = lax.broadcasted_iota(jnp.int32, (n, 1), 0)
    rows_f = rows_i.astype(jnp.float32)                              # [N, 1]
    cols_nn = lax.broadcasted_iota(jnp.int32, (n, n), 1)
    cols_f = lax.broadcasted_iota(jnp.int32, (1, n), 1).astype(jnp.float32)
    perm_t = jnp.zeros((n, n), jnp.float32)   # perm_t[j, p]=1 <=> row p pivots col j
    used = jnp.zeros((n, 1), jnp.float32)
    for j in range(n):
        colj = jnp.sum(jnp.where(cols_nn == j, m, 0.0),
                       axis=1, keepdims=True)                        # [N, 1]
        score = jnp.where(used > 0.5, -1.0, jnp.abs(colj))           # [N, 1]
        best = jnp.max(score, axis=0, keepdims=True)                 # [1, 1]
        pivot_idx = jnp.min(jnp.where(score == best, rows_f, float(n)),
                            axis=0, keepdims=True)                   # [1, 1]
        p_onehot = (rows_f == pivot_idx).astype(jnp.float32)         # [N, 1]
        inv_piv = 1.0 / jnp.sum(colj * p_onehot, axis=0, keepdims=True)
        pivot_m = jnp.sum(p_onehot * m, axis=0, keepdims=True)       # [1, N]
        pivot_y = jnp.sum(p_onehot * y, axis=0, keepdims=True)       # [1, C]
        factor = (colj - p_onehot) * inv_piv                         # [N, 1]
        m = m - factor * pivot_m      # eliminates col j everywhere; pivot row /= pivot
        y = y - factor * pivot_y
        perm_t = perm_t + (rows_i == j).astype(jnp.float32) * (cols_f == pivot_idx)
        used = used + p_onehot
    # un-permute: F_all[j] = y[pivot_row(j)]
    out_ref[...] = jnp.dot(perm_t, y, preferred_element_type=jnp.float32)


# ---------------------------------------------------------------------------
# Hoisted (once-per-parameter-set) setup + jit-safe forward wrapper
# ---------------------------------------------------------------------------
def prepare_gcn_gram(gcn_weight):
    """G = W @ W.T ([D, D]).  The GCN hidden dim (1000) and the bias disappear
    from the per-call forward entirely (bias cancels in pairwise distances and
    x_gcn itself is never returned)."""
    w = jnp.asarray(gcn_weight, jnp.float32)
    return jnp.dot(w, w.T, precision=lax.Precision.HIGHEST)


def multi_gcn_propagation(features, s_label, gram_w, aifa_raw, alpha, n_way):
    eps_val = float(np.finfo(float).eps)
    N, D = features.shape
    num_classes = int(n_way)
    num_support = int(s_label.shape[0]) // num_classes
    C = num_classes
    k = int(round(N / n_way))

    # tiny scalar prep (stays in XLA; everything heavy is in the fused kernel)
    aifa = jax.nn.softmax(jnp.asarray(aifa_raw, jnp.float32).reshape(3))
    alpha_v = jnp.asarray(alpha, jnp.float32).reshape(1)
    labels_pad = jnp.full((N, 1), -1, jnp.int32).at[: s_label.shape[0], 0].set(
        jnp.asarray(s_label, jnp.int32))

    cost = pl.CostEstimate(
        flops=int(4 * N * N * D          # two Gram-style matmuls
                  + 2 * N * N * N        # adjn @ adjn
                  + 2 * N * N * D        # A_comb @ X
                  + 2 * N * D * D        # Z @ G
                  + 2 * N * N * (N + C)  # Gauss-Jordan rank-1 updates
                  + 2 * N * N * C        # un-permute matmul
                  + 40 * N * N),
        transcendentals=int(2 * N * N + 2 * N),
        bytes_accessed=int(4 * (N * D + D * D + N + N * C) + 16),
    )

    F_all = pl.pallas_call(
        functools.partial(_fused_forward_kernel, k=k, num_classes=C,
                          eps_val=eps_val),
        out_shape=jax.ShapeDtypeStruct((N, C), jnp.float32),
        in_specs=[_smem(), _smem(), _vmem(), _vmem(), _vmem()],
        out_specs=_vmem(),
        cost_estimate=cost,
    )(aifa, alpha_v, jnp.asarray(features, jnp.float32), gram_w, labels_pad)

    Fq = F_all[num_classes * num_support:, :]
    return F_all, Fq


# ---------------------------------------------------------------------------
# Pure-JAX reference (validation of the fused kernel, incl. the in-kernel
# Gauss-Jordan solve and the exact W@W.T collapse)
# ---------------------------------------------------------------------------
def _reference_forward(features, s_label, gram_w, aifa_raw, alpha, n_way):
    hp = lax.Precision.HIGHEST
    N = features.shape[0]
    C = int(n_way)
    S = int(s_label.shape[0])
    k = int(round(N / n_way))
    eps_val = float(np.finfo(float).eps)
    eye = jnp.eye(N, dtype=jnp.float32)

    def affinity(sq, gram, sigma):
        d2 = jnp.maximum(sq + sq.T - 2.0 * gram, 0.0) * (1.0 - eye)
        return jnp.exp(-d2 / sigma)

    def topk_mask(a):
        kth = jnp.sort(a, axis=1)[:, N - k:N - k + 1]
        return (a >= kth).astype(jnp.float32) * (1.0 - eye)

    x = jnp.asarray(features, jnp.float32)
    adj_e = affinity(jnp.sum(x * x, 1, keepdims=True),
                     jnp.dot(x, x.T, precision=hp), 9.0)
    adj = eye + topk_mask(adj_e) * adj_e
    inv_d = 1.0 / jnp.sqrt(jnp.sum(adj, 1, keepdims=True))
    adjn = adj * inv_d * inv_d.T
    aifa = jax.nn.softmax(jnp.asarray(aifa_raw, jnp.float32))
    a_comb = (aifa[0] * eye + aifa[1] * adjn
              + aifa[2] * jnp.dot(adjn, adjn, precision=hp))

    z = jnp.dot(a_comb, x, precision=hp)
    zg = jnp.dot(z, gram_w, precision=hp)
    adj_e2 = affinity(jnp.sum(zg * z, 1, keepdims=True),
                      jnp.dot(zg, z.T, precision=hp), 30.0)
    s_mat = eye + topk_mask(adj_e2) * adj_e2

    y = jnp.concatenate(
        [jax.nn.one_hot(s_label, C, dtype=jnp.float32),
         jnp.zeros((N - S, C), jnp.float32)], axis=0)
    m = eye - jnp.asarray(alpha, jnp.float32).reshape(()) * s_mat + eps_val
    F_all = jnp.linalg.solve(m, y)
    return F_all, F_all[S:, :]


# ---------------------------------------------------------------------------
# Deterministic parameter init + example run
# ---------------------------------------------------------------------------
if __name__ == "__main__":
    key = jax.random.PRNGKey(0)
    k_feat, k_w = jax.random.split(key)

    input_dim = 32          # node feature dim
    hidden = 1000           # hard-coded GCN output dim in the module
    n_way = 5               # test_N_way
    num_classes = 5
    num_support = 2         # labeled (support) nodes per class
    N = 20                  # total nodes: 10 support + 10 query

    # inputs
    features = jax.random.normal(k_feat, (N, input_dim), jnp.float32)
    s_label = jnp.array(
        [c for c in range(num_classes) for _ in range(num_support)],
        dtype=jnp.int32)

    # parameters (deterministic, mirroring the module's __init__)
    bound = float(np.sqrt(6.0 / input_dim))   # kaiming_uniform, fan_in = input_dim
    gcn_weight = jax.random.uniform(
        k_w, (input_dim, hidden), jnp.float32, -bound, bound)
    # gcn_bias is zeros_()-initialized and cancels in pairwise distances -> unused
    aifa_raw = jnp.zeros((3,), jnp.float32)   # aifa1 = aifa2 = aifa3 = 0
    alpha = jnp.array([0.5], jnp.float32)

    # hoisted, once-per-parameter-set setup (not per forward call)
    gram_w = prepare_gcn_gram(gcn_weight)

    fwd = jax.jit(multi_gcn_propagation, static_argnums=(5,))
    F_all, Fq = fwd(features, s_label, gram_w, aifa_raw, alpha, n_way)
    jax.block_until_ready((F_all, Fq))

    assert F_all.shape == (N, num_classes)
    assert Fq.shape == (N - num_classes * num_support, num_classes)
    assert bool(jnp.all(jnp.isfinite(F_all)))

    # validate the fused kernel against the pure-JAX reference
    F_ref, _ = _reference_forward(features, s_label, gram_w, aifa_raw, alpha,
                                  n_way)
    assert bool(jnp.allclose(F_all, F_ref, rtol=2e-2, atol=1e-3)), (
        "max abs err = %g" % float(jnp.max(jnp.abs(F_all - F_ref))))

    print("KERNEL_OK")
</pallas_src>

<mosaic_0001>
module attributes {stable_mosaic.version = 11 : i64} {
  func.func @_fused_forward_kernel(%arg0: memref<3xf32, #tpu.memory_space<smem>>, %arg1: memref<1xf32, #tpu.memory_space<smem>>, %arg2: memref<20x32xf32, #tpu.memory_space<vmem>>, %arg3: memref<32x32xf32, #tpu.memory_space<vmem>>, %arg4: memref<20x1xi32, #tpu.memory_space<vmem>>, %arg5: memref<20x5xf32, #tpu.memory_space<vmem>>) attributes {dimension_semantics = [], scalar_prefetch = 0 : i64, scratch_operands = 0 : i64, tpu.core_type = #tpu.core_type<tc>} {
    %c0 = arith.constant 0 : index
    %c0_0 = arith.constant 0 : index
    %0 = vector.load %arg2[%c0, %c0_0] : memref<20x32xf32, #tpu.memory_space<vmem>>, vector<20x32xf32>
    %1 = tpu.iota {dimensions = array<i32: 0>} : vector<20x20xi32>
    %2 = tpu.iota {dimensions = array<i32: 1>} : vector<20x20xi32>
    %3 = arith.cmpi eq, %1, %2 : vector<20x20xi32>
    %4 = arith.extui %3 : vector<20x20xi1> to vector<20x20xi32>
    %5 = arith.sitofp %4 : vector<20x20xi32> to vector<20x20xf32>
    %cst = arith.constant dense<0.000000e+00> : vector<20x20xf32>
    %6 = tpu.matmul %0, %0, %cst {dimension_numbers = #tpu.dot_dimension_numbers<[1], [1], [0], [0], [0, 0, 1, 0], [], []>} : vector<20x32xf32>, vector<20x32xf32>, vector<20x20xf32> -> vector<20x20xf32>
    %7 = arith.mulf %0, %0 : vector<20x32xf32>
    %cst_1 = arith.constant dense<0.000000e+00> : vector<20xf32>
    %8 = vector.multi_reduction <add>, %7, %cst_1 [1] : vector<20x32xf32> to vector<20xf32>
    %9 = vector.shape_cast %8 : vector<20xf32> to vector<20x1xf32>
    %10 = tpu.transpose %9, [1, 0] : vector<20x1xf32> -> vector<1x20xf32>
    %11 = vector.broadcast %9 : vector<20x1xf32> to vector<20x20xf32>
    %12 = vector.broadcast %10 : vector<1x20xf32> to vector<20x20xf32>
    %13 = arith.addf %11, %12 : vector<20x20xf32>
    %cst_2 = arith.constant 2.000000e+00 : f32
    %14 = vector.broadcast %cst_2 : f32 to vector<20x20xf32>
    %15 = arith.mulf %14, %6 : vector<20x20xf32>
    %16 = arith.subf %13, %15 : vector<20x20xf32>
    %cst_3 = arith.constant 0.000000e+00 : f32
    %17 = vector.broadcast %cst_3 : f32 to vector<20x20xf32>
    %18 = arith.maximumf %16, %17 : vector<20x20xf32>
    %cst_4 = arith.constant 1.000000e+00 : f32
    %19 = vector.broadcast %cst_4 : f32 to vector<20x20xf32>
    %20 = arith.subf %19, %5 : vector<20x20xf32>
    %21 = arith.mulf %18, %20 : vector<20x20xf32>
    %cst_5 = arith.constant 0.000000e+00 : f32
    %22 = vector.broadcast %cst_5 : f32 to vector<20x20xf32>
    %23 = arith.subf %22, %21 : vector<20x20xf32>
    %cst_6 = arith.constant 0.111111112 : f32
    %24 = vector.broadcast %cst_6 : f32 to vector<20x20xf32>
    %25 = arith.mulf %23, %24 : vector<20x20xf32>
    %26 = math.exp %25 : vector<20x20xf32>
    %cst_7 = arith.constant dense<0xFF800000> : vector<20xf32>
    %27 = vector.multi_reduction <maximumf>, %26, %cst_7 [1] : vector<20x20xf32> to vector<20xf32>
    %28 = vector.shape_cast %27 : vector<20xf32> to vector<20x1xf32>
    %29 = vector.broadcast %28 : vector<20x1xf32> to vector<20x20xf32>
    %30 = arith.cmpf oge, %26, %29 : vector<20x20xf32>
    %cst_8 = arith.constant 0xFF800000 : f32
    %31 = vector.broadcast %cst_8 : f32 to vector<20x20xf32>
    %32 = arith.select %30, %31, %26 : vector<20x20xi1>, vector<20x20xf32>
    %cst_9 = arith.constant dense<0xFF800000> : vector<20xf32>
    %33 = vector.multi_reduction <maximumf>, %32, %cst_9 [1] : vector<20x20xf32> to vector<20xf32>
    %34 = vector.shape_cast %33 : vector<20xf32> to vector<20x1xf32>
    %35 = vector.broadcast %34 : vector<20x1xf32> to vector<20x20xf32>
    %36 = arith.cmpf oge, %32, %35 : vector<20x20xf32>
    %cst_10 = arith.constant 0xFF800000 : f32
    %37 = vector.broadcast %cst_10 : f32 to vector<20x20xf32>
    %38 = arith.select %36, %37, %32 : vector<20x20xi1>, vector<20x20xf32>
    %cst_11 = arith.constant dense<0xFF800000> : vector<20xf32>
    %39 = vector.multi_reduction <maximumf>, %38, %cst_11 [1] : vector<20x20xf32> to vector<20xf32>
    %40 = vector.shape_cast %39 : vector<20xf32> to vector<20x1xf32>
    %41 = vector.broadcast %40 : vector<20x1xf32> to vector<20x20xf32>
    %42 = arith.cmpf oge, %38, %41 : vector<20x20xf32>
    %cst_12 = arith.constant 0xFF800000 : f32
    %43 = vector.broadcast %cst_12 : f32 to vector<20x20xf32>
    %44 = arith.select %42, %43, %38 : vector<20x20xi1>, vector<20x20xf32>
    %cst_13 = arith.constant dense<0xFF800000> : vector<20xf32>
    %45 = vector.multi_reduction <maximumf>, %44, %cst_13 [1] : vector<20x20xf32> to vector<20xf32>
    %46 = vector.shape_cast %45 : vector<20xf32> to vector<20x1xf32>
    %47 = vector.broadcast %46 : vector<20x1xf32> to vector<20x20xf32>
    %48 = arith.cmpf oge, %26, %47 : vector<20x20xf32>
    %cst_14 = arith.constant 1.000000e+00 : f32
    %cst_15 = arith.constant 0.000000e+00 : f32
    %49 = vector.broadcast %cst_14 : f32 to vector<20x20xf32>
    %50 = vector.broadcast %cst_15 : f32 to vector<20x20xf32>
    %51 = arith.select %48, %49, %50 : vector<20x20xi1>, vector<20x20xf32>
    %cst_16 = arith.constant 1.000000e+00 : f32
    %52 = vector.broadcast %cst_16 : f32 to vector<20x20xf32>
    %53 = arith.subf %52, %5 : vector<20x20xf32>
    %54 = arith.mulf %51, %53 : vector<20x20xf32>
    %55 = arith.mulf %54, %26 : vector<20x20xf32>
    %56 = arith.addf %5, %55 : vector<20x20xf32>
    %cst_17 = arith.constant dense<0.000000e+00> : vector<20xf32>
    %57 = vector.multi_reduction <add>, %56, %cst_17 [1] : vector<20x20xf32> to vector<20xf32>
    %58 = vector.shape_cast %57 : vector<20xf32> to vector<20x1xf32>
    %59 = math.rsqrt %58 : vector<20x1xf32>
    %60 = vector.broadcast %59 : vector<20x1xf32> to vector<20x20xf32>
    %61 = arith.mulf %56, %60 : vector<20x20xf32>
    %62 = tpu.transpose %59, [1, 0] : vector<20x1xf32> -> vector<1x20xf32>
    %63 = vector.broadcast %62 : vector<1x20xf32> to vector<20x20xf32>
    %64 = arith.mulf %61, %63 : vector<20x20xf32>
    %cst_18 = arith.constant dense<0.000000e+00> : vector<20x20xf32>
    %65 = tpu.matmul %64, %64, %cst_18 {dimension_numbers = #tpu.dot_dimension_numbers<[1], [0], [0], [1], [0, 0, 1, 1], [], []>} : vector<20x20xf32>, vector<20x20xf32>, vector<20x20xf32> -> vector<20x20xf32>
    %c0_19 = arith.constant 0 : index
    %66 = memref.load %arg0[%c0_19] : memref<3xf32, #tpu.memory_space<smem>>
    %67 = vector.broadcast %66 : f32 to vector<20x20xf32>
    %68 = arith.mulf %67, %5 : vector<20x20xf32>
    %c1 = arith.constant 1 : index
    %69 = memref.load %arg0[%c1] : memref<3xf32, #tpu.memory_space<smem>>
    %70 = vector.broadcast %69 : f32 to vector<20x20xf32>
    %71 = arith.mulf %70, %64 : vector<20x20xf32>
    %72 = arith.addf %68, %71 : vector<20x20xf32>
    %c2 = arith.constant 2 : index
    %73 = memref.load %arg0[%c2] : memref<3xf32, #tpu.memory_space<smem>>
    %74 = vector.broadcast %73 : f32 to vector<20x20xf32>
    %75 = arith.mulf %74, %65 : vector<20x20xf32>
    %76 = arith.addf %72, %75 : vector<20x20xf32>
    %cst_20 = arith.constant dense<0.000000e+00> : vector<20x32xf32>
    %77 = tpu.matmul %76, %0, %cst_20 {dimension_numbers = #tpu.dot_dimension_numbers<[1], [0], [0], [1], [0, 0, 1, 1], [], []>} : vector<20x20xf32>, vector<20x32xf32>, vector<20x32xf32> -> vector<20x32xf32>
    %c0_21 = arith.constant 0 : index
    %c0_22 = arith.constant 0 : index
    %78 = vector.load %arg3[%c0_21, %c0_22] : memref<32x32xf32, #tpu.memory_space<vmem>>, vector<32x32xf32>
    %cst_23 = arith.constant dense<0.000000e+00> : vector<20x32xf32>
    %79 = tpu.matmul %77, %78, %cst_23 {dimension_numbers = #tpu.dot_dimension_numbers<[1], [0], [0], [1], [0, 0, 1, 1], [], []>} : vector<20x32xf32>, vector<32x32xf32>, vector<20x32xf32> -> vector<20x32xf32>
    %cst_24 = arith.constant dense<0.000000e+00> : vector<20x20xf32>
    %80 = tpu.matmul %79, %77, %cst_24 {dimension_numbers = #tpu.dot_dimension_numbers<[1], [1], [0], [0], [0, 0, 1, 0], [], []>} : vector<20x32xf32>, vector<20x32xf32>, vector<20x20xf32> -> vector<20x20xf32>
    %81 = arith.mulf %79, %77 : vector<20x32xf32>
    %cst_25 = arith.constant dense<0.000000e+00> : vector<20xf32>
    %82 = vector.multi_reduction <add>, %81, %cst_25 [1] : vector<20x32xf32> to vector<20xf32>
    %83 = vector.shape_cast %82 : vector<20xf32> to vector<20x1xf32>
    %84 = tpu.transpose %83, [1, 0] : vector<20x1xf32> -> vector<1x20xf32>
    %85 = vector.broadcast %83 : vector<20x1xf32> to vector<20x20xf32>
    %86 = vector.broadcast %84 : vector<1x20xf32> to vector<20x20xf32>
    %87 = arith.addf %85, %86 : vector<20x20xf32>
    %cst_26 = arith.constant 2.000000e+00 : f32
    %88 = vector.broadcast %cst_26 : f32 to vector<20x20xf32>
    %89 = arith.mulf %88, %80 : vector<20x20xf32>
    %90 = arith.subf %87, %89 : vector<20x20xf32>
    %cst_27 = arith.constant 0.000000e+00 : f32
    %91 = vector.broadcast %cst_27 : f32 to vector<20x20xf32>
    %92 = arith.maximumf %90, %91 : vector<20x20xf32>
    %cst_28 = arith.constant 1.000000e+00 : f32
    %93 = vector.broadcast %cst_28 : f32 to vector<20x20xf32>
    %94 = arith.subf %93, %5 : vector<20x20xf32>
    %95 = arith.mulf %92, %94 : vector<20x20xf32>
    %cst_29 = arith.constant 0.000000e+00 : f32
    %96 = vector.broadcast %cst_29 : f32 to vector<20x20xf32>
    %97 = arith.subf %96, %95 : vector<20x20xf32>
    %cst_30 = arith.constant 0.0333333351 : f32
    %98 = vector.broadcast %cst_30 : f32 to vector<20x20xf32>
    %99 = arith.mulf %97, %98 : vector<20x20xf32>
    %100 = math.exp %99 : vector<20x20xf32>
    %cst_31 = arith.constant dense<0xFF800000> : vector<20xf32>
    %101 = vector.multi_reduction <maximumf>, %100, %cst_31 [1] : vector<20x20xf32> to vector<20xf32>
    %102 = vector.shape_cast %101 : vector<20xf32> to vector<20x1xf32>
    %103 = vector.broadcast %102 : vector<20x1xf32> to vector<20x20xf32>
    %104 = arith.cmpf oge, %100, %103 : vector<20x20xf32>
    %cst_32 = arith.constant 0xFF800000 : f32
    %105 = vector.broadcast %cst_32 : f32 to vector<20x20xf32>
    %106 = arith.select %104, %105, %100 : vector<20x20xi1>, vector<20x20xf32>
    %cst_33 = arith.constant dense<0xFF800000> : vector<20xf32>
    %107 = vector.multi_reduction <maximumf>, %106, %cst_33 [1] : vector<20x20xf32> to vector<20xf32>
    %108 = vector.shape_cast %107 : vector<20xf32> to vector<20x1xf32>
    %109 = vector.broadcast %108 : vector<20x1xf32> to vector<20x20xf32>
    %110 = arith.cmpf oge, %106, %109 : vector<20x20xf32>
    %cst_34 = arith.constant 0xFF800000 : f32
    %111 = vector.broadcast %cst_34 : f32 to vector<20x20xf32>
    %112 = arith.select %110, %111, %106 : vector<20x20xi1>, vector<20x20xf32>
    %cst_35 = arith.constant dense<0xFF800000> : vector<20xf32>
    %113 = vector.multi_reduction <maximumf>, %112, %cst_35 [1] : vector<20x20xf32> to vector<20xf32>
    %114 = vector.shape_cast %113 : vector<20xf32> to vector<20x1xf32>
    %115 = vector.broadcast %114 : vector<20x1xf32> to vector<20x20xf32>
    %116 = arith.cmpf oge, %112, %115 : vector<20x20xf32>
    %cst_36 = arith.constant 0xFF800000 : f32
    %117 = vector.broadcast %cst_36 : f32 to vector<20x20xf32>
    %118 = arith.select %116, %117, %112 : vector<20x20xi1>, vector<20x20xf32>
    %cst_37 = arith.constant dense<0xFF800000> : vector<20xf32>
    %119 = vector.multi_reduction <maximumf>, %118, %cst_37 [1] : vector<20x20xf32> to vector<20xf32>
    %120 = vector.shape_cast %119 : vector<20xf32> to vector<20x1xf32>
    %121 = vector.broadcast %120 : vector<20x1xf32> to vector<20x20xf32>
    %122 = arith.cmpf oge, %100, %121 : vector<20x20xf32>
    %cst_38 = arith.constant 1.000000e+00 : f32
    %cst_39 = arith.constant 0.000000e+00 : f32
    %123 = vector.broadcast %cst_38 : f32 to vector<20x20xf32>
    %124 = vector.broadcast %cst_39 : f32 to vector<20x20xf32>
    %125 = arith.select %122, %123, %124 : vector<20x20xi1>, vector<20x20xf32>
    %cst_40 = arith.constant 1.000000e+00 : f32
    %126 = vector.broadcast %cst_40 : f32 to vector<20x20xf32>
    %127 = arith.subf %126, %5 : vector<20x20xf32>
    %128 = arith.mulf %125, %127 : vector<20x20xf32>
    %c0_41 = arith.constant 0 : index
    %129 = memref.load %arg1[%c0_41] : memref<1xf32, #tpu.memory_space<smem>>
    %cst_42 = arith.constant 1.000000e+00 : f32
    %130 = arith.subf %cst_42, %129 : f32
    %131 = vector.broadcast %130 : f32 to vector<20x20xf32>
    %132 = arith.mulf %131, %5 : vector<20x20xf32>
    %133 = arith.mulf %128, %100 : vector<20x20xf32>
    %134 = vector.broadcast %129 : f32 to vector<20x20xf32>
    %135 = arith.mulf %134, %133 : vector<20x20xf32>
    %136 = arith.subf %132, %135 : vector<20x20xf32>
    %cst_43 = arith.constant 2.22044605E-16 : f32
    %137 = vector.broadcast %cst_43 : f32 to vector<20x20xf32>
    %138 = arith.addf %136, %137 : vector<20x20xf32>
    %139 = tpu.iota {dimensions = array<i32: 1>} : vector<20x5xi32>
    %c0_44 = arith.constant 0 : index
    %c0_45 = arith.constant 0 : index
    %140 = vector.load %arg4[%c0_44, %c0_45] : memref<20x1xi32, #tpu.memory_space<vmem>>, vector<20x1xi32>
    %141 = vector.broadcast %140 : vector<20x1xi32> to vector<20x5xi32>
    %142 = arith.cmpi eq, %141, %139 : vector<20x5xi32>
    %143 = arith.extui %142 : vector<20x5xi1> to vector<20x5xi32>
    %144 = arith.sitofp %143 : vector<20x5xi32> to vector<20x5xf32>
    %145 = tpu.iota {dimensions = array<i32: 0>} : vector<20x1xi32>
    %146 = arith.sitofp %145 : vector<20x1xi32> to vector<20x1xf32>
    %147 = tpu.iota {dimensions = array<i32: 1>} : vector<20x20xi32>
    %148 = tpu.iota {dimensions = array<i32: 1>} : vector<1x20xi32>
    %149 = arith.sitofp %148 : vector<1x20xi32> to vector<1x20xf32>
    %cst_46 = arith.constant 0.000000e+00 : f32
    %150 = vector.broadcast %cst_46 : f32 to vector<20x20xf32>
    %cst_47 = arith.constant 0.000000e+00 : f32
    %151 = vector.broadcast %cst_47 : f32 to vector<20x1xf32>
    %c0_i32 = arith.constant 0 : i32
    %152 = vector.broadcast %c0_i32 : i32 to vector<20x20xi32>
    %153 = arith.cmpi eq, %147, %152 : vector<20x20xi32>
    %cst_48 = arith.constant 0.000000e+00 : f32
    %154 = vector.broadcast %cst_48 : f32 to vector<20x20xf32>
    %155 = arith.select %153, %138, %154 : vector<20x20xi1>, vector<20x20xf32>
    %cst_49 = arith.constant dense<0.000000e+00> : vector<20xf32>
    %156 = vector.multi_reduction <add>, %155, %cst_49 [1] : vector<20x20xf32> to vector<20xf32>
    %157 = vector.shape_cast %156 : vector<20xf32> to vector<20x1xf32>
    %cst_50 = arith.constant 5.000000e-01 : f32
    %158 = vector.broadcast %cst_50 : f32 to vector<20x1xf32>
    %159 = arith.cmpf ogt, %151, %158 : vector<20x1xf32>
    %160 = math.absf %157 : vector<20x1xf32>
    %cst_51 = arith.constant -1.000000e+00 : f32
    %161 = vector.broadcast %cst_51 : f32 to vector<20x1xf32>
    %162 = arith.select %159, %161, %160 : vector<20x1xi1>, vector<20x1xf32>
    %cst_52 = arith.constant dense<0xFF800000> : vector<1xf32>
    %163 = vector.multi_reduction <maximumf>, %162, %cst_52 [0] : vector<20x1xf32> to vector<1xf32>
    %164 = vector.shape_cast %163 : vector<1xf32> to vector<1x1xf32>
    %165 = vector.broadcast %164 : vector<1x1xf32> to vector<20x1xf32>
    %166 = arith.cmpf oeq, %162, %165 : vector<20x1xf32>
    %cst_53 = arith.constant 2.000000e+01 : f32
    %167 = vector.broadcast %cst_53 : f32 to vector<20x1xf32>
    %168 = arith.select %166, %146, %167 : vector<20x1xi1>, vector<20x1xf32>
    %cst_54 = arith.constant dense<0x7F800000> : vector<1xf32>
    %169 = vector.multi_reduction <minimumf>, %168, %cst_54 [0] : vector<20x1xf32> to vector<1xf32>
    %170 = vector.shape_cast %169 : vector<1xf32> to vector<1x1xf32>
    %171 = vector.broadcast %170 : vector<1x1xf32> to vector<20x1xf32>
    %172 = arith.cmpf oeq, %146, %171 : vector<20x1xf32>
    %173 = arith.extui %172 : vector<20x1xi1> to vector<20x1xi32>
    %174 = arith.sitofp %173 : vector<20x1xi32> to vector<20x1xf32>
    %175 = arith.mulf %157, %174 : vector<20x1xf32>
    %cst_55 = arith.constant dense<0.000000e+00> : vector<1xf32>
    %176 = vector.multi_reduction <add>, %175, %cst_55 [0] : vector<20x1xf32> to vector<1xf32>
    %177 = vector.shape_cast %176 : vector<1xf32> to vector<1x1xf32>
    %cst_56 = arith.constant 1.000000e+00 : f32
    %178 = vector.broadcast %cst_56 : f32 to vector<1x1xf32>
    %179 = arith.divf %178, %177 : vector<1x1xf32>
    %180 = vector.broadcast %174 : vector<20x1xf32> to vector<20x20xf32>
    %181 = arith.mulf %180, %138 : vector<20x20xf32>
    %cst_57 = arith.constant dense<0.000000e+00> : vector<20xf32>
    %182 = vector.multi_reduction <add>, %181, %cst_57 [0] : vector<20x20xf32> to vector<20xf32>
    %183 = vector.shape_cast %182 : vector<20xf32> to vector<1x20xf32>
    %184 = vector.broadcast %174 : vector<20x1xf32> to vector<20x5xf32>
    %185 = arith.mulf %184, %144 : vector<20x5xf32>
    %cst_58 = arith.constant dense<0.000000e+00> : vector<5xf32>
    %186 = vector.multi_reduction <add>, %185, %cst_58 [0] : vector<20x5xf32> to vector<5xf32>
    %187 = vector.shape_cast %186 : vector<5xf32> to vector<1x5xf32>
    %188 = arith.subf %157, %174 : vector<20x1xf32>
    %189 = vector.broadcast %179 : vector<1x1xf32> to vector<20x1xf32>
    %190 = arith.mulf %188, %189 : vector<20x1xf32>
    %191 = vector.broadcast %190 : vector<20x1xf32> to vector<20x20xf32>
    %192 = vector.broadcast %183 : vector<1x20xf32> to vector<20x20xf32>
    %193 = arith.mulf %191, %192 : vector<20x20xf32>
    %194 = arith.subf %138, %193 : vector<20x20xf32>
    %195 = vector.broadcast %190 : vector<20x1xf32> to vector<20x5xf32>
    %196 = vector.broadcast %187 : vector<1x5xf32> to vector<20x5xf32>
    %197 = arith.mulf %195, %196 : vector<20x5xf32>
    %198 = arith.subf %144, %197 : vector<20x5xf32>
    %c0_i32_59 = arith.constant 0 : i32
    %199 = vector.broadcast %c0_i32_59 : i32 to vector<20x1xi32>
    %200 = arith.cmpi eq, %145, %199 : vector<20x1xi32>
    %201 = arith.extui %200 : vector<20x1xi1> to vector<20x1xi32>
    %202 = arith.sitofp %201 : vector<20x1xi32> to vector<20x1xf32>
    %203 = vector.broadcast %170 : vector<1x1xf32> to vector<1x20xf32>
    %204 = arith.cmpf oeq, %149, %203 : vector<1x20xf32>
    %205 = arith.extui %204 : vector<1x20xi1> to vector<1x20xi32>
    %206 = arith.sitofp %205 : vector<1x20xi32> to vector<1x20xf32>
    %207 = vector.broadcast %202 : vector<20x1xf32> to vector<20x20xf32>
    %208 = vector.broadcast %206 : vector<1x20xf32> to vector<20x20xf32>
    %209 = arith.mulf %207, %208 : vector<20x20xf32>
    %210 = arith.addf %150, %209 : vector<20x20xf32>
    %211 = arith.addf %151, %174 : vector<20x1xf32>
    %c1_i32 = arith.constant 1 : i32
    %212 = vector.broadcast %c1_i32 : i32 to vector<20x20xi32>
    %213 = arith.cmpi eq, %147, %212 : vector<20x20xi32>
    %cst_60 = arith.constant 0.000000e+00 : f32
    %214 = vector.broadcast %cst_60 : f32 to vector<20x20xf32>
    %215 = arith.select %213, %194, %214 : vector<20x20xi1>, vector<20x20xf32>
    %cst_61 = arith.constant dense<0.000000e+00> : vector<20xf32>
    %216 = vector.multi_reduction <add>, %215, %cst_61 [1] : vector<20x20xf32> to vector<20xf32>
    %217 = vector.shape_cast %216 : vector<20xf32> to vector<20x1xf32>
    %cst_62 = arith.constant 5.000000e-01 : f32
    %218 = vector.broadcast %cst_62 : f32 to vector<20x1xf32>
    %219 = arith.cmpf ogt, %211, %218 : vector<20x1xf32>
    %220 = math.absf %217 : vector<20x1xf32>
    %cst_63 = arith.constant -1.000000e+00 : f32
    %221 = vector.broadcast %cst_63 : f32 to vector<20x1xf32>
    %222 = arith.select %219, %221, %220 : vector<20x1xi1>, vector<20x1xf32>
    %cst_64 = arith.constant dense<0xFF800000> : vector<1xf32>
    %223 = vector.multi_reduction <maximumf>, %222, %cst_64 [0] : vector<20x1xf32> to vector<1xf32>
    %224 = vector.shape_cast %223 : vector<1xf32> to vector<1x1xf32>
    %225 = vector.broadcast %224 : vector<1x1xf32> to vector<20x1xf32>
    %226 = arith.cmpf oeq, %222, %225 : vector<20x1xf32>
    %cst_65 = arith.constant 2.000000e+01 : f32
    %227 = vector.broadcast %cst_65 : f32 to vector<20x1xf32>
    %228 = arith.select %226, %146, %227 : vector<20x1xi1>, vector<20x1xf32>
    %cst_66 = arith.constant dense<0x7F800000> : vector<1xf32>
    %229 = vector.multi_reduction <minimumf>, %228, %cst_66 [0] : vector<20x1xf32> to vector<1xf32>
    %230 = vector.shape_cast %229 : vector<1xf32> to vector<1x1xf32>
    %231 = vector.broadcast %230 : vector<1x1xf32> to vector<20x1xf32>
    %232 = arith.cmpf oeq, %146, %231 : vector<20x1xf32>
    %233 = arith.extui %232 : vector<20x1xi1> to vector<20x1xi32>
    %234 = arith.sitofp %233 : vector<20x1xi32> to vector<20x1xf32>
    %235 = arith.mulf %217, %234 : vector<20x1xf32>
    %cst_67 = arith.constant dense<0.000000e+00> : vector<1xf32>
    %236 = vector.multi_reduction <add>, %235, %cst_67 [0] : vector<20x1xf32> to vector<1xf32>
    %237 = vector.shape_cast %236 : vector<1xf32> to vector<1x1xf32>
    %cst_68 = arith.constant 1.000000e+00 : f32
    %238 = vector.broadcast %cst_68 : f32 to vector<1x1xf32>
    %239 = arith.divf %238, %237 : vector<1x1xf32>
    %240 = vector.broadcast %234 : vector<20x1xf32> to vector<20x20xf32>
    %241 = arith.mulf %240, %194 : vector<20x20xf32>
    %cst_69 = arith.constant dense<0.000000e+00> : vector<20xf32>
    %242 = vector.multi_reduction <add>, %241, %cst_69 [0] : vector<20x20xf32> to vector<20xf32>
    %243 = vector.shape_cast %242 : vector<20xf32> to vector<1x20xf32>
    %244 = vector.broadcast %234 : vector<20x1xf32> to vector<20x5xf32>
    %245 = arith.mulf %244, %198 : vector<20x5xf32>
    %cst_70 = arith.constant dense<0.000000e+00> : vector<5xf32>
    %246 = vector.multi_reduction <add>, %245, %cst_70 [0] : vector<20x5xf32> to vector<5xf32>
    %247 = vector.shape_cast %246 : vector<5xf32> to vector<1x5xf32>
    %248 = arith.subf %217, %234 : vector<20x1xf32>
    %249 = vector.broadcast %239 : vector<1x1xf32> to vector<20x1xf32>
    %250 = arith.mulf %248, %249 : vector<20x1xf32>
    %251 = vector.broadcast %250 : vector<20x1xf32> to vector<20x20xf32>
    %252 = vector.broadcast %243 : vector<1x20xf32> to vector<20x20xf32>
    %253 = arith.mulf %251, %252 : vector<20x20xf32>
    %254 = arith.subf %194, %253 : vector<20x20xf32>
    %255 = vector.broadcast %250 : vector<20x1xf32> to vector<20x5xf32>
    %256 = vector.broadcast %247 : vector<1x5xf32> to vector<20x5xf32>
    %257 = arith.mulf %255, %256 : vector<20x5xf32>
    %258 = arith.subf %198, %257 : vector<20x5xf32>
    %c1_i32_71 = arith.constant 1 : i32
    %259 = vector.broadcast %c1_i32_71 : i32 to vector<20x1xi32>
    %260 = arith.cmpi eq, %145, %259 : vector<20x1xi32>
    %261 = arith.extui %260 : vector<20x1xi1> to vector<20x1xi32>
    %262 = arith.sitofp %261 : vector<20x1xi32> to vector<20x1xf32>
    %263 = vector.broadcast %230 : vector<1x1xf32> to vector<1x20xf32>
    %264 = arith.cmpf oeq, %149, %263 : vector<1x20xf32>
    %265 = arith.extui %264 : vector<1x20xi1> to vector<1x20xi32>
    %266 = arith.sitofp %265 : vector<1x20xi32> to vector<1x20xf32>
    %267 = vector.broadcast %262 : vector<20x1xf32> to vector<20x20xf32>
    %268 = vector.broadcast %266 : vector<1x20xf32> to vector<20x20xf32>
    %269 = arith.mulf %267, %268 : vector<20x20xf32>
    %270 = arith.addf %210, %269 : vector<20x20xf32>
    %271 = arith.addf %211, %234 : vector<20x1xf32>
    %c2_i32 = arith.constant 2 : i32
    %272 = vector.broadcast %c2_i32 : i32 to vector<20x20xi32>
    %273 = arith.cmpi eq, %147, %272 : vector<20x20xi32>
    %cst_72 = arith.constant 0.000000e+00 : f32
    %274 = vector.broadcast %cst_72 : f32 to vector<20x20xf32>
    %275 = arith.select %273, %254, %274 : vector<20x20xi1>, vector<20x20xf32>
    %cst_73 = arith.constant dense<0.000000e+00> : vector<20xf32>
    %276 = vector.multi_reduction <add>, %275, %cst_73 [1] : vector<20x20xf32> to vector<20xf32>
    %277 = vector.shape_cast %276 : vector<20xf32> to vector<20x1xf32>
    %cst_74 = arith.constant 5.000000e-01 : f32
    %278 = vector.broadcast %cst_74 : f32 to vector<20x1xf32>
    %279 = arith.cmpf ogt, %271, %278 : vector<20x1xf32>
    %280 = math.absf %277 : vector<20x1xf32>
    %cst_75 = arith.constant -1.000000e+00 : f32
    %281 = vector.broadcast %cst_75 : f32 to vector<20x1xf32>
    %282 = arith.select %279, %281, %280 : vector<20x1xi1>, vector<20x1xf32>
    %cst_76 = arith.constant dense<0xFF800000> : vector<1xf32>
    %283 = vector.multi_reduction <maximumf>, %282, %cst_76 [0] : vector<20x1xf32> to vector<1xf32>
    %284 = vector.shape_cast %283 : vector<1xf32> to vector<1x1xf32>
    %285 = vector.broadcast %284 : vector<1x1xf32> to vector<20x1xf32>
    %286 = arith.cmpf oeq, %282, %285 : vector<20x1xf32>
    %cst_77 = arith.constant 2.000000e+01 : f32
    %287 = vector.broadcast %cst_77 : f32 to vector<20x1xf32>
    %288 = arith.select %286, %146, %287 : vector<20x1xi1>, vector<20x1xf32>
    %cst_78 = arith.constant dense<0x7F800000> : vector<1xf32>
    %289 = vector.multi_reduction <minimumf>, %288, %cst_78 [0] : vector<20x1xf32> to vector<1xf32>
    %290 = vector.shape_cast %289 : vector<1xf32> to vector<1x1xf32>
    %291 = vector.broadcast %290 : vector<1x1xf32> to vector<20x1xf32>
    %292 = arith.cmpf oeq, %146, %291 : vector<20x1xf32>
    %293 = arith.extui %292 : vector<20x1xi1> to vector<20x1xi32>
    %294 = arith.sitofp %293 : vector<20x1xi32> to vector<20x1xf32>
    %295 = arith.mulf %277, %294 : vector<20x1xf32>
    %cst_79 = arith.constant dense<0.000000e+00> : vector<1xf32>
    %296 = vector.multi_reduction <add>, %295, %cst_79 [0] : vector<20x1xf32> to vector<1xf32>
    %297 = vector.shape_cast %296 : vector<1xf32> to vector<1x1xf32>
    %cst_80 = arith.constant 1.000000e+00 : f32
    %298 = vector.broadcast %cst_80 : f32 to vector<1x1xf32>
    %299 = arith.divf %298, %297 : vector<1x1xf32>
    %300 = vector.broadcast %294 : vector<20x1xf32> to vector<20x20xf32>
    %301 = arith.mulf %300, %254 : vector<20x20xf32>
    %cst_81 = arith.constant dense<0.000000e+00> : vector<20xf32>
    %302 = vector.multi_reduction <add>, %301, %cst_81 [0] : vector<20x20xf32> to vector<20xf32>
    %303 = vector.shape_cast %302 : vector<20xf32> to vector<1x20xf32>
    %304 = vector.broadcast %294 : vector<20x1xf32> to vector<20x5xf32>
    %305 = arith.mulf %304, %258 : vector<20x5xf32>
    %cst_82 = arith.constant dense<0.000000e+00> : vector<5xf32>
    %306 = vector.multi_reduction <add>, %305, %cst_82 [0] : vector<20x5xf32> to vector<5xf32>
    %307 = vector.shape_cast %306 : vector<5xf32> to vector<1x5xf32>
    %308 = arith.subf %277, %294 : vector<20x1xf32>
    %309 = vector.broadcast %299 : vector<1x1xf32> to vector<20x1xf32>
    %310 = arith.mulf %308, %309 : vector<20x1xf32>
    %311 = vector.broadcast %310 : vector<20x1xf32> to vector<20x20xf32>
    %312 = vector.broadcast %303 : vector<1x20xf32> to vector<20x20xf32>
    %313 = arith.mulf %311, %312 : vector<20x20xf32>
    %314 = arith.subf %254, %313 : vector<20x20xf32>
    %315 = vector.broadcast %310 : vector<20x1xf32> to vector<20x5xf32>
    %316 = vector.broadcast %307 : vector<1x5xf32> to vector<20x5xf32>
    %317 = arith.mulf %315, %316 : vector<20x5xf32>
    %318 = arith.subf %258, %317 : vector<20x5xf32>
    %c2_i32_83 = arith.constant 2 : i32
    %319 = vector.broadcast %c2_i32_83 : i32 to vector<20x1xi32>
    %320 = arith.cmpi eq, %145, %319 : vector<20x1xi32>
    %321 = arith.extui %320 : vector<20x1xi1> to vector<20x1xi32>
    %322 = arith.sitofp %321 : vector<20x1xi32> to vector<20x1xf32>
    %323 = vector.broadcast %290 : vector<1x1xf32> to vector<1x20xf32>
    %324 = arith.cmpf oeq, %149, %323 : vector<1x20xf32>
    %325 = arith.extui %324 : vector<1x20xi1> to vector<1x20xi32>
    %326 = arith.sitofp %325 : vector<1x20xi32> to vector<1x20xf32>
    %327 = vector.broadcast %322 : vector<20x1xf32> to vector<20x20xf32>
    %328 = vector.broadcast %326 : vector<1x20xf32> to vector<20x20xf32>
    %329 = arith.mulf %327, %328 : vector<20x20xf32>
    %330 = arith.addf %270, %329 : vector<20x20xf32>
    %331 = arith.addf %271, %294 : vector<20x1xf32>
    %c3_i32 = arith.constant 3 : i32
    %332 = vector.broadcast %c3_i32 : i32 to vector<20x20xi32>
    %333 = arith.cmpi eq, %147, %332 : vector<20x20xi32>
    %cst_84 = arith.constant 0.000000e+00 : f32
    %334 = vector.broadcast %cst_84 : f32 to vector<20x20xf32>
    %335 = arith.select %333, %314, %334 : vector<20x20xi1>, vector<20x20xf32>
    %cst_85 = arith.constant dense<0.000000e+00> : vector<20xf32>
    %336 = vector.multi_reduction <add>, %335, %cst_85 [1] : vector<20x20xf32> to vector<20xf32>
    %337 = vector.shape_cast %336 : vector<20xf32> to vector<20x1xf32>
    %cst_86 = arith.constant 5.000000e-01 : f32
    %338 = vector.broadcast %cst_86 : f32 to vector<20x1xf32>
    %339 = arith.cmpf ogt, %331, %338 : vector<20x1xf32>
    %340 = math.absf %337 : vector<20x1xf32>
    %cst_87 = arith.constant -1.000000e+00 : f32
    %341 = vector.broadcast %cst_87 : f32 to vector<20x1xf32>
    %342 = arith.select %339, %341, %340 : vector<20x1xi1>, vector<20x1xf32>
    %cst_88 = arith.constant dense<0xFF800000> : vector<1xf32>
    %343 = vector.multi_reduction <maximumf>, %342, %cst_88 [0] : vector<20x1xf32> to vector<1xf32>
    %344 = vector.shape_cast %343 : vector<1xf32> to vector<1x1xf32>
    %345 = vector.broadcast %344 : vector<1x1xf32> to vector<20x1xf32>
    %346 = arith.cmpf oeq, %342, %345 : vector<20x1xf32>
    %cst_89 = arith.constant 2.000000e+01 : f32
    %347 = vector.broadcast %cst_89 : f32 to vector<20x1xf32>
    %348 = arith.select %346, %146, %347 : vector<20x1xi1>, vector<20x1xf32>
    %cst_90 = arith.constant dense<0x7F800000> : vector<1xf32>
    %349 = vector.multi_reduction <minimumf>, %348, %cst_90 [0] : vector<20x1xf32> to vector<1xf32>
    %350 = vector.shape_cast %349 : vector<1xf32> to vector<1x1xf32>
    %351 = vector.broadcast %350 : vector<1x1xf32> to vector<20x1xf32>
    %352 = arith.cmpf oeq, %146, %351 : vector<20x1xf32>
    %353 = arith.extui %352 : vector<20x1xi1> to vector<20x1xi32>
    %354 = arith.sitofp %353 : vector<20x1xi32> to vector<20x1xf32>
    %355 = arith.mulf %337, %354 : vector<20x1xf32>
    %cst_91 = arith.constant dense<0.000000e+00> : vector<1xf32>
    %356 = vector.multi_reduction <add>, %355, %cst_91 [0] : vector<20x1xf32> to vector<1xf32>
    %357 = vector.shape_cast %356 : vector<1xf32> to vector<1x1xf32>
    %cst_92 = arith.constant 1.000000e+00 : f32
    %358 = vector.broadcast %cst_92 : f32 to vector<1x1xf32>
    %359 = arith.divf %358, %357 : vector<1x1xf32>
    %360 = vector.broadcast %354 : vector<20x1xf32> to vector<20x20xf32>
    %361 = arith.mulf %360, %314 : vector<20x20xf32>
    %cst_93 = arith.constant dense<0.000000e+00> : vector<20xf32>
    %362 = vector.multi_reduction <add>, %361, %cst_93 [0] : vector<20x20xf32> to vector<20xf32>
    %363 = vector.shape_cast %362 : vector<20xf32> to vector<1x20xf32>
    %364 = vector.broadcast %354 : vector<20x1xf32> to vector<20x5xf32>
    %365 = arith.mulf %364, %318 : vector<20x5xf32>
    %cst_94 = arith.constant dense<0.000000e+00> : vector<5xf32>
    %366 = vector.multi_reduction <add>, %365, %cst_94 [0] : vector<20x5xf32> to vector<5xf32>
    %367 = vector.shape_cast %366 : vector<5xf32> to vector<1x5xf32>
    %368 = arith.subf %337, %354 : vector<20x1xf32>
    %369 = vector.broadcast %359 : vector<1x1xf32> to vector<20x1xf32>
    %370 = arith.mulf %368, %369 : vector<20x1xf32>
    %371 = vector.broadcast %370 : vector<20x1xf32> to vector<20x20xf32>
    %372 = vector.broadcast %363 : vector<1x20xf32> to vector<20x20xf32>
    %373 = arith.mulf %371, %372 : vector<20x20xf32>
    %374 = arith.subf %314, %373 : vector<20x20xf32>
    %375 = vector.broadcast %370 : vector<20x1xf32> to vector<20x5xf32>
    %376 = vector.broadcast %367 : vector<1x5xf32> to vector<20x5xf32>
    %377 = arith.mulf %375, %376 : vector<20x5xf32>
    %378 = arith.subf %318, %377 : vector<20x5xf32>
    %c3_i32_95 = arith.constant 3 : i32
    %379 = vector.broadcast %c3_i32_95 : i32 to vector<20x1xi32>
    %380 = arith.cmpi eq, %145, %379 : vector<20x1xi32>
    %381 = arith.extui %380 : vector<20x1xi1> to vector<20x1xi32>
    %382 = arith.sitofp %381 : vector<20x1xi32> to vector<20x1xf32>
    %383 = vector.broadcast %350 : vector<1x1xf32> to vector<1x20xf32>
    %384 = arith.cmpf oeq, %149, %383 : vector<1x20xf32>
    %385 = arith.extui %384 : vector<1x20xi1> to vector<1x20xi32>
    %386 = arith.sitofp %385 : vector<1x20xi32> to vector<1x20xf32>
    %387 = vector.broadcast %382 : vector<20x1xf32> to vector<20x20xf32>
    %388 = vector.broadcast %386 : vector<1x20xf32> to vector<20x20xf32>
    %389 = arith.mulf %387, %388 : vector<20x20xf32>
    %390 = arith.addf %330, %389 : vector<20x20xf32>
    %391 = arith.addf %331, %354 : vector<20x1xf32>
    %c4_i32 = arith.constant 4 : i32
    %392 = vector.broadcast %c4_i32 : i32 to vector<20x20xi32>
    %393 = arith.cmpi eq, %147, %392 : vector<20x20xi32>
    %cst_96 = arith.constant 0.000000e+00 : f32
    %394 = vector.broadcast %cst_96 : f32 to vector<20x20xf32>
    %395 = arith.select %393, %374, %394 : vector<20x20xi1>, vector<20x20xf32>
    %cst_97 = arith.constant dense<0.000000e+00> : vector<20xf32>
    %396 = vector.multi_reduction <add>, %395, %cst_97 [1] : vector<20x20xf32> to vector<20xf32>
    %397 = vector.shape_cast %396 : vector<20xf32> to vector<20x1xf32>
    %cst_98 = arith.constant 5.000000e-01 : f32
    %398 = vector.broadcast %cst_98 : f32 to vector<20x1xf32>
    %399 = arith.cmpf ogt, %391, %398 : vector<20x1xf32>
    %400 = math.absf %397 : vector<20x1xf32>
    %cst_99 = arith.constant -1.000000e+00 : f32
    %401 = vector.broadcast %cst_99 : f32 to vector<20x1xf32>
    %402 = arith.select %399, %401, %400 : vector<20x1xi1>, vector<20x1xf32>
    %cst_100 = arith.constant dense<0xFF800000> : vector<1xf32>
    %403 = vector.multi_reduction <maximumf>, %402, %cst_100 [0] : vector<20x1xf32> to vector<1xf32>
    %404 = vector.shape_cast %403 : vector<1xf32> to vector<1x1xf32>
    %405 = vector.broadcast %404 : vector<1x1xf32> to vector<20x1xf32>
    %406 = arith.cmpf oeq, %402, %405 : vector<20x1xf32>
    %cst_101 = arith.constant 2.000000e+01 : f32
    %407 = vector.broadcast %cst_101 : f32 to vector<20x1xf32>
    %408 = arith.select %406, %146, %407 : vector<20x1xi1>, vector<20x1xf32>
    %cst_102 = arith.constant dense<0x7F800000> : vector<1xf32>
    %409 = vector.multi_reduction <minimumf>, %408, %cst_102 [0] : vector<20x1xf32> to vector<1xf32>
    %410 = vector.shape_cast %409 : vector<1xf32> to vector<1x1xf32>
    %411 = vector.broadcast %410 : vector<1x1xf32> to vector<20x1xf32>
    %412 = arith.cmpf oeq, %146, %411 : vector<20x1xf32>
    %413 = arith.extui %412 : vector<20x1xi1> to vector<20x1xi32>
    %414 = arith.sitofp %413 : vector<20x1xi32> to vector<20x1xf32>
    %415 = arith.mulf %397, %414 : vector<20x1xf32>
    %cst_103 = arith.constant dense<0.000000e+00> : vector<1xf32>
    %416 = vector.multi_reduction <add>, %415, %cst_103 [0] : vector<20x1xf32> to vector<1xf32>
    %417 = vector.shape_cast %416 : vector<1xf32> to vector<1x1xf32>
    %cst_104 = arith.constant 1.000000e+00 : f32
    %418 = vector.broadcast %cst_104 : f32 to vector<1x1xf32>
    %419 = arith.divf %418, %417 : vector<1x1xf32>
    %420 = vector.broadcast %414 : vector<20x1xf32> to vector<20x20xf32>
    %421 = arith.mulf %420, %374 : vector<20x20xf32>
    %cst_105 = arith.constant dense<0.000000e+00> : vector<20xf32>
    %422 = vector.multi_reduction <add>, %421, %cst_105 [0] : vector<20x20xf32> to vector<20xf32>
    %423 = vector.shape_cast %422 : vector<20xf32> to vector<1x20xf32>
    %424 = vector.broadcast %414 : vector<20x1xf32> to vector<20x5xf32>
    %425 = arith.mulf %424, %378 : vector<20x5xf32>
    %cst_106 = arith.constant dense<0.000000e+00> : vector<5xf32>
    %426 = vector.multi_reduction <add>, %425, %cst_106 [0] : vector<20x5xf32> to vector<5xf32>
    %427 = vector.shape_cast %426 : vector<5xf32> to vector<1x5xf32>
    %428 = arith.subf %397, %414 : vector<20x1xf32>
    %429 = vector.broadcast %419 : vector<1x1xf32> to vector<20x1xf32>
    %430 = arith.mulf %428, %429 : vector<20x1xf32>
    %431 = vector.broadcast %430 : vector<20x1xf32> to vector<20x20xf32>
    %432 = vector.broadcast %423 : vector<1x20xf32> to vector<20x20xf32>
    %433 = arith.mulf %431, %432 : vector<20x20xf32>
    %434 = arith.subf %374, %433 : vector<20x20xf32>
    %435 = vector.broadcast %430 : vector<20x1xf32> to vector<20x5xf32>
    %436 = vector.broadcast %427 : vector<1x5xf32> to vector<20x5xf32>
    %437 = arith.mulf %435, %436 : vector<20x5xf32>
    %438 = arith.subf %378, %437 : vector<20x5xf32>
    %c4_i32_107 = arith.constant 4 : i32
    %439 = vector.broadcast %c4_i32_107 : i32 to vector<20x1xi32>
    %440 = arith.cmpi eq, %145, %439 : vector<20x1xi32>
    %441 = arith.extui %440 : vector<20x1xi1> to vector<20x1xi32>
    %442 = arith.sitofp %441 : vector<20x1xi32> to vector<20x1xf32>
    %443 = vector.broadcast %410 : vector<1x1xf32> to vector<1x20xf32>
    %444 = arith.cmpf oeq, %149, %443 : vector<1x20xf32>
    %445 = arith.extui %444 : vector<1x20xi1> to vector<1x20xi32>
    %446 = arith.sitofp %445 : vector<1x20xi32> to vector<1x20xf32>
    %447 = vector.broadcast %442 : vector<20x1xf32> to vector<20x20xf32>
    %448 = vector.broadcast %446 : vector<1x20xf32> to vector<20x20xf32>
    %449 = arith.mulf %447, %448 : vector<20x20xf32>
    %450 = arith.addf %390, %449 : vector<20x20xf32>
    %451 = arith.addf %391, %414 : vector<20x1xf32>
    %c5_i32 = arith.constant 5 : i32
    %452 = vector.broadcast %c5_i32 : i32 to vector<20x20xi32>
    %453 = arith.cmpi eq, %147, %452 : vector<20x20xi32>
    %cst_108 = arith.constant 0.000000e+00 : f32
    %454 = vector.broadcast %cst_108 : f32 to vector<20x20xf32>
    %455 = arith.select %453, %434, %454 : vector<20x20xi1>, vector<20x20xf32>
    %cst_109 = arith.constant dense<0.000000e+00> : vector<20xf32>
    %456 = vector.multi_reduction <add>, %455, %cst_109 [1] : vector<20x20xf32> to vector<20xf32>
    %457 = vector.shape_cast %456 : vector<20xf32> to vector<20x1xf32>
    %cst_110 = arith.constant 5.000000e-01 : f32
    %458 = vector.broadcast %cst_110 : f32 to vector<20x1xf32>
    %459 = arith.cmpf ogt, %451, %458 : vector<20x1xf32>
    %460 = math.absf %457 : vector<20x1xf32>
    %cst_111 = arith.constant -1.000000e+00 : f32
    %461 = vector.broadcast %cst_111 : f32 to vector<20x1xf32>
    %462 = arith.select %459, %461, %460 : vector<20x1xi1>, vector<20x1xf32>
    %cst_112 = arith.constant dense<0xFF800000> : vector<1xf32>
    %463 = vector.multi_reduction <maximumf>, %462, %cst_112 [0] : vector<20x1xf32> to vector<1xf32>
    %464 = vector.shape_cast %463 : vector<1xf32> to vector<1x1xf32>
    %465 = vector.broadcast %464 : vector<1x1xf32> to vector<20x1xf32>
    %466 = arith.cmpf oeq, %462, %465 : vector<20x1xf32>
    %cst_113 = arith.constant 2.000000e+01 : f32
    %467 = vector.broadcast %cst_113 : f32 to vector<20x1xf32>
    %468 = arith.select %466, %146, %467 : vector<20x1xi1>, vector<20x1xf32>
    %cst_114 = arith.constant dense<0x7F800000> : vector<1xf32>
    %469 = vector.multi_reduction <minimumf>, %468, %cst_114 [0] : vector<20x1xf32> to vector<1xf32>
    %470 = vector.shape_cast %469 : vector<1xf32> to vector<1x1xf32>
    %471 = vector.broadcast %470 : vector<1x1xf32> to vector<20x1xf32>
    %472 = arith.cmpf oeq, %146, %471 : vector<20x1xf32>
    %473 = arith.extui %472 : vector<20x1xi1> to vector<20x1xi32>
    %474 = arith.sitofp %473 : vector<20x1xi32> to vector<20x1xf32>
    %475 = arith.mulf %457, %474 : vector<20x1xf32>
    %cst_115 = arith.constant dense<0.000000e+00> : vector<1xf32>
    %476 = vector.multi_reduction <add>, %475, %cst_115 [0] : vector<20x1xf32> to vector<1xf32>
    %477 = vector.shape_cast %476 : vector<1xf32> to vector<1x1xf32>
    %cst_116 = arith.constant 1.000000e+00 : f32
    %478 = vector.broadcast %cst_116 : f32 to vector<1x1xf32>
    %479 = arith.divf %478, %477 : vector<1x1xf32>
    %480 = vector.broadcast %474 : vector<20x1xf32> to vector<20x20xf32>
    %481 = arith.mulf %480, %434 : vector<20x20xf32>
    %cst_117 = arith.constant dense<0.000000e+00> : vector<20xf32>
    %482 = vector.multi_reduction <add>, %481, %cst_117 [0] : vector<20x20xf32> to vector<20xf32>
    %483 = vector.shape_cast %482 : vector<20xf32> to vector<1x20xf32>
    %484 = vector.broadcast %474 : vector<20x1xf32> to vector<20x5xf32>
    %485 = arith.mulf %484, %438 : vector<20x5xf32>
    %cst_118 = arith.constant dense<0.000000e+00> : vector<5xf32>
    %486 = vector.multi_reduction <add>, %485, %cst_118 [0] : vector<20x5xf32> to vector<5xf32>
    %487 = vector.shape_cast %486 : vector<5xf32> to vector<1x5xf32>
    %488 = arith.subf %457, %474 : vector<20x1xf32>
    %489 = vector.broadcast %479 : vector<1x1xf32> to vector<20x1xf32>
    %490 = arith.mulf %488, %489 : vector<20x1xf32>
    %491 = vector.broadcast %490 : vector<20x1xf32> to vector<20x20xf32>
    %492 = vector.broadcast %483 : vector<1x20xf32> to vector<20x20xf32>
    %493 = arith.mulf %491, %492 : vector<20x20xf32>
    %494 = arith.subf %434, %493 : vector<20x20xf32>
    %495 = vector.broadcast %490 : vector<20x1xf32> to vector<20x5xf32>
    %496 = vector.broadcast %487 : vector<1x5xf32> to vector<20x5xf32>
    %497 = arith.mulf %495, %496 : vector<20x5xf32>
    %498 = arith.subf %438, %497 : vector<20x5xf32>
    %c5_i32_119 = arith.constant 5 : i32
    %499 = vector.broadcast %c5_i32_119 : i32 to vector<20x1xi32>
    %500 = arith.cmpi eq, %145, %499 : vector<20x1xi32>
    %501 = arith.extui %500 : vector<20x1xi1> to vector<20x1xi32>
    %502 = arith.sitofp %501 : vector<20x1xi32> to vector<20x1xf32>
    %503 = vector.broadcast %470 : vector<1x1xf32> to vector<1x20xf32>
    %504 = arith.cmpf oeq, %149, %503 : vector<1x20xf32>
    %505 = arith.extui %504 : vector<1x20xi1> to vector<1x20xi32>
    %506 = arith.sitofp %505 : vector<1x20xi32> to vector<1x20xf32>
    %507 = vector.broadcast %502 : vector<20x1xf32> to vector<20x20xf32>
    %508 = vector.broadcast %506 : vector<1x20xf32> to vector<20x20xf32>
    %509 = arith.mulf %507, %508 : vector<20x20xf32>
    %510 = arith.addf %450, %509 : vector<20x20xf32>
    %511 = arith.addf %451, %474 : vector<20x1xf32>
    %c6_i32 = arith.constant 6 : i32
    %512 = vector.broadcast %c6_i32 : i32 to vector<20x20xi32>
    %513 = arith.cmpi eq, %147, %512 : vector<20x20xi32>
    %cst_120 = arith.constant 0.000000e+00 : f32
    %514 = vector.broadcast %cst_120 : f32 to vector<20x20xf32>
    %515 = arith.select %513, %494, %514 : vector<20x20xi1>, vector<20x20xf32>
    %cst_121 = arith.constant dense<0.000000e+00> : vector<20xf32>
    %516 = vector.multi_reduction <add>, %515, %cst_121 [1] : vector<20x20xf32> to vector<20xf32>
    %517 = vector.shape_cast %516 : vector<20xf32> to vector<20x1xf32>
    %cst_122 = arith.constant 5.000000e-01 : f32
    %518 = vector.broadcast %cst_122 : f32 to vector<20x1xf32>
    %519 = arith.cmpf ogt, %511, %518 : vector<20x1xf32>
    %520 = math.absf %517 : vector<20x1xf32>
    %cst_123 = arith.constant -1.000000e+00 : f32
    %521 = vector.broadcast %cst_123 : f32 to vector<20x1xf32>
    %522 = arith.select %519, %521, %520 : vector<20x1xi1>, vector<20x1xf32>
    %cst_124 = arith.constant dense<0xFF800000> : vector<1xf32>
    %523 = vector.multi_reduction <maximumf>, %522, %cst_124 [0] : vector<20x1xf32> to vector<1xf32>
    %524 = vector.shape_cast %523 : vector<1xf32> to vector<1x1xf32>
    %525 = vector.broadcast %524 : vector<1x1xf32> to vector<20x1xf32>
    %526 = arith.cmpf oeq, %522, %525 : vector<20x1xf32>
    %cst_125 = arith.constant 2.000000e+01 : f32
    %527 = vector.broadcast %cst_125 : f32 to vector<20x1xf32>
    %528 = arith.select %526, %146, %527 : vector<20x1xi1>, vector<20x1xf32>
    %cst_126 = arith.constant dense<0x7F800000> : vector<1xf32>
    %529 = vector.multi_reduction <minimumf>, %528, %cst_126 [0] : vector<20x1xf32> to vector<1xf32>
    %530 = vector.shape_cast %529 : vector<1xf32> to vector<1x1xf32>
    %531 = vector.broadcast %530 : vector<1x1xf32> to vector<20x1xf32>
    %532 = arith.cmpf oeq, %146, %531 : vector<20x1xf32>
    %533 = arith.extui %532 : vector<20x1xi1> to vector<20x1xi32>
    %534 = arith.sitofp %533 : vector<20x1xi32> to vector<20x1xf32>
    %535 = arith.mulf %517, %534 : vector<20x1xf32>
    %cst_127 = arith.constant dense<0.000000e+00> : vector<1xf32>
    %536 = vector.multi_reduction <add>, %535, %cst_127 [0] : vector<20x1xf32> to vector<1xf32>
    %537 = vector.shape_cast %536 : vector<1xf32> to vector<1x1xf32>
    %cst_128 = arith.constant 1.000000e+00 : f32
    %538 = vector.broadcast %cst_128 : f32 to vector<1x1xf32>
    %539 = arith.divf %538, %537 : vector<1x1xf32>
    %540 = vector.broadcast %534 : vector<20x1xf32> to vector<20x20xf32>
    %541 = arith.mulf %540, %494 : vector<20x20xf32>
    %cst_129 = arith.constant dense<0.000000e+00> : vector<20xf32>
    %542 = vector.multi_reduction <add>, %541, %cst_129 [0] : vector<20x20xf32> to vector<20xf32>
    %543 = vector.shape_cast %542 : vector<20xf32> to vector<1x20xf32>
    %544 = vector.broadcast %534 : vector<20x1xf32> to vector<20x5xf32>
    %545 = arith.mulf %544, %498 : vector<20x5xf32>
    %cst_130 = arith.constant dense<0.000000e+00> : vector<5xf32>
    %546 = vector.multi_reduction <add>, %545, %cst_130 [0] : vector<20x5xf32> to vector<5xf32>
    %547 = vector.shape_cast %546 : vector<5xf32> to vector<1x5xf32>
    %548 = arith.subf %517, %534 : vector<20x1xf32>
    %549 = vector.broadcast %539 : vector<1x1xf32> to vector<20x1xf32>
    %550 = arith.mulf %548, %549 : vector<20x1xf32>
    %551 = vector.broadcast %550 : vector<20x1xf32> to vector<20x20xf32>
    %552 = vector.broadcast %543 : vector<1x20xf32> to vector<20x20xf32>
    %553 = arith.mulf %551, %552 : vector<20x20xf32>
    %554 = arith.subf %494, %553 : vector<20x20xf32>
    %555 = vector.broadcast %550 : vector<20x1xf32> to vector<20x5xf32>
    %556 = vector.broadcast %547 : vector<1x5xf32> to vector<20x5xf32>
    %557 = arith.mulf %555, %556 : vector<20x5xf32>
    %558 = arith.subf %498, %557 : vector<20x5xf32>
    %c6_i32_131 = arith.constant 6 : i32
    %559 = vector.broadcast %c6_i32_131 : i32 to vector<20x1xi32>
    %560 = arith.cmpi eq, %145, %559 : vector<20x1xi32>
    %561 = arith.extui %560 : vector<20x1xi1> to vector<20x1xi32>
    %562 = arith.sitofp %561 : vector<20x1xi32> to vector<20x1xf32>
    %563 = vector.broadcast %530 : vector<1x1xf32> to vector<1x20xf32>
    %564 = arith.cmpf oeq, %149, %563 : vector<1x20xf32>
    %565 = arith.extui %564 : vector<1x20xi1> to vector<1x20xi32>
    %566 = arith.sitofp %565 : vector<1x20xi32> to vector<1x20xf32>
    %567 = vector.broadcast %562 : vector<20x1xf32> to vector<20x20xf32>
    %568 = vector.broadcast %566 : vector<1x20xf32> to vector<20x20xf32>
    %569 = arith.mulf %567, %568 : vector<20x20xf32>
    %570 = arith.addf %510, %569 : vector<20x20xf32>
    %571 = arith.addf %511, %534 : vector<20x1xf32>
    %c7_i32 = arith.constant 7 : i32
    %572 = vector.broadcast %c7_i32 : i32 to vector<20x20xi32>
    %573 = arith.cmpi eq, %147, %572 : vector<20x20xi32>
    %cst_132 = arith.constant 0.000000e+00 : f32
    %574 = vector.broadcast %cst_132 : f32 to vector<20x20xf32>
    %575 = arith.select %573, %554, %574 : vector<20x20xi1>, vector<20x20xf32>
    %cst_133 = arith.constant dense<0.000000e+00> : vector<20xf32>
    %576 = vector.multi_reduction <add>, %575, %cst_133 [1] : vector<20x20xf32> to vector<20xf32>
    %577 = vector.shape_cast %576 : vector<20xf32> to vector<20x1xf32>
    %cst_134 = arith.constant 5.000000e-01 : f32
    %578 = vector.broadcast %cst_134 : f32 to vector<20x1xf32>
    %579 = arith.cmpf ogt, %571, %578 : vector<20x1xf32>
    %580 = math.absf %577 : vector<20x1xf32>
    %cst_135 = arith.constant -1.000000e+00 : f32
    %581 = vector.broadcast %cst_135 : f32 to vector<20x1xf32>
    %582 = arith.select %579, %581, %580 : vector<20x1xi1>, vector<20x1xf32>
    %cst_136 = arith.constant dense<0xFF800000> : vector<1xf32>
    %583 = vector.multi_reduction <maximumf>, %582, %cst_136 [0] : vector<20x1xf32> to vector<1xf32>
    %584 = vector.shape_cast %583 : vector<1xf32> to vector<1x1xf32>
    %585 = vector.broadcast %584 : vector<1x1xf32> to vector<20x1xf32>
    %586 = arith.cmpf oeq, %582, %585 : vector<20x1xf32>
    %cst_137 = arith.constant 2.000000e+01 : f32
    %587 = vector.broadcast %cst_137 : f32 to vector<20x1xf32>
    %588 = arith.select %586, %146, %587 : vector<20x1xi1>, vector<20x1xf32>
    %cst_138 = arith.constant dense<0x7F800000> : vector<1xf32>
    %589 = vector.multi_reduction <minimumf>, %588, %cst_138 [0] : vector<20x1xf32> to vector<1xf32>
    %590 = vector.shape_cast %589 : vector<1xf32> to vector<1x1xf32>
    %591 = vector.broadcast %590 : vector<1x1xf32> to vector<20x1xf32>
    %592 = arith.cmpf oeq, %146, %591 : vector<20x1xf32>
    %593 = arith.extui %592 : vector<20x1xi1> to vector<20x1xi32>
    %594 = arith.sitofp %593 : vector<20x1xi32> to vector<20x1xf32>
    %595 = arith.mulf %577, %594 : vector<20x1xf32>
    %cst_139 = arith.constant dense<0.000000e+00> : vector<1xf32>
    %596 = vector.multi_reduction <add>, %595, %cst_139 [0] : vector<20x1xf32> to vector<1xf32>
    %597 = vector.shape_cast %596 : vector<1xf32> to vector<1x1xf32>
    %cst_140 = arith.constant 1.000000e+00 : f32
    %598 = vector.broadcast %cst_140 : f32 to vector<1x1xf32>
    %599 = arith.divf %598, %597 : vector<1x1xf32>
    %600 = vector.broadcast %594 : vector<20x1xf32> to vector<20x20xf32>
    %601 = arith.mulf %600, %554 : vector<20x20xf32>
    %cst_141 = arith.constant dense<0.000000e+00> : vector<20xf32>
    %602 = vector.multi_reduction <add>, %601, %cst_141 [0] : vector<20x20xf32> to vector<20xf32>
    %603 = vector.shape_cast %602 : vector<20xf32> to vector<1x20xf32>
    %604 = vector.broadcast %594 : vector<20x1xf32> to vector<20x5xf32>
    %605 = arith.mulf %604, %558 : vector<20x5xf32>
    %cst_142 = arith.constant dense<0.000000e+00> : vector<5xf32>
    %606 = vector.multi_reduction <add>, %605, %cst_142 [0] : vector<20x5xf32> to vector<5xf32>
    %607 = vector.shape_cast %606 : vector<5xf32> to vector<1x5xf32>
    %608 = arith.subf %577, %594 : vector<20x1xf32>
    %609 = vector.broadcast %599 : vector<1x1xf32> to vector<20x1xf32>
    %610 = arith.mulf %608, %609 : vector<20x1xf32>
    %611 = vector.broadcast %610 : vector<20x1xf32> to vector<20x20xf32>
    %612 = vector.broadcast %603 : vector<1x20xf32> to vector<20x20xf32>
    %613 = arith.mulf %611, %612 : vector<20x20xf32>
    %614 = arith.subf %554, %613 : vector<20x20xf32>
    %615 = vector.broadcast %610 : vector<20x1xf32> to vector<20x5xf32>
    %616 = vector.broadcast %607 : vector<1x5xf32> to vector<20x5xf32>
    %617 = arith.mulf %615, %616 : vector<20x5xf32>
    %618 = arith.subf %558, %617 : vector<20x5xf32>
    %c7_i32_143 = arith.constant 7 : i32
    %619 = vector.broadcast %c7_i32_143 : i32 to vector<20x1xi32>
    %620 = arith.cmpi eq, %145, %619 : vector<20x1xi32>
    %621 = arith.extui %620 : vector<20x1xi1> to vector<20x1xi32>
    %622 = arith.sitofp %621 : vector<20x1xi32> to vector<20x1xf32>
    %623 = vector.broadcast %590 : vector<1x1xf32> to vector<1x20xf32>
    %624 = arith.cmpf oeq, %149, %623 : vector<1x20xf32>
    %625 = arith.extui %624 : vector<1x20xi1> to vector<1x20xi32>
    %626 = arith.sitofp %625 : vector<1x20xi32> to vector<1x20xf32>
    %627 = vector.broadcast %622 : vector<20x1xf32> to vector<20x20xf32>
    %628 = vector.broadcast %626 : vector<1x20xf32> to vector<20x20xf32>
    %629 = arith.mulf %627, %628 : vector<20x20xf32>
    %630 = arith.addf %570, %629 : vector<20x20xf32>
    %631 = arith.addf %571, %594 : vector<20x1xf32>
    %c8_i32 = arith.constant 8 : i32
    %632 = vector.broadcast %c8_i32 : i32 to vector<20x20xi32>
    %633 = arith.cmpi eq, %147, %632 : vector<20x20xi32>
    %cst_144 = arith.constant 0.000000e+00 : f32
    %634 = vector.broadcast %cst_144 : f32 to vector<20x20xf32>
    %635 = arith.select %633, %614, %634 : vector<20x20xi1>, vector<20x20xf32>
    %cst_145 = arith.constant dense<0.000000e+00> : vector<20xf32>
    %636 = vector.multi_reduction <add>, %635, %cst_145 [1] : vector<20x20xf32> to vector<20xf32>
    %637 = vector.shape_cast %636 : vector<20xf32> to vector<20x1xf32>
    %cst_146 = arith.constant 5.000000e-01 : f32
    %638 = vector.broadcast %cst_146 : f32 to vector<20x1xf32>
    %639 = arith.cmpf ogt, %631, %638 : vector<20x1xf32>
    %640 = math.absf %637 : vector<20x1xf32>
    %cst_147 = arith.constant -1.000000e+00 : f32
    %641 = vector.broadcast %cst_147 : f32 to vector<20x1xf32>
    %642 = arith.select %639, %641, %640 : vector<20x1xi1>, vector<20x1xf32>
    %cst_148 = arith.constant dense<0xFF800000> : vector<1xf32>
    %643 = vector.multi_reduction <maximumf>, %642, %cst_148 [0] : vector<20x1xf32> to vector<1xf32>
    %644 = vector.shape_cast %643 : vector<1xf32> to vector<1x1xf32>
    %645 = vector.broadcast %644 : vector<1x1xf32> to vector<20x1xf32>
    %646 = arith.cmpf oeq, %642, %645 : vector<20x1xf32>
    %cst_149 = arith.constant 2.000000e+01 : f32
    %647 = vector.broadcast %cst_149 : f32 to vector<20x1xf32>
    %648 = arith.select %646, %146, %647 : vector<20x1xi1>, vector<20x1xf32>
    %cst_150 = arith.constant dense<0x7F800000> : vector<1xf32>
    %649 = vector.multi_reduction <minimumf>, %648, %cst_150 [0] : vector<20x1xf32> to vector<1xf32>
    %650 = vector.shape_cast %649 : vector<1xf32> to vector<1x1xf32>
    %651 = vector.broadcast %650 : vector<1x1xf32> to vector<20x1xf32>
    %652 = arith.cmpf oeq, %146, %651 : vector<20x1xf32>
    %653 = arith.extui %652 : vector<20x1xi1> to vector<20x1xi32>
    %654 = arith.sitofp %653 : vector<20x1xi32> to vector<20x1xf32>
    %655 = arith.mulf %637, %654 : vector<20x1xf32>
    %cst_151 = arith.constant dense<0.000000e+00> : vector<1xf32>
    %656 = vector.multi_reduction <add>, %655, %cst_151 [0] : vector<20x1xf32> to vector<1xf32>
    %657 = vector.shape_cast %656 : vector<1xf32> to vector<1x1xf32>
    %cst_152 = arith.constant 1.000000e+00 : f32
    %658 = vector.broadcast %cst_152 : f32 to vector<1x1xf32>
    %659 = arith.divf %658, %657 : vector<1x1xf32>
    %660 = vector.broadcast %654 : vector<20x1xf32> to vector<20x20xf32>
    %661 = arith.mulf %660, %614 : vector<20x20xf32>
    %cst_153 = arith.constant dense<0.000000e+00> : vector<20xf32>
    %662 = vector.multi_reduction <add>, %661, %cst_153 [0] : vector<20x20xf32> to vector<20xf32>
    %663 = vector.shape_cast %662 : vector<20xf32> to vector<1x20xf32>
    %664 = vector.broadcast %654 : vector<20x1xf32> to vector<20x5xf32>
    %665 = arith.mulf %664, %618 : vector<20x5xf32>
    %cst_154 = arith.constant dense<0.000000e+00> : vector<5xf32>
    %666 = vector.multi_reduction <add>, %665, %cst_154 [0] : vector<20x5xf32> to vector<5xf32>
    %667 = vector.shape_cast %666 : vector<5xf32> to vector<1x5xf32>
    %668 = arith.subf %637, %654 : vector<20x1xf32>
    %669 = vector.broadcast %659 : vector<1x1xf32> to vector<20x1xf32>
    %670 = arith.mulf %668, %669 : vector<20x1xf32>
    %671 = vector.broadcast %670 : vector<20x1xf32> to vector<20x20xf32>
    %672 = vector.broadcast %663 : vector<1x20xf32> to vector<20x20xf32>
    %673 = arith.mulf %671, %672 : vector<20x20xf32>
    %674 = arith.subf %614, %673 : vector<20x20xf32>
    %675 = vector.broadcast %670 : vector<20x1xf32> to vector<20x5xf32>
    %676 = vector.broadcast %667 : vector<1x5xf32> to vector<20x5xf32>
    %677 = arith.mulf %675, %676 : vector<20x5xf32>
    %678 = arith.subf %618, %677 : vector<20x5xf32>
    %c8_i32_155 = arith.constant 8 : i32
    %679 = vector.broadcast %c8_i32_155 : i32 to vector<20x1xi32>
    %680 = arith.cmpi eq, %145, %679 : vector<20x1xi32>
    %681 = arith.extui %680 : vector<20x1xi1> to vector<20x1xi32>
    %682 = arith.sitofp %681 : vector<20x1xi32> to vector<20x1xf32>
    %683 = vector.broadcast %650 : vector<1x1xf32> to vector<1x20xf32>
    %684 = arith.cmpf oeq, %149, %683 : vector<1x20xf32>
    %685 = arith.extui %684 : vector<1x20xi1> to vector<1x20xi32>
    %686 = arith.sitofp %685 : vector<1x20xi32> to vector<1x20xf32>
    %687 = vector.broadcast %682 : vector<20x1xf32> to vector<20x20xf32>
    %688 = vector.broadcast %686 : vector<1x20xf32> to vector<20x20xf32>
    %689 = arith.mulf %687, %688 : vector<20x20xf32>
    %690 = arith.addf %630, %689 : vector<20x20xf32>
    %691 = arith.addf %631, %654 : vector<20x1xf32>
    %c9_i32 = arith.constant 9 : i32
    %692 = vector.broadcast %c9_i32 : i32 to vector<20x20xi32>
    %693 = arith.cmpi eq, %147, %692 : vector<20x20xi32>
    %cst_156 = arith.constant 0.000000e+00 : f32
    %694 = vector.broadcast %cst_156 : f32 to vector<20x20xf32>
    %695 = arith.select %693, %674, %694 : vector<20x20xi1>, vector<20x20xf32>
    %cst_157 = arith.constant dense<0.000000e+00> : vector<20xf32>
    %696 = vector.multi_reduction <add>, %695, %cst_157 [1] : vector<20x20xf32> to vector<20xf32>
    %697 = vector.shape_cast %696 : vector<20xf32> to vector<20x1xf32>
    %cst_158 = arith.constant 5.000000e-01 : f32
    %698 = vector.broadcast %cst_158 : f32 to vector<20x1xf32>
    %699 = arith.cmpf ogt, %691, %698 : vector<20x1xf32>
    %700 = math.absf %697 : vector<20x1xf32>
    %cst_159 = arith.constant -1.000000e+00 : f32
    %701 = vector.broadcast %cst_159 : f32 to vector<20x1xf32>
    %702 = arith.select %699, %701, %700 : vector<20x1xi1>, vector<20x1xf32>
    %cst_160 = arith.constant dense<0xFF800000> : vector<1xf32>
    %703 = vector.multi_reduction <maximumf>, %702, %cst_160 [0] : vector<20x1xf32> to vector<1xf32>
    %704 = vector.shape_cast %703 : vector<1xf32> to vector<1x1xf32>
    %705 = vector.broadcast %704 : vector<1x1xf32> to vector<20x1xf32>
    %706 = arith.cmpf oeq, %702, %705 : vector<20x1xf32>
    %cst_161 = arith.constant 2.000000e+01 : f32
    %707 = vector.broadcast %cst_161 : f32 to vector<20x1xf32>
    %708 = arith.select %706, %146, %707 : vector<20x1xi1>, vector<20x1xf32>
    %cst_162 = arith.constant dense<0x7F800000> : vector<1xf32>
    %709 = vector.multi_reduction <minimumf>, %708, %cst_162 [0] : vector<20x1xf32> to vector<1xf32>
    %710 = vector.shape_cast %709 : vector<1xf32> to vector<1x1xf32>
    %711 = vector.broadcast %710 : vector<1x1xf32> to vector<20x1xf32>
    %712 = arith.cmpf oeq, %146, %711 : vector<20x1xf32>
    %713 = arith.extui %712 : vector<20x1xi1> to vector<20x1xi32>
    %714 = arith.sitofp %713 : vector<20x1xi32> to vector<20x1xf32>
    %715 = arith.mulf %697, %714 : vector<20x1xf32>
    %cst_163 = arith.constant dense<0.000000e+00> : vector<1xf32>
    %716 = vector.multi_reduction <add>, %715, %cst_163 [0] : vector<20x1xf32> to vector<1xf32>
    %717 = vector.shape_cast %716 : vector<1xf32> to vector<1x1xf32>
    %cst_164 = arith.constant 1.000000e+00 : f32
    %718 = vector.broadcast %cst_164 : f32 to vector<1x1xf32>
    %719 = arith.divf %718, %717 : vector<1x1xf32>
    %720 = vector.broadcast %714 : vector<20x1xf32> to vector<20x20xf32>
    %721 = arith.mulf %720, %674 : vector<20x20xf32>
    %cst_165 = arith.constant dense<0.000000e+00> : vector<20xf32>
    %722 = vector.multi_reduction <add>, %721, %cst_165 [0] : vector<20x20xf32> to vector<20xf32>
    %723 = vector.shape_cast %722 : vector<20xf32> to vector<1x20xf32>
    %724 = vector.broadcast %714 : vector<20x1xf32> to vector<20x5xf32>
    %725 = arith.mulf %724, %678 : vector<20x5xf32>
    %cst_166 = arith.constant dense<0.000000e+00> : vector<5xf32>
    %726 = vector.multi_reduction <add>, %725, %cst_166 [0] : vector<20x5xf32> to vector<5xf32>
    %727 = vector.shape_cast %726 : vector<5xf32> to vector<1x5xf32>
    %728 = arith.subf %697, %714 : vector<20x1xf32>
    %729 = vector.broadcast %719 : vector<1x1xf32> to vector<20x1xf32>
    %730 = arith.mulf %728, %729 : vector<20x1xf32>
    %731 = vector.broadcast %730 : vector<20x1xf32> to vector<20x20xf32>
    %732 = vector.broadcast %723 : vector<1x20xf32> to vector<20x20xf32>
    %733 = arith.mulf %731, %732 : vector<20x20xf32>
    %734 = arith.subf %674, %733 : vector<20x20xf32>
    %735 = vector.broadcast %730 : vector<20x1xf32> to vector<20x5xf32>
    %736 = vector.broadcast %727 : vector<1x5xf32> to vector<20x5xf32>
    %737 = arith.mulf %735, %736 : vector<20x5xf32>
    %738 = arith.subf %678, %737 : vector<20x5xf32>
    %c9_i32_167 = arith.constant 9 : i32
    %739 = vector.broadcast %c9_i32_167 : i32 to vector<20x1xi32>
    %740 = arith.cmpi eq, %145, %739 : vector<20x1xi32>
    %741 = arith.extui %740 : vector<20x1xi1> to vector<20x1xi32>
    %742 = arith.sitofp %741 : vector<20x1xi32> to vector<20x1xf32>
    %743 = vector.broadcast %710 : vector<1x1xf32> to vector<1x20xf32>
    %744 = arith.cmpf oeq, %149, %743 : vector<1x20xf32>
    %745 = arith.extui %744 : vector<1x20xi1> to vector<1x20xi32>
    %746 = arith.sitofp %745 : vector<1x20xi32> to vector<1x20xf32>
    %747 = vector.broadcast %742 : vector<20x1xf32> to vector<20x20xf32>
    %748 = vector.broadcast %746 : vector<1x20xf32> to vector<20x20xf32>
    %749 = arith.mulf %747, %748 : vector<20x20xf32>
    %750 = arith.addf %690, %749 : vector<20x20xf32>
    %751 = arith.addf %691, %714 : vector<20x1xf32>
    %c10_i32 = arith.constant 10 : i32
    %752 = vector.broadcast %c10_i32 : i32 to vector<20x20xi32>
    %753 = arith.cmpi eq, %147, %752 : vector<20x20xi32>
    %cst_168 = arith.constant 0.000000e+00 : f32
    %754 = vector.broadcast %cst_168 : f32 to vector<20x20xf32>
    %755 = arith.select %753, %734, %754 : vector<20x20xi1>, vector<20x20xf32>
    %cst_169 = arith.constant dense<0.000000e+00> : vector<20xf32>
    %756 = vector.multi_reduction <add>, %755, %cst_169 [1] : vector<20x20xf32> to vector<20xf32>
    %757 = vector.shape_cast %756 : vector<20xf32> to vector<20x1xf32>
    %cst_170 = arith.constant 5.000000e-01 : f32
    %758 = vector.broadcast %cst_170 : f32 to vector<20x1xf32>
    %759 = arith.cmpf ogt, %751, %758 : vector<20x1xf32>
    %760 = math.absf %757 : vector<20x1xf32>
    %cst_171 = arith.constant -1.000000e+00 : f32
    %761 = vector.broadcast %cst_171 : f32 to vector<20x1xf32>
    %762 = arith.select %759, %761, %760 : vector<20x1xi1>, vector<20x1xf32>
    %cst_172 = arith.constant dense<0xFF800000> : vector<1xf32>
    %763 = vector.multi_reduction <maximumf>, %762, %cst_172 [0] : vector<20x1xf32> to vector<1xf32>
    %764 = vector.shape_cast %763 : vector<1xf32> to vector<1x1xf32>
    %765 = vector.broadcast %764 : vector<1x1xf32> to vector<20x1xf32>
    %766 = arith.cmpf oeq, %762, %765 : vector<20x1xf32>
    %cst_173 = arith.constant 2.000000e+01 : f32
    %767 = vector.broadcast %cst_173 : f32 to vector<20x1xf32>
    %768 = arith.select %766, %146, %767 : vector<20x1xi1>, vector<20x1xf32>
    %cst_174 = arith.constant dense<0x7F800000> : vector<1xf32>
    %769 = vector.multi_reduction <minimumf>, %768, %cst_174 [0] : vector<20x1xf32> to vector<1xf32>
    %770 = vector.shape_cast %769 : vector<1xf32> to vector<1x1xf32>
    %771 = vector.broadcast %770 : vector<1x1xf32> to vector<20x1xf32>
    %772 = arith.cmpf oeq, %146, %771 : vector<20x1xf32>
    %773 = arith.extui %772 : vector<20x1xi1> to vector<20x1xi32>
    %774 = arith.sitofp %773 : vector<20x1xi32> to vector<20x1xf32>
    %775 = arith.mulf %757, %774 : vector<20x1xf32>
    %cst_175 = arith.constant dense<0.000000e+00> : vector<1xf32>
    %776 = vector.multi_reduction <add>, %775, %cst_175 [0] : vector<20x1xf32> to vector<1xf32>
    %777 = vector.shape_cast %776 : vector<1xf32> to vector<1x1xf32>
    %cst_176 = arith.constant 1.000000e+00 : f32
    %778 = vector.broadcast %cst_176 : f32 to vector<1x1xf32>
    %779 = arith.divf %778, %777 : vector<1x1xf32>
    %780 = vector.broadcast %774 : vector<20x1xf32> to vector<20x20xf32>
    %781 = arith.mulf %780, %734 : vector<20x20xf32>
    %cst_177 = arith.constant dense<0.000000e+00> : vector<20xf32>
    %782 = vector.multi_reduction <add>, %781, %cst_177 [0] : vector<20x20xf32> to vector<20xf32>
    %783 = vector.shape_cast %782 : vector<20xf32> to vector<1x20xf32>
    %784 = vector.broadcast %774 : vector<20x1xf32> to vector<20x5xf32>
    %785 = arith.mulf %784, %738 : vector<20x5xf32>
    %cst_178 = arith.constant dense<0.000000e+00> : vector<5xf32>
    %786 = vector.multi_reduction <add>, %785, %cst_178 [0] : vector<20x5xf32> to vector<5xf32>
    %787 = vector.shape_cast %786 : vector<5xf32> to vector<1x5xf32>
    %788 = arith.subf %757, %774 : vector<20x1xf32>
    %789 = vector.broadcast %779 : vector<1x1xf32> to vector<20x1xf32>
    %790 = arith.mulf %788, %789 : vector<20x1xf32>
    %791 = vector.broadcast %790 : vector<20x1xf32> to vector<20x20xf32>
    %792 = vector.broadcast %783 : vector<1x20xf32> to vector<20x20xf32>
    %793 = arith.mulf %791, %792 : vector<20x20xf32>
    %794 = arith.subf %734, %793 : vector<20x20xf32>
    %795 = vector.broadcast %790 : vector<20x1xf32> to vector<20x5xf32>
    %796 = vector.broadcast %787 : vector<1x5xf32> to vector<20x5xf32>
    %797 = arith.mulf %795, %796 : vector<20x5xf32>
    %798 = arith.subf %738, %797 : vector<20x5xf32>
    %c10_i32_179 = arith.constant 10 : i32
    %799 = vector.broadcast %c10_i32_179 : i32 to vector<20x1xi32>
    %800 = arith.cmpi eq, %145, %799 : vector<20x1xi32>
    %801 = arith.extui %800 : vector<20x1xi1> to vector<20x1xi32>
    %802 = arith.sitofp %801 : vector<20x1xi32> to vector<20x1xf32>
    %803 = vector.broadcast %770 : vector<1x1xf32> to vector<1x20xf32>
    %804 = arith.cmpf oeq, %149, %803 : vector<1x20xf32>
    %805 = arith.extui %804 : vector<1x20xi1> to vector<1x20xi32>
    %806 = arith.sitofp %805 : vector<1x20xi32> to vector<1x20xf32>
    %807 = vector.broadcast %802 : vector<20x1xf32> to vector<20x20xf32>
    %808 = vector.broadcast %806 : vector<1x20xf32> to vector<20x20xf32>
    %809 = arith.mulf %807, %808 : vector<20x20xf32>
    %810 = arith.addf %750, %809 : vector<20x20xf32>
    %811 = arith.addf %751, %774 : vector<20x1xf32>
    %c11_i32 = arith.constant 11 : i32
    %812 = vector.broadcast %c11_i32 : i32 to vector<20x20xi32>
    %813 = arith.cmpi eq, %147, %812 : vector<20x20xi32>
    %cst_180 = arith.constant 0.000000e+00 : f32
    %814 = vector.broadcast %cst_180 : f32 to vector<20x20xf32>
    %815 = arith.select %813, %794, %814 : vector<20x20xi1>, vector<20x20xf32>
    %cst_181 = arith.constant dense<0.000000e+00> : vector<20xf32>
    %816 = vector.multi_reduction <add>, %815, %cst_181 [1] : vector<20x20xf32> to vector<20xf32>
    %817 = vector.shape_cast %816 : vector<20xf32> to vector<20x1xf32>
    %cst_182 = arith.constant 5.000000e-01 : f32
    %818 = vector.broadcast %cst_182 : f32 to vector<20x1xf32>
    %819 = arith.cmpf ogt, %811, %818 : vector<20x1xf32>
    %820 = math.absf %817 : vector<20x1xf32>
    %cst_183 = arith.constant -1.000000e+00 : f32
    %821 = vector.broadcast %cst_183 : f32 to vector<20x1xf32>
    %822 = arith.select %819, %821, %820 : vector<20x1xi1>, vector<20x1xf32>
    %cst_184 = arith.constant dense<0xFF800000> : vector<1xf32>
    %823 = vector.multi_reduction <maximumf>, %822, %cst_184 [0] : vector<20x1xf32> to vector<1xf32>
    %824 = vector.shape_cast %823 : vector<1xf32> to vector<1x1xf32>
    %825 = vector.broadcast %824 : vector<1x1xf32> to vector<20x1xf32>
    %826 = arith.cmpf oeq, %822, %825 : vector<20x1xf32>
    %cst_185 = arith.constant 2.000000e+01 : f32
    %827 = vector.broadcast %cst_185 : f32 to vector<20x1xf32>
    %828 = arith.select %826, %146, %827 : vector<20x1xi1>, vector<20x1xf32>
    %cst_186 = arith.constant dense<0x7F800000> : vector<1xf32>
    %829 = vector.multi_reduction <minimumf>, %828, %cst_186 [0] : vector<20x1xf32> to vector<1xf32>
    %830 = vector.shape_cast %829 : vector<1xf32> to vector<1x1xf32>
    %831 = vector.broadcast %830 : vector<1x1xf32> to vector<20x1xf32>
    %832 = arith.cmpf oeq, %146, %831 : vector<20x1xf32>
    %833 = arith.extui %832 : vector<20x1xi1> to vector<20x1xi32>
    %834 = arith.sitofp %833 : vector<20x1xi32> to vector<20x1xf32>
    %835 = arith.mulf %817, %834 : vector<20x1xf32>
    %cst_187 = arith.constant dense<0.000000e+00> : vector<1xf32>
    %836 = vector.multi_reduction <add>, %835, %cst_187 [0] : vector<20x1xf32> to vector<1xf32>
    %837 = vector.shape_cast %836 : vector<1xf32> to vector<1x1xf32>
    %cst_188 = arith.constant 1.000000e+00 : f32
    %838 = vector.broadcast %cst_188 : f32 to vector<1x1xf32>
    %839 = arith.divf %838, %837 : vector<1x1xf32>
    %840 = vector.broadcast %834 : vector<20x1xf32> to vector<20x20xf32>
    %841 = arith.mulf %840, %794 : vector<20x20xf32>
    %cst_189 = arith.constant dense<0.000000e+00> : vector<20xf32>
    %842 = vector.multi_reduction <add>, %841, %cst_189 [0] : vector<20x20xf32> to vector<20xf32>
    %843 = vector.shape_cast %842 : vector<20xf32> to vector<1x20xf32>
    %844 = vector.broadcast %834 : vector<20x1xf32> to vector<20x5xf32>
    %845 = arith.mulf %844, %798 : vector<20x5xf32>
    %cst_190 = arith.constant dense<0.000000e+00> : vector<5xf32>
    %846 = vector.multi_reduction <add>, %845, %cst_190 [0] : vector<20x5xf32> to vector<5xf32>
    %847 = vector.shape_cast %846 : vector<5xf32> to vector<1x5xf32>
    %848 = arith.subf %817, %834 : vector<20x1xf32>
    %849 = vector.broadcast %839 : vector<1x1xf32> to vector<20x1xf32>
    %850 = arith.mulf %848, %849 : vector<20x1xf32>
    %851 = vector.broadcast %850 : vector<20x1xf32> to vector<20x20xf32>
    %852 = vector.broadcast %843 : vector<1x20xf32> to vector<20x20xf32>
    %853 = arith.mulf %851, %852 : vector<20x20xf32>
    %854 = arith.subf %794, %853 : vector<20x20xf32>
    %855 = vector.broadcast %850 : vector<20x1xf32> to vector<20x5xf32>
    %856 = vector.broadcast %847 : vector<1x5xf32> to vector<20x5xf32>
    %857 = arith.mulf %855, %856 : vector<20x5xf32>
    %858 = arith.subf %798, %857 : vector<20x5xf32>
    %c11_i32_191 = arith.constant 11 : i32
    %859 = vector.broadcast %c11_i32_191 : i32 to vector<20x1xi32>
    %860 = arith.cmpi eq, %145, %859 : vector<20x1xi32>
    %861 = arith.extui %860 : vector<20x1xi1> to vector<20x1xi32>
    %862 = arith.sitofp %861 : vector<20x1xi32> to vector<20x1xf32>
    %863 = vector.broadcast %830 : vector<1x1xf32> to vector<1x20xf32>
    %864 = arith.cmpf oeq, %149, %863 : vector<1x20xf32>
    %865 = arith.extui %864 : vector<1x20xi1> to vector<1x20xi32>
    %866 = arith.sitofp %865 : vector<1x20xi32> to vector<1x20xf32>
    %867 = vector.broadcast %862 : vector<20x1xf32> to vector<20x20xf32>
    %868 = vector.broadcast %866 : vector<1x20xf32> to vector<20x20xf32>
    %869 = arith.mulf %867, %868 : vector<20x20xf32>
    %870 = arith.addf %810, %869 : vector<20x20xf32>
    %871 = arith.addf %811, %834 : vector<20x1xf32>
    %c12_i32 = arith.constant 12 : i32
    %872 = vector.broadcast %c12_i32 : i32 to vector<20x20xi32>
    %873 = arith.cmpi eq, %147, %872 : vector<20x20xi32>
    %cst_192 = arith.constant 0.000000e+00 : f32
    %874 = vector.broadcast %cst_192 : f32 to vector<20x20xf32>
    %875 = arith.select %873, %854, %874 : vector<20x20xi1>, vector<20x20xf32>
    %cst_193 = arith.constant dense<0.000000e+00> : vector<20xf32>
    %876 = vector.multi_reduction <add>, %875, %cst_193 [1] : vector<20x20xf32> to vector<20xf32>
    %877 = vector.shape_cast %876 : vector<20xf32> to vector<20x1xf32>
    %cst_194 = arith.constant 5.000000e-01 : f32
    %878 = vector.broadcast %cst_194 : f32 to vector<20x1xf32>
    %879 = arith.cmpf ogt, %871, %878 : vector<20x1xf32>
    %880 = math.absf %877 : vector<20x1xf32>
    %cst_195 = arith.constant -1.000000e+00 : f32
    %881 = vector.broadcast %cst_195 : f32 to vector<20x1xf32>
    %882 = arith.select %879, %881, %880 : vector<20x1xi1>, vector<20x1xf32>
    %cst_196 = arith.constant dense<0xFF800000> : vector<1xf32>
    %883 = vector.multi_reduction <maximumf>, %882, %cst_196 [0] : vector<20x1xf32> to vector<1xf32>
    %884 = vector.shape_cast %883 : vector<1xf32> to vector<1x1xf32>
    %885 = vector.broadcast %884 : vector<1x1xf32> to vector<20x1xf32>
    %886 = arith.cmpf oeq, %882, %885 : vector<20x1xf32>
    %cst_197 = arith.constant 2.000000e+01 : f32
    %887 = vector.broadcast %cst_197 : f32 to vector<20x1xf32>
    %888 = arith.select %886, %146, %887 : vector<20x1xi1>, vector<20x1xf32>
    %cst_198 = arith.constant dense<0x7F800000> : vector<1xf32>
    %889 = vector.multi_reduction <minimumf>, %888, %cst_198 [0] : vector<20x1xf32> to vector<1xf32>
    %890 = vector.shape_cast %889 : vector<1xf32> to vector<1x1xf32>
    %891 = vector.broadcast %890 : vector<1x1xf32> to vector<20x1xf32>
    %892 = arith.cmpf oeq, %146, %891 : vector<20x1xf32>
    %893 = arith.extui %892 : vector<20x1xi1> to vector<20x1xi32>
    %894 = arith.sitofp %893 : vector<20x1xi32> to vector<20x1xf32>
    %895 = arith.mulf %877, %894 : vector<20x1xf32>
    %cst_199 = arith.constant dense<0.000000e+00> : vector<1xf32>
    %896 = vector.multi_reduction <add>, %895, %cst_199 [0] : vector<20x1xf32> to vector<1xf32>
    %897 = vector.shape_cast %896 : vector<1xf32> to vector<1x1xf32>
    %cst_200 = arith.constant 1.000000e+00 : f32
    %898 = vector.broadcast %cst_200 : f32 to vector<1x1xf32>
    %899 = arith.divf %898, %897 : vector<1x1xf32>
    %900 = vector.broadcast %894 : vector<20x1xf32> to vector<20x20xf32>
    %901 = arith.mulf %900, %854 : vector<20x20xf32>
    %cst_201 = arith.constant dense<0.000000e+00> : vector<20xf32>
    %902 = vector.multi_reduction <add>, %901, %cst_201 [0] : vector<20x20xf32> to vector<20xf32>
    %903 = vector.shape_cast %902 : vector<20xf32> to vector<1x20xf32>
    %904 = vector.broadcast %894 : vector<20x1xf32> to vector<20x5xf32>
    %905 = arith.mulf %904, %858 : vector<20x5xf32>
    %cst_202 = arith.constant dense<0.000000e+00> : vector<5xf32>
    %906 = vector.multi_reduction <add>, %905, %cst_202 [0] : vector<20x5xf32> to vector<5xf32>
    %907 = vector.shape_cast %906 : vector<5xf32> to vector<1x5xf32>
    %908 = arith.subf %877, %894 : vector<20x1xf32>
    %909 = vector.broadcast %899 : vector<1x1xf32> to vector<20x1xf32>
    %910 = arith.mulf %908, %909 : vector<20x1xf32>
    %911 = vector.broadcast %910 : vector<20x1xf32> to vector<20x20xf32>
    %912 = vector.broadcast %903 : vector<1x20xf32> to vector<20x20xf32>
    %913 = arith.mulf %911, %912 : vector<20x20xf32>
    %914 = arith.subf %854, %913 : vector<20x20xf32>
    %915 = vector.broadcast %910 : vector<20x1xf32> to vector<20x5xf32>
    %916 = vector.broadcast %907 : vector<1x5xf32> to vector<20x5xf32>
    %917 = arith.mulf %915, %916 : vector<20x5xf32>
    %918 = arith.subf %858, %917 : vector<20x5xf32>
    %c12_i32_203 = arith.constant 12 : i32
    %919 = vector.broadcast %c12_i32_203 : i32 to vector<20x1xi32>
    %920 = arith.cmpi eq, %145, %919 : vector<20x1xi32>
    %921 = arith.extui %920 : vector<20x1xi1> to vector<20x1xi32>
    %922 = arith.sitofp %921 : vector<20x1xi32> to vector<20x1xf32>
    %923 = vector.broadcast %890 : vector<1x1xf32> to vector<1x20xf32>
    %924 = arith.cmpf oeq, %149, %923 : vector<1x20xf32>
    %925 = arith.extui %924 : vector<1x20xi1> to vector<1x20xi32>
    %926 = arith.sitofp %925 : vector<1x20xi32> to vector<1x20xf32>
    %927 = vector.broadcast %922 : vector<20x1xf32> to vector<20x20xf32>
    %928 = vector.broadcast %926 : vector<1x20xf32> to vector<20x20xf32>
    %929 = arith.mulf %927, %928 : vector<20x20xf32>
    %930 = arith.addf %870, %929 : vector<20x20xf32>
    %931 = arith.addf %871, %894 : vector<20x1xf32>
    %c13_i32 = arith.constant 13 : i32
    %932 = vector.broadcast %c13_i32 : i32 to vector<20x20xi32>
    %933 = arith.cmpi eq, %147, %932 : vector<20x20xi32>
    %cst_204 = arith.constant 0.000000e+00 : f32
    %934 = vector.broadcast %cst_204 : f32 to vector<20x20xf32>
    %935 = arith.select %933, %914, %934 : vector<20x20xi1>, vector<20x20xf32>
    %cst_205 = arith.constant dense<0.000000e+00> : vector<20xf32>
    %936 = vector.multi_reduction <add>, %935, %cst_205 [1] : vector<20x20xf32> to vector<20xf32>
    %937 = vector.shape_cast %936 : vector<20xf32> to vector<20x1xf32>
    %cst_206 = arith.constant 5.000000e-01 : f32
    %938 = vector.broadcast %cst_206 : f32 to vector<20x1xf32>
    %939 = arith.cmpf ogt, %931, %938 : vector<20x1xf32>
    %940 = math.absf %937 : vector<20x1xf32>
    %cst_207 = arith.constant -1.000000e+00 : f32
    %941 = vector.broadcast %cst_207 : f32 to vector<20x1xf32>
    %942 = arith.select %939, %941, %940 : vector<20x1xi1>, vector<20x1xf32>
    %cst_208 = arith.constant dense<0xFF800000> : vector<1xf32>
    %943 = vector.multi_reduction <maximumf>, %942, %cst_208 [0] : vector<20x1xf32> to vector<1xf32>
    %944 = vector.shape_cast %943 : vector<1xf32> to vector<1x1xf32>
    %945 = vector.broadcast %944 : vector<1x1xf32> to vector<20x1xf32>
    %946 = arith.cmpf oeq, %942, %945 : vector<20x1xf32>
    %cst_209 = arith.constant 2.000000e+01 : f32
    %947 = vector.broadcast %cst_209 : f32 to vector<20x1xf32>
    %948 = arith.select %946, %146, %947 : vector<20x1xi1>, vector<20x1xf32>
    %cst_210 = arith.constant dense<0x7F800000> : vector<1xf32>
    %949 = vector.multi_reduction <minimumf>, %948, %cst_210 [0] : vector<20x1xf32> to vector<1xf32>
    %950 = vector.shape_cast %949 : vector<1xf32> to vector<1x1xf32>
    %951 = vector.broadcast %950 : vector<1x1xf32> to vector<20x1xf32>
    %952 = arith.cmpf oeq, %146, %951 : vector<20x1xf32>
    %953 = arith.extui %952 : vector<20x1xi1> to vector<20x1xi32>
    %954 = arith.sitofp %953 : vector<20x1xi32> to vector<20x1xf32>
    %955 = arith.mulf %937, %954 : vector<20x1xf32>
    %cst_211 = arith.constant dense<0.000000e+00> : vector<1xf32>
    %956 = vector.multi_reduction <add>, %955, %cst_211 [0] : vector<20x1xf32> to vector<1xf32>
    %957 = vector.shape_cast %956 : vector<1xf32> to vector<1x1xf32>
    %cst_212 = arith.constant 1.000000e+00 : f32
    %958 = vector.broadcast %cst_212 : f32 to vector<1x1xf32>
    %959 = arith.divf %958, %957 : vector<1x1xf32>
    %960 = vector.broadcast %954 : vector<20x1xf32> to vector<20x20xf32>
    %961 = arith.mulf %960, %914 : vector<20x20xf32>
    %cst_213 = arith.constant dense<0.000000e+00> : vector<20xf32>
    %962 = vector.multi_reduction <add>, %961, %cst_213 [0] : vector<20x20xf32> to vector<20xf32>
    %963 = vector.shape_cast %962 : vector<20xf32> to vector<1x20xf32>
    %964 = vector.broadcast %954 : vector<20x1xf32> to vector<20x5xf32>
    %965 = arith.mulf %964, %918 : vector<20x5xf32>
    %cst_214 = arith.constant dense<0.000000e+00> : vector<5xf32>
    %966 = vector.multi_reduction <add>, %965, %cst_214 [0] : vector<20x5xf32> to vector<5xf32>
    %967 = vector.shape_cast %966 : vector<5xf32> to vector<1x5xf32>
    %968 = arith.subf %937, %954 : vector<20x1xf32>
    %969 = vector.broadcast %959 : vector<1x1xf32> to vector<20x1xf32>
    %970 = arith.mulf %968, %969 : vector<20x1xf32>
    %971 = vector.broadcast %970 : vector<20x1xf32> to vector<20x20xf32>
    %972 = vector.broadcast %963 : vector<1x20xf32> to vector<20x20xf32>
    %973 = arith.mulf %971, %972 : vector<20x20xf32>
    %974 = arith.subf %914, %973 : vector<20x20xf32>
    %975 = vector.broadcast %970 : vector<20x1xf32> to vector<20x5xf32>
    %976 = vector.broadcast %967 : vector<1x5xf32> to vector<20x5xf32>
    %977 = arith.mulf %975, %976 : vector<20x5xf32>
    %978 = arith.subf %918, %977 : vector<20x5xf32>
    %c13_i32_215 = arith.constant 13 : i32
    %979 = vector.broadcast %c13_i32_215 : i32 to vector<20x1xi32>
    %980 = arith.cmpi eq, %145, %979 : vector<20x1xi32>
    %981 = arith.extui %980 : vector<20x1xi1> to vector<20x1xi32>
    %982 = arith.sitofp %981 : vector<20x1xi32> to vector<20x1xf32>
    %983 = vector.broadcast %950 : vector<1x1xf32> to vector<1x20xf32>
    %984 = arith.cmpf oeq, %149, %983 : vector<1x20xf32>
    %985 = arith.extui %984 : vector<1x20xi1> to vector<1x20xi32>
    %986 = arith.sitofp %985 : vector<1x20xi32> to vector<1x20xf32>
    %987 = vector.broadcast %982 : vector<20x1xf32> to vector<20x20xf32>
    %988 = vector.broadcast %986 : vector<1x20xf32> to vector<20x20xf32>
    %989 = arith.mulf %987, %988 : vector<20x20xf32>
    %990 = arith.addf %930, %989 : vector<20x20xf32>
    %991 = arith.addf %931, %954 : vector<20x1xf32>
    %c14_i32 = arith.constant 14 : i32
    %992 = vector.broadcast %c14_i32 : i32 to vector<20x20xi32>
    %993 = arith.cmpi eq, %147, %992 : vector<20x20xi32>
    %cst_216 = arith.constant 0.000000e+00 : f32
    %994 = vector.broadcast %cst_216 : f32 to vector<20x20xf32>
    %995 = arith.select %993, %974, %994 : vector<20x20xi1>, vector<20x20xf32>
    %cst_217 = arith.constant dense<0.000000e+00> : vector<20xf32>
    %996 = vector.multi_reduction <add>, %995, %cst_217 [1] : vector<20x20xf32> to vector<20xf32>
    %997 = vector.shape_cast %996 : vector<20xf32> to vector<20x1xf32>
    %cst_218 = arith.constant 5.000000e-01 : f32
    %998 = vector.broadcast %cst_218 : f32 to vector<20x1xf32>
    %999 = arith.cmpf ogt, %991, %998 : vector<20x1xf32>
    %1000 = math.absf %997 : vector<20x1xf32>
    %cst_219 = arith.constant -1.000000e+00 : f32
    %1001 = vector.broadcast %cst_219 : f32 to vector<20x1xf32>
    %1002 = arith.select %999, %1001, %1000 : vector<20x1xi1>, vector<20x1xf32>
    %cst_220 = arith.constant dense<0xFF800000> : vector<1xf32>
    %1003 = vector.multi_reduction <maximumf>, %1002, %cst_220 [0] : vector<20x1xf32> to vector<1xf32>
    %1004 = vector.shape_cast %1003 : vector<1xf32> to vector<1x1xf32>
    %1005 = vector.broadcast %1004 : vector<1x1xf32> to vector<20x1xf32>
    %1006 = arith.cmpf oeq, %1002, %1005 : vector<20x1xf32>
    %cst_221 = arith.constant 2.000000e+01 : f32
    %1007 = vector.broadcast %cst_221 : f32 to vector<20x1xf32>
    %1008 = arith.select %1006, %146, %1007 : vector<20x1xi1>, vector<20x1xf32>
    %cst_222 = arith.constant dense<0x7F800000> : vector<1xf32>
    %1009 = vector.multi_reduction <minimumf>, %1008, %cst_222 [0] : vector<20x1xf32> to vector<1xf32>
    %1010 = vector.shape_cast %1009 : vector<1xf32> to vector<1x1xf32>
    %1011 = vector.broadcast %1010 : vector<1x1xf32> to vector<20x1xf32>
    %1012 = arith.cmpf oeq, %146, %1011 : vector<20x1xf32>
    %1013 = arith.extui %1012 : vector<20x1xi1> to vector<20x1xi32>
    %1014 = arith.sitofp %1013 : vector<20x1xi32> to vector<20x1xf32>
    %1015 = arith.mulf %997, %1014 : vector<20x1xf32>
    %cst_223 = arith.constant dense<0.000000e+00> : vector<1xf32>
    %1016 = vector.multi_reduction <add>, %1015, %cst_223 [0] : vector<20x1xf32> to vector<1xf32>
    %1017 = vector.shape_cast %1016 : vector<1xf32> to vector<1x1xf32>
    %cst_224 = arith.constant 1.000000e+00 : f32
    %1018 = vector.broadcast %cst_224 : f32 to vector<1x1xf32>
    %1019 = arith.divf %1018, %1017 : vector<1x1xf32>
    %1020 = vector.broadcast %1014 : vector<20x1xf32> to vector<20x20xf32>
    %1021 = arith.mulf %1020, %974 : vector<20x20xf32>
    %cst_225 = arith.constant dense<0.000000e+00> : vector<20xf32>
    %1022 = vector.multi_reduction <add>, %1021, %cst_225 [0] : vector<20x20xf32> to vector<20xf32>
    %1023 = vector.shape_cast %1022 : vector<20xf32> to vector<1x20xf32>
    %1024 = vector.broadcast %1014 : vector<20x1xf32> to vector<20x5xf32>
    %1025 = arith.mulf %1024, %978 : vector<20x5xf32>
    %cst_226 = arith.constant dense<0.000000e+00> : vector<5xf32>
    %1026 = vector.multi_reduction <add>, %1025, %cst_226 [0] : vector<20x5xf32> to vector<5xf32>
    %1027 = vector.shape_cast %1026 : vector<5xf32> to vector<1x5xf32>
    %1028 = arith.subf %997, %1014 : vector<20x1xf32>
    %1029 = vector.broadcast %1019 : vector<1x1xf32> to vector<20x1xf32>
    %1030 = arith.mulf %1028, %1029 : vector<20x1xf32>
    %1031 = vector.broadcast %1030 : vector<20x1xf32> to vector<20x20xf32>
    %1032 = vector.broadcast %1023 : vector<1x20xf32> to vector<20x20xf32>
    %1033 = arith.mulf %1031, %1032 : vector<20x20xf32>
    %1034 = arith.subf %974, %1033 : vector<20x20xf32>
    %1035 = vector.broadcast %1030 : vector<20x1xf32> to vector<20x5xf32>
    %1036 = vector.broadcast %1027 : vector<1x5xf32> to vector<20x5xf32>
    %1037 = arith.mulf %1035, %1036 : vector<20x5xf32>
    %1038 = arith.subf %978, %1037 : vector<20x5xf32>
    %c14_i32_227 = arith.constant 14 : i32
    %1039 = vector.broadcast %c14_i32_227 : i32 to vector<20x1xi32>
    %1040 = arith.cmpi eq, %145, %1039 : vector<20x1xi32>
    %1041 = arith.extui %1040 : vector<20x1xi1> to vector<20x1xi32>
    %1042 = arith.sitofp %1041 : vector<20x1xi32> to vector<20x1xf32>
    %1043 = vector.broadcast %1010 : vector<1x1xf32> to vector<1x20xf32>
    %1044 = arith.cmpf oeq, %149, %1043 : vector<1x20xf32>
    %1045 = arith.extui %1044 : vector<1x20xi1> to vector<1x20xi32>
    %1046 = arith.sitofp %1045 : vector<1x20xi32> to vector<1x20xf32>
    %1047 = vector.broadcast %1042 : vector<20x1xf32> to vector<20x20xf32>
    %1048 = vector.broadcast %1046 : vector<1x20xf32> to vector<20x20xf32>
    %1049 = arith.mulf %1047, %1048 : vector<20x20xf32>
    %1050 = arith.addf %990, %1049 : vector<20x20xf32>
    %1051 = arith.addf %991, %1014 : vector<20x1xf32>
    %c15_i32 = arith.constant 15 : i32
    %1052 = vector.broadcast %c15_i32 : i32 to vector<20x20xi32>
    %1053 = arith.cmpi eq, %147, %1052 : vector<20x20xi32>
    %cst_228 = arith.constant 0.000000e+00 : f32
    %1054 = vector.broadcast %cst_228 : f32 to vector<20x20xf32>
    %1055 = arith.select %1053, %1034, %1054 : vector<20x20xi1>, vector<20x20xf32>
    %cst_229 = arith.constant dense<0.000000e+00> : vector<20xf32>
    %1056 = vector.multi_reduction <add>, %1055, %cst_229 [1] : vector<20x20xf32> to vector<20xf32>
    %1057 = vector.shape_cast %1056 : vector<20xf32> to vector<20x1xf32>
    %cst_230 = arith.constant 5.000000e-01 : f32
    %1058 = vector.broadcast %cst_230 : f32 to vector<20x1xf32>
    %1059 = arith.cmpf ogt, %1051, %1058 : vector<20x1xf32>
    %1060 = math.absf %1057 : vector<20x1xf32>
    %cst_231 = arith.constant -1.000000e+00 : f32
    %1061 = vector.broadcast %cst_231 : f32 to vector<20x1xf32>
    %1062 = arith.select %1059, %1061, %1060 : vector<20x1xi1>, vector<20x1xf32>
    %cst_232 = arith.constant dense<0xFF800000> : vector<1xf32>
    %1063 = vector.multi_reduction <maximumf>, %1062, %cst_232 [0] : vector<20x1xf32> to vector<1xf32>
    %1064 = vector.shape_cast %1063 : vector<1xf32> to vector<1x1xf32>
    %1065 = vector.broadcast %1064 : vector<1x1xf32> to vector<20x1xf32>
    %1066 = arith.cmpf oeq, %1062, %1065 : vector<20x1xf32>
    %cst_233 = arith.constant 2.000000e+01 : f32
    %1067 = vector.broadcast %cst_233 : f32 to vector<20x1xf32>
    %1068 = arith.select %1066, %146, %1067 : vector<20x1xi1>, vector<20x1xf32>
    %cst_234 = arith.constant dense<0x7F800000> : vector<1xf32>
    %1069 = vector.multi_reduction <minimumf>, %1068, %cst_234 [0] : vector<20x1xf32> to vector<1xf32>
    %1070 = vector.shape_cast %1069 : vector<1xf32> to vector<1x1xf32>
    %1071 = vector.broadcast %1070 : vector<1x1xf32> to vector<20x1xf32>
    %1072 = arith.cmpf oeq, %146, %1071 : vector<20x1xf32>
    %1073 = arith.extui %1072 : vector<20x1xi1> to vector<20x1xi32>
    %1074 = arith.sitofp %1073 : vector<20x1xi32> to vector<20x1xf32>
    %1075 = arith.mulf %1057, %1074 : vector<20x1xf32>
    %cst_235 = arith.constant dense<0.000000e+00> : vector<1xf32>
    %1076 = vector.multi_reduction <add>, %1075, %cst_235 [0] : vector<20x1xf32> to vector<1xf32>
    %1077 = vector.shape_cast %1076 : vector<1xf32> to vector<1x1xf32>
    %cst_236 = arith.constant 1.000000e+00 : f32
    %1078 = vector.broadcast %cst_236 : f32 to vector<1x1xf32>
    %1079 = arith.divf %1078, %1077 : vector<1x1xf32>
    %1080 = vector.broadcast %1074 : vector<20x1xf32> to vector<20x20xf32>
    %1081 = arith.mulf %1080, %1034 : vector<20x20xf32>
    %cst_237 = arith.constant dense<0.000000e+00> : vector<20xf32>
    %1082 = vector.multi_reduction <add>, %1081, %cst_237 [0] : vector<20x20xf32> to vector<20xf32>
    %1083 = vector.shape_cast %1082 : vector<20xf32> to vector<1x20xf32>
    %1084 = vector.broadcast %1074 : vector<20x1xf32> to vector<20x5xf32>
    %1085 = arith.mulf %1084, %1038 : vector<20x5xf32>
    %cst_238 = arith.constant dense<0.000000e+00> : vector<5xf32>
    %1086 = vector.multi_reduction <add>, %1085, %cst_238 [0] : vector<20x5xf32> to vector<5xf32>
    %1087 = vector.shape_cast %1086 : vector<5xf32> to vector<1x5xf32>
    %1088 = arith.subf %1057, %1074 : vector<20x1xf32>
    %1089 = vector.broadcast %1079 : vector<1x1xf32> to vector<20x1xf32>
    %1090 = arith.mulf %1088, %1089 : vector<20x1xf32>
    %1091 = vector.broadcast %1090 : vector<20x1xf32> to vector<20x20xf32>
    %1092 = vector.broadcast %1083 : vector<1x20xf32> to vector<20x20xf32>
    %1093 = arith.mulf %1091, %1092 : vector<20x20xf32>
    %1094 = arith.subf %1034, %1093 : vector<20x20xf32>
    %1095 = vector.broadcast %1090 : vector<20x1xf32> to vector<20x5xf32>
    %1096 = vector.broadcast %1087 : vector<1x5xf32> to vector<20x5xf32>
    %1097 = arith.mulf %1095, %1096 : vector<20x5xf32>
    %1098 = arith.subf %1038, %1097 : vector<20x5xf32>
    %c15_i32_239 = arith.constant 15 : i32
    %1099 = vector.broadcast %c15_i32_239 : i32 to vector<20x1xi32>
    %1100 = arith.cmpi eq, %145, %1099 : vector<20x1xi32>
    %1101 = arith.extui %1100 : vector<20x1xi1> to vector<20x1xi32>
    %1102 = arith.sitofp %1101 : vector<20x1xi32> to vector<20x1xf32>
    %1103 = vector.broadcast %1070 : vector<1x1xf32> to vector<1x20xf32>
    %1104 = arith.cmpf oeq, %149, %1103 : vector<1x20xf32>
    %1105 = arith.extui %1104 : vector<1x20xi1> to vector<1x20xi32>
    %1106 = arith.sitofp %1105 : vector<1x20xi32> to vector<1x20xf32>
    %1107 = vector.broadcast %1102 : vector<20x1xf32> to vector<20x20xf32>
    %1108 = vector.broadcast %1106 : vector<1x20xf32> to vector<20x20xf32>
    %1109 = arith.mulf %1107, %1108 : vector<20x20xf32>
    %1110 = arith.addf %1050, %1109 : vector<20x20xf32>
    %1111 = arith.addf %1051, %1074 : vector<20x1xf32>
    %c16_i32 = arith.constant 16 : i32
    %1112 = vector.broadcast %c16_i32 : i32 to vector<20x20xi32>
    %1113 = arith.cmpi eq, %147, %1112 : vector<20x20xi32>
    %cst_240 = arith.constant 0.000000e+00 : f32
    %1114 = vector.broadcast %cst_240 : f32 to vector<20x20xf32>
    %1115 = arith.select %1113, %1094, %1114 : vector<20x20xi1>, vector<20x20xf32>
    %cst_241 = arith.constant dense<0.000000e+00> : vector<20xf32>
    %1116 = vector.multi_reduction <add>, %1115, %cst_241 [1] : vector<20x20xf32> to vector<20xf32>
    %1117 = vector.shape_cast %1116 : vector<20xf32> to vector<20x1xf32>
    %cst_242 = arith.constant 5.000000e-01 : f32
    %1118 = vector.broadcast %cst_242 : f32 to vector<20x1xf32>
    %1119 = arith.cmpf ogt, %1111, %1118 : vector<20x1xf32>
    %1120 = math.absf %1117 : vector<20x1xf32>
    %cst_243 = arith.constant -1.000000e+00 : f32
    %1121 = vector.broadcast %cst_243 : f32 to vector<20x1xf32>
    %1122 = arith.select %1119, %1121, %1120 : vector<20x1xi1>, vector<20x1xf32>
    %cst_244 = arith.constant dense<0xFF800000> : vector<1xf32>
    %1123 = vector.multi_reduction <maximumf>, %1122, %cst_244 [0] : vector<20x1xf32> to vector<1xf32>
    %1124 = vector.shape_cast %1123 : vector<1xf32> to vector<1x1xf32>
    %1125 = vector.broadcast %1124 : vector<1x1xf32> to vector<20x1xf32>
    %1126 = arith.cmpf oeq, %1122, %1125 : vector<20x1xf32>
    %cst_245 = arith.constant 2.000000e+01 : f32
    %1127 = vector.broadcast %cst_245 : f32 to vector<20x1xf32>
    %1128 = arith.select %1126, %146, %1127 : vector<20x1xi1>, vector<20x1xf32>
    %cst_246 = arith.constant dense<0x7F800000> : vector<1xf32>
    %1129 = vector.multi_reduction <minimumf>, %1128, %cst_246 [0] : vector<20x1xf32> to vector<1xf32>
    %1130 = vector.shape_cast %1129 : vector<1xf32> to vector<1x1xf32>
    %1131 = vector.broadcast %1130 : vector<1x1xf32> to vector<20x1xf32>
    %1132 = arith.cmpf oeq, %146, %1131 : vector<20x1xf32>
    %1133 = arith.extui %1132 : vector<20x1xi1> to vector<20x1xi32>
    %1134 = arith.sitofp %1133 : vector<20x1xi32> to vector<20x1xf32>
    %1135 = arith.mulf %1117, %1134 : vector<20x1xf32>
    %cst_247 = arith.constant dense<0.000000e+00> : vector<1xf32>
    %1136 = vector.multi_reduction <add>, %1135, %cst_247 [0] : vector<20x1xf32> to vector<1xf32>
    %1137 = vector.shape_cast %1136 : vector<1xf32> to vector<1x1xf32>
    %cst_248 = arith.constant 1.000000e+00 : f32
    %1138 = vector.broadcast %cst_248 : f32 to vector<1x1xf32>
    %1139 = arith.divf %1138, %1137 : vector<1x1xf32>
    %1140 = vector.broadcast %1134 : vector<20x1xf32> to vector<20x20xf32>
    %1141 = arith.mulf %1140, %1094 : vector<20x20xf32>
    %cst_249 = arith.constant dense<0.000000e+00> : vector<20xf32>
    %1142 = vector.multi_reduction <add>, %1141, %cst_249 [0] : vector<20x20xf32> to vector<20xf32>
    %1143 = vector.shape_cast %1142 : vector<20xf32> to vector<1x20xf32>
    %1144 = vector.broadcast %1134 : vector<20x1xf32> to vector<20x5xf32>
    %1145 = arith.mulf %1144, %1098 : vector<20x5xf32>
    %cst_250 = arith.constant dense<0.000000e+00> : vector<5xf32>
    %1146 = vector.multi_reduction <add>, %1145, %cst_250 [0] : vector<20x5xf32> to vector<5xf32>
    %1147 = vector.shape_cast %1146 : vector<5xf32> to vector<1x5xf32>
    %1148 = arith.subf %1117, %1134 : vector<20x1xf32>
    %1149 = vector.broadcast %1139 : vector<1x1xf32> to vector<20x1xf32>
    %1150 = arith.mulf %1148, %1149 : vector<20x1xf32>
    %1151 = vector.broadcast %1150 : vector<20x1xf32> to vector<20x20xf32>
    %1152 = vector.broadcast %1143 : vector<1x20xf32> to vector<20x20xf32>
    %1153 = arith.mulf %1151, %1152 : vector<20x20xf32>
    %1154 = arith.subf %1094, %1153 : vector<20x20xf32>
    %1155 = vector.broadcast %1150 : vector<20x1xf32> to vector<20x5xf32>
    %1156 = vector.broadcast %1147 : vector<1x5xf32> to vector<20x5xf32>
    %1157 = arith.mulf %1155, %1156 : vector<20x5xf32>
    %1158 = arith.subf %1098, %1157 : vector<20x5xf32>
    %c16_i32_251 = arith.constant 16 : i32
    %1159 = vector.broadcast %c16_i32_251 : i32 to vector<20x1xi32>
    %1160 = arith.cmpi eq, %145, %1159 : vector<20x1xi32>
    %1161 = arith.extui %1160 : vector<20x1xi1> to vector<20x1xi32>
    %1162 = arith.sitofp %1161 : vector<20x1xi32> to vector<20x1xf32>
    %1163 = vector.broadcast %1130 : vector<1x1xf32> to vector<1x20xf32>
    %1164 = arith.cmpf oeq, %149, %1163 : vector<1x20xf32>
    %1165 = arith.extui %1164 : vector<1x20xi1> to vector<1x20xi32>
    %1166 = arith.sitofp %1165 : vector<1x20xi32> to vector<1x20xf32>
    %1167 = vector.broadcast %1162 : vector<20x1xf32> to vector<20x20xf32>
    %1168 = vector.broadcast %1166 : vector<1x20xf32> to vector<20x20xf32>
    %1169 = arith.mulf %1167, %1168 : vector<20x20xf32>
    %1170 = arith.addf %1110, %1169 : vector<20x20xf32>
    %1171 = arith.addf %1111, %1134 : vector<20x1xf32>
    %c17_i32 = arith.constant 17 : i32
    %1172 = vector.broadcast %c17_i32 : i32 to vector<20x20xi32>
    %1173 = arith.cmpi eq, %147, %1172 : vector<20x20xi32>
    %cst_252 = arith.constant 0.000000e+00 : f32
    %1174 = vector.broadcast %cst_252 : f32 to vector<20x20xf32>
    %1175 = arith.select %1173, %1154, %1174 : vector<20x20xi1>, vector<20x20xf32>
    %cst_253 = arith.constant dense<0.000000e+00> : vector<20xf32>
    %1176 = vector.multi_reduction <add>, %1175, %cst_253 [1] : vector<20x20xf32> to vector<20xf32>
    %1177 = vector.shape_cast %1176 : vector<20xf32> to vector<20x1xf32>
    %cst_254 = arith.constant 5.000000e-01 : f32
    %1178 = vector.broadcast %cst_254 : f32 to vector<20x1xf32>
    %1179 = arith.cmpf ogt, %1171, %1178 : vector<20x1xf32>
    %1180 = math.absf %1177 : vector<20x1xf32>
    %cst_255 = arith.constant -1.000000e+00 : f32
    %1181 = vector.broadcast %cst_255 : f32 to vector<20x1xf32>
    %1182 = arith.select %1179, %1181, %1180 : vector<20x1xi1>, vector<20x1xf32>
    %cst_256 = arith.constant dense<0xFF800000> : vector<1xf32>
    %1183 = vector.multi_reduction <maximumf>, %1182, %cst_256 [0] : vector<20x1xf32> to vector<1xf32>
    %1184 = vector.shape_cast %1183 : vector<1xf32> to vector<1x1xf32>
    %1185 = vector.broadcast %1184 : vector<1x1xf32> to vector<20x1xf32>
    %1186 = arith.cmpf oeq, %1182, %1185 : vector<20x1xf32>
    %cst_257 = arith.constant 2.000000e+01 : f32
    %1187 = vector.broadcast %cst_257 : f32 to vector<20x1xf32>
    %1188 = arith.select %1186, %146, %1187 : vector<20x1xi1>, vector<20x1xf32>
    %cst_258 = arith.constant dense<0x7F800000> : vector<1xf32>
    %1189 = vector.multi_reduction <minimumf>, %1188, %cst_258 [0] : vector<20x1xf32> to vector<1xf32>
    %1190 = vector.shape_cast %1189 : vector<1xf32> to vector<1x1xf32>
    %1191 = vector.broadcast %1190 : vector<1x1xf32> to vector<20x1xf32>
    %1192 = arith.cmpf oeq, %146, %1191 : vector<20x1xf32>
    %1193 = arith.extui %1192 : vector<20x1xi1> to vector<20x1xi32>
    %1194 = arith.sitofp %1193 : vector<20x1xi32> to vector<20x1xf32>
    %1195 = arith.mulf %1177, %1194 : vector<20x1xf32>
    %cst_259 = arith.constant dense<0.000000e+00> : vector<1xf32>
    %1196 = vector.multi_reduction <add>, %1195, %cst_259 [0] : vector<20x1xf32> to vector<1xf32>
    %1197 = vector.shape_cast %1196 : vector<1xf32> to vector<1x1xf32>
    %cst_260 = arith.constant 1.000000e+00 : f32
    %1198 = vector.broadcast %cst_260 : f32 to vector<1x1xf32>
    %1199 = arith.divf %1198, %1197 : vector<1x1xf32>
    %1200 = vector.broadcast %1194 : vector<20x1xf32> to vector<20x20xf32>
    %1201 = arith.mulf %1200, %1154 : vector<20x20xf32>
    %cst_261 = arith.constant dense<0.000000e+00> : vector<20xf32>
    %1202 = vector.multi_reduction <add>, %1201, %cst_261 [0] : vector<20x20xf32> to vector<20xf32>
    %1203 = vector.shape_cast %1202 : vector<20xf32> to vector<1x20xf32>
    %1204 = vector.broadcast %1194 : vector<20x1xf32> to vector<20x5xf32>
    %1205 = arith.mulf %1204, %1158 : vector<20x5xf32>
    %cst_262 = arith.constant dense<0.000000e+00> : vector<5xf32>
    %1206 = vector.multi_reduction <add>, %1205, %cst_262 [0] : vector<20x5xf32> to vector<5xf32>
    %1207 = vector.shape_cast %1206 : vector<5xf32> to vector<1x5xf32>
    %1208 = arith.subf %1177, %1194 : vector<20x1xf32>
    %1209 = vector.broadcast %1199 : vector<1x1xf32> to vector<20x1xf32>
    %1210 = arith.mulf %1208, %1209 : vector<20x1xf32>
    %1211 = vector.broadcast %1210 : vector<20x1xf32> to vector<20x20xf32>
    %1212 = vector.broadcast %1203 : vector<1x20xf32> to vector<20x20xf32>
    %1213 = arith.mulf %1211, %1212 : vector<20x20xf32>
    %1214 = arith.subf %1154, %1213 : vector<20x20xf32>
    %1215 = vector.broadcast %1210 : vector<20x1xf32> to vector<20x5xf32>
    %1216 = vector.broadcast %1207 : vector<1x5xf32> to vector<20x5xf32>
    %1217 = arith.mulf %1215, %1216 : vector<20x5xf32>
    %1218 = arith.subf %1158, %1217 : vector<20x5xf32>
    %c17_i32_263 = arith.constant 17 : i32
    %1219 = vector.broadcast %c17_i32_263 : i32 to vector<20x1xi32>
    %1220 = arith.cmpi eq, %145, %1219 : vector<20x1xi32>
    %1221 = arith.extui %1220 : vector<20x1xi1> to vector<20x1xi32>
    %1222 = arith.sitofp %1221 : vector<20x1xi32> to vector<20x1xf32>
    %1223 = vector.broadcast %1190 : vector<1x1xf32> to vector<1x20xf32>
    %1224 = arith.cmpf oeq, %149, %1223 : vector<1x20xf32>
    %1225 = arith.extui %1224 : vector<1x20xi1> to vector<1x20xi32>
    %1226 = arith.sitofp %1225 : vector<1x20xi32> to vector<1x20xf32>
    %1227 = vector.broadcast %1222 : vector<20x1xf32> to vector<20x20xf32>
    %1228 = vector.broadcast %1226 : vector<1x20xf32> to vector<20x20xf32>
    %1229 = arith.mulf %1227, %1228 : vector<20x20xf32>
    %1230 = arith.addf %1170, %1229 : vector<20x20xf32>
    %1231 = arith.addf %1171, %1194 : vector<20x1xf32>
    %c18_i32 = arith.constant 18 : i32
    %1232 = vector.broadcast %c18_i32 : i32 to vector<20x20xi32>
    %1233 = arith.cmpi eq, %147, %1232 : vector<20x20xi32>
    %cst_264 = arith.constant 0.000000e+00 : f32
    %1234 = vector.broadcast %cst_264 : f32 to vector<20x20xf32>
    %1235 = arith.select %1233, %1214, %1234 : vector<20x20xi1>, vector<20x20xf32>
    %cst_265 = arith.constant dense<0.000000e+00> : vector<20xf32>
    %1236 = vector.multi_reduction <add>, %1235, %cst_265 [1] : vector<20x20xf32> to vector<20xf32>
    %1237 = vector.shape_cast %1236 : vector<20xf32> to vector<20x1xf32>
    %cst_266 = arith.constant 5.000000e-01 : f32
    %1238 = vector.broadcast %cst_266 : f32 to vector<20x1xf32>
    %1239 = arith.cmpf ogt, %1231, %1238 : vector<20x1xf32>
    %1240 = math.absf %1237 : vector<20x1xf32>
    %cst_267 = arith.constant -1.000000e+00 : f32
    %1241 = vector.broadcast %cst_267 : f32 to vector<20x1xf32>
    %1242 = arith.select %1239, %1241, %1240 : vector<20x1xi1>, vector<20x1xf32>
    %cst_268 = arith.constant dense<0xFF800000> : vector<1xf32>
    %1243 = vector.multi_reduction <maximumf>, %1242, %cst_268 [0] : vector<20x1xf32> to vector<1xf32>
    %1244 = vector.shape_cast %1243 : vector<1xf32> to vector<1x1xf32>
    %1245 = vector.broadcast %1244 : vector<1x1xf32> to vector<20x1xf32>
    %1246 = arith.cmpf oeq, %1242, %1245 : vector<20x1xf32>
    %cst_269 = arith.constant 2.000000e+01 : f32
    %1247 = vector.broadcast %cst_269 : f32 to vector<20x1xf32>
    %1248 = arith.select %1246, %146, %1247 : vector<20x1xi1>, vector<20x1xf32>
    %cst_270 = arith.constant dense<0x7F800000> : vector<1xf32>
    %1249 = vector.multi_reduction <minimumf>, %1248, %cst_270 [0] : vector<20x1xf32> to vector<1xf32>
    %1250 = vector.shape_cast %1249 : vector<1xf32> to vector<1x1xf32>
    %1251 = vector.broadcast %1250 : vector<1x1xf32> to vector<20x1xf32>
    %1252 = arith.cmpf oeq, %146, %1251 : vector<20x1xf32>
    %1253 = arith.extui %1252 : vector<20x1xi1> to vector<20x1xi32>
    %1254 = arith.sitofp %1253 : vector<20x1xi32> to vector<20x1xf32>
    %1255 = arith.mulf %1237, %1254 : vector<20x1xf32>
    %cst_271 = arith.constant dense<0.000000e+00> : vector<1xf32>
    %1256 = vector.multi_reduction <add>, %1255, %cst_271 [0] : vector<20x1xf32> to vector<1xf32>
    %1257 = vector.shape_cast %1256 : vector<1xf32> to vector<1x1xf32>
    %cst_272 = arith.constant 1.000000e+00 : f32
    %1258 = vector.broadcast %cst_272 : f32 to vector<1x1xf32>
    %1259 = arith.divf %1258, %1257 : vector<1x1xf32>
    %1260 = vector.broadcast %1254 : vector<20x1xf32> to vector<20x20xf32>
    %1261 = arith.mulf %1260, %1214 : vector<20x20xf32>
    %cst_273 = arith.constant dense<0.000000e+00> : vector<20xf32>
    %1262 = vector.multi_reduction <add>, %1261, %cst_273 [0] : vector<20x20xf32> to vector<20xf32>
    %1263 = vector.shape_cast %1262 : vector<20xf32> to vector<1x20xf32>
    %1264 = vector.broadcast %1254 : vector<20x1xf32> to vector<20x5xf32>
    %1265 = arith.mulf %1264, %1218 : vector<20x5xf32>
    %cst_274 = arith.constant dense<0.000000e+00> : vector<5xf32>
    %1266 = vector.multi_reduction <add>, %1265, %cst_274 [0] : vector<20x5xf32> to vector<5xf32>
    %1267 = vector.shape_cast %1266 : vector<5xf32> to vector<1x5xf32>
    %1268 = arith.subf %1237, %1254 : vector<20x1xf32>
    %1269 = vector.broadcast %1259 : vector<1x1xf32> to vector<20x1xf32>
    %1270 = arith.mulf %1268, %1269 : vector<20x1xf32>
    %1271 = vector.broadcast %1270 : vector<20x1xf32> to vector<20x20xf32>
    %1272 = vector.broadcast %1263 : vector<1x20xf32> to vector<20x20xf32>
    %1273 = arith.mulf %1271, %1272 : vector<20x20xf32>
    %1274 = arith.subf %1214, %1273 : vector<20x20xf32>
    %1275 = vector.broadcast %1270 : vector<20x1xf32> to vector<20x5xf32>
    %1276 = vector.broadcast %1267 : vector<1x5xf32> to vector<20x5xf32>
    %1277 = arith.mulf %1275, %1276 : vector<20x5xf32>
    %1278 = arith.subf %1218, %1277 : vector<20x5xf32>
    %c18_i32_275 = arith.constant 18 : i32
    %1279 = vector.broadcast %c18_i32_275 : i32 to vector<20x1xi32>
    %1280 = arith.cmpi eq, %145, %1279 : vector<20x1xi32>
    %1281 = arith.extui %1280 : vector<20x1xi1> to vector<20x1xi32>
    %1282 = arith.sitofp %1281 : vector<20x1xi32> to vector<20x1xf32>
    %1283 = vector.broadcast %1250 : vector<1x1xf32> to vector<1x20xf32>
    %1284 = arith.cmpf oeq, %149, %1283 : vector<1x20xf32>
    %1285 = arith.extui %1284 : vector<1x20xi1> to vector<1x20xi32>
    %1286 = arith.sitofp %1285 : vector<1x20xi32> to vector<1x20xf32>
    %1287 = vector.broadcast %1282 : vector<20x1xf32> to vector<20x20xf32>
    %1288 = vector.broadcast %1286 : vector<1x20xf32> to vector<20x20xf32>
    %1289 = arith.mulf %1287, %1288 : vector<20x20xf32>
    %1290 = arith.addf %1230, %1289 : vector<20x20xf32>
    %1291 = arith.addf %1231, %1254 : vector<20x1xf32>
    %c19_i32 = arith.constant 19 : i32
    %1292 = vector.broadcast %c19_i32 : i32 to vector<20x20xi32>
    %1293 = arith.cmpi eq, %147, %1292 : vector<20x20xi32>
    %cst_276 = arith.constant 0.000000e+00 : f32
    %1294 = vector.broadcast %cst_276 : f32 to vector<20x20xf32>
    %1295 = arith.select %1293, %1274, %1294 : vector<20x20xi1>, vector<20x20xf32>
    %cst_277 = arith.constant dense<0.000000e+00> : vector<20xf32>
    %1296 = vector.multi_reduction <add>, %1295, %cst_277 [1] : vector<20x20xf32> to vector<20xf32>
    %1297 = vector.shape_cast %1296 : vector<20xf32> to vector<20x1xf32>
    %cst_278 = arith.constant 5.000000e-01 : f32
    %1298 = vector.broadcast %cst_278 : f32 to vector<20x1xf32>
    %1299 = arith.cmpf ogt, %1291, %1298 : vector<20x1xf32>
    %1300 = math.absf %1297 : vector<20x1xf32>
    %cst_279 = arith.constant -1.000000e+00 : f32
    %1301 = vector.broadcast %cst_279 : f32 to vector<20x1xf32>
    %1302 = arith.select %1299, %1301, %1300 : vector<20x1xi1>, vector<20x1xf32>
    %cst_280 = arith.constant dense<0xFF800000> : vector<1xf32>
    %1303 = vector.multi_reduction <maximumf>, %1302, %cst_280 [0] : vector<20x1xf32> to vector<1xf32>
    %1304 = vector.shape_cast %1303 : vector<1xf32> to vector<1x1xf32>
    %1305 = vector.broadcast %1304 : vector<1x1xf32> to vector<20x1xf32>
    %1306 = arith.cmpf oeq, %1302, %1305 : vector<20x1xf32>
    %cst_281 = arith.constant 2.000000e+01 : f32
    %1307 = vector.broadcast %cst_281 : f32 to vector<20x1xf32>
    %1308 = arith.select %1306, %146, %1307 : vector<20x1xi1>, vector<20x1xf32>
    %cst_282 = arith.constant dense<0x7F800000> : vector<1xf32>
    %1309 = vector.multi_reduction <minimumf>, %1308, %cst_282 [0] : vector<20x1xf32> to vector<1xf32>
    %1310 = vector.shape_cast %1309 : vector<1xf32> to vector<1x1xf32>
    %1311 = vector.broadcast %1310 : vector<1x1xf32> to vector<20x1xf32>
    %1312 = arith.cmpf oeq, %146, %1311 : vector<20x1xf32>
    %1313 = arith.extui %1312 : vector<20x1xi1> to vector<20x1xi32>
    %1314 = arith.sitofp %1313 : vector<20x1xi32> to vector<20x1xf32>
    %1315 = arith.mulf %1297, %1314 : vector<20x1xf32>
    %cst_283 = arith.constant dense<0.000000e+00> : vector<1xf32>
    %1316 = vector.multi_reduction <add>, %1315, %cst_283 [0] : vector<20x1xf32> to vector<1xf32>
    %1317 = vector.shape_cast %1316 : vector<1xf32> to vector<1x1xf32>
    %cst_284 = arith.constant 1.000000e+00 : f32
    %1318 = vector.broadcast %cst_284 : f32 to vector<1x1xf32>
    %1319 = arith.divf %1318, %1317 : vector<1x1xf32>
    %1320 = vector.broadcast %1314 : vector<20x1xf32> to vector<20x5xf32>
    %1321 = arith.mulf %1320, %1278 : vector<20x5xf32>
    %cst_285 = arith.constant dense<0.000000e+00> : vector<5xf32>
    %1322 = vector.multi_reduction <add>, %1321, %cst_285 [0] : vector<20x5xf32> to vector<5xf32>
    %1323 = vector.shape_cast %1322 : vector<5xf32> to vector<1x5xf32>
    %1324 = arith.subf %1297, %1314 : vector<20x1xf32>
    %1325 = vector.broadcast %1319 : vector<1x1xf32> to vector<20x1xf32>
    %1326 = arith.mulf %1324, %1325 : vector<20x1xf32>
    %1327 = vector.broadcast %1326 : vector<20x1xf32> to vector<20x5xf32>
    %1328 = vector.broadcast %1323 : vector<1x5xf32> to vector<20x5xf32>
    %1329 = arith.mulf %1327, %1328 : vector<20x5xf32>
    %1330 = arith.subf %1278, %1329 : vector<20x5xf32>
    %c19_i32_286 = arith.constant 19 : i32
    %1331 = vector.broadcast %c19_i32_286 : i32 to vector<20x1xi32>
    %1332 = arith.cmpi eq, %145, %1331 : vector<20x1xi32>
    %1333 = arith.extui %1332 : vector<20x1xi1> to vector<20x1xi32>
    %1334 = arith.sitofp %1333 : vector<20x1xi32> to vector<20x1xf32>
    %1335 = vector.broadcast %1310 : vector<1x1xf32> to vector<1x20xf32>
    %1336 = arith.cmpf oeq, %149, %1335 : vector<1x20xf32>
    %1337 = arith.extui %1336 : vector<1x20xi1> to vector<1x20xi32>
    %1338 = arith.sitofp %1337 : vector<1x20xi32> to vector<1x20xf32>
    %1339 = vector.broadcast %1334 : vector<20x1xf32> to vector<20x20xf32>
    %1340 = vector.broadcast %1338 : vector<1x20xf32> to vector<20x20xf32>
    %1341 = arith.mulf %1339, %1340 : vector<20x20xf32>
    %1342 = arith.addf %1290, %1341 : vector<20x20xf32>
    %cst_287 = arith.constant dense<0.000000e+00> : vector<20x5xf32>
    %1343 = tpu.matmul %1342, %1330, %cst_287 {dimension_numbers = #tpu.dot_dimension_numbers<[1], [0], [0], [1], [0, 0, 1, 1], [], []>} : vector<20x20xf32>, vector<20x5xf32>, vector<20x5xf32> -> vector<20x5xf32>
    %c0_288 = arith.constant 0 : index
    %c0_289 = arith.constant 0 : index
    %1344 = vector.load %arg5[%c0_288, %c0_289] : memref<20x5xf32, #tpu.memory_space<vmem>>, vector<20x5xf32>
    tpu.vector_store %arg5[%c0_288, %c0_289], %1343 {strides = array<i32>} : memref<20x5xf32, #tpu.memory_space<vmem>>, vector<20x5xf32>,
    return
  }
}

</mosaic_0001>

<bundles_post_ra>
// kernel: multi_gcn_propagation.1
= control target key start
LH: loop header
LB: loop body
LE: loop exit
PB: predicated region body
PF: predicated region fallthrough
CT: control target
= control target key end

     0   :  { %11 = vsyncpa [#allocation4], 0  ;;  %s3884_s21 = smov [#allocation3]   ;;  %s6283_s0 = inlined_call_operand.vmem [shape: f32[3], index: 0, kind: input, shape index: {}]   ;;  %s6284_s1 = inlined_call_operand.<no memory space> [shape: f32[1], index: 1, kind: input, shape index: {}]   ;;  %s6285_s2 = inlined_call_operand.vmem [shape: f32[20,32], index: 2, kind: input, shape index: {}]   ;;  %s6286_s3 = inlined_call_operand.vmem [shape: f32[32,32], index: 3, kind: input, shape index: {}]   ;;  %s6287_s4 = inlined_call_operand.vmem [shape: s32[20,1], index: 4, kind: input, shape index: {}]   ;;  %s6288_s5 = inlined_call_operand.vmem [shape: f32[20,5], index: 5, kind: output, shape index: {}]  }
   0x1   :  { %s17_s20 = sshll.u32 %s6283_s0, 4  ;;  %s18_s20 = int_to_ptr.vmem [resolvable:$true] %s17_s20 }
   0x2   :  { %20 = dma.vmem_to_smem %s18_s20, 16, %s3884_s21, [#allocation4]  }
   0x3   :  { %3882 = dma.done.wait [#allocation4], 16  }
   0x4   :  { %3883 = vsyncadd [#allocation4], 4294967280 }
   0x5   :  { %33 = sfence }
   0x6   :  { %v3923_v0 = vld [vmem:[%s6285_s2] sm:$0xff]  ;;  %vm52_vm0 = vcmask 261120   ;;  %v3928_v1 = vld [vmem:[%s6285_s2 + $0x10] sm:$0xf]  ;;  %vm97_vm1 = vcmask 257024   ;;  %v3939_v4 = vld [vmem:[%s6285_s2 + $0x8] sm:$0xff]  ;;  %v37_v13 = vlaneseq }
   0x7   :  { %v88_v2 = vmul.f32 %v3923_v0, %v3923_v0  ;;  %v90_v3 = vmul.f32 %v3928_v1, %v3928_v1  ;;  %3668 = vmatpush.xpose.msk.msra.mxu0 %vm52_vm0, %v3928_v1  ;;  %v89_v7 = vmul.f32 %v3939_v4, %v3939_v4  ;;  %v6289_v20 = vmov 0.0   ;;  %s351_s2 = sld [smem:[#allocation3]] }
   0x8   :  { %v3956_v15 = vshrl.u32 %v37_v13, 7  ;;  %v3961_v17 = vand.u32 127, %v37_v13  ;;  %vm164_vm5 = vcmask 162816   ;;  %vm171_vm6 = vcmask 158720   ;;  %s3678_s27 = sld [smem:[#allocation3 + $0x1]] }
   0x9   :  { %v91_v5 = vsel %vm52_vm0, %v88_v2, 0.0  ;;  %v98_v6 = vsel %vm97_vm1, %v90_v3, 0.0  ;;  %v94_v8 = vsel %vm52_vm0, %v89_v7, 0.0  ;;  %s3679_s7 = sld [smem:[#allocation3 + $0x2]] }
   0xa   :  { %92 = vadd.xlane.f32.xlu0 %v91_v5  ;;  %99 = vadd.xlane.f32.xlu1 %v98_v6  ;;  %v3959_v16 = vadd.s32 8, %v3956_v15  ;;  %v3964_v18 = vadd.s32 16, %v3956_v15  ;;  %vm43_vm2 = vcmp.eq.s32.totalorder %v3956_v15, %v3961_v17  ;;  %s619_s13 = ssub.f32 1.0, %s6284_s1 }
   0xb   :  { %3669 = vmatpush.xpose.msk.msra.mxu0 %vm52_vm0, %v3939_v4  ;;  %v3973_v21 = vsel %vm43_vm2, 1.0, %v6289_v20 }
   0xc   :  { %6359 = vst [vmem:[#allocation6_spill] sm:$0xff] %v3964_v18  ;;  %vm44_vm3 = vcmp.eq.s32.totalorder %v3959_v16, %v3961_v17  ;;  %vm45_vm4 = vcmp.eq.s32.totalorder %v3964_v18, %v3961_v17  ;;  %v3982_v32 = vsub.f32 1.0, %v3973_v21 }
   0xd   :  { %v3976_v22 = vsel %vm44_vm3, 1.0, %v6289_v20  ;;  %v3979_v28 = vsel %vm45_vm4, 1.0, %v6289_v20 }
   0xe   :  { %v3985_v33 = vsub.f32 1.0, %v3976_v22  ;;  %v3988_v37 = vsub.f32 1.0, %v3979_v28 }
   0xf   :  { %3670 = vmatpush.xpose.msk.msra.mxu0 %vm52_vm0, %v3923_v0 }
  0x12   :  { %95 = vadd.xlane.f32.xlu0 %v94_v8  ;;  %3671 = vmatmul.msk.f32.vlgmr.msra.gmra.mxu0 %vm52_vm0, %v3923_v0 }
  0x1a   :  { %3672 = vmatmul.msk.f32.gmra.mxu0 %vm52_vm0, %v3939_v4 }
  0x22   :  { %3673 = vmatmul.msk.f32.gmra.mxu0 %vm52_vm0, %v3928_v1 }
  0x7d   :  { %v93_v9 = vpop.xlane.xlu0 %92  ;;  %v100_v11 = vpop.xlane.xlu1 %99 }
  0x7e   :  { %101 = vxpose.xlu1.b32.start [1/3] (short) (narrow) %v93_v9, 8 }
  0x85   :  { %v96_v10 = vpop.xlane.xlu0 %95 }
  0x86   :  { %102 = vxpose.xlu1.b32.cont [2/3] (short) (narrow) %v96_v10, 8 }
  0x8e   :  { %103 = vxpose.xlu1.b32.end [3/3] (short) (narrow) %v100_v11, 8 }
  0x8f   :  { %v79_v12 = vpop.f32.mrf.mxu0 }
  0x90   :  { %v137_v24 = vmul.f32 2.0, %v79_v12 }
  0x97   :  { %v82_v14 = vpop.f32.mrf.mxu0 }
  0x98   :  { %v138_v25 = vmul.f32 2.0, %v82_v14 }
  0x9f   :  { %v85_v19 = vpop.f32.mrf.mxu0 }
  0xa0   :  { %v139_v27 = vmul.f32 2.0, %v85_v19 }
 0x122   :  { %v117_v23 = vpop.trf.xlu1 }
 0x123   :  { %v133_v26 = vperm.slane %v117_v23, 0 }
 0x125   :  { %v134_v29 = vadd.f32 %v133_v26, %v93_v9  ;;  %v135_v30 = vadd.f32 %v133_v26, %v96_v10  ;;  %v136_v31 = vadd.f32 %v133_v26, %v100_v11 }
 0x127   :  { %v140_v34 = vsub.f32 %v134_v29, %v137_v24  ;;  %v141_v35 = vsub.f32 %v135_v30, %v138_v25  ;;  %v142_v36 = vsub.f32 %v136_v31, %v139_v27 }
 0x129   :  { %v143_v38 = vmax.f32 %v140_v34, 0.0  ;;  %v144_v39 = vmax.f32 %v141_v35, 0.0  ;;  %v145_v40 = vmax.f32 %v142_v36, 0.0 }
 0x12b   :  { %v149_v41 = vmul.f32 %v3982_v32, %v143_v38  ;;  %v150_v42 = vmul.f32 %v3985_v33, %v144_v39  ;;  %v151_v43 = vmul.f32 %v3988_v37, %v145_v40 }
 0x12d   :  { %v152_v44 = vsub.f32 0.0, %v149_v41  ;;  %v153_v45 = vsub.f32 0.0, %v150_v42  ;;  %v154_v46 = vsub.f32 0.0, %v151_v43 }
 0x12f   :  { %v155_v47 = vmul.f32 0.11111111, %v152_v44  ;;  %v157_v48 = vmul.f32 0.11111111, %v154_v46  ;;  %v156_v49 = vmul.f32 0.11111111, %v153_v45 }
 0x131   :  { %v158_v50 = vmul.f32 1.442695, %v155_v47  ;;  %v162_v51 = vmul.f32 1.442695, %v157_v48  ;;  %v160_v52 = vmul.f32 1.442695, %v156_v49 }
 0x133   :  { %3812 = vpow2.f32 %v158_v50 }
 0x134   :  { %3814 = vpow2.f32 %v162_v51 }
 0x135   :  { %3816 = vpow2.f32 %v160_v52 }
 0x139   :  { %v3813_v53 = vpop.eup %3812 }
 0x13a   :  { %v165_v54 = vsel %vm164_vm5, %v3813_v53, -inf  ;;  %v3994_v55 = vpop.eup %3814 }
 0x13b   :  { %166 = vmax.xlane.f32.xlu2 %v165_v54  ;;  %v172_v56 = vsel %vm171_vm6, %v3994_v55, -inf  ;;  %v3998_v57 = vpop.eup %3816 }
 0x13c   :  { %173 = vmax.xlane.f32.xlu0 %v172_v56  ;;  %v168_v58 = vsel %vm164_vm5, %v3998_v57, -inf }
 0x143   :  { %169 = vmax.xlane.f32.xlu2 %v168_v58 }
 0x1ae   :  { %v167_v59 = vpop.xlane.xlu2 %166 }
 0x1af   :  { %vm175_vm7 = vcmp.ge.f32.partialorder %v3813_v53, %v167_v59  ;;  %v174_v61 = vpop.xlane.xlu0 %173 }
 0x1b0   :  { %v178_v60 = vsel %vm175_vm7, -inf, %v3813_v53  ;;  %vm177_vm8 = vcmp.ge.f32.partialorder %v3994_v55, %v174_v61 }
 0x1b1   :  { %v181_v62 = vsel %vm164_vm5, %v178_v60, -inf  ;;  %v180_v63 = vsel %vm177_vm8, -inf, %v3994_v55 }
 0x1b2   :  { %182 = vmax.xlane.f32.xlu2 %v181_v62  ;;  %v187_v6 = vsel %vm171_vm6, %v180_v63, -inf }
 0x1b6   :  { %v170_v2 = vpop.xlane.xlu2 %169 }
 0x1b7   :  { %vm176_vm9 = vcmp.ge.f32.partialorder %v3998_v57, %v170_v2 }
 0x1b8   :  { %v179_v3 = vsel %vm176_vm9, -inf, %v3998_v57 }
 0x1b9   :  { %v184_v5 = vsel %vm164_vm5, %v179_v3, -inf }
 0x1ba   :  { %185 = vmax.xlane.f32.xlu0 %v184_v5  ;;  %188 = vmax.xlane.f32.xlu2 %v187_v6 }
 0x225   :  { %v183_v7 = vpop.xlane.xlu2 %182 }
 0x226   :  { %vm190_vm10 = vcmp.ge.f32.partialorder %v178_v60, %v183_v7 }
 0x227   :  { %v193_v8 = vsel %vm190_vm10, -inf, %v178_v60 }
 0x228   :  { %v196_v9 = vsel %vm164_vm5, %v193_v8, -inf }
 0x229   :  { %197 = vmax.xlane.f32.xlu0 %v196_v9 }
 0x22d   :  { %v189_v10 = vpop.xlane.xlu2 %188  ;;  %v186_v11 = vpop.xlane.xlu0 %185 }
 0x22e   :  { %vm192_vm11 = vcmp.ge.f32.partialorder %v180_v63, %v189_v10  ;;  %vm191_vm12 = vcmp.ge.f32.partialorder %v179_v3, %v186_v11 }
 0x22f   :  { %v195_v12 = vsel %vm192_vm11, -inf, %v180_v63  ;;  %v194_v13 = vsel %vm191_vm12, -inf, %v179_v3 }
 0x230   :  { %v202_v14 = vsel %vm171_vm6, %v195_v12, -inf  ;;  %v199_v19 = vsel %vm164_vm5, %v194_v13, -inf }
 0x231   :  { %203 = vmax.xlane.f32.xlu0 %v202_v14  ;;  %200 = vmax.xlane.f32.xlu2 %v199_v19 }
 0x29c   :  { %v198_v23 = vpop.xlane.xlu0 %197 }
 0x29d   :  { %vm205_vm13 = vcmp.ge.f32.partialorder %v193_v8, %v198_v23 }
 0x29e   :  { %v208_v24 = vsel %vm205_vm13, -inf, %v193_v8 }
 0x29f   :  { %v211_v25 = vsel %vm164_vm5, %v208_v24, -inf }
 0x2a0   :  { %212 = vmax.xlane.f32.xlu2 %v211_v25 }
 0x2a4   :  { %v201_v26 = vpop.xlane.xlu2 %200  ;;  %v204_v27 = vpop.xlane.xlu0 %203 }
 0x2a5   :  { %vm206_vm14 = vcmp.ge.f32.partialorder %v194_v13, %v201_v26  ;;  %vm207_vm15 = vcmp.ge.f32.partialorder %v195_v12, %v204_v27 }
 0x2a6   :  { %v209_v29 = vsel %vm206_vm14, -inf, %v194_v13  ;;  %v210_v30 = vsel %vm207_vm15, -inf, %v195_v12 }
 0x2a7   :  { %v214_v31 = vsel %vm164_vm5, %v209_v29, -inf  ;;  %v217_v34 = vsel %vm171_vm6, %v210_v30, -inf }
 0x2a8   :  { %215 = vmax.xlane.f32.xlu0 %v214_v31  ;;  %218 = vmax.xlane.f32.xlu2 %v217_v34  ;;  %v410_v34 = vld [vmem:[%s6286_s3 + $0x8] sm:$0xff] }
 0x313   :  { %v213_v35 = vpop.xlane.xlu2 %212 }
 0x314   :  { %vm220_vm2 = vcmp.ge.f32.partialorder %v3813_v53, %v213_v35  ;;  %v352_v35 = vstv %s351_s2 }
 0x315   :  { %v223_v36 = vsel %vm220_vm2, 1.0, %v6289_v20  ;;  %vm322_vm2 = vcmask 1043456  }
 0x316   :  { %v226_v38 = vmul.f32 %v223_v36, %v3982_v32  ;;  %3680 = vmatpush.msk.msrb.mxu0 %vm322_vm2, %v3928_v1  ;;  %3803 = vmatpush.msk.msra.mxu2 %vm322_vm2, %v3928_v1  ;;  %v357_v36 = vstv %s3678_s27 }
 0x318   :  { %v229_v39 = vmul.f32 %v3813_v53, %v226_v38  ;;  %397 = vmatpush.msrb.mxu0 %v3939_v4  ;;  %3804 = vmatpush.msra.mxu2 %v3939_v4  ;;  %v411_v4 = vld [vmem:[%s6286_s3 + $0x10] sm:$0xff]  ;;  %v353_v38 = vmul.f32 %v3973_v21, %v352_v35 }
 0x31a   :  { %v4018_v40 = vadd.f32 %v3973_v21, %v229_v39  ;;  %398 = vmatpush.msrb.mxu0 %v3923_v0  ;;  %3805 = vmatpush.msra.mxu2 %v3923_v0  ;;  %v412_v0 = vld [vmem:[%s6286_s3 + $0x18] sm:$0xff] }
 0x31b   :  { %v219_v41 = vpop.xlane.xlu2 %218  ;;  %v216_v42 = vpop.xlane.xlu0 %215 }
 0x31c   :  { %vm222_vm3 = vcmp.ge.f32.partialorder %v3994_v55, %v219_v41  ;;  %vm221_vm4 = vcmp.ge.f32.partialorder %v3998_v57, %v216_v42  ;;  %v235_v43 = vsel %vm164_vm5, %v4018_v40, 0.0 }
 0x31d   :  { %v225_v44 = vsel %vm222_vm3, 1.0, %v6289_v20  ;;  %v224_v45 = vsel %vm221_vm4, 1.0, %v6289_v20  ;;  %236 = vadd.xlane.f32.xlu0 %v235_v43 }
 0x31e   :  { %v228_v46 = vmul.f32 %v225_v44, %v3988_v37  ;;  %v227_v47 = vmul.f32 %v224_v45, %v3985_v33  ;;  %v354_v45 = vmul.f32 %v3976_v22, %v352_v35 }
 0x320   :  { %v231_v48 = vmul.f32 %v3994_v55, %v228_v46  ;;  %v230_v49 = vmul.f32 %v3998_v57, %v227_v47 }
 0x322   :  { %v234_v50 = vadd.f32 %v3979_v28, %v231_v48  ;;  %v233_v51 = vadd.f32 %v3976_v22, %v230_v49 }
 0x324   :  { %v241_v52 = vsel %vm171_vm6, %v234_v50, 0.0  ;;  %v238_v53 = vsel %vm164_vm5, %v233_v51, 0.0 }
 0x325   :  { %242 = vadd.xlane.f32.xlu0 %v241_v52  ;;  %239 = vadd.xlane.f32.xlu2 %v238_v53  ;;  %v355_v52 = vmul.f32 %v3979_v28, %v352_v35 }
 0x390   :  { %v237_v54 = vpop.xlane.xlu0 %236 }
 0x391   :  { %3818 = vrsqrt.f32 %v237_v54  ;;  %vm250_vm8 = vweird.f32 %v237_v54 }
 0x397   :  { %v3819_v56 = vpop.eup %3818 }
 0x398   :  { %v245_v58 = vmul.f32 %v3819_v56, %v237_v54  ;;  %v240_v59 = vpop.xlane.xlu2 %239  ;;  %v243_v60 = vpop.xlane.xlu0 %242  ;;  %vm251_vm7 = vweird.f32 %v3819_v56 }
 0x399   :  { %3820 = vrsqrt.f32 %v240_v59  ;;  %vm252_vm9 = vmor %vm250_vm8, %vm251_vm7  ;;  %vm260_vm11 = vweird.f32 %v240_v59  ;;  %vm270_vm14 = vweird.f32 %v243_v60 }
 0x39a   :  { %v246_v55 = vmul.f32 %v3819_v56, %v245_v58  ;;  %3822 = vrsqrt.f32 %v243_v60 }
 0x39c   :  { %v247_v57 = vmul.f32 0.5, %v246_v55 }
 0x39e   :  { %v248_v61 = vsub.f32 1.5, %v247_v57 }
 0x39f   :  { %v3821_v62 = vpop.eup %3820 }
 0x3a0   :  { %v3823_v63 = vpop.eup %3822  ;;  %v255_v2 = vmul.f32 %v3821_v62, %v240_v59  ;;  %v249_v3 = vmul.f32 %v3819_v56, %v248_v61  ;;  %vm261_vm10 = vweird.f32 %v3821_v62  ;;  %v409_v59 = vld [vmem:[%s6286_s3] sm:$0xff] }
 0x3a1   :  { %v265_v5 = vmul.f32 %v3823_v63, %v243_v60  ;;  %vm262_vm12 = vmor %vm260_vm11, %vm261_vm10  ;;  %vm271_vm13 = vweird.f32 %v3823_v63 }
 0x3a2   :  { %v256_v6 = vmul.f32 %v3821_v62, %v255_v2  ;;  %v253_v7 = vsel %vm252_vm9, %v3819_v56, %v249_v3  ;;  %vm272_vm15 = vmor %vm270_vm14, %vm271_vm13  ;;  %vm662_vm14 = vcmp.eq.s32.totalorder %v3961_v17, 0 }
 0x3a3   :  { %v266_v8 = vmul.f32 %v3823_v63, %v265_v5  ;;  %277 = vxpose.xlu2.b32.start [1/3] (short) (narrow) %v253_v7, 8  ;;  %v274_v30 = vmul.f32 %v253_v7, %v4018_v40  ;;  %v365_v40 = vstv %s3679_s7 }
 0x3a4   :  { %v257_v9 = vmul.f32 0.5, %v256_v6 }
 0x3a5   :  { %v267_v11 = vmul.f32 0.5, %v266_v8 }
 0x3a6   :  { %v258_v10 = vsub.f32 1.5, %v257_v9 }
 0x3a7   :  { %v268_v13 = vsub.f32 1.5, %v267_v11 }
 0x3a8   :  { %v259_v12 = vmul.f32 %v3821_v62, %v258_v10 }
 0x3a9   :  { %v269_v19 = vmul.f32 %v3823_v63, %v268_v13 }
 0x3aa   :  { %v263_v14 = vsel %vm262_vm12, %v3821_v62, %v259_v12 }
 0x3ab   :  { %278 = vxpose.xlu2.b32.cont [2/3] (short) (narrow) %v263_v14, 8  ;;  %v273_v23 = vsel %vm272_vm15, %v3823_v63, %v269_v19  ;;  %v275_v27 = vmul.f32 %v263_v14, %v233_v51 }
 0x3ac   :  { %v276_v25 = vmul.f32 %v273_v23, %v234_v50 }
 0x3b3   :  { %279 = vxpose.xlu2.b32.end [3/3] (short) (narrow) %v273_v23, 8 }
 0x43c   :  { %v293_v24 = vpop.trf.xlu2 }
 0x43d   :  { %v309_v26 = vperm.slane %v293_v24, 0 }
 0x43f   :  { %v312_v29 = vmul.f32 %v309_v26, %v276_v25  ;;  %v311_v31 = vmul.f32 %v309_v26, %v275_v27  ;;  %v310_v1 = vmul.f32 %v309_v26, %v274_v30 }
 0x441   :  { %3674 = vmatpush.msk.msra.mxu1 %vm322_vm2, %v312_v29  ;;  %3800 = vmatpush.msk.msra.mxu3 %vm322_vm2, %v312_v29  ;;  %v358_v39 = vmul.f32 %v357_v36, %v310_v1  ;;  %v359_v46 = vmul.f32 %v357_v36, %v311_v31  ;;  %v360_v53 = vmul.f32 %v357_v36, %v312_v29 }
 0x443   :  { %339 = vmatpush.msra.mxu1 %v311_v31  ;;  %3801 = vmatpush.msra.mxu3 %v311_v31  ;;  %v361_v42 = vadd.f32 %v358_v39, %v353_v38  ;;  %v362_v48 = vadd.f32 %v359_v46, %v354_v45  ;;  %v363_v56 = vadd.f32 %v360_v53, %v355_v52 }
 0x445   :  { %340 = vmatpush.msra.mxu1 %v310_v1  ;;  %3802 = vmatpush.msra.mxu3 %v310_v1 }
 0x446   :  { %3675 = vmatmul.msk.f32.vlgmr.msra.gmra.mxu1 %vm164_vm5, %v310_v1  ;;  %3677 = vmatmul.msk.f32.vlgmr.msra.gmra.mxu3 %vm164_vm5, %v312_v29 }
 0x447   :  { %434 = vmatpush.msrb.mxu3 %v412_v0 }
 0x449   :  { %435 = vmatpush.msrb.mxu3 %v411_v4 }
 0x44b   :  { %436 = vmatpush.msrb.mxu3 %v410_v34 }
 0x44d   :  { %437 = vmatpush.msrb.mxu3 %v409_v59 }
 0x44e   :  { %3676 = vmatmul.msk.f32.gmra.mxu1 %vm164_vm5, %v311_v31 }
 0x4c3   :  { %v342_v41 = vpop.f32.mrf.mxu1 }
 0x4c4   :  { %v366_v43 = vmul.f32 %v365_v40, %v342_v41 }
 0x4c6   :  { %v369_v44 = vadd.f32 %v366_v43, %v361_v42 }
 0x4c8   :  { %3681 = vmatmul.msk.f32.vlgmr.msrb.gmra.mxu0 %vm164_vm5, %v369_v44 }
 0x4c9   :  { %v348_v51 = vpop.f32.mrf.mxu3 }
 0x4ca   :  { %v368_v54 = vmul.f32 %v365_v40, %v348_v51 }
 0x4cb   :  { %v345_v47 = vpop.f32.mrf.mxu1 }
 0x4cc   :  { %v367_v49 = vmul.f32 %v365_v40, %v345_v47  ;;  %v371_v58 = vadd.f32 %v368_v54, %v363_v56 }
 0x4ce   :  { %v370_v50 = vadd.f32 %v367_v49, %v362_v48 }
 0x4d0   :  { %3682 = vmatmul.msk.f32.vlgmr.msra.gmra.mxu2 %vm164_vm5, %v370_v50 }
 0x4d8   :  { %3683 = vmatmul.msk.f32.gmra.mxu2 %vm164_vm5, %v371_v58 }
 0x545   :  { %v400_v60 = vpop.f32.mrf.mxu0 }
 0x546   :  { %3684 = vmatmul.msk.f32.vlgmr.msrb.gmra.mxu3 %vm52_vm0, %v400_v60 }
 0x553   :  { %v403_v55 = vpop.f32.mrf.mxu2 }
 0x554   :  { %3685 = vmatmul.msk.f32.gmra.mxu3 %vm52_vm0, %v403_v55 }
 0x55b   :  { %v406_v57 = vpop.f32.mrf.mxu2 }
 0x55c   :  { %3686 = vmatmul.msk.f32.gmra.mxu3 %vm52_vm0, %v406_v57  ;;  %3687 = vmatpush.xpose.msk.msrb.mxu1 %vm52_vm0, %v406_v57 }
 0x560   :  { %3688 = vmatpush.xpose.msk.msrb.mxu1 %vm52_vm0, %v403_v55 }
 0x564   :  { %3689 = vmatpush.xpose.msk.msrb.mxu1 %vm52_vm0, %v400_v60 }
 0x5c9   :  { %v439_v61 = vpop.f32.mrf.mxu3 }
 0x5ca   :  { %v483_v62 = vmul.f32 %v439_v61, %v400_v60  ;;  %3690 = vmatmul.msk.f32.vlgmr.msrb.gmra.mxu1 %vm52_vm0, %v439_v61 }
 0x5cc   :  { %v486_v63 = vsel %vm52_vm0, %v483_v62, 0.0 }
 0x5cd   :  { %487 = vadd.xlane.f32.xlu0 %v486_v63 }
 0x5d7   :  { %v442_v2 = vpop.f32.mrf.mxu3 }
 0x5d8   :  { %v484_v3 = vmul.f32 %v442_v2, %v403_v55  ;;  %3691 = vmatmul.msk.f32.gmra.mxu1 %vm52_vm0, %v442_v2 }
 0x5da   :  { %v489_v5 = vsel %vm52_vm0, %v484_v3, 0.0 }
 0x5db   :  { %490 = vadd.xlane.f32.xlu0 %v489_v5 }
 0x5df   :  { %v445_v6 = vpop.f32.mrf.mxu3 }
 0x5e0   :  { %v485_v7 = vmul.f32 %v445_v6, %v406_v57  ;;  %3692 = vmatmul.msk.f32.gmra.mxu1 %vm52_vm0, %v445_v6 }
 0x5e2   :  { %v492_v8 = vsel %vm97_vm1, %v485_v7, 0.0 }
 0x5e3   :  { %493 = vadd.xlane.f32.xlu1 %v492_v8 }
 0x640   :  { %v488_v9 = vpop.xlane.xlu0 %487 }
 0x641   :  { %495 = vxpose.xlu0.b32.start [1/3] (short) (narrow) %v488_v9, 8 }
 0x647   :  { %v474_v12 = vpop.f32.mrf.mxu1 }
 0x648   :  { %v531_v24 = vmul.f32 2.0, %v474_v12 }
 0x64e   :  { %v491_v10 = vpop.xlane.xlu0 %490 }
 0x64f   :  { %496 = vxpose.xlu0.b32.cont [2/3] (short) (narrow) %v491_v10, 8 }
 0x655   :  { %v477_v13 = vpop.f32.mrf.mxu1 }
 0x656   :  { %v494_v11 = vpop.xlane.xlu1 %493  ;;  %v532_v25 = vmul.f32 2.0, %v477_v13 }
 0x657   :  { %497 = vxpose.xlu0.b32.end [3/3] (short) (narrow) %v494_v11, 8 }
 0x65d   :  { %v480_v14 = vpop.f32.mrf.mxu1 }
 0x65e   :  { %v533_v26 = vmul.f32 2.0, %v480_v14 }
 0x6eb   :  { %v511_v19 = vpop.trf.xlu0 }
 0x6ec   :  { %v527_v23 = vperm.slane %v511_v19, 0 }
 0x6ee   :  { %v528_v27 = vadd.f32 %v527_v23, %v488_v9  ;;  %v529_v29 = vadd.f32 %v527_v23, %v491_v10  ;;  %v530_v30 = vadd.f32 %v527_v23, %v494_v11 }
 0x6f0   :  { %v534_v31 = vsub.f32 %v528_v27, %v531_v24  ;;  %v535_v1 = vsub.f32 %v529_v29, %v532_v25  ;;  %v536_v0 = vsub.f32 %v530_v30, %v533_v26 }
 0x6f2   :  { %v537_v4 = vmax.f32 %v534_v31, 0.0  ;;  %v538_v34 = vmax.f32 %v535_v1, 0.0  ;;  %v539_v35 = vmax.f32 %v536_v0, 0.0  ;;  %v620_v31 = vstv %s619_s13 }
 0x6f3   :  { %v627_v0 = vstv %s6284_s1 }
 0x6f4   :  { %v540_v36 = vmul.f32 %v537_v4, %v3982_v32  ;;  %v541_v38 = vmul.f32 %v538_v34, %v3985_v33  ;;  %v542_v39 = vmul.f32 %v539_v35, %v3988_v37  ;;  %v621_v34 = vmul.f32 %v3973_v21, %v620_v31 }
 0x6f5   :  { %v622_v21 = vmul.f32 %v3976_v22, %v620_v31 }
 0x6f6   :  { %v543_v40 = vsub.f32 0.0, %v540_v36  ;;  %v544_v41 = vsub.f32 0.0, %v541_v38  ;;  %v545_v42 = vsub.f32 0.0, %v542_v39 }
 0x6f8   :  { %v546_v43 = vmul.f32 0.033333335, %v543_v40  ;;  %v547_v44 = vmul.f32 0.033333335, %v544_v41  ;;  %v548_v45 = vmul.f32 0.033333335, %v545_v42 }
 0x6fa   :  { %v549_v46 = vmul.f32 1.442695, %v546_v43  ;;  %v551_v47 = vmul.f32 1.442695, %v547_v44  ;;  %v553_v48 = vmul.f32 1.442695, %v548_v45 }
 0x6fc   :  { %3824 = vpow2.f32 %v549_v46 }
 0x6fd   :  { %3826 = vpow2.f32 %v551_v47 }
 0x6fe   :  { %3828 = vpow2.f32 %v553_v48 }
 0x702   :  { %v3825_v49 = vpop.eup %3824 }
 0x703   :  { %v4081_v50 = vpop.eup %3826  ;;  %v555_v51 = vsel %vm164_vm5, %v3825_v49, -inf }
 0x704   :  { %v4084_v52 = vpop.eup %3828  ;;  %v558_v53 = vsel %vm164_vm5, %v4081_v50, -inf  ;;  %556 = vmax.xlane.f32.xlu2 %v555_v51 }
 0x705   :  { %559 = vmax.xlane.f32.xlu0 %v558_v53  ;;  %v561_v54 = vsel %vm171_vm6, %v4084_v52, -inf }
 0x706   :  { %562 = vmax.xlane.f32.xlu1 %v561_v54 }
 0x777   :  { %v557_v56 = vpop.xlane.xlu2 %556 }
 0x778   :  { %vm564_vm0 = vcmp.ge.f32.partialorder %v3825_v49, %v557_v56  ;;  %v560_v58 = vpop.xlane.xlu0 %559 }
 0x779   :  { %v567_v59 = vsel %vm564_vm0, -inf, %v3825_v49  ;;  %vm565_vm1 = vcmp.ge.f32.partialorder %v4081_v50, %v560_v58  ;;  %v563_v57 = vpop.xlane.xlu1 %562 }
 0x77a   :  { %v570_v60 = vsel %vm164_vm5, %v567_v59, -inf  ;;  %v568_v55 = vsel %vm565_vm1, -inf, %v4081_v50  ;;  %vm566_vm3 = vcmp.ge.f32.partialorder %v4084_v52, %v563_v57 }
 0x77b   :  { %571 = vmax.xlane.f32.xlu1 %v570_v60  ;;  %v573_v61 = vsel %vm164_vm5, %v568_v55, -inf  ;;  %v569_v62 = vsel %vm566_vm3, -inf, %v4084_v52 }
 0x77c   :  { %v576_v63 = vsel %vm171_vm6, %v569_v62, -inf }
 0x783   :  { %574 = vmax.xlane.f32.xlu1 %v573_v61 }
 0x78b   :  { %577 = vmax.xlane.f32.xlu1 %v576_v63 }
 0x7ee   :  { %v572_v2 = vpop.xlane.xlu1 %571 }
 0x7ef   :  { %vm579_vm4 = vcmp.ge.f32.partialorder %v567_v59, %v572_v2 }
 0x7f0   :  { %v582_v3 = vsel %vm579_vm4, -inf, %v567_v59 }
 0x7f1   :  { %v585_v5 = vsel %vm164_vm5, %v582_v3, -inf }
 0x7f2   :  { %586 = vmax.xlane.f32.xlu1 %v585_v5 }
 0x7f6   :  { %v575_v6 = vpop.xlane.xlu1 %574 }
 0x7f7   :  { %vm580_vm7 = vcmp.ge.f32.partialorder %v568_v55, %v575_v6 }
 0x7f8   :  { %v583_v7 = vsel %vm580_vm7, -inf, %v568_v55 }
 0x7f9   :  { %v588_v8 = vsel %vm164_vm5, %v583_v7, -inf }
 0x7fa   :  { %589 = vmax.xlane.f32.xlu1 %v588_v8  ;;  %v4152_v8 = vcvt.s32.f32 %v3956_v15 }
 0x7fe   :  { %v578_v9 = vpop.xlane.xlu1 %577 }
 0x7ff   :  { %vm581_vm8 = vcmp.ge.f32.partialorder %v569_v62, %v578_v9  ;;  %v4155_v9 = vcvt.s32.f32 %v3959_v16 }
 0x800   :  { %v584_v10 = vsel %vm581_vm8, -inf, %v569_v62 }
 0x801   :  { %v591_v11 = vsel %vm171_vm6, %v584_v10, -inf }
 0x802   :  { %592 = vmax.xlane.f32.xlu1 %v591_v11 }
 0x865   :  { %v587_v12 = vpop.xlane.xlu1 %586 }
 0x866   :  { %vm594_vm9 = vcmp.ge.f32.partialorder %v582_v3, %v587_v12 }
 0x867   :  { %v597_v13 = vsel %vm594_vm9, -inf, %v582_v3 }
 0x868   :  { %v600_v14 = vsel %vm164_vm5, %v597_v13, -inf }
 0x869   :  { %601 = vmax.xlane.f32.xlu1 %v600_v14 }
 0x86d   :  { %v590_v19 = vpop.xlane.xlu1 %589 }
 0x86e   :  { %vm595_vm10 = vcmp.ge.f32.partialorder %v583_v7, %v590_v19 }
 0x86f   :  { %v598_v23 = vsel %vm595_vm10, -inf, %v583_v7 }
 0x870   :  { %v603_v24 = vsel %vm164_vm5, %v598_v23, -inf }
 0x871   :  { %604 = vmax.xlane.f32.xlu2 %v603_v24 }
 0x875   :  { %v593_v25 = vpop.xlane.xlu1 %592 }
 0x876   :  { %vm596_vm11 = vcmp.ge.f32.partialorder %v584_v10, %v593_v25 }
 0x877   :  { %v599_v26 = vsel %vm596_vm11, -inf, %v584_v10  ;;  %v4158_v10 = vcvt.s32.f32 %v3964_v18 }
 0x878   :  { %v606_v27 = vsel %vm171_vm6, %v599_v26, -inf }
 0x879   :  { %607 = vmax.xlane.f32.xlu1 %v606_v27 }
 0x8dc   :  { %v602_v29 = vpop.xlane.xlu1 %601 }
 0x8dd   :  { %vm609_vm12 = vcmp.ge.f32.partialorder %v3825_v49, %v602_v29 }
 0x8de   :  { %v612_v30 = vsel %vm609_vm12, 1.0, %v6289_v20 }
 0x8df   :  { %v615_v1 = vmul.f32 %v612_v30, %v3982_v32 }
 0x8e1   :  { %v624_v4 = vmul.f32 %v3825_v49, %v615_v1 }
 0x8e3   :  { %v628_v35 = vmul.f32 %v627_v0, %v624_v4 }
 0x8e4   :  { %v605_v36 = vpop.xlane.xlu2 %604 }
 0x8e5   :  { %vm610_vm13 = vcmp.ge.f32.partialorder %v4081_v50, %v605_v36  ;;  %v631_v38 = vsub.f32 %v621_v34, %v628_v35 }
 0x8e6   :  { %v613_v39 = vsel %vm610_vm13, 1.0, %v6289_v20  ;;  %vm811_vm13 = vcmp.eq.s32.totalorder %v3961_v17, 1 }
 0x8e7   :  { %v616_v40 = vmul.f32 %v613_v39, %v3985_v33  ;;  %v4116_v41 = vadd.f32 2.220446e-16, %v631_v38 }
 0x8e9   :  { %v625_v32 = vmul.f32 %v4081_v50, %v616_v40  ;;  %v663_v42 = vsel %vm662_vm14, %v4116_v41, 0.0  ;;  %v623_v50 = vmul.f32 %v3979_v28, %v620_v31 }
 0x8ea   :  { %v666_v43 = vsel %vm164_vm5, %v663_v42, 0.0 }
 0x8eb   :  { %v629_v44 = vmul.f32 %v627_v0, %v625_v32  ;;  %667 = vadd.xlane.f32.xlu2 %v666_v43 }
 0x8ec   :  { %v608_v45 = vpop.xlane.xlu1 %607 }
 0x8ed   :  { %vm611_vm15 = vcmp.ge.f32.partialorder %v4084_v52, %v608_v45  ;;  %v632_v46 = vsub.f32 %v622_v21, %v629_v44 }
 0x8ee   :  { %v614_v33 = vsel %vm611_vm15, 1.0, %v6289_v20 }
 0x8ef   :  { %v617_v47 = vmul.f32 %v614_v33, %v3988_v37  ;;  %v4127_v48 = vadd.f32 2.220446e-16, %v632_v46 }
 0x8f1   :  { %v626_v49 = vmul.f32 %v4084_v52, %v617_v47  ;;  %v664_v22 = vsel %vm662_vm14, %v4127_v48, 0.0 }
 0x8f2   :  { %v669_v51 = vsel %vm164_vm5, %v664_v22, 0.0 }
 0x8f3   :  { %v630_v53 = vmul.f32 %v627_v0, %v626_v49  ;;  %670 = vadd.xlane.f32.xlu1 %v669_v51 }
 0x8f5   :  { %v633_v54 = vsub.f32 %v623_v50, %v630_v53 }
 0x8f7   :  { %v4135_v56 = vadd.f32 2.220446e-16, %v633_v54 }
 0x8f9   :  { %v665_v37 = vsel %vm662_vm14, %v4135_v56, 0.0 }
 0x8fa   :  { %v672_v58 = vsel %vm171_vm6, %v665_v37, 0.0 }
 0x8fb   :  { %673 = vadd.xlane.f32.xlu2 %v672_v58 }
 0x95e   :  { %v4141_v52 = vpop.xlane.xlu2 %667 }
 0x95f   :  { %v676_v60 = vand.u32 2147483647, %v4141_v52 }
 0x966   :  { %v4143_v59 = vpop.xlane.xlu1 %670 }
 0x967   :  { %v677_v28 = vand.u32 2147483647, %v4143_v59 }
 0x969   :  { %v683_v61 = vmax.f32 %v676_v60, %v677_v28 }
 0x96e   :  { %v4147_v55 = vpop.xlane.xlu2 %673 }
 0x96f   :  { %v678_v57 = vand.u32 2147483647, %v4147_v55 }
 0x971   :  { %v682_v62 = vsel %vm322_vm2, %v678_v57, -inf }
 0x972   :  { %v684_v63 = vmax.f32 %v683_v61, %v682_v62 }
 0x974   :  { %v685_v2 = vrot.slane %v684_v63, 4 }
 0x976   :  { %v686_v3 = vmax.f32 %v684_v63, %v685_v2 }
 0x978   :  { %v687_v5 = vrot.slane %v686_v3, 2 }
 0x97a   :  { %v688_v6 = vmax.f32 %v686_v3, %v687_v5 }
 0x97c   :  { %v689_v7 = vrot.slane %v688_v6, 1 }
 0x97e   :  { %v690_v11 = vmax.f32 %v688_v6, %v689_v7 }
 0x980   :  { %vm691_vm0 = vcmp.eq.f32.partialorder %v676_v60, %v690_v11  ;;  %vm692_vm1 = vcmp.eq.f32.partialorder %v677_v28, %v690_v11  ;;  %vm693_vm3 = vcmp.eq.f32.partialorder %v678_v57, %v690_v11 }
 0x981   :  { %v694_v12 = vsel %vm691_vm0, %v4152_v8, 20.0  ;;  %v695_v13 = vsel %vm692_vm1, %v4155_v9, 20.0  ;;  %v696_v14 = vsel %vm693_vm3, %v4158_v10, 20.0 }
 0x982   :  { %v697_v19 = vsel %vm322_vm2, %v696_v14, inf  ;;  %v698_v23 = vmin.f32 %v694_v12, %v695_v13 }
 0x984   :  { %v699_v24 = vmin.f32 %v698_v23, %v697_v19 }
 0x986   :  { %v700_v25 = vrot.slane %v699_v24, 4 }
 0x988   :  { %v701_v26 = vmin.f32 %v699_v24, %v700_v25 }
 0x98a   :  { %v702_v27 = vrot.slane %v701_v26, 2 }
 0x98c   :  { %v703_v29 = vmin.f32 %v701_v26, %v702_v27 }
 0x98e   :  { %v704_v30 = vrot.slane %v703_v29, 1 }
 0x990   :  { %v4164_v31 = vmin.f32 %v703_v29, %v704_v30 }
 0x992   :  { %vm706_vm4 = vcmp.eq.f32.partialorder %v4152_v8, %v4164_v31  ;;  %vm707_vm7 = vcmp.eq.f32.partialorder %v4155_v9, %v4164_v31  ;;  %vm708_vm8 = vcmp.eq.f32.partialorder %v4158_v10, %v4164_v31 }
 0x993   :  { %v4173_v1 = vsel %vm706_vm4, 1.0, %v6289_v20  ;;  %v4176_v0 = vsel %vm707_vm7, 1.0, %v6289_v20  ;;  %v4179_v4 = vsel %vm708_vm8, 1.0, %v6289_v20  ;;  %vm790_vm7 = vcmp.eq.s32.totalorder %v3956_v15, 0 }
 0x994   :  { %v715_v34 = vmul.f32 %v4173_v1, %v4141_v52  ;;  %v716_v35 = vmul.f32 %v4176_v0, %v4143_v59  ;;  %v717_v36 = vmul.f32 %v4179_v4, %v4147_v55  ;;  %v742_v38 = vmul.f32 %v4173_v1, %v4116_v41 }
 0x995   :  { %v743_v39 = vmul.f32 %v4176_v0, %v4127_v48  ;;  %v744_v45 = vmul.f32 %v4179_v4, %v4135_v56  ;;  %v774_v7 = vsub.f32 %v4147_v55, %v4179_v4  ;;  %v773_v12 = vsub.f32 %v4143_v59, %v4176_v0 }
 0x996   :  { %v718_v40 = vadd.f32 %v716_v35, %v715_v34  ;;  %v719_v32 = vsel %vm322_vm2, %v717_v36, 0.0  ;;  %v745_v21 = vsel %vm164_vm5, %v742_v38, 0.0  ;;  %v772_v13 = vsub.f32 %v4141_v52, %v4173_v1 }
 0x997   :  { %v746_v43 = vsel %vm164_vm5, %v743_v39, 0.0  ;;  %v748_v49 = vsel %vm171_vm6, %v744_v45, 0.0  ;;  %vm826_vm14 = vcmp.gt.f32.partialorder %v4179_v4, 0.5  ;;  %vm825_vm15 = vcmp.gt.f32.partialorder %v4176_v0, 0.5 }
 0x998   :  { %v720_v42 = vadd.f32 %v719_v32, %v718_v40  ;;  %v747_v46 = vadd.f32 %v746_v43, %v745_v21  ;;  %vm824_vm0 = vcmp.gt.f32.partialorder %v4173_v1, 0.5 }
 0x99a   :  { %v721_v44 = vrot.slane %v720_v42, 4  ;;  %v749_v22 = vadd.f32 %v748_v49, %v747_v46 }
 0x99c   :  { %v722_v33 = vadd.f32 %v721_v44, %v720_v42  ;;  %v750_v53 = vrot.slane %v749_v22, 4 }
 0x99e   :  { %v723_v47 = vrot.slane %v722_v33, 2  ;;  %v751_v37 = vadd.f32 %v750_v53, %v749_v22 }
 0x9a0   :  { %v724_v50 = vadd.f32 %v723_v47, %v722_v33  ;;  %v752_v58 = vrot.slane %v751_v37, 2 }
 0x9a2   :  { %v725_v51 = vrot.slane %v724_v50, 1  ;;  %v753_v61 = vadd.f32 %v752_v58, %v751_v37 }
 0x9a4   :  { %v726_v54 = vadd.f32 %v725_v51, %v724_v50  ;;  %v754_v5 = vrot.slane %v753_v61, 1 }
 0x9a6   :  { %3830 = vrcp.f32 %v726_v54  ;;  %v738_v62 = vand.u32 2147483648, %v726_v54  ;;  %v736_v2 = vand.u32 2147483647, %v726_v54  ;;  %vm732_vm10 = vweird.f32 %v726_v54 }
 0x9a7   :  { %v755_v19 = vadd.f32 %v754_v5, %v753_v61 }
 0x9a8   :  { %v739_v6 = vor.u32 1.1754944e-38, %v738_v62  ;;  %vm737_vm12 = vcmp.eq.f32.partialorder %v736_v2, 8.507059e+37 }
 0x9ac   :  { %v3831_v28 = vpop.eup %3830 }
 0x9ad   :  { %v728_v60 = vmul.f32 %v3831_v28, %v726_v54  ;;  %vm733_vm9 = vweird.f32 %v3831_v28 }
 0x9ae   :  { %vm734_vm11 = vmor %vm732_vm10, %vm733_vm9  ;;  %vm939_vm9 = vcmp.eq.s32.totalorder %v3956_v15, 1 }
 0x9af   :  { %v729_v57 = vsub.f32 1.0, %v728_v60 }
 0x9b1   :  { %v730_v63 = vmul.f32 %v3831_v28, %v729_v57 }
 0x9b3   :  { %v731_v3 = vadd.f32 %v3831_v28, %v730_v63  ;;  %v4246_v63 = vcvt.s32.f32 %v3961_v17 }
 0x9b5   :  { %v735_v11 = vsel %vm734_vm11, %v3831_v28, %v731_v3  ;;  %vm799_vm8 = vcmp.eq.f32.partialorder %v4246_v63, %v4164_v31 }
 0x9b6   :  { %v740_v14 = vsel %vm737_vm12, %v739_v6, %v735_v11  ;;  %v3700_v11 = vsel %vm799_vm8, 1.0, %v6289_v20 }
 0x9b7   :  { %v4203_v23 = vmul.f32 %v774_v7, %v740_v14  ;;  %v4205_v24 = vmul.f32 %v773_v12, %v740_v14  ;;  %v4207_v25 = vmul.f32 %v772_v13, %v740_v14  ;;  %v3699_v7 = vsel %vm790_vm7, 1.0, %v6289_v20 }
 0x9b8   :  { %v3704_v12 = vsel %vm939_vm9, 1.0, %v6289_v20 }
 0x9b9   :  { %v780_v26 = vmul.f32 %v4203_v23, %v755_v19  ;;  %v779_v55 = vmul.f32 %v4205_v24, %v755_v19  ;;  %v778_v27 = vmul.f32 %v4207_v25, %v755_v19 }
 0x9bb   :  { %v4214_v59 = vsub.f32 %v4135_v56, %v780_v26  ;;  %v4217_v52 = vsub.f32 %v4127_v48, %v779_v55  ;;  %v4220_v29 = vsub.f32 %v4116_v41, %v778_v27 }
 0x9bd   :  { %v814_v30 = vsel %vm811_vm13, %v4214_v59, 0.0  ;;  %v813_v34 = vsel %vm811_vm13, %v4217_v52, 0.0  ;;  %v812_v35 = vsel %vm811_vm13, %v4220_v29, 0.0 }
 0x9be   :  { %v821_v36 = vsel %vm171_vm6, %v814_v30, 0.0  ;;  %v818_v38 = vsel %vm164_vm5, %v813_v34, 0.0  ;;  %v815_v39 = vsel %vm164_vm5, %v812_v35, 0.0  ;;  %v802_v34 = vmul.f32 %v3700_v11, %v3699_v7 }
 0x9bf   :  { %822 = vadd.xlane.f32.xlu2 %v821_v36  ;;  %819 = vadd.xlane.f32.xlu1 %v818_v38  ;;  %v803_v38 = vmul.f32 0.0, %v3700_v11 }
 0x9c0   :  { %816 = vadd.xlane.f32.xlu0 %v815_v39 }
 0xa32   :  { %v4228_v48 = vpop.xlane.xlu2 %822  ;;  %v4230_v56 = vpop.xlane.xlu1 %819 }
 0xa33   :  { %v829_v41 = vand.u32 2147483647, %v4228_v48  ;;  %v828_v40 = vand.u32 2147483647, %v4230_v56  ;;  %v4234_v32 = vpop.xlane.xlu0 %816 }
 0xa34   :  { %v827_v42 = vand.u32 2147483647, %v4234_v32 }
 0xa35   :  { %v832_v21 = vsel %vm826_vm14, -1.0, %v829_v41  ;;  %v831_v43 = vsel %vm825_vm15, -1.0, %v828_v40 }
 0xa36   :  { %v833_v44 = vsel %vm322_vm2, %v832_v21, -inf  ;;  %v830_v45 = vsel %vm824_vm0, -1.0, %v827_v42 }
 0xa37   :  { %v834_v46 = vmax.f32 %v830_v45, %v831_v43 }
 0xa39   :  { %v835_v33 = vmax.f32 %v834_v46, %v833_v44 }
 0xa3b   :  { %v836_v47 = vrot.slane %v835_v33, 4 }
 0xa3d   :  { %v837_v49 = vmax.f32 %v835_v33, %v836_v47 }
 0xa3f   :  { %v838_v22 = vrot.slane %v837_v49, 2 }
 0xa41   :  { %v839_v50 = vmax.f32 %v837_v49, %v838_v22 }
 0xa43   :  { %v840_v51 = vrot.slane %v839_v50, 1 }
 0xa45   :  { %v841_v53 = vmax.f32 %v839_v50, %v840_v51 }
 0xa47   :  { %vm842_vm1 = vcmp.eq.f32.partialorder %v830_v45, %v841_v53  ;;  %vm843_vm3 = vcmp.eq.f32.partialorder %v831_v43, %v841_v53  ;;  %vm844_vm4 = vcmp.eq.f32.partialorder %v832_v21, %v841_v53 }
 0xa48   :  { %v845_v54 = vsel %vm842_vm1, %v4152_v8, 20.0  ;;  %v846_v37 = vsel %vm843_vm3, %v4155_v9, 20.0  ;;  %v847_v58 = vsel %vm844_vm4, %v4158_v10, 20.0  ;;  %vm960_vm3 = vcmp.eq.s32.totalorder %v3961_v17, 2 }
 0xa49   :  { %v848_v28 = vsel %vm322_vm2, %v847_v58, inf  ;;  %v849_v60 = vmin.f32 %v845_v54, %v846_v37 }
 0xa4b   :  { %v850_v57 = vmin.f32 %v849_v60, %v848_v28 }
 0xa4d   :  { %v851_v61 = vrot.slane %v850_v57, 4 }
 0xa4f   :  { %v852_v62 = vmin.f32 %v850_v57, %v851_v61 }
 0xa51   :  { %v853_v2 = vrot.slane %v852_v62, 2 }
 0xa53   :  { %v854_v3 = vmin.f32 %v852_v62, %v853_v2 }
 0xa55   :  { %v855_v5 = vrot.slane %v854_v3, 1 }
 0xa57   :  { %v856_v6 = vmin.f32 %v854_v3, %v855_v5 }
 0xa59   :  { %vm857_vm10 = vcmp.eq.f32.partialorder %v4152_v8, %v856_v6  ;;  %vm858_vm11 = vcmp.eq.f32.partialorder %v4155_v9, %v856_v6  ;;  %vm859_vm12 = vcmp.eq.f32.partialorder %v4158_v10, %v856_v6  ;;  %vm948_vm13 = vcmp.eq.f32.partialorder %v4246_v63, %v856_v6 }
 0xa5a   :  { %v4260_v31 = vsel %vm857_vm10, 1.0, %v6289_v20  ;;  %v4263_v13 = vsel %vm858_vm11, 1.0, %v6289_v20  ;;  %v4266_v14 = vsel %vm859_vm12, 1.0, %v6289_v20  ;;  %v3705_v19 = vsel %vm948_vm13, 1.0, %v6289_v20 }
 0xa5b   :  { %v866_v26 = vmul.f32 %v4260_v31, %v4234_v32  ;;  %v867_v55 = vmul.f32 %v4263_v13, %v4230_v56  ;;  %v868_v27 = vmul.f32 %v4266_v14, %v4228_v48  ;;  %v893_v30 = vmul.f32 %v4260_v31, %v4220_v29 }
 0xa5c   :  { %v894_v35 = vmul.f32 %v4263_v13, %v4217_v52  ;;  %v951_v36 = vmul.f32 %v3705_v19, %v3704_v12  ;;  %v952_v40 = vmul.f32 0.0, %v3705_v19  ;;  %v895_v33 = vmul.f32 %v4266_v14, %v4214_v59 }
 0xa5d   :  { %v869_v39 = vadd.f32 %v867_v55, %v866_v26  ;;  %v870_v41 = vsel %vm322_vm2, %v868_v27, 0.0  ;;  %v896_v43 = vsel %vm164_vm5, %v893_v30, 0.0  ;;  %v921_v19 = vsub.f32 %v4234_v32, %v4260_v31 }
 0xa5e   :  { %v4280_v42 = vadd.f32 %v951_v36, %v802_v34  ;;  %v897_v44 = vsel %vm164_vm5, %v894_v35, 0.0  ;;  %v4284_v45 = vadd.f32 %v952_v40, %v803_v38  ;;  %v899_v50 = vsel %vm171_vm6, %v895_v33, 0.0 }
 0xa5f   :  { %v871_v21 = vadd.f32 %v870_v41, %v869_v39  ;;  %v898_v47 = vadd.f32 %v897_v44, %v896_v43  ;;  %v923_v55 = vsub.f32 %v4228_v48, %v4266_v14  ;;  %v922_v27 = vsub.f32 %v4230_v56, %v4263_v13 }
 0xa60   :  { %vm1088_vm12 = vcmp.eq.s32.totalorder %v3956_v15, 2 }
 0xa61   :  { %v872_v46 = vrot.slane %v871_v21, 4  ;;  %v900_v51 = vadd.f32 %v899_v50, %v898_v47 }
 0xa63   :  { %v873_v49 = vadd.f32 %v872_v46, %v871_v21  ;;  %v901_v37 = vrot.slane %v900_v51, 4 }
 0xa65   :  { %v874_v22 = vrot.slane %v873_v49, 2  ;;  %v902_v28 = vadd.f32 %v901_v37, %v900_v51 }
 0xa67   :  { %v875_v53 = vadd.f32 %v874_v22, %v873_v49  ;;  %v903_v60 = vrot.slane %v902_v28, 2 }
 0xa69   :  { %v876_v54 = vrot.slane %v875_v53, 1  ;;  %v904_v2 = vadd.f32 %v903_v60, %v902_v28 }
 0xa6b   :  { %v877_v58 = vadd.f32 %v876_v54, %v875_v53  ;;  %v905_v11 = vrot.slane %v904_v2, 1 }
 0xa6d   :  { %3832 = vrcp.f32 %v877_v58  ;;  %v889_v3 = vand.u32 2147483648, %v877_v58  ;;  %v887_v6 = vand.u32 2147483647, %v877_v58  ;;  %vm883_vm15 = vweird.f32 %v877_v58 }
 0xa6e   :  { %v906_v34 = vadd.f32 %v905_v11, %v904_v2 }
 0xa6f   :  { %v890_v12 = vor.u32 1.1754944e-38, %v889_v3  ;;  %vm888_vm1 = vcmp.eq.f32.partialorder %v887_v6, 8.507059e+37 }
 0xa73   :  { %v3833_v57 = vpop.eup %3832 }
 0xa74   :  { %v879_v61 = vmul.f32 %v3833_v57, %v877_v58  ;;  %vm884_vm14 = vweird.f32 %v3833_v57 }
 0xa75   :  { %vm885_vm0 = vmor %vm883_vm15, %vm884_vm14 }
 0xa76   :  { %v880_v62 = vsub.f32 1.0, %v879_v61 }
 0xa78   :  { %v881_v5 = vmul.f32 %v3833_v57, %v880_v62 }
 0xa7a   :  { %v882_v7 = vadd.f32 %v3833_v57, %v881_v5 }
 0xa7c   :  { %v886_v26 = vsel %vm885_vm0, %v3833_v57, %v882_v7 }
 0xa7d   :  { %v891_v30 = vsel %vm888_vm1, %v890_v12, %v886_v26 }
 0xa7e   :  { %v4295_v35 = vmul.f32 %v921_v19, %v891_v30  ;;  %v4297_v36 = vmul.f32 %v923_v55, %v891_v30  ;;  %v4299_v38 = vmul.f32 %v922_v27, %v891_v30 }
 0xa80   :  { %v927_v39 = vmul.f32 %v4295_v35, %v906_v34  ;;  %v929_v32 = vmul.f32 %v4297_v36, %v906_v34  ;;  %v928_v41 = vmul.f32 %v4299_v38, %v906_v34 }
 0xa82   :  { %v4306_v48 = vsub.f32 %v4214_v59, %v929_v32  ;;  %v4309_v56 = vsub.f32 %v4217_v52, %v928_v41  ;;  %v4312_v40 = vsub.f32 %v4220_v29, %v927_v39  ;;  %v4322_v59 = vadd.f32 %v4266_v14, %v4179_v4 }
 0xa83   :  { %v4326_v52 = vadd.f32 %v4263_v13, %v4176_v0  ;;  %v4330_v29 = vadd.f32 %v4260_v31, %v4173_v1 }
 0xa84   :  { %v963_v21 = vsel %vm960_vm3, %v4306_v48, 0.0  ;;  %v962_v43 = vsel %vm960_vm3, %v4309_v56, 0.0  ;;  %v961_v44 = vsel %vm960_vm3, %v4312_v40, 0.0  ;;  %vm975_vm4 = vcmp.gt.f32.partialorder %v4322_v59, 0.5 }
 0xa85   :  { %v970_v46 = vsel %vm171_vm6, %v963_v21, 0.0  ;;  %v967_v33 = vsel %vm164_vm5, %v962_v43, 0.0  ;;  %v964_v47 = vsel %vm164_vm5, %v961_v44, 0.0  ;;  %vm974_vm7 = vcmp.gt.f32.partialorder %v4326_v52, 0.5 }
 0xa86   :  { %971 = vadd.xlane.f32.xlu2 %v970_v46  ;;  %968 = vadd.xlane.f32.xlu1 %v967_v33  ;;  %vm973_vm8 = vcmp.gt.f32.partialorder %v4330_v29, 0.5  ;;  %v3709_v43 = vsel %vm1088_vm12, 1.0, %v6289_v20 }
 0xa87   :  { %965 = vadd.xlane.f32.xlu0 %v964_v47 }
 0xaf9   :  { %v4332_v49 = vpop.xlane.xlu2 %971  ;;  %v4334_v22 = vpop.xlane.xlu1 %968 }
 0xafa   :  { %v978_v50 = vand.u32 2147483647, %v4332_v49  ;;  %v977_v51 = vand.u32 2147483647, %v4334_v22  ;;  %v4338_v53 = vpop.xlane.xlu0 %965 }
 0xafb   :  { %v976_v54 = vand.u32 2147483647, %v4338_v53 }
 0xafc   :  { %v981_v37 = vsel %vm975_vm4, -1.0, %v978_v50  ;;  %v980_v58 = vsel %vm974_vm7, -1.0, %v977_v51 }
 0xafd   :  { %v982_v28 = vsel %vm322_vm2, %v981_v37, -inf  ;;  %v979_v60 = vsel %vm973_vm8, -1.0, %v976_v54  ;;  %vm1109_vm8 = vcmp.eq.s32.totalorder %v3961_v17, 3 }
 0xafe   :  { %v983_v57 = vmax.f32 %v979_v60, %v980_v58 }
 0xb00   :  { %v984_v61 = vmax.f32 %v983_v57, %v982_v28 }
 0xb02   :  { %v985_v62 = vrot.slane %v984_v61, 4 }
 0xb04   :  { %v986_v2 = vmax.f32 %v984_v61, %v985_v62 }
 0xb06   :  { %v987_v3 = vrot.slane %v986_v2, 2 }
 0xb08   :  { %v988_v5 = vmax.f32 %v986_v2, %v987_v3 }
 0xb0a   :  { %v989_v6 = vrot.slane %v988_v5, 1 }
 0xb0c   :  { %v990_v7 = vmax.f32 %v988_v5, %v989_v6 }
 0xb0e   :  { %vm991_vm9 = vcmp.eq.f32.partialorder %v979_v60, %v990_v7  ;;  %vm992_vm10 = vcmp.eq.f32.partialorder %v980_v58, %v990_v7  ;;  %vm993_vm11 = vcmp.eq.f32.partialorder %v981_v37, %v990_v7 }
 0xb0f   :  { %v994_v11 = vsel %vm991_vm9, %v4152_v8, 20.0  ;;  %v995_v12 = vsel %vm992_vm10, %v4155_v9, 20.0  ;;  %v996_v19 = vsel %vm993_vm11, %v4158_v10, 20.0 }
 0xb10   :  { %v997_v26 = vsel %vm322_vm2, %v996_v19, inf  ;;  %v998_v55 = vmin.f32 %v994_v11, %v995_v12 }
 0xb12   :  { %v999_v27 = vmin.f32 %v998_v55, %v997_v26 }
 0xb14   :  { %v1000_v30 = vrot.slane %v999_v27, 4 }
 0xb16   :  { %v1001_v34 = vmin.f32 %v999_v27, %v1000_v30 }
 0xb18   :  { %v1002_v39 = vrot.slane %v1001_v34, 2 }
 0xb1a   :  { %v1003_v32 = vmin.f32 %v1001_v34, %v1002_v39 }
 0xb1c   :  { %v1004_v41 = vrot.slane %v1003_v32, 1 }
 0xb1e   :  { %v1005_v21 = vmin.f32 %v1003_v32, %v1004_v41 }
 0xb20   :  { %vm1006_vm13 = vcmp.eq.f32.partialorder %v4152_v8, %v1005_v21  ;;  %vm1007_vm14 = vcmp.eq.f32.partialorder %v4155_v9, %v1005_v21  ;;  %vm1008_vm15 = vcmp.eq.f32.partialorder %v4158_v10, %v1005_v21  ;;  %vm1097_vm0 = vcmp.eq.f32.partialorder %v4246_v63, %v1005_v21 }
 0xb21   :  { %v4356_v44 = vsel %vm1006_vm13, 1.0, %v6289_v20  ;;  %v4359_v46 = vsel %vm1007_vm14, 1.0, %v6289_v20  ;;  %v4362_v33 = vsel %vm1008_vm15, 1.0, %v6289_v20  ;;  %v3710_v47 = vsel %vm1097_vm0, 1.0, %v6289_v20 }
 0xb22   :  { %v1015_v50 = vmul.f32 %v4356_v44, %v4338_v53  ;;  %v1016_v51 = vmul.f32 %v4359_v46, %v4334_v22  ;;  %v1017_v54 = vmul.f32 %v4362_v33, %v4332_v49  ;;  %v1042_v37 = vmul.f32 %v4356_v44, %v4312_v40 }
 0xb23   :  { %v1043_v58 = vmul.f32 %v4359_v46, %v4309_v56  ;;  %v1100_v28 = vmul.f32 %v3710_v47, %v3709_v43  ;;  %v1101_v61 = vmul.f32 0.0, %v3710_v47  ;;  %v1044_v11 = vmul.f32 %v4362_v33, %v4306_v48 }
 0xb24   :  { %v1018_v60 = vadd.f32 %v1016_v51, %v1015_v50  ;;  %v1019_v57 = vsel %vm322_vm2, %v1017_v54, 0.0  ;;  %v1045_v3 = vsel %vm164_vm5, %v1042_v37, 0.0  ;;  %vm1237_vm15 = vcmp.eq.s32.totalorder %v3956_v15, 3 }
 0xb25   :  { %v4377_v62 = vadd.f32 %v1100_v28, %v4280_v42  ;;  %v1046_v5 = vsel %vm164_vm5, %v1043_v58, 0.0  ;;  %v4382_v6 = vadd.f32 %v1101_v61, %v4284_v45  ;;  %v1048_v55 = vsel %vm171_vm6, %v1044_v11, 0.0 }
 0xb26   :  { %v1020_v2 = vadd.f32 %v1019_v57, %v1018_v60  ;;  %v1047_v12 = vadd.f32 %v1046_v5, %v1045_v3  ;;  %v1070_v60 = vsub.f32 %v4338_v53, %v4356_v44  ;;  %v1072_v61 = vsub.f32 %v4332_v49, %v4362_v33 }
 0xb28   :  { %v1021_v7 = vrot.slane %v1020_v2, 4  ;;  %v1049_v27 = vadd.f32 %v1048_v55, %v1047_v12 }
 0xb2a   :  { %v1022_v19 = vadd.f32 %v1021_v7, %v1020_v2  ;;  %v1050_v34 = vrot.slane %v1049_v27, 4  ;;  %v1071_v2 = vsub.f32 %v4334_v22, %v4359_v46 }
 0xb2c   :  { %v1023_v26 = vrot.slane %v1022_v19, 2  ;;  %v1051_v32 = vadd.f32 %v1050_v34, %v1049_v27 }
 0xb2e   :  { %v1024_v42 = vadd.f32 %v1023_v26, %v1022_v19  ;;  %v1052_v41 = vrot.slane %v1051_v32, 2 }
 0xb30   :  { %v1025_v30 = vrot.slane %v1024_v42, 1  ;;  %v1053_v47 = vadd.f32 %v1052_v41, %v1051_v32 }
 0xb32   :  { %v1026_v39 = vadd.f32 %v1025_v30, %v1024_v42  ;;  %v1054_v58 = vrot.slane %v1053_v47, 1 }
 0xb34   :  { %3834 = vrcp.f32 %v1026_v39  ;;  %v1038_v50 = vand.u32 2147483648, %v1026_v39  ;;  %v1036_v54 = vand.u32 2147483647, %v1026_v39  ;;  %vm1032_vm3 = vweird.f32 %v1026_v39 }
 0xb35   :  { %v1055_v5 = vadd.f32 %v1054_v58, %v1053_v47 }
 0xb36   :  { %v1039_v28 = vor.u32 1.1754944e-38, %v1038_v50  ;;  %vm1037_vm7 = vcmp.eq.f32.partialorder %v1036_v54, 8.507059e+37 }
 0xb3a   :  { %v3835_v21 = vpop.eup %3834 }
 0xb3b   :  { %v1028_v45 = vmul.f32 %v3835_v21, %v1026_v39  ;;  %vm1033_vm1 = vweird.f32 %v3835_v21 }
 0xb3c   :  { %vm1034_vm4 = vmor %vm1032_vm3, %vm1033_vm1 }
 0xb3d   :  { %v1029_v43 = vsub.f32 1.0, %v1028_v45 }
 0xb3f   :  { %v1030_v51 = vmul.f32 %v3835_v21, %v1029_v43 }
 0xb41   :  { %v1031_v37 = vadd.f32 %v3835_v21, %v1030_v51 }
 0xb43   :  { %v1035_v57 = vsel %vm1034_vm4, %v3835_v21, %v1031_v37 }
 0xb44   :  { %v1040_v3 = vsel %vm1037_vm7, %v1039_v28, %v1035_v57 }
 0xb45   :  { %v4393_v7 = vmul.f32 %v1070_v60, %v1040_v3  ;;  %v4395_v11 = vmul.f32 %v1072_v61, %v1040_v3  ;;  %v4397_v12 = vmul.f32 %v1071_v2, %v1040_v3 }
 0xb47   :  { %v1076_v19 = vmul.f32 %v4393_v7, %v1055_v5  ;;  %v1078_v53 = vmul.f32 %v4395_v11, %v1055_v5  ;;  %v1077_v26 = vmul.f32 %v4397_v12, %v1055_v5 }
 0xb49   :  { %v4404_v49 = vsub.f32 %v4306_v48, %v1078_v53  ;;  %v4407_v22 = vsub.f32 %v4309_v56, %v1077_v26  ;;  %v4410_v55 = vsub.f32 %v4312_v40, %v1076_v19  ;;  %v4420_v48 = vadd.f32 %v4362_v33, %v4322_v59 }
 0xb4a   :  { %v4424_v56 = vadd.f32 %v4359_v46, %v4326_v52  ;;  %v4428_v40 = vadd.f32 %v4356_v44, %v4330_v29 }
 0xb4b   :  { %v1112_v27 = vsel %vm1109_vm8, %v4404_v49, 0.0  ;;  %v1111_v42 = vsel %vm1109_vm8, %v4407_v22, 0.0  ;;  %v1110_v30 = vsel %vm1109_vm8, %v4410_v55, 0.0  ;;  %vm1124_vm9 = vcmp.gt.f32.partialorder %v4420_v48, 0.5 }
 0xb4c   :  { %v1119_v34 = vsel %vm171_vm6, %v1112_v27, 0.0  ;;  %v1116_v39 = vsel %vm164_vm5, %v1111_v42, 0.0  ;;  %v1113_v32 = vsel %vm164_vm5, %v1110_v30, 0.0  ;;  %vm1123_vm10 = vcmp.gt.f32.partialorder %v4424_v56, 0.5 }
 0xb4d   :  { %1120 = vadd.xlane.f32.xlu2 %v1119_v34  ;;  %1117 = vadd.xlane.f32.xlu1 %v1116_v39  ;;  %vm1122_vm11 = vcmp.gt.f32.partialorder %v4428_v40, 0.5 }
 0xb4e   :  { %1114 = vadd.xlane.f32.xlu0 %v1113_v32 }
 0xbc0   :  { %v4430_v41 = vpop.xlane.xlu2 %1120  ;;  %v4432_v21 = vpop.xlane.xlu1 %1117 }
 0xbc1   :  { %v1127_v45 = vand.u32 2147483647, %v4430_v41  ;;  %v1126_v43 = vand.u32 2147483647, %v4432_v21  ;;  %v4436_v47 = vpop.xlane.xlu0 %1114 }
 0xbc2   :  { %v1125_v59 = vand.u32 2147483647, %v4436_v47 }
 0xbc3   :  { %v1130_v52 = vsel %vm1124_vm9, -1.0, %v1127_v45  ;;  %v1129_v50 = vsel %vm1123_vm10, -1.0, %v1126_v43  ;;  %v3714_v43 = vsel %vm1237_vm15, 1.0, %v6289_v20 }
 0xbc4   :  { %v1131_v29 = vsel %vm322_vm2, %v1130_v52, -inf  ;;  %v1128_v51 = vsel %vm1122_vm11, -1.0, %v1125_v59  ;;  %vm1258_vm11 = vcmp.eq.s32.totalorder %v3961_v17, 4 }
 0xbc5   :  { %v1132_v54 = vmax.f32 %v1128_v51, %v1129_v50 }
 0xbc7   :  { %v1133_v37 = vmax.f32 %v1132_v54, %v1131_v29 }
 0xbc9   :  { %v1134_v58 = vrot.slane %v1133_v37, 4 }
 0xbcb   :  { %v1135_v28 = vmax.f32 %v1133_v37, %v1134_v58 }
 0xbcd   :  { %v1136_v60 = vrot.slane %v1135_v28, 2 }
 0xbcf   :  { %v1137_v57 = vmax.f32 %v1135_v28, %v1136_v60 }
 0xbd1   :  { %v1138_v61 = vrot.slane %v1137_v57, 1 }
 0xbd3   :  { %v1139_v2 = vmax.f32 %v1137_v57, %v1138_v61 }
 0xbd5   :  { %vm1140_vm12 = vcmp.eq.f32.partialorder %v1128_v51, %v1139_v2  ;;  %vm1141_vm13 = vcmp.eq.f32.partialorder %v1129_v50, %v1139_v2  ;;  %vm1142_vm14 = vcmp.eq.f32.partialorder %v1130_v52, %v1139_v2 }
 0xbd6   :  { %v1143_v3 = vsel %vm1140_vm12, %v4152_v8, 20.0  ;;  %v1144_v5 = vsel %vm1141_vm13, %v4155_v9, 20.0  ;;  %v1145_v19 = vsel %vm1142_vm14, %v4158_v10, 20.0 }
 0xbd7   :  { %v1146_v53 = vsel %vm322_vm2, %v1145_v19, inf  ;;  %v1147_v26 = vmin.f32 %v1143_v3, %v1144_v5 }
 0xbd9   :  { %v1148_v27 = vmin.f32 %v1147_v26, %v1146_v53 }
 0xbdb   :  { %v1149_v42 = vrot.slane %v1148_v27, 4 }
 0xbdd   :  { %v1150_v30 = vmin.f32 %v1148_v27, %v1149_v42 }
 0xbdf   :  { %v1151_v34 = vrot.slane %v1150_v30, 2 }
 0xbe1   :  { %v1152_v39 = vmin.f32 %v1150_v30, %v1151_v34 }
 0xbe3   :  { %v1153_v32 = vrot.slane %v1152_v39, 1 }
 0xbe5   :  { %v1154_v45 = vmin.f32 %v1152_v39, %v1153_v32 }
 0xbe7   :  { %vm1155_vm0 = vcmp.eq.f32.partialorder %v4152_v8, %v1154_v45  ;;  %vm1156_vm1 = vcmp.eq.f32.partialorder %v4155_v9, %v1154_v45  ;;  %vm1157_vm3 = vcmp.eq.f32.partialorder %v4158_v10, %v1154_v45  ;;  %vm1246_vm4 = vcmp.eq.f32.partialorder %v4246_v63, %v1154_v45 }
 0xbe8   :  { %v4454_v59 = vsel %vm1155_vm0, 1.0, %v6289_v20  ;;  %v4457_v52 = vsel %vm1156_vm1, 1.0, %v6289_v20  ;;  %v4460_v50 = vsel %vm1157_vm3, 1.0, %v6289_v20  ;;  %v3715_v29 = vsel %vm1246_vm4, 1.0, %v6289_v20 }
 0xbe9   :  { %6360 = vst [vmem:[#allocation7_spill] sm:$0xff] %v4460_v50  ;;  %v1164_v51 = vmul.f32 %v4454_v59, %v4436_v47  ;;  %v1165_v54 = vmul.f32 %v4457_v52, %v4432_v21  ;;  %v1166_v37 = vmul.f32 %v4460_v50, %v4430_v41  ;;  %v1191_v58 = vmul.f32 %v4454_v59, %v4410_v55 }
 0xbea   :  { %v1192_v28 = vmul.f32 %v4457_v52, %v4407_v22  ;;  %v1249_v60 = vmul.f32 %v3715_v29, %v3714_v43  ;;  %v1250_v2 = vmul.f32 0.0, %v3715_v29  ;;  %v1193_v42 = vmul.f32 %v4460_v50, %v4404_v49 }
 0xbeb   :  { %v1167_v57 = vadd.f32 %v1165_v54, %v1164_v51  ;;  %v1168_v61 = vsel %vm322_vm2, %v1166_v37, 0.0  ;;  %v1194_v19 = vsel %vm164_vm5, %v1191_v58, 0.0  ;;  %vm1386_vm3 = vcmp.eq.s32.totalorder %v3956_v15, 4 }
 0xbec   :  { %v4475_v3 = vadd.f32 %v1249_v60, %v4377_v62  ;;  %v1195_v53 = vsel %vm164_vm5, %v1192_v28, 0.0  ;;  %v4480_v26 = vadd.f32 %v1250_v2, %v4382_v6  ;;  %v1197_v32 = vsel %vm171_vm6, %v1193_v42, 0.0 }
 0xbed   :  { %v1169_v5 = vadd.f32 %v1168_v61, %v1167_v57  ;;  %v1196_v30 = vadd.f32 %v1195_v53, %v1194_v19 }
 0xbef   :  { %v1170_v27 = vrot.slane %v1169_v5, 4  ;;  %v1198_v45 = vadd.f32 %v1197_v32, %v1196_v30  ;;  %v1221_v30 = vsub.f32 %v4430_v41, %v4460_v50 }
 0xbf1   :  { %v1171_v34 = vadd.f32 %v1170_v27, %v1169_v5  ;;  %v1199_v29 = vrot.slane %v1198_v45, 4  ;;  %v1219_v27 = vsub.f32 %v4436_v47, %v4454_v59 }
 0xbf3   :  { %v1172_v39 = vrot.slane %v1171_v34, 2  ;;  %v1200_v54 = vadd.f32 %v1199_v29, %v1198_v45 }
 0xbf5   :  { %v1173_v62 = vadd.f32 %v1172_v39, %v1171_v34  ;;  %v1201_v37 = vrot.slane %v1200_v54, 2  ;;  %v1220_v34 = vsub.f32 %v4432_v21, %v4457_v52 }
 0xbf7   :  { %v1174_v43 = vrot.slane %v1173_v62, 1  ;;  %v1202_v60 = vadd.f32 %v1201_v37, %v1200_v54 }
 0xbf9   :  { %v1175_v51 = vadd.f32 %v1174_v43, %v1173_v62  ;;  %v1203_v19 = vrot.slane %v1202_v60, 1 }
 0xbfb   :  { %3836 = vrcp.f32 %v1175_v51  ;;  %v1187_v57 = vand.u32 2147483648, %v1175_v51  ;;  %v1185_v2 = vand.u32 2147483647, %v1175_v51  ;;  %vm1181_vm8 = vweird.f32 %v1175_v51 }
 0xbfc   :  { %v1204_v32 = vadd.f32 %v1203_v19, %v1202_v60 }
 0xbfd   :  { %v1188_v53 = vor.u32 1.1754944e-38, %v1187_v57  ;;  %vm1186_vm10 = vcmp.eq.f32.partialorder %v1185_v2, 8.507059e+37 }
 0xc01   :  { %v3837_v58 = vpop.eup %3836 }
 0xc02   :  { %v1177_v6 = vmul.f32 %v3837_v58, %v1175_v51  ;;  %vm1182_vm7 = vweird.f32 %v3837_v58 }
 0xc03   :  { %vm1183_vm9 = vmor %vm1181_vm8, %vm1182_vm7 }
 0xc04   :  { %v1178_v28 = vsub.f32 1.0, %v1177_v6 }
 0xc06   :  { %v1179_v61 = vmul.f32 %v3837_v58, %v1178_v28 }
 0xc08   :  { %v1180_v5 = vadd.f32 %v3837_v58, %v1179_v61 }
 0xc0a   :  { %v1184_v42 = vsel %vm1183_vm9, %v3837_v58, %v1180_v5 }
 0xc0b   :  { %v1189_v39 = vsel %vm1186_vm10, %v1188_v53, %v1184_v42 }
 0xc0c   :  { %v4491_v45 = vmul.f32 %v1219_v27, %v1189_v39  ;;  %v4493_v62 = vmul.f32 %v1221_v30, %v1189_v39  ;;  %v4495_v43 = vmul.f32 %v1220_v34, %v1189_v39 }
 0xc0e   :  { %6361 = vst [vmem:[#allocation8_spill] sm:$0xff] %v4491_v45  ;;  %v1225_v29 = vmul.f32 %v4491_v45, %v1204_v32  ;;  %v1227_v47 = vmul.f32 %v4493_v62, %v1204_v32  ;;  %v1226_v51 = vmul.f32 %v4495_v43, %v1204_v32 }
 0xc0f   :  { %6362 = vst [vmem:[#allocation9_spill] sm:$0xff] %v4493_v62 }
 0xc10   :  { %6363 = vst [vmem:[#allocation10_spill] sm:$0xff] %v4495_v43  ;;  %v4502_v41 = vsub.f32 %v4404_v49, %v1227_v47  ;;  %v4505_v21 = vsub.f32 %v4407_v22, %v1226_v51  ;;  %v4508_v54 = vsub.f32 %v4410_v55, %v1225_v29  ;;  %v4518_v49 = vadd.f32 %v4460_v50, %v4420_v48 }
 0xc11   :  { %v4522_v22 = vadd.f32 %v4457_v52, %v4424_v56  ;;  %v4526_v55 = vadd.f32 %v4454_v59, %v4428_v40 }
 0xc12   :  { %v1261_v37 = vsel %vm1258_vm11, %v4502_v41, 0.0  ;;  %v1260_v58 = vsel %vm1258_vm11, %v4505_v21, 0.0  ;;  %v1259_v6 = vsel %vm1258_vm11, %v4508_v54, 0.0  ;;  %vm1273_vm12 = vcmp.gt.f32.partialorder %v4518_v49, 0.5 }
 0xc13   :  { %v1268_v28 = vsel %vm171_vm6, %v1261_v37, 0.0  ;;  %v1265_v60 = vsel %vm164_vm5, %v1260_v58, 0.0  ;;  %v1262_v57 = vsel %vm164_vm5, %v1259_v6, 0.0  ;;  %vm1272_vm13 = vcmp.gt.f32.partialorder %v4522_v22, 0.5 }
 0xc14   :  { %1269 = vadd.xlane.f32.xlu2 %v1268_v28  ;;  %1266 = vadd.xlane.f32.xlu1 %v1265_v60  ;;  %vm1271_vm14 = vcmp.gt.f32.partialorder %v4526_v55, 0.5 }
 0xc15   :  { %1263 = vadd.xlane.f32.xlu0 %v1262_v57 }
 0xc87   :  { %v4528_v61 = vpop.xlane.xlu2 %1269  ;;  %v4530_v2 = vpop.xlane.xlu1 %1266 }
 0xc88   :  { %v1276_v5 = vand.u32 2147483647, %v4528_v61  ;;  %v1275_v19 = vand.u32 2147483647, %v4530_v2  ;;  %v4534_v53 = vpop.xlane.xlu0 %1263 }
 0xc89   :  { %v1274_v48 = vand.u32 2147483647, %v4534_v53 }
 0xc8a   :  { %v1279_v56 = vsel %vm1273_vm12, -1.0, %v1276_v5  ;;  %v1278_v27 = vsel %vm1272_vm13, -1.0, %v1275_v19 }
 0xc8b   :  { %v1280_v40 = vsel %vm322_vm2, %v1279_v56, -inf  ;;  %v1277_v42 = vsel %vm1271_vm14, -1.0, %v1274_v48  ;;  %vm1407_vm14 = vcmp.eq.s32.totalorder %v3961_v17, 5 }
 0xc8c   :  { %v1281_v30 = vmax.f32 %v1277_v42, %v1278_v27 }
 0xc8e   :  { %v1282_v34 = vmax.f32 %v1281_v30, %v1280_v40 }
 0xc90   :  { %v1283_v39 = vrot.slane %v1282_v34, 4 }
 0xc92   :  { %v1284_v32 = vmax.f32 %v1282_v34, %v1283_v39 }
 0xc94   :  { %v1285_v29 = vrot.slane %v1284_v32, 2 }
 0xc96   :  { %v1286_v47 = vmax.f32 %v1284_v32, %v1285_v29 }
 0xc98   :  { %v1287_v51 = vrot.slane %v1286_v47, 1 }
 0xc9a   :  { %v1288_v37 = vmax.f32 %v1286_v47, %v1287_v51 }
 0xc9c   :  { %vm1289_vm15 = vcmp.eq.f32.partialorder %v1277_v42, %v1288_v37  ;;  %vm1290_vm0 = vcmp.eq.f32.partialorder %v1278_v27, %v1288_v37  ;;  %vm1291_vm1 = vcmp.eq.f32.partialorder %v1279_v56, %v1288_v37  ;;  %v3719_v56 = vsel %vm1386_vm3, 1.0, %v6289_v20 }
 0xc9d   :  { %v1292_v58 = vsel %vm1289_vm15, %v4152_v8, 20.0  ;;  %v1293_v6 = vsel %vm1290_vm0, %v4155_v9, 20.0  ;;  %v1294_v28 = vsel %vm1291_vm1, %v4158_v10, 20.0 }
 0xc9e   :  { %v1295_v60 = vsel %vm322_vm2, %v1294_v28, inf  ;;  %v1296_v57 = vmin.f32 %v1292_v58, %v1293_v6 }
 0xca0   :  { %v1297_v5 = vmin.f32 %v1296_v57, %v1295_v60 }
 0xca2   :  { %v1298_v19 = vrot.slane %v1297_v5, 4 }
 0xca4   :  { %v1299_v48 = vmin.f32 %v1297_v5, %v1298_v19 }
 0xca6   :  { %v1300_v40 = vrot.slane %v1299_v48, 2 }
 0xca8   :  { %v1301_v30 = vmin.f32 %v1299_v48, %v1300_v40 }
 0xcaa   :  { %v1302_v34 = vrot.slane %v1301_v30, 1 }
 0xcac   :  { %v1303_v42 = vmin.f32 %v1301_v30, %v1302_v34 }
 0xcae   :  { %vm1304_vm4 = vcmp.eq.f32.partialorder %v4152_v8, %v1303_v42  ;;  %vm1305_vm7 = vcmp.eq.f32.partialorder %v4155_v9, %v1303_v42  ;;  %vm1306_vm8 = vcmp.eq.f32.partialorder %v4158_v10, %v1303_v42  ;;  %vm1395_vm9 = vcmp.eq.f32.partialorder %v4246_v63, %v1303_v42 }
 0xcaf   :  { %v4552_v27 = vsel %vm1304_vm4, 1.0, %v6289_v20  ;;  %v4555_v39 = vsel %vm1305_vm7, 1.0, %v6289_v20  ;;  %v4558_v32 = vsel %vm1306_vm8, 1.0, %v6289_v20  ;;  %v3720_v29 = vsel %vm1395_vm9, 1.0, %v6289_v20 }
 0xcb0   :  { %6364 = vst [vmem:[#allocation11_spill] sm:$0xff] %v4552_v27  ;;  %v1313_v47 = vmul.f32 %v4552_v27, %v4534_v53  ;;  %v1314_v51 = vmul.f32 %v4555_v39, %v4530_v2  ;;  %v1315_v37 = vmul.f32 %v4558_v32, %v4528_v61  ;;  %v1340_v58 = vmul.f32 %v4552_v27, %v4508_v54 }
 0xcb1   :  { %6365 = vst [vmem:[#allocation12_spill] sm:$0xff] %v4555_v39  ;;  %v1341_v6 = vmul.f32 %v4555_v39, %v4505_v21  ;;  %v1398_v28 = vmul.f32 %v3720_v29, %v3719_v56  ;;  %v1399_v5 = vmul.f32 0.0, %v3720_v29  ;;  %v1342_v20 = vmul.f32 %v4558_v32, %v4502_v41 }
 0xcb2   :  { %6366 = vst [vmem:[#allocation13_spill] sm:$0xff] %v4558_v32  ;;  %v1316_v60 = vadd.f32 %v1314_v51, %v1313_v47  ;;  %v1317_v57 = vsel %vm322_vm2, %v1315_v37, 0.0  ;;  %v1343_v40 = vsel %vm164_vm5, %v1340_v58, 0.0  ;;  %vm1535_vm8 = vcmp.eq.s32.totalorder %v3956_v15, 5 }
 0xcb3   :  { %v4573_v19 = vadd.f32 %v1398_v28, %v4475_v3  ;;  %v1344_v30 = vsel %vm164_vm5, %v1341_v6, 0.0  ;;  %v4578_v34 = vadd.f32 %v1399_v5, %v4480_v26  ;;  %v1346_v29 = vsel %vm171_vm6, %v1342_v20, 0.0 }
 0xcb4   :  { %v1318_v48 = vadd.f32 %v1317_v57, %v1316_v60  ;;  %v1345_v56 = vadd.f32 %v1344_v30, %v1343_v40 }
 0xcb6   :  { %v1319_v42 = vrot.slane %v1318_v48, 4  ;;  %v1347_v37 = vadd.f32 %v1346_v29, %v1345_v56 }
 0xcb8   :  { %v1320_v47 = vadd.f32 %v1319_v42, %v1318_v48  ;;  %v1348_v60 = vrot.slane %v1347_v37, 4  ;;  %v1368_v42 = vsub.f32 %v4534_v53, %v4552_v27 }
 0xcba   :  { %v1321_v51 = vrot.slane %v1320_v47, 2  ;;  %v1349_v58 = vadd.f32 %v1348_v60, %v1347_v37 }
 0xcbc   :  { %v1322_v3 = vadd.f32 %v1321_v51, %v1320_v47  ;;  %v1350_v6 = vrot.slane %v1349_v58, 2  ;;  %v1370_v47 = vsub.f32 %v4528_v61, %v4558_v32  ;;  %v1369_v51 = vsub.f32 %v4530_v2, %v4555_v39 }
 0xcbe   :  { %v1323_v28 = vrot.slane %v1322_v3, 1  ;;  %v1351_v62 = vadd.f32 %v1350_v6, %v1349_v58 }
 0xcc0   :  { %v1324_v57 = vadd.f32 %v1323_v28, %v1322_v3  ;;  %v1352_v30 = vrot.slane %v1351_v62, 1 }
 0xcc2   :  { %3838 = vrcp.f32 %v1324_v57  ;;  %v1336_v43 = vand.u32 2147483648, %v1324_v57  ;;  %v1334_v40 = vand.u32 2147483647, %v1324_v57  ;;  %vm1330_vm11 = vweird.f32 %v1324_v57 }
 0xcc3   :  { %v1353_v37 = vadd.f32 %v1352_v30, %v1351_v62 }
 0xcc4   :  { %v1337_v20 = vor.u32 1.1754944e-38, %v1336_v43  ;;  %vm1335_vm13 = vcmp.eq.f32.partialorder %v1334_v40, 8.507059e+37 }
 0xcc8   :  { %v3839_v18 = vpop.eup %3838 }
 0xcc9   :  { %v1326_v26 = vmul.f32 %v3839_v18, %v1324_v57  ;;  %vm1331_vm10 = vweird.f32 %v3839_v18 }
 0xcca   :  { %vm1332_vm12 = vmor %vm1330_vm11, %vm1331_vm10 }
 0xccb   :  { %v1327_v5 = vsub.f32 1.0, %v1326_v26 }
 0xccd   :  { %v1328_v45 = vmul.f32 %v3839_v18, %v1327_v5 }
 0xccf   :  { %v1329_v48 = vadd.f32 %v3839_v18, %v1328_v45 }
 0xcd1   :  { %v1333_v56 = vsel %vm1332_vm12, %v3839_v18, %v1329_v48 }
 0xcd2   :  { %v1338_v29 = vsel %vm1335_vm13, %v1337_v20, %v1333_v56 }
 0xcd3   :  { %v4589_v3 = vmul.f32 %v1368_v42, %v1338_v29  ;;  %v4591_v45 = vmul.f32 %v1370_v47, %v1338_v29  ;;  %v4593_v28 = vmul.f32 %v1369_v51, %v1338_v29 }
 0xcd5   :  { %6367 = vst [vmem:[#allocation14_spill] sm:$0xff] %v4589_v3  ;;  %v1374_v43 = vmul.f32 %v4589_v3, %v1353_v37  ;;  %v1376_v53 = vmul.f32 %v4591_v45, %v1353_v37  ;;  %v1375_v18 = vmul.f32 %v4593_v28, %v1353_v37 }
 0xcd6   :  { %6368 = vst [vmem:[#allocation15_spill] sm:$0xff] %v4591_v45 }
 0xcd7   :  { %6369 = vst [vmem:[#allocation16_spill] sm:$0xff] %v4593_v28  ;;  %v4600_v61 = vsub.f32 %v4502_v41, %v1376_v53  ;;  %v4603_v2 = vsub.f32 %v4505_v21, %v1375_v18  ;;  %v4606_v62 = vsub.f32 %v4508_v54, %v1374_v43  ;;  %v4616_v41 = vadd.f32 %v4558_v32, %v4518_v49 }
 0xcd8   :  { %v4620_v21 = vadd.f32 %v4555_v39, %v4522_v22  ;;  %v4624_v54 = vadd.f32 %v4552_v27, %v4526_v55 }
 0xcd9   :  { %v1410_v60 = vsel %vm1407_vm14, %v4600_v61, 0.0  ;;  %v1409_v57 = vsel %vm1407_vm14, %v4603_v2, 0.0  ;;  %v1408_v58 = vsel %vm1407_vm14, %v4606_v62, 0.0  ;;  %vm1422_vm15 = vcmp.gt.f32.partialorder %v4616_v41, 0.5 }
 0xcda   :  { %v1417_v6 = vsel %vm171_vm6, %v1410_v60, 0.0  ;;  %v1414_v26 = vsel %vm164_vm5, %v1409_v57, 0.0  ;;  %v1411_v5 = vsel %vm164_vm5, %v1408_v58, 0.0  ;;  %vm1421_vm0 = vcmp.gt.f32.partialorder %v4620_v21, 0.5 }
 0xcdb   :  { %1418 = vadd.xlane.f32.xlu2 %v1417_v6  ;;  %1415 = vadd.xlane.f32.xlu1 %v1414_v26  ;;  %vm1420_vm1 = vcmp.gt.f32.partialorder %v4624_v54, 0.5 }
 0xcdc   :  { %1412 = vadd.xlane.f32.xlu0 %v1411_v5 }
 0xd4e   :  { %v4626_v40 = vpop.xlane.xlu2 %1418  ;;  %v4628_v48 = vpop.xlane.xlu1 %1415 }
 0xd4f   :  { %v1425_v30 = vand.u32 2147483647, %v4626_v40  ;;  %v1424_v20 = vand.u32 2147483647, %v4628_v48  ;;  %v4632_v42 = vpop.xlane.xlu0 %1412 }
 0xd50   :  { %v1423_v49 = vand.u32 2147483647, %v4632_v42 }
 0xd51   :  { %v1428_v22 = vsel %vm1422_vm15, -1.0, %v1425_v30  ;;  %v1427_v56 = vsel %vm1421_vm0, -1.0, %v1424_v20 }
 0xd52   :  { %v1429_v55 = vsel %vm322_vm2, %v1428_v22, -inf  ;;  %v1426_v47 = vsel %vm1420_vm1, -1.0, %v1423_v49  ;;  %vm1556_vm1 = vcmp.eq.s32.totalorder %v3961_v17, 6 }
 0xd53   :  { %v1430_v51 = vmax.f32 %v1426_v47, %v1427_v56 }
 0xd55   :  { %v1431_v29 = vmax.f32 %v1430_v51, %v1429_v55 }
 0xd57   :  { %v1432_v37 = vrot.slane %v1431_v29, 4 }
 0xd59   :  { %v1433_v43 = vmax.f32 %v1431_v29, %v1432_v37 }
 0xd5b   :  { %v1434_v53 = vrot.slane %v1433_v43, 2 }
 0xd5d   :  { %v1435_v18 = vmax.f32 %v1433_v43, %v1434_v53 }
 0xd5f   :  { %v1436_v60 = vrot.slane %v1435_v18, 1 }
 0xd61   :  { %v1437_v57 = vmax.f32 %v1435_v18, %v1436_v60 }
 0xd63   :  { %vm1438_vm3 = vcmp.eq.f32.partialorder %v1426_v47, %v1437_v57  ;;  %vm1439_vm4 = vcmp.eq.f32.partialorder %v1427_v56, %v1437_v57  ;;  %vm1440_vm7 = vcmp.eq.f32.partialorder %v1428_v22, %v1437_v57  ;;  %v6370_v56 = vmov 0.0  }
 0xd64   :  { %v1441_v58 = vsel %vm1438_vm3, %v4152_v8, 20.0  ;;  %v1442_v6 = vsel %vm1439_vm4, %v4155_v9, 20.0  ;;  %v1443_v26 = vsel %vm1440_vm7, %v4158_v10, 20.0  ;;  %v3724_v22 = vsel %vm1535_vm8, 1.0, %v6370_v56 }
 0xd65   :  { %v1444_v5 = vsel %vm322_vm2, %v1443_v26, inf  ;;  %v1445_v30 = vmin.f32 %v1441_v58, %v1442_v6 }
 0xd67   :  { %v1446_v20 = vmin.f32 %v1445_v30, %v1444_v5 }
 0xd69   :  { %v1447_v49 = vrot.slane %v1446_v20, 4 }
 0xd6b   :  { %v1448_v55 = vmin.f32 %v1446_v20, %v1447_v49 }
 0xd6d   :  { %v1449_v51 = vrot.slane %v1448_v55, 2 }
 0xd6f   :  { %v1450_v29 = vmin.f32 %v1448_v55, %v1449_v51 }
 0xd71   :  { %v1451_v37 = vrot.slane %v1450_v29, 1 }
 0xd73   :  { %v1452_v47 = vmin.f32 %v1450_v29, %v1451_v37 }
 0xd75   :  { %vm1453_vm9 = vcmp.eq.f32.partialorder %v4152_v8, %v1452_v47  ;;  %vm1454_vm10 = vcmp.eq.f32.partialorder %v4155_v9, %v1452_v47  ;;  %vm1455_vm11 = vcmp.eq.f32.partialorder %v4158_v10, %v1452_v47  ;;  %vm1544_vm12 = vcmp.eq.f32.partialorder %v4246_v63, %v1452_v47 }
 0xd76   :  { %v4650_v43 = vsel %vm1453_vm9, 1.0, %v6370_v56  ;;  %v4653_v53 = vsel %vm1454_vm10, 1.0, %v6370_v56  ;;  %v4656_v18 = vsel %vm1455_vm11, 1.0, %v6370_v56  ;;  %v3725_v60 = vsel %vm1544_vm12, 1.0, %v6370_v56 }
 0xd77   :  { %6371 = vst [vmem:[#allocation17_spill] sm:$0xff] %v4650_v43  ;;  %v1462_v57 = vmul.f32 %v4650_v43, %v4632_v42  ;;  %v1463_v58 = vmul.f32 %v4653_v53, %v4628_v48  ;;  %v1464_v6 = vmul.f32 %v4656_v18, %v4626_v40  ;;  %v1489_v26 = vmul.f32 %v4650_v43, %v4606_v62 }
 0xd78   :  { %6372 = vst [vmem:[#allocation18_spill] sm:$0xff] %v4653_v53  ;;  %v1490_v5 = vmul.f32 %v4653_v53, %v4603_v2  ;;  %v1547_v30 = vmul.f32 %v3725_v60, %v3724_v22  ;;  %v1548_v55 = vmul.f32 0.0, %v3725_v60  ;;  %v1491_v3 = vmul.f32 %v4656_v18, %v4600_v61 }
 0xd79   :  { %6373 = vst [vmem:[#allocation19_spill] sm:$0xff] %v4656_v18  ;;  %v1465_v20 = vadd.f32 %v1463_v58, %v1462_v57  ;;  %v1466_v49 = vsel %vm322_vm2, %v1464_v6, 0.0  ;;  %v1492_v37 = vsel %vm164_vm5, %v1489_v26, 0.0  ;;  %vm1684_vm11 = vcmp.eq.s32.totalorder %v3956_v15, 6 }
 0xd7a   :  { %v4671_v51 = vadd.f32 %v1547_v30, %v4573_v19  ;;  %v1493_v47 = vsel %vm164_vm5, %v1490_v5, 0.0  ;;  %v4676_v45 = vadd.f32 %v1548_v55, %v4578_v34  ;;  %v1495_v60 = vsel %vm171_vm6, %v1491_v3, 0.0 }
 0xd7b   :  { %v1467_v29 = vadd.f32 %v1466_v49, %v1465_v20  ;;  %v1494_v22 = vadd.f32 %v1493_v47, %v1492_v37  ;;  %v1517_v47 = vsub.f32 %v4632_v42, %v4650_v43 }
 0xd7d   :  { %v1468_v28 = vrot.slane %v1467_v29, 4  ;;  %v1496_v6 = vadd.f32 %v1495_v60, %v1494_v22 }
 0xd7f   :  { %v1469_v57 = vadd.f32 %v1468_v28, %v1467_v29  ;;  %v1497_v20 = vrot.slane %v1496_v6, 4 }
 0xd81   :  { %v1470_v58 = vrot.slane %v1469_v57, 2  ;;  %v1498_v26 = vadd.f32 %v1497_v20, %v1496_v6 }
 0xd83   :  { %v1471_v19 = vadd.f32 %v1470_v58, %v1469_v57  ;;  %v1499_v5 = vrot.slane %v1498_v26, 2  ;;  %v1519_v57 = vsub.f32 %v4626_v40, %v4656_v18  ;;  %v1518_v58 = vsub.f32 %v4628_v48, %v4653_v53 }
 0xd85   :  { %v1472_v30 = vrot.slane %v1471_v19, 1  ;;  %v1500_v39 = vadd.f32 %v1499_v5, %v1498_v26 }
 0xd87   :  { %v1473_v49 = vadd.f32 %v1472_v30, %v1471_v19  ;;  %v1501_v29 = vrot.slane %v1500_v39, 1 }
 0xd89   :  { %3840 = vrcp.f32 %v1473_v49  ;;  %v1485_v27 = vand.u32 2147483648, %v1473_v49  ;;  %v1483_v37 = vand.u32 2147483647, %v1473_v49  ;;  %vm1479_vm14 = vweird.f32 %v1473_v49 }
 0xd8a   :  { %v1502_v6 = vadd.f32 %v1501_v29, %v1500_v39 }
 0xd8b   :  { %v1486_v3 = vor.u32 1.1754944e-38, %v1485_v27  ;;  %vm1484_vm0 = vcmp.eq.f32.partialorder %v1483_v37, 8.507059e+37 }
 0xd8f   :  { %v3841_v32 = vpop.eup %3840 }
 0xd90   :  { %v1475_v34 = vmul.f32 %v3841_v32, %v1473_v49  ;;  %vm1480_vm13 = vweird.f32 %v3841_v32 }
 0xd91   :  { %vm1481_vm15 = vmor %vm1479_vm14, %vm1480_vm13 }
 0xd92   :  { %v1476_v55 = vsub.f32 1.0, %v1475_v34 }
 0xd94   :  { %v1477_v50 = vmul.f32 %v3841_v32, %v1476_v55 }
 0xd96   :  { %v1478_v28 = vadd.f32 %v3841_v32, %v1477_v50 }
 0xd98   :  { %v1482_v22 = vsel %vm1481_vm15, %v3841_v32, %v1478_v28 }
 0xd99   :  { %v1487_v60 = vsel %vm1484_vm0, %v1486_v3, %v1482_v22 }
 0xd9a   :  { %v4687_v19 = vmul.f32 %v1517_v47, %v1487_v60  ;;  %v4689_v50 = vmul.f32 %v1519_v57, %v1487_v60  ;;  %v4691_v30 = vmul.f32 %v1518_v58, %v1487_v60 }
 0xd9c   :  { %6374 = vst [vmem:[#allocation20_spill] sm:$0xff] %v4687_v19  ;;  %v1523_v27 = vmul.f32 %v4687_v19, %v1502_v6  ;;  %v1525_v42 = vmul.f32 %v4689_v50, %v1502_v6  ;;  %v1524_v32 = vmul.f32 %v4691_v30, %v1502_v6 }
 0xd9d   :  { %6375 = vst [vmem:[#allocation21_spill] sm:$0xff] %v4689_v50 }
 0xd9e   :  { %6376 = vst [vmem:[#allocation22_spill] sm:$0xff] %v4691_v30  ;;  %v4698_v40 = vsub.f32 %v4600_v61, %v1525_v42  ;;  %v4701_v48 = vsub.f32 %v4603_v2, %v1524_v32  ;;  %v4704_v39 = vsub.f32 %v4606_v62, %v1523_v27  ;;  %v4714_v61 = vadd.f32 %v4656_v18, %v4616_v41 }
 0xd9f   :  { %v4718_v2 = vadd.f32 %v4653_v53, %v4620_v21  ;;  %v4722_v62 = vadd.f32 %v4650_v43, %v4624_v54 }
 0xda0   :  { %v1559_v20 = vsel %vm1556_vm1, %v4698_v40, 0.0  ;;  %v1558_v49 = vsel %vm1556_vm1, %v4701_v48, 0.0  ;;  %v1557_v26 = vsel %vm1556_vm1, %v4704_v39, 0.0  ;;  %vm1571_vm3 = vcmp.gt.f32.partialorder %v4714_v61, 0.5 }
 0xda1   :  { %v1566_v5 = vsel %vm171_vm6, %v1559_v20, 0.0  ;;  %v1563_v34 = vsel %vm164_vm5, %v1558_v49, 0.0  ;;  %v1560_v55 = vsel %vm164_vm5, %v1557_v26, 0.0  ;;  %vm1570_vm4 = vcmp.gt.f32.partialorder %v4718_v2, 0.5 }
 0xda2   :  { %1567 = vadd.xlane.f32.xlu2 %v1566_v5  ;;  %1564 = vadd.xlane.f32.xlu1 %v1563_v34  ;;  %vm1569_vm7 = vcmp.gt.f32.partialorder %v4722_v62, 0.5 }
 0xda3   :  { %1561 = vadd.xlane.f32.xlu0 %v1560_v55 }
 0xe15   :  { %v4724_v37 = vpop.xlane.xlu2 %1567  ;;  %v4726_v28 = vpop.xlane.xlu1 %1564 }
 0xe16   :  { %v1574_v29 = vand.u32 2147483647, %v4724_v37  ;;  %v1573_v3 = vand.u32 2147483647, %v4726_v28  ;;  %v4730_v47 = vpop.xlane.xlu0 %1561 }
 0xe17   :  { %v1572_v41 = vand.u32 2147483647, %v4730_v47 }
 0xe18   :  { %v1577_v21 = vsel %vm1571_vm3, -1.0, %v1574_v29  ;;  %v1576_v22 = vsel %vm1570_vm4, -1.0, %v1573_v3 }
 0xe19   :  { %v1578_v54 = vsel %vm322_vm2, %v1577_v21, -inf  ;;  %v1575_v57 = vsel %vm1569_vm7, -1.0, %v1572_v41  ;;  %vm1705_vm7 = vcmp.eq.s32.totalorder %v3961_v17, 7 }
 0xe1a   :  { %v1579_v58 = vmax.f32 %v1575_v57, %v1576_v22 }
 0xe1c   :  { %v1580_v60 = vmax.f32 %v1579_v58, %v1578_v54 }
 0xe1e   :  { %v1581_v6 = vrot.slane %v1580_v60, 4 }
 0xe20   :  { %v1582_v27 = vmax.f32 %v1580_v60, %v1581_v6 }
 0xe22   :  { %v1583_v42 = vrot.slane %v1582_v27, 2 }
 0xe24   :  { %v1584_v32 = vmax.f32 %v1582_v27, %v1583_v42 }
 0xe26   :  { %v1585_v20 = vrot.slane %v1584_v32, 1 }
 0xe28   :  { %v1586_v49 = vmax.f32 %v1584_v32, %v1585_v20 }
 0xe2a   :  { %vm1587_vm8 = vcmp.eq.f32.partialorder %v1575_v57, %v1586_v49  ;;  %vm1588_vm9 = vcmp.eq.f32.partialorder %v1576_v22, %v1586_v49  ;;  %vm1589_vm10 = vcmp.eq.f32.partialorder %v1577_v21, %v1586_v49  ;;  %v3729_v21 = vsel %vm1684_vm11, 1.0, %v6370_v56 }
 0xe2b   :  { %v1590_v26 = vsel %vm1587_vm8, %v4152_v8, 20.0  ;;  %v1591_v5 = vsel %vm1588_vm9, %v4155_v9, 20.0  ;;  %v1592_v34 = vsel %vm1589_vm10, %v4158_v10, 20.0 }
 0xe2c   :  { %v1593_v55 = vsel %vm322_vm2, %v1592_v34, inf  ;;  %v1594_v29 = vmin.f32 %v1590_v26, %v1591_v5 }
 0xe2e   :  { %v1595_v3 = vmin.f32 %v1594_v29, %v1593_v55 }
 0xe30   :  { %v1596_v41 = vrot.slane %v1595_v3, 4 }
 0xe32   :  { %v1597_v54 = vmin.f32 %v1595_v3, %v1596_v41 }
 0xe34   :  { %v1598_v58 = vrot.slane %v1597_v54, 2 }
 0xe36   :  { %v1599_v60 = vmin.f32 %v1597_v54, %v1598_v58 }
 0xe38   :  { %v1600_v6 = vrot.slane %v1599_v60, 1 }
 0xe3a   :  { %v1601_v57 = vmin.f32 %v1599_v60, %v1600_v6 }
 0xe3c   :  { %vm1602_vm12 = vcmp.eq.f32.partialorder %v4152_v8, %v1601_v57  ;;  %vm1603_vm13 = vcmp.eq.f32.partialorder %v4155_v9, %v1601_v57  ;;  %vm1604_vm14 = vcmp.eq.f32.partialorder %v4158_v10, %v1601_v57  ;;  %vm1693_vm15 = vcmp.eq.f32.partialorder %v4246_v63, %v1601_v57 }
 0xe3d   :  { %v4748_v22 = vsel %vm1602_vm12, 1.0, %v6370_v56  ;;  %v4751_v27 = vsel %vm1603_vm13, 1.0, %v6370_v56  ;;  %v4754_v42 = vsel %vm1604_vm14, 1.0, %v6370_v56  ;;  %v3730_v32 = vsel %vm1693_vm15, 1.0, %v6370_v56 }
 0xe3e   :  { %6377 = vst [vmem:[#allocation23_spill] sm:$0xff] %v4748_v22  ;;  %v1611_v20 = vmul.f32 %v4748_v22, %v4730_v47  ;;  %v1612_v49 = vmul.f32 %v4751_v27, %v4726_v28  ;;  %v1613_v26 = vmul.f32 %v4754_v42, %v4724_v37  ;;  %v1638_v5 = vmul.f32 %v4748_v22, %v4704_v39 }
 0xe3f   :  { %6378 = vst [vmem:[#allocation24_spill] sm:$0xff] %v4751_v27  ;;  %v1639_v34 = vmul.f32 %v4751_v27, %v4701_v48  ;;  %v1696_v55 = vmul.f32 %v3730_v32, %v3729_v21  ;;  %v1697_v41 = vmul.f32 0.0, %v3730_v32  ;;  %v1640_v30 = vmul.f32 %v4754_v42, %v4698_v40 }
 0xe40   :  { %6379 = vst [vmem:[#allocation25_spill] sm:$0xff] %v4754_v42  ;;  %v1614_v29 = vadd.f32 %v1612_v49, %v1611_v20  ;;  %v1615_v3 = vsel %vm322_vm2, %v1613_v26, 0.0  ;;  %v1641_v60 = vsel %vm164_vm5, %v1638_v5, 0.0  ;;  %vm1833_vm14 = vcmp.eq.s32.totalorder %v3956_v15, 7 }
 0xe41   :  { %v4769_v54 = vadd.f32 %v1696_v55, %v4671_v51  ;;  %v1642_v6 = vsel %vm164_vm5, %v1639_v34, 0.0  ;;  %v4774_v57 = vadd.f32 %v1697_v41, %v4676_v45  ;;  %v1644_v32 = vsel %vm171_vm6, %v1640_v30, 0.0 }
 0xe42   :  { %v1616_v58 = vadd.f32 %v1615_v3, %v1614_v29  ;;  %v1643_v21 = vadd.f32 %v1642_v6, %v1641_v60  ;;  %v1666_v6 = vsub.f32 %v4730_v47, %v4748_v22 }
 0xe44   :  { %v1617_v50 = vrot.slane %v1616_v58, 4  ;;  %v1645_v26 = vadd.f32 %v1644_v32, %v1643_v21 }
 0xe46   :  { %v1618_v20 = vadd.f32 %v1617_v50, %v1616_v58  ;;  %v1646_v29 = vrot.slane %v1645_v26, 4 }
 0xe48   :  { %v1619_v49 = vrot.slane %v1618_v20, 2  ;;  %v1647_v5 = vadd.f32 %v1646_v29, %v1645_v26 }
 0xe4a   :  { %v1620_v51 = vadd.f32 %v1619_v49, %v1618_v20  ;;  %v1648_v34 = vrot.slane %v1647_v5, 2  ;;  %v1668_v20 = vsub.f32 %v4724_v37, %v4754_v42  ;;  %v1667_v49 = vsub.f32 %v4726_v28, %v4751_v27 }
 0xe4c   :  { %v1621_v55 = vrot.slane %v1620_v51, 1  ;;  %v1649_v18 = vadd.f32 %v1648_v34, %v1647_v5 }
 0xe4e   :  { %v1622_v3 = vadd.f32 %v1621_v55, %v1620_v51  ;;  %v1650_v58 = vrot.slane %v1649_v18, 1 }
 0xe50   :  { %3842 = vrcp.f32 %v1622_v3  ;;  %v1634_v53 = vand.u32 2147483648, %v1622_v3  ;;  %v1632_v60 = vand.u32 2147483647, %v1622_v3  ;;  %vm1628_vm1 = vweird.f32 %v1622_v3 }
 0xe51   :  { %v1651_v26 = vadd.f32 %v1650_v58, %v1649_v18 }
 0xe52   :  { %v1635_v30 = vor.u32 1.1754944e-38, %v1634_v53  ;;  %vm1633_vm4 = vcmp.eq.f32.partialorder %v1632_v60, 8.507059e+37 }
 0xe56   :  { %v3843_v19 = vpop.eup %3842 }
 0xe57   :  { %v1624_v45 = vmul.f32 %v3843_v19, %v1622_v3  ;;  %vm1629_vm0 = vweird.f32 %v3843_v19 }
 0xe58   :  { %vm1630_vm3 = vmor %vm1628_vm1, %vm1629_vm0 }
 0xe59   :  { %v1625_v41 = vsub.f32 1.0, %v1624_v45 }
 0xe5b   :  { %v1626_v43 = vmul.f32 %v3843_v19, %v1625_v41 }
 0xe5d   :  { %v1627_v50 = vadd.f32 %v3843_v19, %v1626_v43 }
 0xe5f   :  { %v1631_v21 = vsel %vm1630_vm3, %v3843_v19, %v1627_v50 }
 0xe60   :  { %v1636_v32 = vsel %vm1633_vm4, %v1635_v30, %v1631_v21 }
 0xe61   :  { %v4785_v51 = vmul.f32 %v1666_v6, %v1636_v32  ;;  %v4787_v43 = vmul.f32 %v1668_v20, %v1636_v32  ;;  %v4789_v55 = vmul.f32 %v1667_v49, %v1636_v32 }
 0xe63   :  { %6380 = vst [vmem:[#allocation26_spill] sm:$0xff] %v4785_v51  ;;  %v1672_v53 = vmul.f32 %v4785_v51, %v1651_v26  ;;  %v1674_v47 = vmul.f32 %v4787_v43, %v1651_v26  ;;  %v1673_v19 = vmul.f32 %v4789_v55, %v1651_v26 }
 0xe64   :  { %6381 = vst [vmem:[#allocation27_spill] sm:$0xff] %v4787_v43 }
 0xe65   :  { %6382 = vst [vmem:[#allocation28_spill] sm:$0xff] %v4789_v55  ;;  %v4796_v37 = vsub.f32 %v4698_v40, %v1674_v47  ;;  %v4799_v28 = vsub.f32 %v4701_v48, %v1673_v19  ;;  %v4802_v18 = vsub.f32 %v4704_v39, %v1672_v53  ;;  %v4812_v40 = vadd.f32 %v4754_v42, %v4714_v61 }
 0xe66   :  { %v4816_v48 = vadd.f32 %v4751_v27, %v4718_v2  ;;  %v4820_v39 = vadd.f32 %v4748_v22, %v4722_v62 }
 0xe67   :  { %v1708_v29 = vsel %vm1705_vm7, %v4796_v37, 0.0  ;;  %v1707_v3 = vsel %vm1705_vm7, %v4799_v28, 0.0  ;;  %v1706_v5 = vsel %vm1705_vm7, %v4802_v18, 0.0  ;;  %vm1720_vm8 = vcmp.gt.f32.partialorder %v4812_v40, 0.5 }
 0xe68   :  { %v1715_v34 = vsel %vm171_vm6, %v1708_v29, 0.0  ;;  %v1712_v45 = vsel %vm164_vm5, %v1707_v3, 0.0  ;;  %v1709_v41 = vsel %vm164_vm5, %v1706_v5, 0.0  ;;  %vm1719_vm9 = vcmp.gt.f32.partialorder %v4816_v48, 0.5 }
 0xe69   :  { %1716 = vadd.xlane.f32.xlu2 %v1715_v34  ;;  %1713 = vadd.xlane.f32.xlu1 %v1712_v45  ;;  %vm1718_vm10 = vcmp.gt.f32.partialorder %v4820_v39, 0.5 }
 0xe6a   :  { %1710 = vadd.xlane.f32.xlu0 %v1709_v41 }
 0xedc   :  { %v4822_v60 = vpop.xlane.xlu2 %1716  ;;  %v4824_v50 = vpop.xlane.xlu1 %1713 }
 0xedd   :  { %v1723_v58 = vand.u32 2147483647, %v4822_v60  ;;  %v1722_v30 = vand.u32 2147483647, %v4824_v50  ;;  %v4828_v6 = vpop.xlane.xlu0 %1710 }
 0xede   :  { %v1721_v61 = vand.u32 2147483647, %v4828_v6 }
 0xedf   :  { %v1726_v2 = vsel %vm1720_vm8, -1.0, %v1723_v58  ;;  %v1725_v21 = vsel %vm1719_vm9, -1.0, %v1722_v30 }
 0xee0   :  { %v1727_v62 = vsel %vm322_vm2, %v1726_v2, -inf  ;;  %v1724_v20 = vsel %vm1718_vm10, -1.0, %v1721_v61  ;;  %vm1854_vm10 = vcmp.eq.s32.totalorder %v3961_v17, 8 }
 0xee1   :  { %v1728_v49 = vmax.f32 %v1724_v20, %v1725_v21 }
 0xee3   :  { %v1729_v32 = vmax.f32 %v1728_v49, %v1727_v62 }
 0xee5   :  { %v1730_v26 = vrot.slane %v1729_v32, 4 }
 0xee7   :  { %v1731_v53 = vmax.f32 %v1729_v32, %v1730_v26 }
 0xee9   :  { %v1732_v47 = vrot.slane %v1731_v53, 2 }
 0xeeb   :  { %v1733_v19 = vmax.f32 %v1731_v53, %v1732_v47 }
 0xeed   :  { %v1734_v29 = vrot.slane %v1733_v19, 1 }
 0xeef   :  { %v1735_v3 = vmax.f32 %v1733_v19, %v1734_v29 }
 0xef1   :  { %vm1736_vm11 = vcmp.eq.f32.partialorder %v1724_v20, %v1735_v3  ;;  %vm1737_vm12 = vcmp.eq.f32.partialorder %v1725_v21, %v1735_v3  ;;  %vm1738_vm13 = vcmp.eq.f32.partialorder %v1726_v2, %v1735_v3  ;;  %v3734_v2 = vsel %vm1833_vm14, 1.0, %v6370_v56 }
 0xef2   :  { %v1739_v5 = vsel %vm1736_vm11, %v4152_v8, 20.0  ;;  %v1740_v34 = vsel %vm1737_vm12, %v4155_v9, 20.0  ;;  %v1741_v45 = vsel %vm1738_vm13, %v4158_v10, 20.0 }
 0xef3   :  { %v1742_v41 = vsel %vm322_vm2, %v1741_v45, inf  ;;  %v1743_v58 = vmin.f32 %v1739_v5, %v1740_v34 }
 0xef5   :  { %v1744_v30 = vmin.f32 %v1743_v58, %v1742_v41 }
 0xef7   :  { %v1745_v61 = vrot.slane %v1744_v30, 4 }
 0xef9   :  { %v1746_v62 = vmin.f32 %v1744_v30, %v1745_v61 }
 0xefb   :  { %v1747_v49 = vrot.slane %v1746_v62, 2 }
 0xefd   :  { %v1748_v32 = vmin.f32 %v1746_v62, %v1747_v49 }
 0xeff   :  { %v1749_v26 = vrot.slane %v1748_v32, 1 }
 0xf01   :  { %v1750_v20 = vmin.f32 %v1748_v32, %v1749_v26 }
 0xf03   :  { %vm1751_vm15 = vcmp.eq.f32.partialorder %v4152_v8, %v1750_v20  ;;  %vm1752_vm0 = vcmp.eq.f32.partialorder %v4155_v9, %v1750_v20  ;;  %vm1753_vm1 = vcmp.eq.f32.partialorder %v4158_v10, %v1750_v20  ;;  %vm1842_vm3 = vcmp.eq.f32.partialorder %v4246_v63, %v1750_v20 }
 0xf04   :  { %v4846_v21 = vsel %vm1751_vm15, 1.0, %v6370_v56  ;;  %v4849_v53 = vsel %vm1752_vm0, 1.0, %v6370_v56  ;;  %v4852_v15 = vsel %vm1753_vm1, 1.0, %v6370_v56  ;;  %v3735_v47 = vsel %vm1842_vm3, 1.0, %v6370_v56 }
 0xf05   :  { %6383 = vst [vmem:[#allocation29_spill] sm:$0xff] %v4846_v21  ;;  %v1760_v19 = vmul.f32 %v4846_v21, %v4828_v6  ;;  %v1761_v29 = vmul.f32 %v4849_v53, %v4824_v50  ;;  %v1762_v3 = vmul.f32 %v4852_v15, %v4822_v60  ;;  %v1787_v5 = vmul.f32 %v4846_v21, %v4802_v18 }
 0xf06   :  { %6384 = vst [vmem:[#allocation30_spill] sm:$0xff] %v4849_v53  ;;  %v1788_v34 = vmul.f32 %v4849_v53, %v4799_v28  ;;  %v1845_v45 = vmul.f32 %v3735_v47, %v3734_v2  ;;  %v1846_v30 = vmul.f32 0.0, %v3735_v47  ;;  %v1789_v43 = vmul.f32 %v4852_v15, %v4796_v37 }
 0xf07   :  { %6385 = vst [vmem:[#allocation31_spill] sm:$0xff] %v4852_v15  ;;  %v1763_v41 = vadd.f32 %v1761_v29, %v1760_v19  ;;  %v1764_v58 = vsel %vm322_vm2, %v1762_v3, 0.0  ;;  %v1790_v49 = vsel %vm164_vm5, %v1787_v5, 0.0  ;;  %vm1983_vm1 = vcmp.eq.s32.totalorder %v3959_v16, 8 }
 0xf08   :  { %v4867_v61 = vadd.f32 %v1845_v45, %v4769_v54  ;;  %v1791_v32 = vsel %vm164_vm5, %v1788_v34, 0.0  ;;  %v4872_v26 = vadd.f32 %v1846_v30, %v4774_v57  ;;  %v1793_v47 = vsel %vm171_vm6, %v1789_v43, 0.0 }
 0xf09   :  { %v1765_v62 = vadd.f32 %v1764_v58, %v1763_v41  ;;  %v1792_v2 = vadd.f32 %v1791_v32, %v1790_v49 }
 0xf0b   :  { %v1766_v20 = vrot.slane %v1765_v62, 4  ;;  %v1794_v3 = vadd.f32 %v1793_v47, %v1792_v2 }
 0xf0d   :  { %v1767_v19 = vadd.f32 %v1766_v20, %v1765_v62  ;;  %v1795_v41 = vrot.slane %v1794_v3, 4  ;;  %v1815_v20 = vsub.f32 %v4828_v6, %v4846_v21 }
 0xf0f   :  { %v1768_v29 = vrot.slane %v1767_v19, 2  ;;  %v1796_v5 = vadd.f32 %v1795_v41, %v1794_v3 }
 0xf11   :  { %v1769_v54 = vadd.f32 %v1768_v29, %v1767_v19  ;;  %v1797_v34 = vrot.slane %v1796_v5, 2  ;;  %v1817_v19 = vsub.f32 %v4822_v60, %v4852_v15  ;;  %v1816_v29 = vsub.f32 %v4824_v50, %v4849_v53 }
 0xf13   :  { %v1770_v45 = vrot.slane %v1769_v54, 1  ;;  %v1798_v51 = vadd.f32 %v1797_v34, %v1796_v5 }
 0xf15   :  { %v1771_v58 = vadd.f32 %v1770_v45, %v1769_v54  ;;  %v1799_v32 = vrot.slane %v1798_v51, 1 }
 0xf17   :  { %3844 = vrcp.f32 %v1771_v58  ;;  %v1783_v42 = vand.u32 2147483648, %v1771_v58  ;;  %v1781_v49 = vand.u32 2147483647, %v1771_v58  ;;  %vm1777_vm7 = vweird.f32 %v1771_v58 }
 0xf18   :  { %v1800_v3 = vadd.f32 %v1799_v32, %v1798_v51 }
 0xf19   :  { %v1784_v43 = vor.u32 1.1754944e-38, %v1783_v42  ;;  %vm1782_vm9 = vcmp.eq.f32.partialorder %v1781_v49, 8.507059e+37 }
 0xf1d   :  { %v3845_v55 = vpop.eup %3844 }
 0xf1e   :  { %v1773_v57 = vmul.f32 %v3845_v55, %v1771_v58  ;;  %vm1778_vm4 = vweird.f32 %v3845_v55 }
 0xf1f   :  { %vm1779_vm8 = vmor %vm1777_vm7, %vm1778_vm4 }
 0xf20   :  { %v1774_v30 = vsub.f32 1.0, %v1773_v57 }
 0xf22   :  { %v1775_v27 = vmul.f32 %v3845_v55, %v1774_v30 }
 0xf24   :  { %v1776_v62 = vadd.f32 %v3845_v55, %v1775_v27 }
 0xf26   :  { %v1780_v2 = vsel %vm1779_vm8, %v3845_v55, %v1776_v62 }
 0xf27   :  { %v1785_v47 = vsel %vm1782_vm9, %v1784_v43, %v1780_v2 }
 0xf28   :  { %v4883_v54 = vmul.f32 %v1815_v20, %v1785_v47  ;;  %v4885_v27 = vmul.f32 %v1817_v19, %v1785_v47  ;;  %v4887_v45 = vmul.f32 %v1816_v29, %v1785_v47 }
 0xf2a   :  { %6386 = vst [vmem:[#allocation32_spill] sm:$0xff] %v4883_v54  ;;  %v1821_v42 = vmul.f32 %v4883_v54, %v1800_v3  ;;  %v1823_v6 = vmul.f32 %v4885_v27, %v1800_v3  ;;  %v1822_v55 = vmul.f32 %v4887_v45, %v1800_v3 }
 0xf2b   :  { %6387 = vst [vmem:[#allocation33_spill] sm:$0xff] %v4885_v27 }
 0xf2c   :  { %6388 = vst [vmem:[#allocation34_spill] sm:$0xff] %v4887_v45  ;;  %v4894_v60 = vsub.f32 %v4796_v37, %v1823_v6  ;;  %v4897_v50 = vsub.f32 %v4799_v28, %v1822_v55  ;;  %v4900_v51 = vsub.f32 %v4802_v18, %v1821_v42  ;;  %v4910_v37 = vadd.f32 %v4852_v15, %v4812_v40 }
 0xf2d   :  { %v4914_v28 = vadd.f32 %v4849_v53, %v4816_v48  ;;  %v4918_v18 = vadd.f32 %v4846_v21, %v4820_v39 }
 0xf2e   :  { %v1857_v41 = vsel %vm1854_vm10, %v4894_v60, 0.0  ;;  %v1856_v58 = vsel %vm1854_vm10, %v4897_v50, 0.0  ;;  %v1855_v5 = vsel %vm1854_vm10, %v4900_v51, 0.0  ;;  %vm1869_vm11 = vcmp.gt.f32.partialorder %v4910_v37, 0.5 }
 0xf2f   :  { %v1864_v34 = vsel %vm171_vm6, %v1857_v41, 0.0  ;;  %v1861_v57 = vsel %vm164_vm5, %v1856_v58, 0.0  ;;  %v1858_v30 = vsel %vm164_vm5, %v1855_v5, 0.0  ;;  %vm1868_vm12 = vcmp.gt.f32.partialorder %v4914_v28, 0.5 }
 0xf30   :  { %1865 = vadd.xlane.f32.xlu2 %v1864_v34  ;;  %1862 = vadd.xlane.f32.xlu1 %v1861_v57  ;;  %vm1867_vm13 = vcmp.gt.f32.partialorder %v4918_v18, 0.5 }
 0xf31   :  { %1859 = vadd.xlane.f32.xlu0 %v1858_v30 }
 0xfa3   :  { %v4920_v49 = vpop.xlane.xlu2 %1865  ;;  %v4922_v62 = vpop.xlane.xlu1 %1862 }
 0xfa4   :  { %v1872_v32 = vand.u32 2147483647, %v4920_v49  ;;  %v1871_v43 = vand.u32 2147483647, %v4922_v62  ;;  %v4926_v20 = vpop.xlane.xlu0 %1859 }
 0xfa5   :  { %v1870_v40 = vand.u32 2147483647, %v4926_v20 }
 0xfa6   :  { %v1875_v48 = vsel %vm1869_vm11, -1.0, %v1872_v32  ;;  %v1874_v2 = vsel %vm1868_vm12, -1.0, %v1871_v43 }
 0xfa7   :  { %v1876_v39 = vsel %vm322_vm2, %v1875_v48, -inf  ;;  %v1873_v19 = vsel %vm1867_vm13, -1.0, %v1870_v40  ;;  %vm2003_vm13 = vcmp.eq.s32.totalorder %v3961_v17, 9 }
 0xfa8   :  { %v1877_v29 = vmax.f32 %v1873_v19, %v1874_v2 }
 0xfaa   :  { %v1878_v47 = vmax.f32 %v1877_v29, %v1876_v39 }
 0xfac   :  { %v1879_v3 = vrot.slane %v1878_v47, 4 }
 0xfae   :  { %v1880_v42 = vmax.f32 %v1878_v47, %v1879_v3 }
 0xfb0   :  { %v1881_v6 = vrot.slane %v1880_v42, 2 }
 0xfb2   :  { %v1882_v55 = vmax.f32 %v1880_v42, %v1881_v6 }
 0xfb4   :  { %v1883_v41 = vrot.slane %v1882_v55, 1 }
 0xfb6   :  { %v1884_v58 = vmax.f32 %v1882_v55, %v1883_v41 }
 0xfb8   :  { %vm1885_vm14 = vcmp.eq.f32.partialorder %v1873_v19, %v1884_v58  ;;  %vm1886_vm15 = vcmp.eq.f32.partialorder %v1874_v2, %v1884_v58  ;;  %vm1887_vm0 = vcmp.eq.f32.partialorder %v1875_v48, %v1884_v58  ;;  %v3739_v48 = vsel %vm1983_vm1, 1.0, %v6370_v56 }
 0xfb9   :  { %v1888_v5 = vsel %vm1885_vm14, %v4152_v8, 20.0  ;;  %v1889_v34 = vsel %vm1886_vm15, %v4155_v9, 20.0  ;;  %v1890_v57 = vsel %vm1887_vm0, %v4158_v10, 20.0 }
 0xfba   :  { %v1891_v30 = vsel %vm322_vm2, %v1890_v57, inf  ;;  %v1892_v32 = vmin.f32 %v1888_v5, %v1889_v34 }
 0xfbc   :  { %v1893_v43 = vmin.f32 %v1892_v32, %v1891_v30 }
 0xfbe   :  { %v1894_v40 = vrot.slane %v1893_v43, 4 }
 0xfc0   :  { %v1895_v39 = vmin.f32 %v1893_v43, %v1894_v40 }
 0xfc2   :  { %v1896_v29 = vrot.slane %v1895_v39, 2 }
 0xfc4   :  { %v1897_v47 = vmin.f32 %v1895_v39, %v1896_v29 }
 0xfc6   :  { %v1898_v3 = vrot.slane %v1897_v47, 1 }
 0xfc8   :  { %v1899_v19 = vmin.f32 %v1897_v47, %v1898_v3 }
 0xfca   :  { %vm1900_vm3 = vcmp.eq.f32.partialorder %v4152_v8, %v1899_v19  ;;  %vm1901_vm4 = vcmp.eq.f32.partialorder %v4155_v9, %v1899_v19  ;;  %vm1902_vm7 = vcmp.eq.f32.partialorder %v4158_v10, %v1899_v19  ;;  %vm1991_vm8 = vcmp.eq.f32.partialorder %v4246_v63, %v1899_v19 }
 0xfcb   :  { %v4944_v2 = vsel %vm1900_vm3, 1.0, %v6370_v56  ;;  %v4947_v42 = vsel %vm1901_vm4, 1.0, %v6370_v56  ;;  %v4950_v6 = vsel %vm1902_vm7, 1.0, %v6370_v56  ;;  %v3740_v55 = vsel %vm1991_vm8, 1.0, %v6370_v56 }
 0xfcc   :  { %6389 = vst [vmem:[#allocation35_spill] sm:$0xff] %v4944_v2  ;;  %v1909_v41 = vmul.f32 %v4944_v2, %v4926_v20  ;;  %v1910_v58 = vmul.f32 %v4947_v42, %v4922_v62  ;;  %v1911_v5 = vmul.f32 %v4950_v6, %v4920_v49  ;;  %v1936_v34 = vmul.f32 %v4944_v2, %v4900_v51 }
 0xfcd   :  { %6390 = vst [vmem:[#allocation36_spill] sm:$0xff] %v4947_v42  ;;  %v1937_v57 = vmul.f32 %v4947_v42, %v4897_v50  ;;  %v1994_v30 = vmul.f32 0.0, %v3740_v55  ;;  %v1995_v40 = vmul.f32 %v3740_v55, %v3739_v48  ;;  %vm2132_vm7 = vcmp.eq.s32.totalorder %v3959_v16, 9 }
 0xfce   :  { %6391 = vst [vmem:[#allocation37_spill] sm:$0xff] %v4950_v6  ;;  %v1912_v32 = vadd.f32 %v1910_v58, %v1909_v41  ;;  %v1913_v43 = vsel %vm322_vm2, %v1911_v5, 0.0  ;;  %v1939_v47 = vsel %vm164_vm5, %v1936_v34, 0.0  ;;  %v1938_v41 = vmul.f32 %v4950_v6, %v4894_v60 }
 0xfcf   :  { %v4965_v39 = vadd.f32 %v1994_v30, %v4867_v61  ;;  %v1940_v3 = vsel %vm164_vm5, %v1937_v57, 0.0  ;;  %v4970_v19 = vadd.f32 %v1995_v40, %v4872_v26  ;;  %v4973_v27 = vadd.f32 %v1994_v30, %v4872_v26 }
 0xfd0   :  { %v1914_v29 = vadd.f32 %v1913_v43, %v1912_v32  ;;  %v1941_v58 = vadd.f32 %v1940_v3, %v1939_v47  ;;  %v1942_v61 = vsel %vm171_vm6, %v1938_v41, 0.0  ;;  %v1964_v41 = vsub.f32 %v4926_v20, %v4944_v2 }
 0xfd2   :  { %v1915_v45 = vrot.slane %v1914_v29, 4  ;;  %v1943_v5 = vadd.f32 %v1942_v61, %v1941_v58 }
 0xfd4   :  { %v1916_v48 = vadd.f32 %v1915_v45, %v1914_v29  ;;  %v1944_v43 = vrot.slane %v1943_v5, 4 }
 0xfd6   :  { %v1917_v55 = vrot.slane %v1916_v48, 2  ;;  %v1945_v40 = vadd.f32 %v1944_v43, %v1943_v5 }
 0xfd8   :  { %v1918_v32 = vadd.f32 %v1917_v55, %v1916_v48  ;;  %v1946_v54 = vrot.slane %v1945_v40, 2  ;;  %v1966_v48 = vsub.f32 %v4920_v49, %v4950_v6 }
 0xfda   :  { %v1919_v34 = vrot.slane %v1918_v32, 1  ;;  %v1947_v53 = vadd.f32 %v1946_v54, %v1945_v40  ;;  %v1965_v54 = vsub.f32 %v4922_v62, %v4947_v42 }
 0xfdc   :  { %v1920_v57 = vadd.f32 %v1919_v34, %v1918_v32  ;;  %v1948_v29 = vrot.slane %v1947_v53, 1 }
 0xfde   :  { %3846 = vrcp.f32 %v1920_v57  ;;  %v1932_v21 = vand.u32 2147483648, %v1920_v57  ;;  %v1930_v47 = vand.u32 2147483647, %v1920_v57  ;;  %vm1926_vm10 = vweird.f32 %v1920_v57 }
 0xfdf   :  { %v1949_v61 = vadd.f32 %v1948_v29, %v1947_v53 }
 0xfe0   :  { %v1933_v3 = vor.u32 1.1754944e-38, %v1932_v21  ;;  %vm1931_vm12 = vcmp.eq.f32.partialorder %v1930_v47, 8.507059e+37 }
 0xfe4   :  { %v3847_v15 = vpop.eup %3846 }
 0xfe5   :  { %v1922_v26 = vmul.f32 %v3847_v15, %v1920_v57  ;;  %vm1927_vm9 = vweird.f32 %v3847_v15 }
 0xfe6   :  { %vm1928_vm11 = vmor %vm1926_vm10, %vm1927_vm9 }
 0xfe7   :  { %v1923_v30 = vsub.f32 1.0, %v1922_v26 }
 0xfe9   :  { %v1924_v22 = vmul.f32 %v3847_v15, %v1923_v30 }
 0xfeb   :  { %v1925_v45 = vadd.f32 %v3847_v15, %v1924_v22 }
 0xfed   :  { %v1929_v58 = vsel %vm1928_vm11, %v3847_v15, %v1925_v45 }
 0xfee   :  { %v1934_v55 = vsel %vm1931_vm12, %v1933_v3, %v1929_v58 }
 0xfef   :  { %v4984_v5 = vmul.f32 %v1964_v41, %v1934_v55  ;;  %v4986_v22 = vmul.f32 %v1966_v48, %v1934_v55  ;;  %v4988_v32 = vmul.f32 %v1965_v54, %v1934_v55 }
 0xff1   :  { %6392 = vst [vmem:[#allocation38_spill] sm:$0xff] %v4984_v5  ;;  %v1970_v21 = vmul.f32 %v4984_v5, %v1949_v61  ;;  %v1972_v20 = vmul.f32 %v4986_v22, %v1949_v61  ;;  %v1971_v15 = vmul.f32 %v4988_v32, %v1949_v61 }
 0xff2   :  { %6393 = vst [vmem:[#allocation39_spill] sm:$0xff] %v4986_v22 }
 0xff3   :  { %6394 = vst [vmem:[#allocation40_spill] sm:$0xff] %v4988_v32  ;;  %v4995_v49 = vsub.f32 %v4894_v60, %v1972_v20  ;;  %v4998_v62 = vsub.f32 %v4897_v50, %v1971_v15  ;;  %v5001_v53 = vsub.f32 %v4900_v51, %v1970_v21  ;;  %v5011_v60 = vadd.f32 %v4950_v6, %v4910_v37 }
 0xff4   :  { %v5015_v50 = vadd.f32 %v4947_v42, %v4914_v28  ;;  %v5019_v51 = vadd.f32 %v4944_v2, %v4918_v18 }
 0xff5   :  { %v2006_v34 = vsel %vm2003_vm13, %v4995_v49, 0.0  ;;  %v2005_v43 = vsel %vm2003_vm13, %v4998_v62, 0.0  ;;  %v2004_v57 = vsel %vm2003_vm13, %v5001_v53, 0.0  ;;  %vm2018_vm14 = vcmp.gt.f32.partialorder %v5011_v60, 0.5 }
 0xff6   :  { %v2013_v40 = vsel %vm171_vm6, %v2006_v34, 0.0  ;;  %v2010_v26 = vsel %vm164_vm5, %v2005_v43, 0.0  ;;  %v2007_v30 = vsel %vm164_vm5, %v2004_v57, 0.0  ;;  %vm2017_vm15 = vcmp.gt.f32.partialorder %v5015_v50, 0.5 }
 0xff7   :  { %2014 = vadd.xlane.f32.xlu2 %v2013_v40  ;;  %2011 = vadd.xlane.f32.xlu1 %v2010_v26  ;;  %vm2016_vm0 = vcmp.gt.f32.partialorder %v5019_v51, 0.5 }
 0xff8   :  { %2008 = vadd.xlane.f32.xlu0 %v2007_v30 }
0x106a   :  { %v5021_v47 = vpop.xlane.xlu2 %2014  ;;  %v5023_v45 = vpop.xlane.xlu1 %2011 }
0x106b   :  { %v2021_v29 = vand.u32 2147483647, %v5021_v47  ;;  %v2020_v3 = vand.u32 2147483647, %v5023_v45  ;;  %v5027_v41 = vpop.xlane.xlu0 %2008 }
0x106c   :  { %v2019_v37 = vand.u32 2147483647, %v5027_v41 }
0x106d   :  { %v2024_v28 = vsel %vm2018_vm14, -1.0, %v2021_v29  ;;  %v2023_v58 = vsel %vm2017_vm15, -1.0, %v2020_v3 }
0x106e   :  { %v2025_v18 = vsel %vm322_vm2, %v2024_v28, -inf  ;;  %v2022_v48 = vsel %vm2016_vm0, -1.0, %v2019_v37  ;;  %vm2152_vm0 = vcmp.eq.s32.totalorder %v3961_v17, 10 }
0x106f   :  { %v2026_v54 = vmax.f32 %v2022_v48, %v2023_v58 }
0x1071   :  { %v2027_v55 = vmax.f32 %v2026_v54, %v2025_v18 }
0x1073   :  { %v2028_v61 = vrot.slane %v2027_v55, 4 }
0x1075   :  { %v2029_v21 = vmax.f32 %v2027_v55, %v2028_v61 }
0x1077   :  { %v2030_v20 = vrot.slane %v2029_v21, 2 }
0x1079   :  { %v2031_v15 = vmax.f32 %v2029_v21, %v2030_v20 }
0x107b   :  { %v2032_v34 = vrot.slane %v2031_v15, 1 }
0x107d   :  { %v2033_v43 = vmax.f32 %v2031_v15, %v2032_v34 }
0x107f   :  { %vm2034_vm1 = vcmp.eq.f32.partialorder %v2022_v48, %v2033_v43  ;;  %vm2035_vm3 = vcmp.eq.f32.partialorder %v2023_v58, %v2033_v43  ;;  %vm2036_vm4 = vcmp.eq.f32.partialorder %v2024_v28, %v2033_v43 }
0x1080   :  { %v2037_v57 = vsel %vm2034_vm1, %v4152_v8, 20.0  ;;  %v2038_v40 = vsel %vm2035_vm3, %v4155_v9, 20.0  ;;  %v2039_v26 = vsel %vm2036_vm4, %v4158_v10, 20.0 }
0x1081   :  { %v2040_v30 = vsel %vm322_vm2, %v2039_v26, inf  ;;  %v2041_v29 = vmin.f32 %v2037_v57, %v2038_v40 }
0x1083   :  { %v2042_v3 = vmin.f32 %v2041_v29, %v2040_v30 }
0x1085   :  { %v2043_v37 = vrot.slane %v2042_v3, 4 }
0x1087   :  { %v2044_v18 = vmin.f32 %v2042_v3, %v2043_v37  ;;  %v3744_v3 = vsel %vm2132_vm7, 1.0, %v6370_v56 }
0x1089   :  { %v2045_v54 = vrot.slane %v2044_v18, 2 }
0x108b   :  { %v2046_v55 = vmin.f32 %v2044_v18, %v2045_v54 }
0x108d   :  { %v2047_v61 = vrot.slane %v2046_v55, 1 }
0x108f   :  { %v2048_v21 = vmin.f32 %v2046_v55, %v2047_v61 }
0x1091   :  { %vm2049_vm8 = vcmp.eq.f32.partialorder %v4152_v8, %v2048_v21  ;;  %vm2050_vm9 = vcmp.eq.f32.partialorder %v4155_v9, %v2048_v21  ;;  %vm2051_vm10 = vcmp.eq.f32.partialorder %v4158_v10, %v2048_v21  ;;  %vm2140_vm11 = vcmp.eq.f32.partialorder %v4246_v63, %v2048_v21 }
0x1092   :  { %v5044_v28 = vsel %vm2049_vm8, 1.0, %v6370_v56  ;;  %v5047_v58 = vsel %vm2050_vm9, 1.0, %v6370_v56  ;;  %v5050_v48 = vsel %vm2051_vm10, 1.0, %v6370_v56  ;;  %v3745_v20 = vsel %vm2140_vm11, 1.0, %v6370_v56 }
0x1093   :  { %6395 = vst [vmem:[#allocation41_spill] sm:$0xff] %v5044_v28  ;;  %v2058_v15 = vmul.f32 %v5044_v28, %v5027_v41  ;;  %v2059_v34 = vmul.f32 %v5047_v58, %v5023_v45  ;;  %v2060_v43 = vmul.f32 %v5050_v48, %v5021_v47  ;;  %v2085_v57 = vmul.f32 %v5044_v28, %v5001_v53 }
0x1094   :  { %6396 = vst [vmem:[#allocation42_spill] sm:$0xff] %v5047_v58  ;;  %v2086_v40 = vmul.f32 %v5047_v58, %v4998_v62  ;;  %v2143_v26 = vmul.f32 0.0, %v3745_v20  ;;  %v2144_v61 = vmul.f32 %v3745_v20, %v3744_v3  ;;  %vm2281_vm10 = vcmp.eq.s32.totalorder %v3959_v16, 10 }
0x1095   :  { %6397 = vst [vmem:[#allocation43_spill] sm:$0xff] %v5050_v48  ;;  %v2061_v30 = vadd.f32 %v2059_v34, %v2058_v15  ;;  %v2062_v29 = vsel %vm322_vm2, %v2060_v43, 0.0  ;;  %v2088_v18 = vsel %vm164_vm5, %v2085_v57, 0.0  ;;  %v2087_v15 = vmul.f32 %v5050_v48, %v4995_v49 }
0x1096   :  { %v2089_v54 = vsel %vm164_vm5, %v2086_v40, 0.0  ;;  %v5070_v55 = vadd.f32 %v2143_v26, %v4965_v39  ;;  %v5073_v21 = vadd.f32 %v2143_v26, %v4973_v27  ;;  %v5078_v43 = vadd.f32 %v2144_v61, %v4970_v19 }
0x1097   :  { %v2063_v37 = vadd.f32 %v2062_v29, %v2061_v30  ;;  %v2090_v34 = vadd.f32 %v2089_v54, %v2088_v18  ;;  %v2091_v57 = vsel %vm171_vm6, %v2087_v15, 0.0  ;;  %v2113_v15 = vsub.f32 %v5027_v41, %v5044_v28 }
0x1099   :  { %v2064_v22 = vrot.slane %v2063_v37, 4  ;;  %v2092_v40 = vadd.f32 %v2091_v57, %v2090_v34 }
0x109b   :  { %v2065_v30 = vadd.f32 %v2064_v22, %v2063_v37  ;;  %v2093_v5 = vrot.slane %v2092_v40, 4 }
0x109d   :  { %v2066_v29 = vrot.slane %v2065_v30, 2  ;;  %v2094_v27 = vadd.f32 %v2093_v5, %v2092_v40  ;;  %v2115_v5 = vsub.f32 %v5021_v47, %v5050_v48 }
0x109f   :  { %v2067_v32 = vadd.f32 %v2066_v29, %v2065_v30  ;;  %v2095_v26 = vrot.slane %v2094_v27, 2 }
0x10a1   :  { %v2068_v39 = vrot.slane %v2067_v32, 1  ;;  %v2096_v2 = vadd.f32 %v2095_v26, %v2094_v27 }
0x10a3   :  { %v2069_v20 = vadd.f32 %v2068_v39, %v2067_v32  ;;  %v2097_v37 = vrot.slane %v2096_v2, 1 }
0x10a5   :  { %3848 = vrcp.f32 %v2069_v20  ;;  %v2081_v18 = vand.u32 2147483648, %v2069_v20  ;;  %v2079_v19 = vand.u32 2147483647, %v2069_v20  ;;  %vm2075_vm13 = vweird.f32 %v2069_v20 }
0x10a7   :  { %v2082_v61 = vor.u32 1.1754944e-38, %v2081_v18  ;;  %vm2080_vm15 = vcmp.eq.f32.partialorder %v2079_v19, 8.507059e+37 }
0x10ab   :  { %v3849_v3 = vpop.eup %3848 }
0x10ac   :  { %v2071_v6 = vmul.f32 %v3849_v3, %v2069_v20  ;;  %vm2076_vm12 = vweird.f32 %v3849_v3 }
0x10ad   :  { %vm2077_vm14 = vmor %vm2075_vm13, %vm2076_vm12 }
0x10ae   :  { %v2072_v42 = vsub.f32 1.0, %v2071_v6  ;;  %v2114_v6 = vsub.f32 %v5023_v45, %v5047_v58 }
0x10b0   :  { %v2073_v54 = vmul.f32 %v3849_v3, %v2072_v42  ;;  %v2098_v42 = vadd.f32 %v2097_v37, %v2096_v2 }
0x10b2   :  { %v2074_v22 = vadd.f32 %v3849_v3, %v2073_v54 }
0x10b4   :  { %v2078_v32 = vsel %vm2077_vm14, %v3849_v3, %v2074_v22 }
0x10b5   :  { %v2083_v34 = vsel %vm2080_vm15, %v2082_v61, %v2078_v32 }
0x10b6   :  { %v5087_v30 = vmul.f32 %v2113_v15, %v2083_v34  ;;  %v5089_v29 = vmul.f32 %v2115_v5, %v2083_v34  ;;  %v5091_v57 = vmul.f32 %v2114_v6, %v2083_v34 }
0x10b8   :  { %6398 = vst [vmem:[#allocation44_spill] sm:$0xff] %v5087_v30  ;;  %v2119_v40 = vmul.f32 %v5087_v30, %v2098_v42  ;;  %v2121_v41 = vmul.f32 %v5089_v29, %v2098_v42  ;;  %v2120_v39 = vmul.f32 %v5091_v57, %v2098_v42 }
0x10b9   :  { %6399 = vst [vmem:[#allocation45_spill] sm:$0xff] %v5089_v29 }
0x10ba   :  { %6400 = vst [vmem:[#allocation46_spill] sm:$0xff] %v5091_v57  ;;  %v5098_v47 = vsub.f32 %v4995_v49, %v2121_v41  ;;  %v5101_v45 = vsub.f32 %v4998_v62, %v2120_v39  ;;  %v5104_v2 = vsub.f32 %v5001_v53, %v2119_v40  ;;  %v5114_v49 = vadd.f32 %v5050_v48, %v5011_v60 }
0x10bb   :  { %v5118_v62 = vadd.f32 %v5047_v58, %v5015_v50  ;;  %v5122_v53 = vadd.f32 %v5044_v28, %v5019_v51 }
0x10bc   :  { %v2155_v20 = vsel %vm2152_vm0, %v5098_v47, 0.0  ;;  %v2154_v27 = vsel %vm2152_vm0, %v5101_v45, 0.0  ;;  %v2153_v26 = vsel %vm2152_vm0, %v5104_v2, 0.0  ;;  %vm2167_vm1 = vcmp.gt.f32.partialorder %v5114_v49, 0.5 }
0x10bd   :  { %v2162_v3 = vsel %vm171_vm6, %v2155_v20, 0.0  ;;  %v2159_v18 = vsel %vm164_vm5, %v2154_v27, 0.0  ;;  %v2156_v54 = vsel %vm164_vm5, %v2153_v26, 0.0  ;;  %vm2166_vm3 = vcmp.gt.f32.partialorder %v5118_v62, 0.5 }
0x10be   :  { %2163 = vadd.xlane.f32.xlu2 %v2162_v3  ;;  %2160 = vadd.xlane.f32.xlu1 %v2159_v18  ;;  %vm2165_vm4 = vcmp.gt.f32.partialorder %v5122_v53, 0.5 }
0x10bf   :  { %2157 = vadd.xlane.f32.xlu0 %v2156_v54 }
0x1131   :  { %v5124_v19 = vpop.xlane.xlu2 %2163  ;;  %v5126_v22 = vpop.xlane.xlu1 %2160 }
0x1132   :  { %v2170_v37 = vand.u32 2147483647, %v5124_v19  ;;  %v2169_v61 = vand.u32 2147483647, %v5126_v22  ;;  %v5130_v15 = vpop.xlane.xlu0 %2157 }
0x1133   :  { %v2168_v60 = vand.u32 2147483647, %v5130_v15 }
0x1134   :  { %v2173_v50 = vsel %vm2167_vm1, -1.0, %v2170_v37  ;;  %v2172_v32 = vsel %vm2166_vm3, -1.0, %v2169_v61 }
0x1135   :  { %v2174_v51 = vsel %vm322_vm2, %v2173_v50, -inf  ;;  %v2171_v5 = vsel %vm2165_vm4, -1.0, %v2168_v60  ;;  %vm2301_vm4 = vcmp.eq.s32.totalorder %v3961_v17, 11 }
0x1136   :  { %v2175_v6 = vmax.f32 %v2171_v5, %v2172_v32 }
0x1138   :  { %v2176_v34 = vmax.f32 %v2175_v6, %v2174_v51 }
0x113a   :  { %v2177_v42 = vrot.slane %v2176_v34, 4 }
0x113c   :  { %v2178_v40 = vmax.f32 %v2176_v34, %v2177_v42 }
0x113e   :  { %v2179_v41 = vrot.slane %v2178_v40, 2 }
0x1140   :  { %v2180_v39 = vmax.f32 %v2178_v40, %v2179_v41 }
0x1142   :  { %v2181_v20 = vrot.slane %v2180_v39, 1 }
0x1144   :  { %v2182_v27 = vmax.f32 %v2180_v39, %v2181_v20 }
0x1146   :  { %vm2183_vm7 = vcmp.eq.f32.partialorder %v2171_v5, %v2182_v27  ;;  %vm2184_vm8 = vcmp.eq.f32.partialorder %v2172_v32, %v2182_v27  ;;  %vm2185_vm9 = vcmp.eq.f32.partialorder %v2173_v50, %v2182_v27 }
0x1147   :  { %v2186_v26 = vsel %vm2183_vm7, %v4152_v8, 20.0  ;;  %v2187_v3 = vsel %vm2184_vm8, %v4155_v9, 20.0  ;;  %v2188_v18 = vsel %vm2185_vm9, %v4158_v10, 20.0 }
0x1148   :  { %v2189_v54 = vsel %vm322_vm2, %v2188_v18, inf  ;;  %v2190_v37 = vmin.f32 %v2186_v26, %v2187_v3 }
0x114a   :  { %v2191_v61 = vmin.f32 %v2190_v37, %v2189_v54 }
0x114c   :  { %v2192_v60 = vrot.slane %v2191_v61, 4 }
0x114e   :  { %v2193_v51 = vmin.f32 %v2191_v61, %v2192_v60  ;;  %v3749_v61 = vsel %vm2281_vm10, 1.0, %v6370_v56 }
0x1150   :  { %v2194_v6 = vrot.slane %v2193_v51, 2 }
0x1152   :  { %v2195_v34 = vmin.f32 %v2193_v51, %v2194_v6 }
0x1154   :  { %v2196_v42 = vrot.slane %v2195_v34, 1 }
0x1156   :  { %v2197_v40 = vmin.f32 %v2195_v34, %v2196_v42 }
0x1158   :  { %vm2198_vm11 = vcmp.eq.f32.partialorder %v4152_v8, %v2197_v40  ;;  %vm2199_vm12 = vcmp.eq.f32.partialorder %v4155_v9, %v2197_v40  ;;  %vm2200_vm13 = vcmp.eq.f32.partialorder %v4158_v10, %v2197_v40  ;;  %vm2289_vm14 = vcmp.eq.f32.partialorder %v4246_v63, %v2197_v40 }
0x1159   :  { %v5147_v50 = vsel %vm2198_vm11, 1.0, %v6370_v56  ;;  %v5150_v32 = vsel %vm2199_vm12, 1.0, %v6370_v56  ;;  %v5153_v5 = vsel %vm2200_vm13, 1.0, %v6370_v56  ;;  %v3750_v41 = vsel %vm2289_vm14, 1.0, %v6370_v56 }
0x115a   :  { %6401 = vst [vmem:[#allocation47_spill] sm:$0xff] %v5147_v50  ;;  %v2207_v39 = vmul.f32 %v5147_v50, %v5130_v15  ;;  %v2208_v20 = vmul.f32 %v5150_v32, %v5126_v22  ;;  %v2209_v27 = vmul.f32 %v5153_v5, %v5124_v19  ;;  %v2234_v26 = vmul.f32 %v5147_v50, %v5104_v2 }
0x115b   :  { %6402 = vst [vmem:[#allocation48_spill] sm:$0xff] %v5150_v32  ;;  %v2235_v3 = vmul.f32 %v5150_v32, %v5101_v45  ;;  %v2292_v18 = vmul.f32 0.0, %v3750_v41  ;;  %v2293_v42 = vmul.f32 %v3750_v41, %v3749_v61 }
0x115c   :  { %6403 = vst [vmem:[#allocation49_spill] sm:$0xff] %v5153_v5  ;;  %v2210_v54 = vadd.f32 %v2208_v20, %v2207_v39  ;;  %v2211_v37 = vsel %vm322_vm2, %v2209_v27, 0.0  ;;  %v2237_v51 = vsel %vm164_vm5, %v2234_v26, 0.0  ;;  %v2236_v39 = vmul.f32 %v5153_v5, %v5098_v47 }
0x115d   :  { %v2238_v6 = vsel %vm164_vm5, %v2235_v3, 0.0  ;;  %v5173_v34 = vadd.f32 %v2292_v18, %v5070_v55  ;;  %v5176_v40 = vadd.f32 %v2292_v18, %v5073_v21  ;;  %v5181_v27 = vadd.f32 %v2293_v42, %v5078_v43 }
0x115e   :  { %v2212_v60 = vadd.f32 %v2211_v37, %v2210_v54  ;;  %v2239_v20 = vadd.f32 %v2238_v6, %v2237_v51  ;;  %v2240_v26 = vsel %vm171_vm6, %v2236_v39, 0.0  ;;  %v2262_v39 = vsub.f32 %v5130_v15, %v5147_v50 }
0x1160   :  { %v2213_v29 = vrot.slane %v2212_v60, 4  ;;  %v2241_v3 = vadd.f32 %v2240_v26, %v2239_v20 }
0x1162   :  { %v2214_v54 = vadd.f32 %v2213_v29, %v2212_v60  ;;  %v2242_v30 = vrot.slane %v2241_v3, 4 }
0x1164   :  { %v2215_v37 = vrot.slane %v2214_v54, 2  ;;  %v2243_v21 = vadd.f32 %v2242_v30, %v2241_v3  ;;  %v2264_v30 = vsub.f32 %v5124_v19, %v5153_v5 }
0x1166   :  { %v2216_v57 = vadd.f32 %v2215_v37, %v2214_v54  ;;  %v2244_v18 = vrot.slane %v2243_v21, 2 }
0x1168   :  { %v2217_v55 = vrot.slane %v2216_v57, 1  ;;  %v2245_v28 = vadd.f32 %v2244_v18, %v2243_v21 }
0x116a   :  { %v2218_v41 = vadd.f32 %v2217_v55, %v2216_v57  ;;  %v2246_v60 = vrot.slane %v2245_v28, 1 }
0x116c   :  { %3850 = vrcp.f32 %v2218_v41  ;;  %v2230_v51 = vand.u32 2147483648, %v2218_v41  ;;  %v2228_v43 = vand.u32 2147483647, %v2218_v41  ;;  %vm2224_vm0 = vweird.f32 %v2218_v41 }
0x116e   :  { %v2231_v42 = vor.u32 1.1754944e-38, %v2230_v51  ;;  %vm2229_vm3 = vcmp.eq.f32.partialorder %v2228_v43, 8.507059e+37 }
0x1172   :  { %v3851_v61 = vpop.eup %3850 }
0x1173   :  { %v2220_v48 = vmul.f32 %v3851_v61, %v2218_v41  ;;  %vm2225_vm15 = vweird.f32 %v3851_v61 }
0x1174   :  { %vm2226_vm1 = vmor %vm2224_vm0, %vm2225_vm15 }
0x1175   :  { %v2221_v58 = vsub.f32 1.0, %v2220_v48  ;;  %v2263_v48 = vsub.f32 %v5126_v22, %v5150_v32 }
0x1177   :  { %v2222_v6 = vmul.f32 %v3851_v61, %v2221_v58  ;;  %v2247_v58 = vadd.f32 %v2246_v60, %v2245_v28 }
0x1179   :  { %v2223_v29 = vadd.f32 %v3851_v61, %v2222_v6 }
0x117b   :  { %v2227_v57 = vsel %vm2226_vm1, %v3851_v61, %v2223_v29  ;;  %vm2430_vm1 = vcmp.eq.s32.totalorder %v3959_v16, 11 }
0x117c   :  { %v2232_v20 = vsel %vm2229_vm3, %v2231_v42, %v2227_v57 }
0x117d   :  { %v5190_v54 = vmul.f32 %v2262_v39, %v2232_v20  ;;  %v5192_v37 = vmul.f32 %v2264_v30, %v2232_v20  ;;  %v5194_v26 = vmul.f32 %v2263_v48, %v2232_v20 }
0x117f   :  { %6404 = vst [vmem:[#allocation50_spill] sm:$0xff] %v5190_v54  ;;  %v2268_v3 = vmul.f32 %v5190_v54, %v2247_v58  ;;  %v2270_v15 = vmul.f32 %v5192_v37, %v2247_v58  ;;  %v2269_v55 = vmul.f32 %v5194_v26, %v2247_v58 }
0x1180   :  { %6405 = vst [vmem:[#allocation51_spill] sm:$0xff] %v5192_v37 }
0x1181   :  { %6406 = vst [vmem:[#allocation52_spill] sm:$0xff] %v5194_v26  ;;  %v5201_v19 = vsub.f32 %v5098_v47, %v2270_v15  ;;  %v5204_v22 = vsub.f32 %v5101_v45, %v2269_v55  ;;  %v5207_v28 = vsub.f32 %v5104_v2, %v2268_v3  ;;  %v5217_v47 = vadd.f32 %v5153_v5, %v5114_v49 }
0x1182   :  { %v5221_v45 = vadd.f32 %v5150_v32, %v5118_v62  ;;  %v5225_v2 = vadd.f32 %v5147_v50, %v5122_v53 }
0x1183   :  { %v2304_v41 = vsel %vm2301_vm4, %v5201_v19, 0.0  ;;  %v2303_v21 = vsel %vm2301_vm4, %v5204_v22, 0.0  ;;  %v2302_v18 = vsel %vm2301_vm4, %v5207_v28, 0.0  ;;  %vm2316_vm7 = vcmp.gt.f32.partialorder %v5217_v47, 0.5 }
0x1184   :  { %v2311_v61 = vsel %vm171_vm6, %v2304_v41, 0.0  ;;  %v2308_v51 = vsel %vm164_vm5, %v2303_v21, 0.0  ;;  %v2305_v6 = vsel %vm164_vm5, %v2302_v18, 0.0  ;;  %vm2315_vm8 = vcmp.gt.f32.partialorder %v5221_v45, 0.5 }
0x1185   :  { %2312 = vadd.xlane.f32.xlu2 %v2311_v61  ;;  %2309 = vadd.xlane.f32.xlu1 %v2308_v51  ;;  %vm2314_vm9 = vcmp.gt.f32.partialorder %v5225_v2, 0.5 }
0x1186   :  { %2306 = vadd.xlane.f32.xlu0 %v2305_v6 }
0x11f8   :  { %v5227_v43 = vpop.xlane.xlu2 %2312  ;;  %v5229_v29 = vpop.xlane.xlu1 %2309 }
0x11f9   :  { %v2319_v60 = vand.u32 2147483647, %v5227_v43  ;;  %v2318_v42 = vand.u32 2147483647, %v5229_v29  ;;  %v5233_v39 = vpop.xlane.xlu0 %2306 }
0x11fa   :  { %v2317_v49 = vand.u32 2147483647, %v5233_v39 }
0x11fb   :  { %v2322_v62 = vsel %vm2316_vm7, -1.0, %v2319_v60  ;;  %v2321_v57 = vsel %vm2315_vm8, -1.0, %v2318_v42 }
0x11fc   :  { %v2323_v53 = vsel %vm322_vm2, %v2322_v62, -inf  ;;  %v2320_v30 = vsel %vm2314_vm9, -1.0, %v2317_v49  ;;  %vm2450_vm9 = vcmp.eq.s32.totalorder %v3961_v17, 12 }
0x11fd   :  { %v2324_v48 = vmax.f32 %v2320_v30, %v2321_v57 }
0x11ff   :  { %v2325_v20 = vmax.f32 %v2324_v48, %v2323_v53 }
0x1201   :  { %v2326_v58 = vrot.slane %v2325_v20, 4 }
0x1203   :  { %v2327_v3 = vmax.f32 %v2325_v20, %v2326_v58 }
0x1205   :  { %v2328_v15 = vrot.slane %v2327_v3, 2 }
0x1207   :  { %v2329_v55 = vmax.f32 %v2327_v3, %v2328_v15 }
0x1209   :  { %v2330_v41 = vrot.slane %v2329_v55, 1 }
0x120b   :  { %v2331_v21 = vmax.f32 %v2329_v55, %v2330_v41 }
0x120d   :  { %vm2332_vm10 = vcmp.eq.f32.partialorder %v2320_v30, %v2331_v21  ;;  %vm2333_vm11 = vcmp.eq.f32.partialorder %v2321_v57, %v2331_v21  ;;  %vm2334_vm12 = vcmp.eq.f32.partialorder %v2322_v62, %v2331_v21 }
0x120e   :  { %v2335_v18 = vsel %vm2332_vm10, %v4152_v8, 20.0  ;;  %v2336_v61 = vsel %vm2333_vm11, %v4155_v9, 20.0  ;;  %v2337_v51 = vsel %vm2334_vm12, %v4158_v10, 20.0 }
0x120f   :  { %v2338_v6 = vsel %vm322_vm2, %v2337_v51, inf  ;;  %v2339_v60 = vmin.f32 %v2335_v18, %v2336_v61 }
0x1211   :  { %v2340_v42 = vmin.f32 %v2339_v60, %v2338_v6  ;;  %v3754_v60 = vsel %vm2430_vm1, 1.0, %v6370_v56 }
0x1213   :  { %v2341_v49 = vrot.slane %v2340_v42, 4 }
0x1215   :  { %v2342_v53 = vmin.f32 %v2340_v42, %v2341_v49 }
0x1217   :  { %v2343_v48 = vrot.slane %v2342_v53, 2 }
0x1219   :  { %v2344_v20 = vmin.f32 %v2342_v53, %v2343_v48 }
0x121b   :  { %v2345_v58 = vrot.slane %v2344_v20, 1 }
0x121d   :  { %v2346_v3 = vmin.f32 %v2344_v20, %v2345_v58 }
0x121f   :  { %vm2347_vm13 = vcmp.eq.f32.partialorder %v4152_v8, %v2346_v3  ;;  %vm2348_vm14 = vcmp.eq.f32.partialorder %v4155_v9, %v2346_v3  ;;  %vm2349_vm15 = vcmp.eq.f32.partialorder %v4158_v10, %v2346_v3  ;;  %vm2438_vm0 = vcmp.eq.f32.partialorder %v4246_v63, %v2346_v3 }
0x1220   :  { %v5249_v62 = vsel %vm2347_vm13, 1.0, %v6370_v56  ;;  %v5252_v57 = vsel %vm2348_vm14, 1.0, %v6370_v56  ;;  %v5255_v30 = vsel %vm2349_vm15, 1.0, %v6370_v56  ;;  %v3755_v61 = vsel %vm2438_vm0, 1.0, %v6370_v56 }
0x1221   :  { %6407 = vst [vmem:[#allocation53_spill] sm:$0xff] %v5249_v62  ;;  %v2356_v15 = vmul.f32 %v5249_v62, %v5233_v39  ;;  %v2357_v55 = vmul.f32 %v5252_v57, %v5229_v29  ;;  %v2358_v41 = vmul.f32 %v5255_v30, %v5227_v43  ;;  %v2383_v21 = vmul.f32 %v5249_v62, %v5207_v28 }
0x1222   :  { %6408 = vst [vmem:[#allocation54_spill] sm:$0xff] %v5252_v57  ;;  %v2384_v18 = vmul.f32 %v5252_v57, %v5204_v22  ;;  %v2441_v48 = vmul.f32 0.0, %v3755_v61  ;;  %v2442_v20 = vmul.f32 %v3755_v61, %v3754_v60  ;;  %v2385_v3 = vmul.f32 %v5255_v30, %v5201_v19 }
0x1223   :  { %6409 = vst [vmem:[#allocation55_spill] sm:$0xff] %v5255_v30  ;;  %v2359_v51 = vadd.f32 %v2357_v55, %v2356_v15  ;;  %v2360_v6 = vsel %vm322_vm2, %v2358_v41, 0.0  ;;  %v2386_v49 = vsel %vm164_vm5, %v2383_v21, 0.0 }
0x1224   :  { %v2387_v53 = vsel %vm164_vm5, %v2384_v18, 0.0  ;;  %v5276_v37 = vadd.f32 %v2441_v48, %v5173_v34  ;;  %v5279_v15 = vadd.f32 %v2442_v20, %v5181_v27  ;;  %v5282_v55 = vadd.f32 %v2441_v48, %v5176_v40 }
0x1225   :  { %v2361_v42 = vadd.f32 %v2360_v6, %v2359_v51  ;;  %v2388_v26 = vadd.f32 %v2387_v53, %v2386_v49  ;;  %v2389_v18 = vsel %vm171_vm6, %v2385_v3, 0.0 }
0x1227   :  { %v2362_v58 = vrot.slane %v2361_v42, 4  ;;  %v2390_v51 = vadd.f32 %v2389_v18, %v2388_v26 }
0x1229   :  { %v2363_v41 = vadd.f32 %v2362_v58, %v2361_v42  ;;  %v2391_v60 = vrot.slane %v2390_v51, 4  ;;  %v2411_v58 = vsub.f32 %v5233_v39, %v5249_v62 }
0x122b   :  { %v2364_v21 = vrot.slane %v2363_v41, 2  ;;  %v2392_v5 = vadd.f32 %v2391_v60, %v2390_v51 }
0x122d   :  { %v2365_v61 = vadd.f32 %v2364_v21, %v2363_v41  ;;  %v2393_v34 = vrot.slane %v2392_v5, 2  ;;  %v2413_v41 = vsub.f32 %v5227_v43, %v5255_v30 }
0x122f   :  { %v2366_v6 = vrot.slane %v2365_v61, 1  ;;  %v2394_v27 = vadd.f32 %v2393_v34, %v2392_v5  ;;  %v2412_v5 = vsub.f32 %v5229_v29, %v5252_v57 }
0x1231   :  { %v2367_v54 = vadd.f32 %v2366_v6, %v2365_v61  ;;  %v2395_v48 = vrot.slane %v2394_v27, 1 }
0x1233   :  { %3852 = vrcp.f32 %v2367_v54  ;;  %v2379_v20 = vand.u32 2147483648, %v2367_v54  ;;  %v2377_v40 = vand.u32 2147483647, %v2367_v54  ;;  %vm2373_vm4 = vweird.f32 %v2367_v54 }
0x1234   :  { %v2396_v18 = vadd.f32 %v2395_v48, %v2394_v27 }
0x1235   :  { %v2380_v26 = vor.u32 1.1754944e-38, %v2379_v20  ;;  %vm2378_vm8 = vcmp.eq.f32.partialorder %v2377_v40, 8.507059e+37 }
0x1239   :  { %v3853_v32 = vpop.eup %3852 }
0x123a   :  { %v2369_v49 = vmul.f32 %v3853_v32, %v2367_v54  ;;  %vm2374_vm3 = vweird.f32 %v3853_v32 }
0x123b   :  { %vm2375_vm7 = vmor %vm2373_vm4, %vm2374_vm3 }
0x123c   :  { %v2370_v53 = vsub.f32 1.0, %v2369_v49 }
0x123e   :  { %v2371_v50 = vmul.f32 %v3853_v32, %v2370_v53 }
0x1240   :  { %v2372_v42 = vadd.f32 %v3853_v32, %v2371_v50 }
0x1242   :  { %v2376_v3 = vsel %vm2375_vm7, %v3853_v32, %v2372_v42  ;;  %vm2579_vm7 = vcmp.eq.s32.totalorder %v3959_v16, 12 }
0x1243   :  { %v2381_v21 = vsel %vm2378_vm8, %v2380_v26, %v2376_v3 }
0x1244   :  { %v5291_v51 = vmul.f32 %v2411_v58, %v2381_v21  ;;  %v5293_v50 = vmul.f32 %v2413_v41, %v2381_v21  ;;  %v5295_v54 = vmul.f32 %v2412_v5, %v2381_v21 }
0x1246   :  { %6410 = vst [vmem:[#allocation56_spill] sm:$0xff] %v5291_v51  ;;  %v2417_v61 = vmul.f32 %v5291_v51, %v2396_v18  ;;  %v2419_v39 = vmul.f32 %v5293_v50, %v2396_v18  ;;  %v2418_v32 = vmul.f32 %v5295_v54, %v2396_v18 }
0x1247   :  { %6411 = vst [vmem:[#allocation57_spill] sm:$0xff] %v5293_v50 }
0x1248   :  { %6412 = vst [vmem:[#allocation58_spill] sm:$0xff] %v5295_v54  ;;  %v5302_v43 = vsub.f32 %v5201_v19, %v2419_v39  ;;  %v5305_v29 = vsub.f32 %v5204_v22, %v2418_v32  ;;  %v5308_v6 = vsub.f32 %v5207_v28, %v2417_v61  ;;  %v5318_v19 = vadd.f32 %v5255_v30, %v5217_v47 }
0x1249   :  { %v5322_v22 = vadd.f32 %v5252_v57, %v5221_v45  ;;  %v5326_v28 = vadd.f32 %v5249_v62, %v5225_v2 }
0x124a   :  { %v2453_v60 = vsel %vm2450_vm9, %v5302_v43, 0.0  ;;  %v2452_v34 = vsel %vm2450_vm9, %v5305_v29, 0.0  ;;  %v2451_v49 = vsel %vm2450_vm9, %v5308_v6, 0.0  ;;  %vm2465_vm10 = vcmp.gt.f32.partialorder %v5318_v19, 0.5 }
0x124b   :  { %v2460_v53 = vsel %vm171_vm6, %v2453_v60, 0.0  ;;  %v2457_v27 = vsel %vm164_vm5, %v2452_v34, 0.0  ;;  %v2454_v20 = vsel %vm164_vm5, %v2451_v49, 0.0  ;;  %vm2464_vm11 = vcmp.gt.f32.partialorder %v5322_v22, 0.5 }
0x124c   :  { %2461 = vadd.xlane.f32.xlu2 %v2460_v53  ;;  %2458 = vadd.xlane.f32.xlu1 %v2457_v27  ;;  %vm2463_vm12 = vcmp.gt.f32.partialorder %v5326_v28, 0.5 }
0x124d   :  { %2455 = vadd.xlane.f32.xlu0 %v2454_v20 }
0x12bf   :  { %v5328_v40 = vpop.xlane.xlu2 %2461  ;;  %v5330_v42 = vpop.xlane.xlu1 %2458 }
0x12c0   :  { %v2468_v48 = vand.u32 2147483647, %v5328_v40  ;;  %v2467_v26 = vand.u32 2147483647, %v5330_v42  ;;  %v5334_v58 = vpop.xlane.xlu0 %2455 }
0x12c1   :  { %v2466_v47 = vand.u32 2147483647, %v5334_v58 }
0x12c2   :  { %v2471_v45 = vsel %vm2465_vm10, -1.0, %v2468_v48  ;;  %v2470_v3 = vsel %vm2464_vm11, -1.0, %v2467_v26 }
0x12c3   :  { %v2472_v2 = vsel %vm322_vm2, %v2471_v45, -inf  ;;  %v2469_v41 = vsel %vm2463_vm12, -1.0, %v2466_v47  ;;  %vm2599_vm12 = vcmp.eq.s32.totalorder %v3961_v17, 13 }
0x12c4   :  { %v2473_v5 = vmax.f32 %v2469_v41, %v2470_v3 }
0x12c6   :  { %v2474_v21 = vmax.f32 %v2473_v5, %v2472_v2 }
0x12c8   :  { %v2475_v18 = vrot.slane %v2474_v21, 4 }
0x12ca   :  { %v2476_v61 = vmax.f32 %v2474_v21, %v2475_v18 }
0x12cc   :  { %v2477_v39 = vrot.slane %v2476_v61, 2 }
0x12ce   :  { %v2478_v32 = vmax.f32 %v2476_v61, %v2477_v39 }
0x12d0   :  { %v2479_v60 = vrot.slane %v2478_v32, 1 }
0x12d2   :  { %v2480_v34 = vmax.f32 %v2478_v32, %v2479_v60 }
0x12d4   :  { %vm2481_vm13 = vcmp.eq.f32.partialorder %v2469_v41, %v2480_v34  ;;  %vm2482_vm14 = vcmp.eq.f32.partialorder %v2470_v3, %v2480_v34  ;;  %vm2483_vm15 = vcmp.eq.f32.partialorder %v2471_v45, %v2480_v34 }
0x12d5   :  { %v2484_v49 = vsel %vm2481_vm13, %v4152_v8, 20.0  ;;  %v2485_v53 = vsel %vm2482_vm14, %v4155_v9, 20.0  ;;  %v2486_v27 = vsel %vm2483_vm15, %v4158_v10, 20.0 }
0x12d6   :  { %v2487_v20 = vsel %vm322_vm2, %v2486_v27, inf  ;;  %v2488_v48 = vmin.f32 %v2484_v49, %v2485_v53 }
0x12d8   :  { %v2489_v26 = vmin.f32 %v2488_v48, %v2487_v20  ;;  %v3759_v48 = vsel %vm2579_vm7, 1.0, %v6370_v56 }
0x12da   :  { %v2490_v47 = vrot.slane %v2489_v26, 4 }
0x12dc   :  { %v2491_v2 = vmin.f32 %v2489_v26, %v2490_v47 }
0x12de   :  { %v2492_v5 = vrot.slane %v2491_v2, 2 }
0x12e0   :  { %v2493_v21 = vmin.f32 %v2491_v2, %v2492_v5 }
0x12e2   :  { %v2494_v18 = vrot.slane %v2493_v21, 1 }
0x12e4   :  { %v2495_v61 = vmin.f32 %v2493_v21, %v2494_v18 }
0x12e6   :  { %vm2496_vm0 = vcmp.eq.f32.partialorder %v4152_v8, %v2495_v61  ;;  %vm2497_vm1 = vcmp.eq.f32.partialorder %v4155_v9, %v2495_v61  ;;  %vm2498_vm3 = vcmp.eq.f32.partialorder %v4158_v10, %v2495_v61  ;;  %vm2587_vm4 = vcmp.eq.f32.partialorder %v4246_v63, %v2495_v61 }
0x12e7   :  { %v5350_v45 = vsel %vm2496_vm0, 1.0, %v6370_v56  ;;  %v5353_v3 = vsel %vm2497_vm1, 1.0, %v6370_v56  ;;  %v5356_v41 = vsel %vm2498_vm3, 1.0, %v6370_v56  ;;  %v3760_v53 = vsel %vm2587_vm4, 1.0, %v6370_v56 }
0x12e8   :  { %6413 = vst [vmem:[#allocation59_spill] sm:$0xff] %v5350_v45  ;;  %v2505_v39 = vmul.f32 %v5350_v45, %v5334_v58  ;;  %v2506_v32 = vmul.f32 %v5353_v3, %v5330_v42  ;;  %v2507_v60 = vmul.f32 %v5356_v41, %v5328_v40  ;;  %v2532_v34 = vmul.f32 %v5350_v45, %v5308_v6 }
0x12e9   :  { %6414 = vst [vmem:[#allocation60_spill] sm:$0xff] %v5353_v3  ;;  %v2533_v49 = vmul.f32 %v5353_v3, %v5305_v29  ;;  %v2590_v5 = vmul.f32 0.0, %v3760_v53  ;;  %v2591_v21 = vmul.f32 %v3760_v53, %v3759_v48  ;;  %v2534_v61 = vmul.f32 %v5356_v41, %v5302_v43 }
0x12ea   :  { %6415 = vst [vmem:[#allocation61_spill] sm:$0xff] %v5356_v41  ;;  %v2508_v27 = vadd.f32 %v2506_v32, %v2505_v39  ;;  %v2509_v20 = vsel %vm322_vm2, %v2507_v60, 0.0  ;;  %v2535_v47 = vsel %vm164_vm5, %v2532_v34, 0.0 }
0x12eb   :  { %v2536_v2 = vsel %vm164_vm5, %v2533_v49, 0.0  ;;  %v5377_v50 = vadd.f32 %v2590_v5, %v5276_v37  ;;  %v5380_v39 = vadd.f32 %v2591_v21, %v5279_v15  ;;  %v5383_v32 = vadd.f32 %v2590_v5, %v5282_v55 }
0x12ec   :  { %v2510_v26 = vadd.f32 %v2509_v20, %v2508_v27  ;;  %v2537_v54 = vadd.f32 %v2536_v2, %v2535_v47  ;;  %v2538_v49 = vsel %vm171_vm6, %v2534_v61, 0.0 }
0x12ee   :  { %v2511_v18 = vrot.slane %v2510_v26, 4  ;;  %v2539_v27 = vadd.f32 %v2538_v49, %v2537_v54 }
0x12f0   :  { %v2512_v60 = vadd.f32 %v2511_v18, %v2510_v26  ;;  %v2540_v48 = vrot.slane %v2539_v27, 4  ;;  %v2560_v18 = vsub.f32 %v5334_v58, %v5350_v45 }
0x12f2   :  { %v2513_v34 = vrot.slane %v2512_v60, 2  ;;  %v2541_v30 = vadd.f32 %v2540_v48, %v2539_v27 }
0x12f4   :  { %v2514_v53 = vadd.f32 %v2513_v34, %v2512_v60  ;;  %v2542_v37 = vrot.slane %v2541_v30, 2  ;;  %v2562_v60 = vsub.f32 %v5328_v40, %v5356_v41 }
0x12f6   :  { %v2515_v20 = vrot.slane %v2514_v53, 1  ;;  %v2543_v15 = vadd.f32 %v2542_v37, %v2541_v30  ;;  %v2561_v30 = vsub.f32 %v5330_v42, %v5353_v3 }
0x12f8   :  { %v2516_v51 = vadd.f32 %v2515_v20, %v2514_v53  ;;  %v2544_v5 = vrot.slane %v2543_v15, 1 }
0x12fa   :  { %3854 = vrcp.f32 %v2516_v51  ;;  %v2528_v21 = vand.u32 2147483648, %v2516_v51  ;;  %v2526_v55 = vand.u32 2147483647, %v2516_v51  ;;  %vm2522_vm9 = vweird.f32 %v2516_v51 }
0x12fb   :  { %v2545_v49 = vadd.f32 %v2544_v5, %v2543_v15 }
0x12fc   :  { %v2529_v54 = vor.u32 1.1754944e-38, %v2528_v21  ;;  %vm2527_vm11 = vcmp.eq.f32.partialorder %v2526_v55, 8.507059e+37 }
0x1300   :  { %v3855_v57 = vpop.eup %3854 }
0x1301   :  { %v2518_v47 = vmul.f32 %v3855_v57, %v2516_v51  ;;  %vm2523_vm8 = vweird.f32 %v3855_v57 }
0x1302   :  { %vm2524_vm10 = vmor %vm2522_vm9, %vm2523_vm8 }
0x1303   :  { %v2519_v2 = vsub.f32 1.0, %v2518_v47 }
0x1305   :  { %v2520_v62 = vmul.f32 %v3855_v57, %v2519_v2 }
0x1307   :  { %v2521_v26 = vadd.f32 %v3855_v57, %v2520_v62 }
0x1309   :  { %v2525_v61 = vsel %vm2524_vm10, %v3855_v57, %v2521_v26  ;;  %vm2728_vm10 = vcmp.eq.s32.totalorder %v3959_v16, 13 }
0x130a   :  { %v2530_v34 = vsel %vm2527_vm11, %v2529_v54, %v2525_v61 }
0x130b   :  { %v5392_v27 = vmul.f32 %v2560_v18, %v2530_v34  ;;  %v5394_v62 = vmul.f32 %v2562_v60, %v2530_v34  ;;  %v5396_v51 = vmul.f32 %v2561_v30, %v2530_v34 }
0x130d   :  { %6416 = vst [vmem:[#allocation62_spill] sm:$0xff] %v5392_v27  ;;  %v2566_v53 = vmul.f32 %v5392_v27, %v2545_v49  ;;  %v2568_v58 = vmul.f32 %v5394_v62, %v2545_v49  ;;  %v2567_v57 = vmul.f32 %v5396_v51, %v2545_v49 }
0x130e   :  { %6417 = vst [vmem:[#allocation63_spill] sm:$0xff] %v5394_v62 }
0x130f   :  { %6418 = vst [vmem:[#allocation64_spill] sm:$0xff] %v5396_v51  ;;  %v5403_v40 = vsub.f32 %v5302_v43, %v2568_v58  ;;  %v5406_v42 = vsub.f32 %v5305_v29, %v2567_v57  ;;  %v5409_v20 = vsub.f32 %v5308_v6, %v2566_v53  ;;  %v5419_v43 = vadd.f32 %v5356_v41, %v5318_v19 }
0x1310   :  { %v5423_v29 = vadd.f32 %v5353_v3, %v5322_v22  ;;  %v5427_v6 = vadd.f32 %v5350_v45, %v5326_v28 }
0x1311   :  { %v2602_v48 = vsel %vm2599_vm12, %v5403_v40, 0.0  ;;  %v2601_v37 = vsel %vm2599_vm12, %v5406_v42, 0.0  ;;  %v2600_v47 = vsel %vm2599_vm12, %v5409_v20, 0.0  ;;  %vm2614_vm13 = vcmp.gt.f32.partialorder %v5419_v43, 0.5 }
0x1312   :  { %v2609_v2 = vsel %vm171_vm6, %v2602_v48, 0.0  ;;  %v2606_v15 = vsel %vm164_vm5, %v2601_v37, 0.0  ;;  %v2603_v21 = vsel %vm164_vm5, %v2600_v47, 0.0  ;;  %vm2613_vm14 = vcmp.gt.f32.partialorder %v5423_v29, 0.5 }
0x1313   :  { %2610 = vadd.xlane.f32.xlu2 %v2609_v2  ;;  %2607 = vadd.xlane.f32.xlu1 %v2606_v15  ;;  %vm2612_vm15 = vcmp.gt.f32.partialorder %v5427_v6, 0.5 }
0x1314   :  { %2604 = vadd.xlane.f32.xlu0 %v2603_v21 }
0x1386   :  { %v5429_v55 = vpop.xlane.xlu2 %2610  ;;  %v5431_v26 = vpop.xlane.xlu1 %2607 }
0x1387   :  { %v2617_v5 = vand.u32 2147483647, %v5429_v55  ;;  %v2616_v54 = vand.u32 2147483647, %v5431_v26  ;;  %v5435_v18 = vpop.xlane.xlu0 %2604 }
0x1388   :  { %v2615_v19 = vand.u32 2147483647, %v5435_v18 }
0x1389   :  { %v2620_v22 = vsel %vm2614_vm13, -1.0, %v2617_v5  ;;  %v2619_v61 = vsel %vm2613_vm14, -1.0, %v2616_v54 }
0x138a   :  { %v2621_v28 = vsel %vm322_vm2, %v2620_v22, -inf  ;;  %v2618_v60 = vsel %vm2612_vm15, -1.0, %v2615_v19  ;;  %vm2748_vm15 = vcmp.eq.s32.totalorder %v3961_v17, 14 }
0x138b   :  { %v2622_v30 = vmax.f32 %v2618_v60, %v2619_v61 }
0x138d   :  { %v2623_v34 = vmax.f32 %v2622_v30, %v2621_v28 }
0x138f   :  { %v2624_v49 = vrot.slane %v2623_v34, 4 }
0x1391   :  { %v2625_v53 = vmax.f32 %v2623_v34, %v2624_v49 }
0x1393   :  { %v2626_v58 = vrot.slane %v2625_v53, 2 }
0x1395   :  { %v2627_v57 = vmax.f32 %v2625_v53, %v2626_v58 }
0x1397   :  { %v2628_v48 = vrot.slane %v2627_v57, 1 }
0x1399   :  { %v2629_v37 = vmax.f32 %v2627_v57, %v2628_v48 }
0x139b   :  { %vm2630_vm0 = vcmp.eq.f32.partialorder %v2618_v60, %v2629_v37  ;;  %vm2631_vm1 = vcmp.eq.f32.partialorder %v2619_v61, %v2629_v37  ;;  %vm2632_vm3 = vcmp.eq.f32.partialorder %v2620_v22, %v2629_v37 }
0x139c   :  { %v2633_v47 = vsel %vm2630_vm0, %v4152_v8, 20.0  ;;  %v2634_v2 = vsel %vm2631_vm1, %v4155_v9, 20.0  ;;  %v2635_v15 = vsel %vm2632_vm3, %v4158_v10, 20.0 }
0x139d   :  { %v2636_v21 = vsel %vm322_vm2, %v2635_v15, inf  ;;  %v2637_v5 = vmin.f32 %v2633_v47, %v2634_v2 }
0x139f   :  { %v2638_v54 = vmin.f32 %v2637_v5, %v2636_v21  ;;  %v3764_v5 = vsel %vm2728_vm10, 1.0, %v6370_v56 }
0x13a1   :  { %v2639_v19 = vrot.slane %v2638_v54, 4 }
0x13a3   :  { %v2640_v28 = vmin.f32 %v2638_v54, %v2639_v19 }
0x13a5   :  { %v2641_v30 = vrot.slane %v2640_v28, 2 }
0x13a7   :  { %v2642_v34 = vmin.f32 %v2640_v28, %v2641_v30 }
0x13a9   :  { %v2643_v49 = vrot.slane %v2642_v34, 1 }
0x13ab   :  { %v2644_v53 = vmin.f32 %v2642_v34, %v2643_v49 }
0x13ad   :  { %vm2645_vm4 = vcmp.eq.f32.partialorder %v4152_v8, %v2644_v53  ;;  %vm2646_vm7 = vcmp.eq.f32.partialorder %v4155_v9, %v2644_v53  ;;  %vm2647_vm8 = vcmp.eq.f32.partialorder %v4158_v10, %v2644_v53  ;;  %vm2736_vm9 = vcmp.eq.f32.partialorder %v4246_v63, %v2644_v53 }
0x13ae   :  { %v5451_v22 = vsel %vm2645_vm4, 1.0, %v6370_v56  ;;  %v5454_v61 = vsel %vm2646_vm7, 1.0, %v6370_v56  ;;  %v5457_v60 = vsel %vm2647_vm8, 1.0, %v6370_v56  ;;  %v3765_v2 = vsel %vm2736_vm9, 1.0, %v6370_v56 }
0x13af   :  { %v2654_v58 = vmul.f32 %v5451_v22, %v5435_v18  ;;  %v2655_v57 = vmul.f32 %v5454_v61, %v5431_v26  ;;  %v2656_v48 = vmul.f32 %v5457_v60, %v5429_v55  ;;  %v2681_v37 = vmul.f32 %v5451_v22, %v5409_v20 }
0x13b0   :  { %v2682_v47 = vmul.f32 %v5454_v61, %v5406_v42  ;;  %v2739_v30 = vmul.f32 0.0, %v3765_v2  ;;  %v2740_v34 = vmul.f32 %v3765_v2, %v3764_v5  ;;  %v2683_v53 = vmul.f32 %v5457_v60, %v5403_v40 }
0x13b1   :  { %v2657_v15 = vadd.f32 %v2655_v57, %v2654_v58  ;;  %v2658_v21 = vsel %vm322_vm2, %v2656_v48, 0.0  ;;  %v2684_v19 = vsel %vm164_vm5, %v2681_v37, 0.0 }
0x13b2   :  { %v2685_v28 = vsel %vm164_vm5, %v2682_v47, 0.0  ;;  %v5478_v62 = vadd.f32 %v2739_v30, %v5377_v50  ;;  %v5481_v58 = vadd.f32 %v2740_v34, %v5380_v39  ;;  %v5484_v57 = vadd.f32 %v2739_v30, %v5383_v32 }
0x13b3   :  { %v2659_v54 = vadd.f32 %v2658_v21, %v2657_v15  ;;  %v2686_v51 = vadd.f32 %v2685_v28, %v2684_v19  ;;  %v2687_v47 = vsel %vm171_vm6, %v2683_v53, 0.0 }
0x13b5   :  { %v2660_v49 = vrot.slane %v2659_v54, 4  ;;  %v2688_v15 = vadd.f32 %v2687_v47, %v2686_v51 }
0x13b7   :  { %v2661_v48 = vadd.f32 %v2660_v49, %v2659_v54  ;;  %v2689_v5 = vrot.slane %v2688_v15, 4  ;;  %v2709_v49 = vsub.f32 %v5435_v18, %v5451_v22 }
0x13b9   :  { %v2662_v37 = vrot.slane %v2661_v48, 2  ;;  %v2690_v41 = vadd.f32 %v2689_v5, %v2688_v15 }
0x13bb   :  { %v2663_v2 = vadd.f32 %v2662_v37, %v2661_v48  ;;  %v2691_v50 = vrot.slane %v2690_v41, 2  ;;  %v2711_v48 = vsub.f32 %v5429_v55, %v5457_v60 }
0x13bd   :  { %v2664_v21 = vrot.slane %v2663_v2, 1  ;;  %v2692_v39 = vadd.f32 %v2691_v50, %v2690_v41  ;;  %v2710_v41 = vsub.f32 %v5431_v26, %v5454_v61 }
0x13bf   :  { %v2665_v27 = vadd.f32 %v2664_v21, %v2663_v2  ;;  %v2693_v30 = vrot.slane %v2692_v39, 1 }
0x13c1   :  { %3856 = vrcp.f32 %v2665_v27  ;;  %v2677_v34 = vand.u32 2147483648, %v2665_v27  ;;  %v2675_v32 = vand.u32 2147483647, %v2665_v27  ;;  %vm2671_vm12 = vweird.f32 %v2665_v27 }
0x13c2   :  { %v2694_v47 = vadd.f32 %v2693_v30, %v2692_v39 }
0x13c3   :  { %v2678_v51 = vor.u32 1.1754944e-38, %v2677_v34  ;;  %vm2676_vm14 = vcmp.eq.f32.partialorder %v2675_v32, 8.507059e+37 }
0x13c7   :  { %v3857_v3 = vpop.eup %3856 }
0x13c8   :  { %v2667_v19 = vmul.f32 %v3857_v3, %v2665_v27  ;;  %vm2672_vm11 = vweird.f32 %v3857_v3 }
0x13c9   :  { %vm2673_vm13 = vmor %vm2671_vm12, %vm2672_vm11 }
0x13ca   :  { %v2668_v28 = vsub.f32 1.0, %v2667_v19 }
0x13cc   :  { %v2669_v45 = vmul.f32 %v3857_v3, %v2668_v28 }
0x13ce   :  { %v2670_v54 = vadd.f32 %v3857_v3, %v2669_v45 }
0x13d0   :  { %v2674_v53 = vsel %vm2673_vm13, %v3857_v3, %v2670_v54  ;;  %vm2877_vm13 = vcmp.eq.s32.totalorder %v3959_v16, 14 }
0x13d1   :  { %v2679_v37 = vsel %vm2676_vm14, %v2678_v51, %v2674_v53 }
0x13d2   :  { %v5493_v15 = vmul.f32 %v2709_v49, %v2679_v37  ;;  %v5495_v45 = vmul.f32 %v2711_v48, %v2679_v37  ;;  %v5497_v27 = vmul.f32 %v2710_v41, %v2679_v37 }
0x13d4   :  { %6419 = vst [vmem:[#allocation65_spill] sm:$0xff] %v5493_v15  ;;  %v2715_v2 = vmul.f32 %v5493_v15, %v2694_v47  ;;  %v2717_v18 = vmul.f32 %v5495_v45, %v2694_v47  ;;  %v2716_v3 = vmul.f32 %v5497_v27, %v2694_v47 }
0x13d5   :  { %6420 = vst [vmem:[#allocation66_spill] sm:$0xff] %v5495_v45 }
0x13d6   :  { %6421 = vst [vmem:[#allocation67_spill] sm:$0xff] %v5497_v27  ;;  %v5504_v55 = vsub.f32 %v5403_v40, %v2717_v18  ;;  %v5507_v26 = vsub.f32 %v5406_v42, %v2716_v3  ;;  %v5510_v21 = vsub.f32 %v5409_v20, %v2715_v2  ;;  %v5520_v40 = vadd.f32 %v5457_v60, %v5419_v43 }
0x13d7   :  { %v5524_v42 = vadd.f32 %v5454_v61, %v5423_v29  ;;  %v5528_v20 = vadd.f32 %v5451_v22, %v5427_v6 }
0x13d8   :  { %v2751_v5 = vsel %vm2748_vm15, %v5504_v55, 0.0  ;;  %v2750_v50 = vsel %vm2748_vm15, %v5507_v26, 0.0  ;;  %v2749_v19 = vsel %vm2748_vm15, %v5510_v21, 0.0  ;;  %vm2763_vm0 = vcmp.gt.f32.partialorder %v5520_v40, 0.5 }
0x13d9   :  { %v2758_v28 = vsel %vm171_vm6, %v2751_v5, 0.0  ;;  %v2755_v39 = vsel %vm164_vm5, %v2750_v50, 0.0  ;;  %v2752_v34 = vsel %vm164_vm5, %v2749_v19, 0.0  ;;  %vm2762_vm1 = vcmp.gt.f32.partialorder %v5524_v42, 0.5 }
0x13da   :  { %2759 = vadd.xlane.f32.xlu2 %v2758_v28  ;;  %2756 = vadd.xlane.f32.xlu1 %v2755_v39  ;;  %vm2761_vm3 = vcmp.gt.f32.partialorder %v5528_v20, 0.5 }
0x13db   :  { %2753 = vadd.xlane.f32.xlu0 %v2752_v34 }
0x144d   :  { %v5530_v32 = vpop.xlane.xlu2 %2759  ;;  %v5532_v54 = vpop.xlane.xlu1 %2756 }
0x144e   :  { %v2766_v30 = vand.u32 2147483647, %v5530_v32  ;;  %v2765_v51 = vand.u32 2147483647, %v5532_v54  ;;  %v5536_v49 = vpop.xlane.xlu0 %2753 }
0x144f   :  { %v2764_v43 = vand.u32 2147483647, %v5536_v49 }
0x1450   :  { %v2769_v29 = vsel %vm2763_vm0, -1.0, %v2766_v30  ;;  %v2768_v53 = vsel %vm2762_vm1, -1.0, %v2765_v51 }
0x1451   :  { %v2770_v6 = vsel %vm322_vm2, %v2769_v29, -inf  ;;  %v2767_v48 = vsel %vm2761_vm3, -1.0, %v2764_v43  ;;  %vm2897_vm3 = vcmp.eq.s32.totalorder %v3961_v17, 15 }
0x1452   :  { %v2771_v41 = vmax.f32 %v2767_v48, %v2768_v53 }
0x1454   :  { %v2772_v37 = vmax.f32 %v2771_v41, %v2770_v6 }
0x1456   :  { %v2773_v47 = vrot.slane %v2772_v37, 4 }
0x1458   :  { %v2774_v2 = vmax.f32 %v2772_v37, %v2773_v47 }
0x145a   :  { %v2775_v18 = vrot.slane %v2774_v2, 2 }
0x145c   :  { %v2776_v3 = vmax.f32 %v2774_v2, %v2775_v18 }
0x145e   :  { %v2777_v5 = vrot.slane %v2776_v3, 1 }
0x1460   :  { %v2778_v50 = vmax.f32 %v2776_v3, %v2777_v5 }
0x1462   :  { %vm2779_vm4 = vcmp.eq.f32.partialorder %v2767_v48, %v2778_v50  ;;  %vm2780_vm7 = vcmp.eq.f32.partialorder %v2768_v53, %v2778_v50  ;;  %vm2781_vm8 = vcmp.eq.f32.partialorder %v2769_v29, %v2778_v50 }
0x1463   :  { %v2782_v19 = vsel %vm2779_vm4, %v4152_v8, 20.0  ;;  %v2783_v28 = vsel %vm2780_vm7, %v4155_v9, 20.0  ;;  %v2784_v39 = vsel %vm2781_vm8, %v4158_v10, 20.0 }
0x1464   :  { %v2785_v34 = vsel %vm322_vm2, %v2784_v39, inf  ;;  %v2786_v30 = vmin.f32 %v2782_v19, %v2783_v28 }
0x1466   :  { %v2787_v51 = vmin.f32 %v2786_v30, %v2785_v34  ;;  %v3769_v30 = vsel %vm2877_vm13, 1.0, %v6370_v56 }
0x1468   :  { %v2788_v43 = vrot.slane %v2787_v51, 4 }
0x146a   :  { %v2789_v6 = vmin.f32 %v2787_v51, %v2788_v43 }
0x146c   :  { %v2790_v41 = vrot.slane %v2789_v6, 2 }
0x146e   :  { %v2791_v37 = vmin.f32 %v2789_v6, %v2790_v41 }
0x1470   :  { %v2792_v47 = vrot.slane %v2791_v37, 1 }
0x1472   :  { %v2793_v2 = vmin.f32 %v2791_v37, %v2792_v47 }
0x1474   :  { %vm2794_vm9 = vcmp.eq.f32.partialorder %v4152_v8, %v2793_v2  ;;  %vm2795_vm10 = vcmp.eq.f32.partialorder %v4155_v9, %v2793_v2  ;;  %vm2796_vm11 = vcmp.eq.f32.partialorder %v4158_v10, %v2793_v2  ;;  %vm2885_vm12 = vcmp.eq.f32.partialorder %v4246_v63, %v2793_v2 }
0x1475   :  { %v5552_v29 = vsel %vm2794_vm9, 1.0, %v6370_v56  ;;  %v5555_v53 = vsel %vm2795_vm10, 1.0, %v6370_v56  ;;  %v5558_v48 = vsel %vm2796_vm11, 1.0, %v6370_v56  ;;  %v3770_v28 = vsel %vm2885_vm12, 1.0, %v6370_v56 }
0x1476   :  { %6422 = vst [vmem:[#allocation68_spill] sm:$0xff] %v5555_v53  ;;  %v2803_v18 = vmul.f32 %v5552_v29, %v5536_v49  ;;  %v2804_v3 = vmul.f32 %v5555_v53, %v5532_v54  ;;  %v2805_v5 = vmul.f32 %v5558_v48, %v5530_v32  ;;  %v2830_v50 = vmul.f32 %v5552_v29, %v5510_v21 }
0x1477   :  { %6423 = vst [vmem:[#allocation69_spill] sm:$0xff] %v5558_v48  ;;  %v2831_v19 = vmul.f32 %v5555_v53, %v5507_v26  ;;  %v2888_v41 = vmul.f32 0.0, %v3770_v28  ;;  %v2889_v37 = vmul.f32 %v3770_v28, %v3769_v30  ;;  %v2832_v2 = vmul.f32 %v5558_v48, %v5504_v55 }
0x1478   :  { %v2806_v39 = vadd.f32 %v2804_v3, %v2803_v18  ;;  %v2807_v34 = vsel %vm322_vm2, %v2805_v5, 0.0  ;;  %v2833_v43 = vsel %vm164_vm5, %v2830_v50, 0.0 }
0x1479   :  { %v2834_v6 = vsel %vm164_vm5, %v2831_v19, 0.0  ;;  %v5579_v45 = vadd.f32 %v2888_v41, %v5478_v62  ;;  %v5582_v18 = vadd.f32 %v2889_v37, %v5481_v58  ;;  %v5585_v3 = vadd.f32 %v2888_v41, %v5484_v57 }
0x147a   :  { %v2808_v51 = vadd.f32 %v2807_v34, %v2806_v39  ;;  %v2835_v27 = vadd.f32 %v2834_v6, %v2833_v43  ;;  %v2836_v19 = vsel %vm171_vm6, %v2832_v2, 0.0  ;;  %v3886_v34 = vmov 0  }
0x147b   :  { %3809 = vset.pattern.permute.xlu0 %v3886_v34  ;;  %3810 = vset.pattern.permute.xlu1 %v3886_v34 }
0x147c   :  { %v2809_v47 = vrot.slane %v2808_v51, 4  ;;  %v2837_v39 = vadd.f32 %v2836_v19, %v2835_v27  ;;  %3811 = vset.pattern.permute.xlu2 %v3886_v34  ;;  %v2858_v19 = vsub.f32 %v5536_v49, %v5552_v29  ;;  %v2859_v34 = vsub.f32 %v5532_v54, %v5555_v53 }
0x147e   :  { %v2810_v5 = vadd.f32 %v2809_v47, %v2808_v51  ;;  %v2838_v62 = vrot.slane %v2837_v39, 4 }
0x1480   :  { %v2811_v50 = vrot.slane %v2810_v5, 2  ;;  %v2839_v43 = vadd.f32 %v2838_v62, %v2837_v39  ;;  %v2860_v39 = vsub.f32 %v5530_v32, %v5558_v48 }
0x1482   :  { %v2812_v28 = vadd.f32 %v2811_v50, %v2810_v5  ;;  %v2840_v58 = vrot.slane %v2839_v43, 2 }
0x1484   :  { %v2813_v30 = vrot.slane %v2812_v28, 1  ;;  %v2841_v41 = vadd.f32 %v2840_v58, %v2839_v43 }
0x1486   :  { %v2814_v15 = vadd.f32 %v2813_v30, %v2812_v28  ;;  %v2842_v5 = vrot.slane %v2841_v41, 1 }
0x1488   :  { %3858 = vrcp.f32 %v2814_v15  ;;  %v2826_v51 = vand.u32 2147483648, %v2814_v15  ;;  %v2824_v2 = vand.u32 2147483647, %v2814_v15  ;;  %vm2820_vm15 = vweird.f32 %v2814_v15 }
0x1489   :  { %v2843_v62 = vadd.f32 %v2842_v5, %v2841_v41 }
0x148a   :  { %v2827_v50 = vor.u32 1.1754944e-38, %v2826_v51  ;;  %vm2825_vm1 = vcmp.eq.f32.partialorder %v2824_v2, 8.507059e+37 }
0x148e   :  { %v3859_v6 = vpop.eup %3858 }
0x148f   :  { %v2816_v37 = vmul.f32 %v3859_v6, %v2814_v15  ;;  %vm2821_vm14 = vweird.f32 %v3859_v6 }
0x1490   :  { %vm2822_vm0 = vmor %vm2820_vm15, %vm2821_vm14  ;;  %vm759_vm15 = vcmask 39936  }
0x1491   :  { %v2817_v57 = vsub.f32 1.0, %v2816_v37 }
0x1493   :  { %v2818_v47 = vmul.f32 %v3859_v6, %v2817_v57 }
0x1495   :  { %v2819_v27 = vadd.f32 %v3859_v6, %v2818_v47 }
0x1497   :  { %v2823_v28 = vsel %vm2822_vm0, %v3859_v6, %v2819_v27  ;;  %vm763_vm0 = vcmask 35840  }
0x1498   :  { %v2828_v30 = vsel %vm2825_vm1, %v2827_v50, %v2823_v28  ;;  %v5630_v50 = vadd.f32 %v5558_v48, %v5520_v40  ;;  %v5638_v28 = vadd.f32 %v5552_v29, %v5528_v20 }
0x1499   :  { %v5594_v43 = vmul.f32 %v2858_v19, %v2828_v30  ;;  %v5596_v58 = vmul.f32 %v2860_v39, %v2828_v30  ;;  %v5598_v15 = vmul.f32 %v2859_v34, %v2828_v30  ;;  %v5634_v19 = vadd.f32 %v5555_v53, %v5524_v42 }
0x149a   :  { %vm2912_vm4 = vcmp.gt.f32.partialorder %v5630_v50, 0.5  ;;  %vm2910_vm8 = vcmp.gt.f32.partialorder %v5638_v28, 0.5 }
0x149b   :  { %6424 = vst [vmem:[#allocation70_spill] sm:$0xff] %v5594_v43  ;;  %v2864_v37 = vmul.f32 %v5594_v43, %v2843_v62  ;;  %v2866_v49 = vmul.f32 %v5596_v58, %v2843_v62  ;;  %v2865_v6 = vmul.f32 %v5598_v15, %v2843_v62  ;;  %vm2911_vm7 = vcmp.gt.f32.partialorder %v5634_v19, 0.5 }
0x149c   :  { %6425 = vst [vmem:[#allocation71_spill] sm:$0xff] %v5596_v58 }
0x149d   :  { %6426 = vst [vmem:[#allocation72_spill] sm:$0xff] %v5598_v15  ;;  %v5605_v32 = vsub.f32 %v5504_v55, %v2866_v49  ;;  %v5608_v54 = vsub.f32 %v5507_v26, %v2865_v6  ;;  %v5611_v57 = vsub.f32 %v5510_v21, %v2864_v37  ;;  %v637_v55 = vld [vmem:[%s6287_s4] sm:$0xff]  ;;  %v639_v26 = vld [vmem:[%s6287_s4 + $0x10] sm:$0xf]  ;;  %v638_v21 = vld [vmem:[%s6287_s4 + $0x8] sm:$0xff] }
0x149f   :  { %v2900_v41 = vsel %vm2897_vm3, %v5605_v32, 0.0  ;;  %v2899_v51 = vsel %vm2897_vm3, %v5608_v54, 0.0  ;;  %v2898_v47 = vsel %vm2897_vm3, %v5611_v57, 0.0 }
0x14a0   :  { %v2907_v2 = vsel %vm171_vm6, %v2900_v41, 0.0  ;;  %v2904_v27 = vsel %vm164_vm5, %v2899_v51, 0.0  ;;  %v2901_v5 = vsel %vm164_vm5, %v2898_v47, 0.0 }
0x14a1   :  { %2908 = vadd.xlane.f32.xlu2 %v2907_v2  ;;  %2905 = vadd.xlane.f32.xlu1 %v2904_v27 }
0x14a2   :  { %2902 = vadd.xlane.f32.xlu0 %v2901_v5 }
0x14b6   :  { %641 = vperm.xlu0 %3809, %v637_v55  }
0x14b9   :  { %647 = vperm.xlu2 %3811, %v639_v26  }
0x14ba   :  { %644 = vperm.xlu1 %3810, %v638_v21  }
0x1514   :  { %v5640_v39 = vpop.xlane.xlu2 %2908  ;;  %v5642_v34 = vpop.xlane.xlu1 %2905 }
0x1515   :  { %v2915_v30 = vand.u32 2147483647, %v5640_v39  ;;  %v2914_v62 = vand.u32 2147483647, %v5642_v34  ;;  %v5646_v37 = vpop.xlane.xlu0 %2902 }
0x1516   :  { %v2913_v40 = vand.u32 2147483647, %v5646_v37 }
0x1517   :  { %v2918_v42 = vsel %vm2912_vm4, -1.0, %v2915_v30  ;;  %v2917_v49 = vsel %vm2911_vm7, -1.0, %v2914_v62  ;;  %vm3026_vm7 = vcmp.eq.s32.totalorder %v3959_v16, 15 }
0x1518   :  { %v2919_v20 = vsel %vm322_vm2, %v2918_v42, -inf  ;;  %v2916_v6 = vsel %vm2910_vm8, -1.0, %v2913_v40 }
0x1519   :  { %v2920_v41 = vmax.f32 %v2916_v6, %v2917_v49 }
0x151b   :  { %v2921_v51 = vmax.f32 %v2920_v41, %v2919_v20 }
0x151c   :  { %v648_v26 = vpop.permute.xlu2 %647 }
0x151d   :  { %v2922_v47 = vrot.slane %v2921_v51, 4  ;;  %vm651_vm9 = vcmp.eq.s32.totalorder %v648_v26, %v3961_v17 }
0x151f   :  { %v2923_v2 = vmax.f32 %v2921_v51, %v2922_v47  ;;  %v3695_v47 = vsel %vm651_vm9, 1.0, %v6370_v56 }
0x1521   :  { %v2924_v27 = vrot.slane %v2923_v2, 2 }
0x1523   :  { %v2925_v5 = vmax.f32 %v2923_v2, %v2924_v27 }
0x1525   :  { %v2926_v55 = vrot.slane %v2925_v5, 1 }
0x1527   :  { %v2927_v21 = vmax.f32 %v2925_v5, %v2926_v55 }
0x1528   :  { %v642_v58 = vpop.permute.xlu0 %641 }
0x1529   :  { %vm2928_vm10 = vcmp.eq.f32.partialorder %v2916_v6, %v2927_v21  ;;  %vm2929_vm11 = vcmp.eq.f32.partialorder %v2917_v49, %v2927_v21  ;;  %vm2930_vm12 = vcmp.eq.f32.partialorder %v2918_v42, %v2927_v21  ;;  %vm649_vm13 = vcmp.eq.s32.totalorder %v642_v58, %v3961_v17 }
0x152a   :  { %v2931_v30 = vsel %vm2928_vm10, %v4152_v8, 20.0  ;;  %v2932_v62 = vsel %vm2929_vm11, %v4155_v9, 20.0  ;;  %v2933_v40 = vsel %vm2930_vm12, %v4158_v10, 20.0  ;;  %v3693_v20 = vsel %vm649_vm13, 1.0, %v6370_v56 }
0x152b   :  { %v2934_v41 = vsel %vm322_vm2, %v2933_v40, inf  ;;  %v2935_v51 = vmin.f32 %v2931_v30, %v2932_v62  ;;  %v756_v49 = vmul.f32 %v4173_v1, %v3693_v20  ;;  %v758_v6 = vmul.f32 %v4179_v4, %v3695_v47 }
0x152c   :  { %v645_v2 = vpop.permute.xlu1 %644  ;;  %vm3046_vm13 = vcmp.eq.s32.totalorder %v3961_v17, 16 }
0x152d   :  { %v2936_v27 = vmin.f32 %v2935_v51, %v2934_v41  ;;  %vm650_vm14 = vcmp.eq.s32.totalorder %v645_v2, %v3961_v17  ;;  %v760_v26 = vsel %vm759_vm15, %v756_v49, 0.0  ;;  %v764_v1 = vsel %vm763_vm0, %v758_v6, 0.0 }
0x152e   :  { %v3694_v58 = vsel %vm650_vm14, 1.0, %v6370_v56 }
0x152f   :  { %v2937_v42 = vrot.slane %v2936_v27, 4  ;;  %v757_v5 = vmul.f32 %v4176_v0, %v3694_v58 }
0x1531   :  { %v2938_v55 = vmin.f32 %v2936_v27, %v2937_v42  ;;  %v761_v21 = vsel %vm759_vm15, %v757_v5, 0.0 }
0x1532   :  { %v762_v30 = vadd.f32 %v761_v21, %v760_v26 }
0x1533   :  { %v2939_v62 = vrot.slane %v2938_v55, 2 }
0x1534   :  { %v765_v40 = vadd.f32 %v764_v1, %v762_v30 }
0x1535   :  { %v2940_v41 = vmin.f32 %v2938_v55, %v2939_v62 }
0x1536   :  { %v766_v51 = vrot.slane %v765_v40, 4 }
0x1537   :  { %v2941_v2 = vrot.slane %v2940_v41, 1 }
0x1538   :  { %v767_v15 = vadd.f32 %v766_v51, %v765_v40 }
0x1539   :  { %v2942_v43 = vmin.f32 %v2940_v41, %v2941_v2 }
0x153a   :  { %v768_v48 = vrot.slane %v767_v15, 2 }
0x153b   :  { %vm2943_vm1 = vcmp.eq.f32.partialorder %v4152_v8, %v2942_v43  ;;  %vm2944_vm3 = vcmp.eq.f32.partialorder %v4155_v9, %v2942_v43  ;;  %vm2945_vm4 = vcmp.eq.f32.partialorder %v4158_v10, %v2942_v43  ;;  %vm3034_vm8 = vcmp.eq.f32.partialorder %v4246_v63, %v2942_v43 }
0x153c   :  { %v5673_v0 = vsel %vm2943_vm1, 1.0, %v6370_v56  ;;  %v5676_v4 = vsel %vm2944_vm3, 1.0, %v6370_v56  ;;  %v5679_v27 = vsel %vm2945_vm4, 1.0, %v6370_v56  ;;  %v769_v49 = vadd.f32 %v768_v48, %v767_v15 }
0x153d   :  { %v2952_v42 = vmul.f32 %v5673_v0, %v5646_v37  ;;  %v2953_v6 = vmul.f32 %v5676_v4, %v5642_v34  ;;  %v2954_v5 = vmul.f32 %v5679_v27, %v5640_v39  ;;  %v2979_v55 = vmul.f32 %v5673_v0, %v5611_v57 }
0x153e   :  { %v2980_v26 = vmul.f32 %v5676_v4, %v5608_v54  ;;  %v770_v21 = vrot.slane %v769_v49, 1  ;;  %v2981_v41 = vmul.f32 %v5679_v27, %v5605_v32  ;;  %v3775_v16 = vsel %vm3034_vm8, 1.0, %v6370_v56 }
0x153f   :  { %v2955_v30 = vadd.f32 %v2953_v6, %v2952_v42  ;;  %v2956_v62 = vsel %vm322_vm2, %v2954_v5, 0.0  ;;  %v2982_v48 = vsel %vm164_vm5, %v2979_v55, 0.0 }
0x1540   :  { %v2983_v15 = vsel %vm164_vm5, %v2980_v26, 0.0  ;;  %v771_v1 = vadd.f32 %v770_v21, %v769_v49  ;;  %v3774_v49 = vsel %vm3026_vm7, 1.0, %v6370_v56 }
0x1541   :  { %v2957_v40 = vadd.f32 %v2956_v62, %v2955_v30  ;;  %v2984_v6 = vadd.f32 %v2983_v15, %v2982_v48  ;;  %v2985_v30 = vsel %vm171_vm6, %v2981_v41, 0.0  ;;  %v3037_v62 = vmul.f32 0.0, %v3775_v16 }
0x1542   :  { %v784_v51 = vmul.f32 %v4207_v25, %v771_v1  ;;  %v785_v2 = vmul.f32 %v4205_v24, %v771_v1  ;;  %v786_v53 = vmul.f32 %v4203_v23, %v771_v1  ;;  %v3038_v48 = vmul.f32 %v3775_v16, %v3774_v49 }
0x1543   :  { %v2958_v42 = vrot.slane %v2957_v40, 4  ;;  %v2986_v1 = vadd.f32 %v2985_v30, %v2984_v6  ;;  %v5710_v15 = vadd.f32 %v3037_v62, %v5579_v45 }
0x1544   :  { %v787_v5 = vsub.f32 %v3693_v20, %v784_v51  ;;  %v788_v55 = vsub.f32 %v3694_v58, %v785_v2  ;;  %v789_v26 = vsub.f32 %v3695_v47, %v786_v53 }
0x1545   :  { %v2959_v21 = vadd.f32 %v2958_v42, %v2957_v40  ;;  %v2987_v41 = vrot.slane %v2986_v1, 4 }
0x1546   :  { %v907_v25 = vmul.f32 %v4260_v31, %v787_v5  ;;  %v908_v24 = vmul.f32 %v4263_v13, %v788_v55  ;;  %v909_v23 = vmul.f32 %v4266_v14, %v789_v26  ;;  %v5714_v31 = vadd.f32 %v3038_v48, %v5582_v18 }
0x1547   :  { %v2960_v43 = vrot.slane %v2959_v21, 2  ;;  %v5717_v13 = vadd.f32 %v3037_v62, %v5585_v3  ;;  %v2988_v6 = vadd.f32 %v2987_v41, %v2986_v1 }
0x1548   :  { %v910_v20 = vsel %vm759_vm15, %v907_v25, 0.0  ;;  %v911_v53 = vsel %vm759_vm15, %v908_v24, 0.0  ;;  %v913_v40 = vsel %vm763_vm0, %v909_v23, 0.0 }
0x1549   :  { %v2961_v47 = vadd.f32 %v2960_v43, %v2959_v21  ;;  %v912_v58 = vadd.f32 %v911_v53, %v910_v20  ;;  %v2989_v30 = vrot.slane %v2988_v6, 2 }
0x154b   :  { %v2962_v14 = vrot.slane %v2961_v47, 1  ;;  %v914_v51 = vadd.f32 %v913_v40, %v912_v58  ;;  %v2990_v23 = vadd.f32 %v2989_v30, %v2988_v6 }
0x154d   :  { %v2963_v2 = vadd.f32 %v2962_v14, %v2961_v47  ;;  %v915_v42 = vrot.slane %v914_v51, 4  ;;  %v2991_v47 = vrot.slane %v2990_v23, 1 }
0x154f   :  { %3860 = vrcp.f32 %v2963_v2  ;;  %v916_v49 = vadd.f32 %v915_v42, %v914_v51  ;;  %v2973_v3 = vand.u32 2147483647, %v2963_v2  ;;  %v2975_v62 = vand.u32 2147483648, %v2963_v2 }
0x1550   :  { %vm2969_vm10 = vweird.f32 %v2963_v2  ;;  %v3007_v42 = vsub.f32 %v5646_v37, %v5673_v0 }
0x1551   :  { %v917_v21 = vrot.slane %v916_v49, 2  ;;  %vm2974_vm12 = vcmp.eq.f32.partialorder %v2973_v3, 8.507059e+37  ;;  %v2976_v51 = vor.u32 1.1754944e-38, %v2975_v62 }
0x1553   :  { %v918_v45 = vadd.f32 %v917_v21, %v916_v49 }
0x1555   :  { %v3861_v16 = vpop.eup %3860  ;;  %v919_v24 = vrot.slane %v918_v45, 1 }
0x1556   :  { %v2965_v25 = vmul.f32 %v3861_v16, %v2963_v2  ;;  %vm2970_vm9 = vweird.f32 %v3861_v16  ;;  %v3009_v2 = vsub.f32 %v5640_v39, %v5679_v27 }
0x1557   :  { %v920_v43 = vadd.f32 %v919_v24, %v918_v45  ;;  %vm2971_vm11 = vmor %vm2969_vm10, %vm2970_vm9 }
0x1558   :  { %v2966_v18 = vsub.f32 1.0, %v2965_v25 }
0x1559   :  { %v933_v20 = vmul.f32 %v4295_v35, %v920_v43  ;;  %v934_v53 = vmul.f32 %v4299_v38, %v920_v43  ;;  %v935_v1 = vmul.f32 %v4297_v36, %v920_v43 }
0x155a   :  { %v2967_v48 = vmul.f32 %v3861_v16, %v2966_v18 }
0x155b   :  { %v936_v40 = vsub.f32 %v787_v5, %v933_v20  ;;  %v937_v14 = vsub.f32 %v788_v55, %v934_v53  ;;  %v938_v41 = vsub.f32 %v789_v26, %v935_v1  ;;  %v3008_v5 = vsub.f32 %v5642_v34, %v5676_v4 }
0x155c   :  { %v2968_v58 = vadd.f32 %v3861_v16, %v2967_v48  ;;  %v2992_v55 = vadd.f32 %v2991_v47, %v2990_v23 }
0x155d   :  { %v1056_v49 = vmul.f32 %v4356_v44, %v936_v40  ;;  %v1057_v35 = vmul.f32 %v4359_v46, %v937_v14  ;;  %v1058_v38 = vmul.f32 %v4362_v33, %v938_v41 }
0x155e   :  { %v2972_v6 = vsel %vm2971_vm11, %v3861_v16, %v2968_v58 }
0x155f   :  { %v2977_v36 = vsel %vm2974_vm12, %v2976_v51, %v2972_v6  ;;  %v1059_v21 = vsel %vm759_vm15, %v1056_v49, 0.0  ;;  %v1060_v37 = vsel %vm759_vm15, %v1057_v35, 0.0  ;;  %v1062_v45 = vsel %vm763_vm0, %v1058_v38, 0.0 }
0x1560   :  { %v5731_v26 = vmul.f32 %v3007_v42, %v2977_v36  ;;  %v1061_v30 = vadd.f32 %v1060_v37, %v1059_v21  ;;  %v5735_v44 = vmul.f32 %v3009_v2, %v2977_v36  ;;  %v5737_v46 = vmul.f32 %v3008_v5, %v2977_v36  ;;  %v6427_v2 = vld [vmem:[#allocation7_spill] sm:$0xff] }
0x1562   :  { %v3013_v33 = vmul.f32 %v5731_v26, %v2992_v55  ;;  %v1063_v39 = vadd.f32 %v1062_v45, %v1061_v30  ;;  %v3015_v16 = vmul.f32 %v5735_v44, %v2992_v55  ;;  %v3014_v34 = vmul.f32 %v5737_v46, %v2992_v55  ;;  %v6428_v45 = vld [vmem:[#allocation8_spill] sm:$0xff] }
0x1564   :  { %v5745_v25 = vsub.f32 %v5611_v57, %v3013_v33  ;;  %v1064_v24 = vrot.slane %v1063_v39, 4  ;;  %v5748_v23 = vsub.f32 %v5605_v32, %v3015_v16  ;;  %v5751_v18 = vsub.f32 %v5608_v54, %v3014_v34  ;;  %v6430_v16 = vld [vmem:[#allocation9_spill] sm:$0xff] }
0x1566   :  { %v3047_v43 = vsel %vm3046_vm13, %v5745_v25, 0.0  ;;  %v1065_v3 = vadd.f32 %v1064_v24, %v1063_v39  ;;  %v3049_v62 = vsel %vm3046_vm13, %v5748_v23, 0.0  ;;  %v3048_v48 = vsel %vm3046_vm13, %v5751_v18, 0.0  ;;  %v6429_v39 = vld [vmem:[#allocation10_spill] sm:$0xff] }
0x1567   :  { %v3050_v20 = vsel %vm164_vm5, %v3047_v43, 0.0  ;;  %v3056_v53 = vsel %vm171_vm6, %v3049_v62, 0.0  ;;  %v3053_v57 = vsel %vm164_vm5, %v3048_v48, 0.0  ;;  %v6431_v62 = vld [vmem:[#allocation11_spill] sm:$0xff] }
0x1568   :  { %3051 = vadd.xlane.f32.xlu2 %v3050_v20  ;;  %v1066_v1 = vrot.slane %v1065_v3, 2  ;;  %3057 = vadd.xlane.f32.xlu0 %v3056_v53  ;;  %v6432_v20 = vld [vmem:[#allocation12_spill] sm:$0xff] }
0x1569   :  { %3054 = vadd.xlane.f32.xlu1 %v3053_v57  ;;  %v6433_v57 = vld [vmem:[#allocation13_spill] sm:$0xff] }
0x156a   :  { %v1067_v32 = vadd.f32 %v1066_v1, %v1065_v3 }
0x156c   :  { %v1068_v54 = vrot.slane %v1067_v32, 1 }
0x156e   :  { %v1069_v47 = vadd.f32 %v1068_v54, %v1067_v32 }
0x1570   :  { %v1082_v58 = vmul.f32 %v4393_v7, %v1069_v47  ;;  %v1083_v51 = vmul.f32 %v4397_v12, %v1069_v47  ;;  %v1084_v42 = vmul.f32 %v4395_v11, %v1069_v47 }
0x1572   :  { %v1085_v6 = vsub.f32 %v936_v40, %v1082_v58  ;;  %v1086_v49 = vsub.f32 %v937_v14, %v1083_v51  ;;  %v1087_v35 = vsub.f32 %v938_v41, %v1084_v42 }
0x1574   :  { %v1205_v38 = vmul.f32 %v4454_v59, %v1085_v6  ;;  %v1206_v36 = vmul.f32 %v4457_v52, %v1086_v49  ;;  %v1207_v5 = vmul.f32 %v6427_v2, %v1087_v35  ;;  %v6434_v2 = vld [vmem:[#allocation14_spill] sm:$0xff] }
0x1576   :  { %v1208_v55 = vsel %vm759_vm15, %v1205_v38, 0.0  ;;  %v1209_v21 = vsel %vm759_vm15, %v1206_v36, 0.0  ;;  %v1211_v7 = vsel %vm763_vm0, %v1207_v5, 0.0 }
0x1577   :  { %v1210_v37 = vadd.f32 %v1209_v21, %v1208_v55  ;;  %v6435_v55 = vld [vmem:[#allocation16_spill] sm:$0xff] }
0x1579   :  { %v1212_v30 = vadd.f32 %v1211_v7, %v1210_v37  ;;  %v6436_v37 = vld [vmem:[#allocation15_spill] sm:$0xff] }
0x157b   :  { %v1213_v12 = vrot.slane %v1212_v30, 4 }
0x157d   :  { %v1214_v33 = vadd.f32 %v1213_v12, %v1212_v30 }
0x157f   :  { %v1215_v11 = vrot.slane %v1214_v33, 2 }
0x1581   :  { %v1216_v40 = vadd.f32 %v1215_v11, %v1214_v33  ;;  %v6437_v11 = vld [vmem:[#allocation17_spill] sm:$0xff] }
0x1583   :  { %v1217_v14 = vrot.slane %v1216_v40, 1 }
0x1585   :  { %v1218_v41 = vadd.f32 %v1217_v14, %v1216_v40  ;;  %v6438_v14 = vld [vmem:[#allocation18_spill] sm:$0xff] }
0x1587   :  { %v1231_v59 = vmul.f32 %v6428_v45, %v1218_v41  ;;  %v1232_v52 = vmul.f32 %v6429_v39, %v1218_v41  ;;  %v1233_v34 = vmul.f32 %v6430_v16, %v1218_v41  ;;  %v6439_v45 = vld [vmem:[#allocation19_spill] sm:$0xff] }
0x1589   :  { %v1234_v24 = vsub.f32 %v1085_v6, %v1231_v59  ;;  %v1235_v43 = vsub.f32 %v1086_v49, %v1232_v52  ;;  %v1236_v3 = vsub.f32 %v1087_v35, %v1233_v34 }
0x158b   :  { %v1354_v48 = vmul.f32 %v6431_v62, %v1234_v24  ;;  %v1355_v53 = vmul.f32 %v6432_v20, %v1235_v43  ;;  %v1356_v1 = vmul.f32 %v6433_v57, %v1236_v3  ;;  %v6440_v57 = vld [vmem:[#allocation20_spill] sm:$0xff] }
0x158d   :  { %v1357_v32 = vsel %vm759_vm15, %v1354_v48, 0.0  ;;  %v1358_v54 = vsel %vm759_vm15, %v1355_v53, 0.0  ;;  %v1360_v58 = vsel %vm763_vm0, %v1356_v1, 0.0 }
0x158e   :  { %v1359_v47 = vadd.f32 %v1358_v54, %v1357_v32  ;;  %v6441_v32 = vld [vmem:[#allocation22_spill] sm:$0xff] }
0x1590   :  { %v1361_v51 = vadd.f32 %v1360_v58, %v1359_v47  ;;  %v6442_v47 = vld [vmem:[#allocation21_spill] sm:$0xff] }
0x1592   :  { %v1362_v42 = vrot.slane %v1361_v51, 4 }
0x1594   :  { %v1363_v38 = vadd.f32 %v1362_v42, %v1361_v51 }
0x1596   :  { %v1364_v36 = vrot.slane %v1363_v38, 2 }
0x1598   :  { %v1365_v6 = vadd.f32 %v1364_v36, %v1363_v38  ;;  %v6443_v36 = vld [vmem:[#allocation23_spill] sm:$0xff] }
0x159a   :  { %v1366_v49 = vrot.slane %v1365_v6, 1 }
0x159c   :  { %v1367_v35 = vadd.f32 %v1366_v49, %v1365_v6  ;;  %v6444_v49 = vld [vmem:[#allocation24_spill] sm:$0xff] }
0x159e   :  { %v1380_v5 = vmul.f32 %v6434_v2, %v1367_v35  ;;  %v1381_v21 = vmul.f32 %v6435_v55, %v1367_v35  ;;  %v1382_v7 = vmul.f32 %v6436_v37, %v1367_v35  ;;  %v6445_v2 = vld [vmem:[#allocation25_spill] sm:$0xff] }
0x15a0   :  { %v1383_v30 = vsub.f32 %v1234_v24, %v1380_v5  ;;  %v1384_v12 = vsub.f32 %v1235_v43, %v1381_v21  ;;  %v1385_v33 = vsub.f32 %v1236_v3, %v1382_v7 }
0x15a2   :  { %v1503_v40 = vmul.f32 %v6437_v11, %v1383_v30  ;;  %v1504_v41 = vmul.f32 %v6438_v14, %v1384_v12  ;;  %v1505_v59 = vmul.f32 %v6439_v45, %v1385_v33  ;;  %v6446_v45 = vld [vmem:[#allocation26_spill] sm:$0xff] }
0x15a4   :  { %v1506_v39 = vsel %vm759_vm15, %v1503_v40, 0.0  ;;  %v1507_v52 = vsel %vm759_vm15, %v1504_v41, 0.0  ;;  %v1509_v34 = vsel %vm763_vm0, %v1505_v59, 0.0 }
0x15a5   :  { %v1508_v16 = vadd.f32 %v1507_v52, %v1506_v39  ;;  %v6447_v39 = vld [vmem:[#allocation28_spill] sm:$0xff] }
0x15a7   :  { %v1510_v62 = vadd.f32 %v1509_v34, %v1508_v16  ;;  %v6448_v16 = vld [vmem:[#allocation27_spill] sm:$0xff] }
0x15a9   :  { %v1511_v48 = vrot.slane %v1510_v62, 4 }
0x15ab   :  { %v1512_v20 = vadd.f32 %v1511_v48, %v1510_v62 }
0x15ad   :  { %v1513_v53 = vrot.slane %v1512_v20, 2 }
0x15af   :  { %v1514_v24 = vadd.f32 %v1513_v53, %v1512_v20  ;;  %v6449_v53 = vld [vmem:[#allocation29_spill] sm:$0xff] }
0x15b1   :  { %v1515_v43 = vrot.slane %v1514_v24, 1 }
0x15b3   :  { %v1516_v3 = vadd.f32 %v1515_v43, %v1514_v24  ;;  %v6450_v43 = vld [vmem:[#allocation30_spill] sm:$0xff] }
0x15b5   :  { %v1529_v1 = vmul.f32 %v6440_v57, %v1516_v3  ;;  %v1530_v54 = vmul.f32 %v6441_v32, %v1516_v3  ;;  %v1531_v58 = vmul.f32 %v6442_v47, %v1516_v3  ;;  %v6451_v57 = vld [vmem:[#allocation31_spill] sm:$0xff] }
0x15b7   :  { %v1532_v51 = vsub.f32 %v1383_v30, %v1529_v1  ;;  %v1533_v42 = vsub.f32 %v1384_v12, %v1530_v54  ;;  %v1534_v38 = vsub.f32 %v1385_v33, %v1531_v58 }
0x15b9   :  { %v1652_v6 = vmul.f32 %v6443_v36, %v1532_v51  ;;  %v1653_v35 = vmul.f32 %v6444_v49, %v1533_v42  ;;  %v1654_v5 = vmul.f32 %v6445_v2, %v1534_v38  ;;  %v5814_v49 = vadd.f32 %v5679_v27, %v5630_v50 }
0x15bb   :  { %v1655_v55 = vsel %vm759_vm15, %v1652_v6, 0.0  ;;  %v1656_v21 = vsel %vm759_vm15, %v1653_v35, 0.0  ;;  %v1658_v7 = vsel %vm763_vm0, %v1654_v5, 0.0  ;;  %vm3061_vm3 = vcmp.gt.f32.partialorder %v5814_v49, 0.5 }
0x15bc   :  { %v1657_v37 = vadd.f32 %v1656_v21, %v1655_v55 }
0x15be   :  { %v1659_v11 = vadd.f32 %v1658_v7, %v1657_v37 }
0x15c0   :  { %v1660_v40 = vrot.slane %v1659_v11, 4 }
0x15c2   :  { %v1661_v14 = vadd.f32 %v1660_v40, %v1659_v11 }
0x15c4   :  { %v1662_v41 = vrot.slane %v1661_v14, 2 }
0x15c6   :  { %v1663_v30 = vadd.f32 %v1662_v41, %v1661_v14 }
0x15c8   :  { %v1664_v12 = vrot.slane %v1663_v30, 1 }
0x15ca   :  { %v1665_v33 = vadd.f32 %v1664_v12, %v1663_v30 }
0x15cc   :  { %v1678_v59 = vmul.f32 %v6446_v45, %v1665_v33  ;;  %v1679_v52 = vmul.f32 %v6447_v39, %v1665_v33  ;;  %v1680_v34 = vmul.f32 %v6448_v16, %v1665_v33  ;;  %v6452_v33 = vld [vmem:[#allocation32_spill] sm:$0xff] }
0x15ce   :  { %v1681_v62 = vsub.f32 %v1532_v51, %v1678_v59  ;;  %v1682_v48 = vsub.f32 %v1533_v42, %v1679_v52  ;;  %v1683_v20 = vsub.f32 %v1534_v38, %v1680_v34  ;;  %v5806_v51 = vadd.f32 %v5673_v0, %v5638_v28  ;;  %v6453_v59 = vld [vmem:[#allocation34_spill] sm:$0xff]  ;;  %v6454_v52 = vld [vmem:[#allocation33_spill] sm:$0xff] }
0x15cf   :  { %v5810_v38 = vadd.f32 %v5676_v4, %v5634_v19 }
0x15d0   :  { %v1801_v24 = vmul.f32 %v6449_v53, %v1681_v62  ;;  %v1802_v3 = vmul.f32 %v6450_v43, %v1682_v48  ;;  %v1803_v1 = vmul.f32 %v6451_v57, %v1683_v20  ;;  %vm3059_vm14 = vcmp.gt.f32.partialorder %v5806_v51, 0.5  ;;  %v6455_v57 = vld [vmem:[#allocation35_spill] sm:$0xff] }
0x15d1   :  { %vm3060_vm1 = vcmp.gt.f32.partialorder %v5810_v38, 0.5 }
0x15d2   :  { %v1804_v32 = vsel %vm759_vm15, %v1801_v24, 0.0  ;;  %v1805_v54 = vsel %vm759_vm15, %v1802_v3, 0.0  ;;  %v1807_v58 = vsel %vm763_vm0, %v1803_v1, 0.0 }
0x15d3   :  { %v1806_v47 = vadd.f32 %v1805_v54, %v1804_v32  ;;  %v6456_v32 = vld [vmem:[#allocation36_spill] sm:$0xff] }
0x15d5   :  { %v1808_v36 = vadd.f32 %v1807_v58, %v1806_v47  ;;  %v6457_v47 = vld [vmem:[#allocation37_spill] sm:$0xff] }
0x15d7   :  { %v1809_v6 = vrot.slane %v1808_v36, 4 }
0x15d9   :  { %v1810_v42 = vadd.f32 %v1809_v6, %v1808_v36 }
0x15db   :  { %v5816_v35 = vpop.xlane.xlu2 %3051  ;;  %v1811_v2 = vrot.slane %v1810_v42, 2  ;;  %v5821_v21 = vpop.xlane.xlu0 %3057 }
0x15dc   :  { %v5818_v5 = vpop.xlane.xlu1 %3054  ;;  %v3062_v55 = vand.u32 2147483647, %v5816_v35  ;;  %v3064_v19 = vand.u32 2147483647, %v5821_v21 }
0x15dd   :  { %v3063_v28 = vand.u32 2147483647, %v5818_v5  ;;  %v1812_v37 = vadd.f32 %v1811_v2, %v1810_v42 }
0x15de   :  { %v3065_v50 = vsel %vm3059_vm14, -1.0, %v3062_v55  ;;  %v3067_v11 = vsel %vm3061_vm3, -1.0, %v3064_v19 }
0x15df   :  { %v3066_v7 = vsel %vm3060_vm1, -1.0, %v3063_v28  ;;  %v1813_v40 = vrot.slane %v1812_v37, 1  ;;  %v3068_v41 = vsel %vm322_vm2, %v3067_v11, -inf }
0x15e0   :  { %v3069_v14 = vmax.f32 %v3065_v50, %v3066_v7 }
0x15e1   :  { %v1814_v30 = vadd.f32 %v1813_v40, %v1812_v37 }
0x15e2   :  { %v3070_v12 = vmax.f32 %v3069_v14, %v3068_v41 }
0x15e3   :  { %v1827_v45 = vmul.f32 %v6452_v33, %v1814_v30  ;;  %v1828_v39 = vmul.f32 %v6453_v59, %v1814_v30  ;;  %v1829_v16 = vmul.f32 %v6454_v52, %v1814_v30 }
0x15e4   :  { %v3071_v34 = vrot.slane %v3070_v12, 4 }
0x15e5   :  { %v1830_v53 = vsub.f32 %v1681_v62, %v1827_v45  ;;  %v1831_v24 = vsub.f32 %v1682_v48, %v1828_v39  ;;  %v1832_v43 = vsub.f32 %v1683_v20, %v1829_v16 }
0x15e6   :  { %v3072_v3 = vmax.f32 %v3070_v12, %v3071_v34 }
0x15e7   :  { %v1950_v1 = vmul.f32 %v6455_v57, %v1830_v53  ;;  %v1951_v54 = vmul.f32 %v6456_v32, %v1831_v24  ;;  %v1952_v58 = vmul.f32 %v6457_v47, %v1832_v43 }
0x15e8   :  { %v3073_v36 = vrot.slane %v3072_v3, 2 }
0x15e9   :  { %v1953_v6 = vsel %vm759_vm15, %v1950_v1, 0.0  ;;  %v1954_v42 = vsel %vm759_vm15, %v1951_v54, 0.0  ;;  %v1956_v28 = vsel %vm763_vm0, %v1952_v58, 0.0  ;;  %v6460_v1 = vld [vmem:[#allocation39_spill] sm:$0xff] }
0x15ea   :  { %v3074_v2 = vmax.f32 %v3072_v3, %v3073_v36  ;;  %v1955_v55 = vadd.f32 %v1954_v42, %v1953_v6  ;;  %v6459_v3 = vld [vmem:[#allocation40_spill] sm:$0xff]  ;;  %v6461_v42 = vld [vmem:[#allocation41_spill] sm:$0xff] }
0x15ec   :  { %v3075_v19 = vrot.slane %v3074_v2, 1  ;;  %v1957_v62 = vadd.f32 %v1956_v28, %v1955_v55  ;;  %v6462_v55 = vld [vmem:[#allocation42_spill] sm:$0xff] }
0x15ee   :  { %v3076_v48 = vmax.f32 %v3074_v2, %v3075_v19  ;;  %v1958_v20 = vrot.slane %v1957_v62, 4  ;;  %v6463_v19 = vld [vmem:[#allocation43_spill] sm:$0xff] }
0x15f0   :  { %vm3077_vm4 = vcmp.eq.f32.partialorder %v3065_v50, %v3076_v48  ;;  %vm3078_vm7 = vcmp.eq.f32.partialorder %v3066_v7, %v3076_v48  ;;  %vm3079_vm8 = vcmp.eq.f32.partialorder %v3067_v11, %v3076_v48  ;;  %v1959_v37 = vadd.f32 %v1958_v20, %v1957_v62  ;;  %v6458_v7 = vld [vmem:[#allocation38_spill] sm:$0xff] }
0x15f1   :  { %v3080_v40 = vsel %vm3077_vm4, %v4152_v8, 20.0  ;;  %v3081_v14 = vsel %vm3078_vm7, %v4155_v9, 20.0  ;;  %v3082_v41 = vsel %vm3079_vm8, %v4158_v10, 20.0  ;;  %vm3195_vm7 = vcmp.eq.s32.totalorder %v3961_v17, 17 }
0x15f2   :  { %v3083_v30 = vsel %vm322_vm2, %v3082_v41, inf  ;;  %v3084_v12 = vmin.f32 %v3080_v40, %v3081_v14  ;;  %v1960_v33 = vrot.slane %v1959_v37, 2  ;;  %v6464_v40 = vld [vmem:[#allocation6_spill] sm:$0xff] }
0x15f3   :  { %vm3176_vm9 = vcmp.eq.s32.totalorder %v6464_v40, 16 }
0x15f4   :  { %v3085_v45 = vmin.f32 %v3084_v12, %v3083_v30  ;;  %v1961_v59 = vadd.f32 %v1960_v33, %v1959_v37 }
0x15f6   :  { %v3086_v39 = vrot.slane %v3085_v45, 4  ;;  %v1962_v52 = vrot.slane %v1961_v59, 1 }
0x15f8   :  { %v3087_v16 = vmin.f32 %v3085_v45, %v3086_v39  ;;  %v1963_v34 = vadd.f32 %v1962_v52, %v1961_v59 }
0x15fa   :  { %v3088_v50 = vrot.slane %v3087_v16, 2  ;;  %v1976_v11 = vmul.f32 %v6458_v7, %v1963_v34  ;;  %v1977_v57 = vmul.f32 %v6459_v3, %v1963_v34  ;;  %v1978_v32 = vmul.f32 %v6460_v1, %v1963_v34 }
0x15fc   :  { %v3089_v54 = vmin.f32 %v3087_v16, %v3088_v50  ;;  %v1979_v47 = vsub.f32 %v1830_v53, %v1976_v11  ;;  %v1980_v58 = vsub.f32 %v1831_v24, %v1977_v57  ;;  %v1981_v36 = vsub.f32 %v1832_v43, %v1978_v32 }
0x15fd   :  { %v3779_v50 = vsel %vm3176_vm9, 1.0, %v6370_v56 }
0x15fe   :  { %v3090_v6 = vrot.slane %v3089_v54, 1  ;;  %v2099_v2 = vmul.f32 %v6461_v42, %v1979_v47  ;;  %v2100_v28 = vmul.f32 %v6462_v55, %v1980_v58  ;;  %v2101_v62 = vmul.f32 %v6463_v19, %v1981_v36 }
0x1600   :  { %v3091_v48 = vmin.f32 %v3089_v54, %v3090_v6  ;;  %v2102_v20 = vsel %vm759_vm15, %v2099_v2, 0.0  ;;  %v2103_v37 = vsel %vm759_vm15, %v2100_v28, 0.0  ;;  %v2105_v53 = vsel %vm763_vm0, %v2101_v62, 0.0 }
0x1601   :  { %v2104_v14 = vadd.f32 %v2103_v37, %v2102_v20 }
0x1602   :  { %vm3092_vm10 = vcmp.eq.f32.partialorder %v4152_v8, %v3091_v48  ;;  %vm3093_vm11 = vcmp.eq.f32.partialorder %v4155_v9, %v3091_v48  ;;  %vm3094_vm12 = vcmp.eq.f32.partialorder %v4158_v10, %v3091_v48  ;;  %vm3183_vm13 = vcmp.eq.f32.partialorder %v4246_v63, %v3091_v48 }
0x1603   :  { %v5856_v24 = vsel %vm3092_vm10, 1.0, %v6370_v56  ;;  %v5859_v43 = vsel %vm3093_vm11, 1.0, %v6370_v56  ;;  %v5862_v41 = vsel %vm3094_vm12, 1.0, %v6370_v56  ;;  %v2106_v30 = vadd.f32 %v2105_v53, %v2104_v14 }
0x1604   :  { %v3101_v12 = vmul.f32 %v5856_v24, %v5816_v35  ;;  %v3102_v33 = vmul.f32 %v5859_v43, %v5818_v5  ;;  %v3103_v45 = vmul.f32 %v5862_v41, %v5821_v21  ;;  %v3128_v59 = vmul.f32 %v5856_v24, %v5745_v25 }
0x1605   :  { %v3129_v39 = vmul.f32 %v5859_v43, %v5751_v18  ;;  %v2107_v52 = vrot.slane %v2106_v30, 4  ;;  %v3780_v1 = vsel %vm3183_vm13, 1.0, %v6370_v56  ;;  %v3130_v6 = vmul.f32 %v5862_v41, %v5748_v23 }
0x1606   :  { %v3104_v16 = vadd.f32 %v3102_v33, %v3101_v12  ;;  %v3105_v34 = vsel %vm322_vm2, %v3103_v45, 0.0  ;;  %v3131_v3 = vsel %vm164_vm5, %v3128_v59, 0.0  ;;  %v3186_v2 = vmul.f32 0.0, %v3780_v1  ;;  %v6465_v45 = vld [vmem:[#allocation44_spill] sm:$0xff] }
0x1607   :  { %v2108_v7 = vadd.f32 %v2107_v52, %v2106_v30  ;;  %v3132_v57 = vsel %vm164_vm5, %v3129_v39, 0.0  ;;  %v3188_v55 = vmul.f32 %v3780_v1, %v3779_v50  ;;  %v3134_v53 = vsel %vm171_vm6, %v3130_v6, 0.0  ;;  %v6466_v39 = vld [vmem:[#allocation46_spill] sm:$0xff]  ;;  %v6469_v1 = vld [vmem:[#allocation48_spill] sm:$0xff] }
0x1608   :  { %v3106_v11 = vadd.f32 %v3105_v34, %v3104_v16  ;;  %v3133_v42 = vadd.f32 %v3132_v57, %v3131_v3  ;;  %v5885_v62 = vadd.f32 %v3186_v2, %v5710_v15  ;;  %v5888_v48 = vadd.f32 %v3186_v2, %v5714_v31  ;;  %v6467_v16 = vld [vmem:[#allocation45_spill] sm:$0xff]  ;;  %v6468_v3 = vld [vmem:[#allocation47_spill] sm:$0xff] }
0x1609   :  { %v2109_v32 = vrot.slane %v2108_v7, 2  ;;  %v5891_v20 = vadd.f32 %v3188_v55, %v5717_v13 }
0x160a   :  { %v3107_v54 = vrot.slane %v3106_v11, 4  ;;  %v3135_v30 = vadd.f32 %v3134_v53, %v3133_v42 }
0x160b   :  { %v2110_v28 = vadd.f32 %v2109_v32, %v2108_v7 }
0x160c   :  { %v3108_v19 = vadd.f32 %v3107_v54, %v3106_v11  ;;  %v3136_v50 = vrot.slane %v3135_v30, 4  ;;  %v6470_v54 = vld [vmem:[#allocation49_spill] sm:$0xff] }
0x160d   :  { %v2111_v37 = vrot.slane %v2110_v28, 1 }
0x160e   :  { %v3109_v14 = vrot.slane %v3108_v19, 2  ;;  %v3137_v55 = vadd.f32 %v3136_v50, %v3135_v30  ;;  %v3157_v50 = vsub.f32 %v5818_v5, %v5859_v43 }
0x160f   :  { %v2112_v12 = vadd.f32 %v2111_v37, %v2110_v28 }
0x1610   :  { %v3110_v33 = vadd.f32 %v3109_v14, %v3108_v19 }
0x1611   :  { %v2125_v59 = vmul.f32 %v6465_v45, %v2112_v12  ;;  %v2126_v52 = vmul.f32 %v6466_v39, %v2112_v12  ;;  %v2127_v15 = vmul.f32 %v6467_v16, %v2112_v12 }
0x1612   :  { %v3111_v34 = vrot.slane %v3110_v33, 1 }
0x1613   :  { %v2128_v31 = vsub.f32 %v1979_v47, %v2125_v59  ;;  %v2129_v7 = vsub.f32 %v1980_v58, %v2126_v52  ;;  %v2130_v11 = vsub.f32 %v1981_v36, %v2127_v15  ;;  %v3138_v58 = vrot.slane %v3137_v55, 2 }
0x1614   :  { %v3112_v13 = vadd.f32 %v3111_v34, %v3110_v33 }
0x1615   :  { %v2248_v57 = vmul.f32 %v6468_v3, %v2128_v31  ;;  %v2249_v32 = vmul.f32 %v6469_v1, %v2129_v7  ;;  %v2250_v6 = vmul.f32 %v6470_v54, %v2130_v11  ;;  %v3139_v45 = vadd.f32 %v3138_v58, %v3137_v55  ;;  %v6471_v55 = vld [vmem:[#allocation50_spill] sm:$0xff] }
0x1616   :  { %3862 = vrcp.f32 %v3112_v13  ;;  %v3124_v33 = vand.u32 2147483648, %v3112_v13  ;;  %v3122_v52 = vand.u32 2147483647, %v3112_v13  ;;  %vm3118_vm1 = vweird.f32 %v3112_v13 }
0x1617   :  { %v2251_v42 = vsel %vm759_vm15, %v2248_v57, 0.0  ;;  %v2252_v2 = vsel %vm759_vm15, %v2249_v32, 0.0  ;;  %v2254_v19 = vsel %vm763_vm0, %v2250_v6, 0.0  ;;  %v3140_v34 = vrot.slane %v3139_v45, 1 }
0x1618   :  { %v2253_v28 = vadd.f32 %v2252_v2, %v2251_v42  ;;  %v3125_v30 = vor.u32 1.1754944e-38, %v3124_v33  ;;  %vm3123_vm4 = vcmp.eq.f32.partialorder %v3122_v52, 8.507059e+37  ;;  %v3156_v1 = vsub.f32 %v5816_v35, %v5856_v24 }
0x1619   :  { %v3158_v6 = vsub.f32 %v5821_v21, %v5862_v41  ;;  %v3141_v2 = vadd.f32 %v3140_v34, %v3139_v45  ;;  %v6474_v45 = vld [vmem:[#allocation53_spill] sm:$0xff] }
0x161a   :  { %v2255_v37 = vadd.f32 %v2254_v19, %v2253_v28  ;;  %v6472_v19 = vld [vmem:[#allocation52_spill] sm:$0xff] }
0x161c   :  { %v3863_v47 = vpop.eup %3862  ;;  %v2256_v36 = vrot.slane %v2255_v37, 4 }
0x161d   :  { %v3114_v14 = vmul.f32 %v3863_v47, %v3112_v13  ;;  %vm3119_vm14 = vweird.f32 %v3863_v47 }
0x161e   :  { %v2257_v53 = vadd.f32 %v2256_v36, %v2255_v37  ;;  %vm3120_vm3 = vmor %vm3118_vm1, %vm3119_vm14  ;;  %v6473_v37 = vld [vmem:[#allocation51_spill] sm:$0xff] }
0x161f   :  { %v3115_v12 = vsub.f32 1.0, %v3114_v14 }
0x1620   :  { %v2258_v59 = vrot.slane %v2257_v53, 2 }
0x1621   :  { %v3116_v39 = vmul.f32 %v3863_v47, %v3115_v12 }
0x1622   :  { %v2259_v16 = vadd.f32 %v2258_v59, %v2257_v53 }
0x1623   :  { %v3117_v15 = vadd.f32 %v3863_v47, %v3116_v39  ;;  %v6475_v39 = vld [vmem:[#allocation54_spill] sm:$0xff] }
0x1624   :  { %v2260_v3 = vrot.slane %v2259_v16, 1 }
0x1625   :  { %v3121_v57 = vsel %vm3120_vm3, %v3863_v47, %v3117_v15 }
0x1626   :  { %v3126_v32 = vsel %vm3123_vm4, %v3125_v30, %v3121_v57  ;;  %v2261_v54 = vadd.f32 %v2260_v3, %v2259_v16  ;;  %v6476_v16 = vld [vmem:[#allocation55_spill] sm:$0xff] }
0x1627   :  { %v5909_v42 = vmul.f32 %v3157_v50, %v3126_v32  ;;  %v5911_v13 = vmul.f32 %v3156_v1, %v3126_v32  ;;  %v5916_v58 = vmul.f32 %v3158_v6, %v3126_v32 }
0x1628   :  { %v2274_v28 = vmul.f32 %v6471_v55, %v2261_v54  ;;  %v2275_v5 = vmul.f32 %v6472_v19, %v2261_v54  ;;  %v2276_v47 = vmul.f32 %v6473_v37, %v2261_v54  ;;  %v6477_v37 = vld [vmem:[#allocation56_spill] sm:$0xff] }
0x1629   :  { %v3163_v35 = vmul.f32 %v5909_v42, %v3141_v2  ;;  %v3162_v36 = vmul.f32 %v5911_v13, %v3141_v2  ;;  %v3164_v30 = vmul.f32 %v5916_v58, %v3141_v2 }
0x162a   :  { %v2277_v14 = vsub.f32 %v2128_v31, %v2274_v28  ;;  %v2278_v53 = vsub.f32 %v2129_v7, %v2275_v5  ;;  %v2279_v21 = vsub.f32 %v2130_v11, %v2276_v47 }
0x162b   :  { %v5922_v12 = vsub.f32 %v5751_v18, %v3163_v35  ;;  %v5925_v33 = vsub.f32 %v5745_v25, %v3162_v36  ;;  %v5943_v57 = vsub.f32 %v5748_v23, %v3164_v30  ;;  %v6478_v35 = vld [vmem:[#allocation58_spill] sm:$0xff]  ;;  %v6479_v23 = vld [vmem:[#allocation57_spill] sm:$0xff]  ;;  %v6481_v30 = vld [vmem:[#allocation60_spill] sm:$0xff] }
0x162c   :  { %v2397_v59 = vmul.f32 %v6474_v45, %v2277_v14  ;;  %v2398_v52 = vmul.f32 %v6475_v39, %v2278_v53  ;;  %v2399_v15 = vmul.f32 %v6476_v16, %v2279_v21  ;;  %v6480_v16 = vld [vmem:[#allocation59_spill] sm:$0xff] }
0x162d   :  { %v3197_v31 = vsel %vm3195_vm7, %v5922_v12, 0.0  ;;  %v3196_v18 = vsel %vm3195_vm7, %v5925_v33, 0.0  ;;  %v3198_v54 = vsel %vm3195_vm7, %v5943_v57, 0.0  ;;  %vm3325_vm7 = vcmp.eq.s32.totalorder %v6464_v40, 17 }
0x162e   :  { %v2400_v7 = vsel %vm759_vm15, %v2397_v59, 0.0  ;;  %v2401_v25 = vsel %vm759_vm15, %v2398_v52, 0.0  ;;  %v3202_v11 = vsel %vm164_vm5, %v3197_v31, 0.0  ;;  %v3199_v50 = vsel %vm164_vm5, %v3196_v18, 0.0  ;;  %v6482_v18 = vld [vmem:[#allocation61_spill] sm:$0xff] }
0x162f   :  { %v2402_v34 = vadd.f32 %v2401_v25, %v2400_v7  ;;  %3203 = vadd.xlane.f32.xlu1 %v3202_v11  ;;  %v2403_v3 = vsel %vm763_vm0, %v2399_v15, 0.0  ;;  %3200 = vadd.xlane.f32.xlu2 %v3199_v50  ;;  %v3205_v55 = vsel %vm171_vm6, %v3198_v54, 0.0 }
0x1631   :  { %v2404_v1 = vadd.f32 %v2403_v3, %v2402_v34 }
0x1633   :  { %v2405_v32 = vrot.slane %v2404_v1, 4 }
0x1635   :  { %v2406_v6 = vadd.f32 %v2405_v32, %v2404_v1 }
0x1637   :  { %v2407_v2 = vrot.slane %v2406_v6, 2  ;;  %3206 = vadd.xlane.f32.xlu2 %v3205_v55  ;;  %v6484_v55 = vld [vmem:[#allocation64_spill] sm:$0xff] }
0x1639   :  { %v2408_v28 = vadd.f32 %v2407_v2, %v2406_v6  ;;  %v6483_v6 = vld [vmem:[#allocation62_spill] sm:$0xff] }
0x163b   :  { %v2409_v19 = vrot.slane %v2408_v28, 1 }
0x163d   :  { %v2410_v5 = vadd.f32 %v2409_v19, %v2408_v28  ;;  %v6485_v19 = vld [vmem:[#allocation63_spill] sm:$0xff] }
0x163f   :  { %v2423_v47 = vmul.f32 %v6477_v37, %v2410_v5  ;;  %v2424_v36 = vmul.f32 %v6478_v35, %v2410_v5  ;;  %v2425_v45 = vmul.f32 %v6479_v23, %v2410_v5 }
0x1641   :  { %v2426_v59 = vsub.f32 %v2277_v14, %v2423_v47  ;;  %v2427_v39 = vsub.f32 %v2278_v53, %v2424_v36  ;;  %v2428_v52 = vsub.f32 %v2279_v21, %v2425_v45 }
0x1643   :  { %v2546_v15 = vmul.f32 %v6480_v16, %v2426_v59  ;;  %v2547_v31 = vmul.f32 %v6481_v30, %v2427_v39  ;;  %v2548_v7 = vmul.f32 %v6482_v18, %v2428_v52 }
0x1645   :  { %v2549_v25 = vsel %vm759_vm15, %v2546_v15, 0.0  ;;  %v2550_v11 = vsel %vm759_vm15, %v2547_v31, 0.0  ;;  %v2552_v50 = vsel %vm763_vm0, %v2548_v7, 0.0 }
0x1646   :  { %v2551_v34 = vadd.f32 %v2550_v11, %v2549_v25 }
0x1648   :  { %v2553_v3 = vadd.f32 %v2552_v50, %v2551_v34  ;;  %v6486_v34 = vld [vmem:[#allocation65_spill] sm:$0xff]  ;;  %v6487_v50 = vld [vmem:[#allocation67_spill] sm:$0xff] }
0x164a   :  { %v2554_v1 = vrot.slane %v2553_v3, 4 }
0x164c   :  { %v2555_v32 = vadd.f32 %v2554_v1, %v2553_v3  ;;  %v6488_v3 = vld [vmem:[#allocation66_spill] sm:$0xff] }
0x164e   :  { %v2556_v54 = vrot.slane %v2555_v32, 2 }
0x1650   :  { %v2557_v14 = vadd.f32 %v2556_v54, %v2555_v32 }
0x1652   :  { %v2558_v53 = vrot.slane %v2557_v14, 1 }
0x1654   :  { %v2559_v21 = vadd.f32 %v2558_v53, %v2557_v14  ;;  %v6489_v53 = vld [vmem:[#allocation68_spill] sm:$0xff] }
0x1656   :  { %v2572_v2 = vmul.f32 %v6483_v6, %v2559_v21  ;;  %v2573_v28 = vmul.f32 %v6484_v55, %v2559_v21  ;;  %v2574_v5 = vmul.f32 %v6485_v19, %v2559_v21  ;;  %v6490_v6 = vld [vmem:[#allocation69_spill] sm:$0xff] }
0x1658   :  { %v2575_v37 = vsub.f32 %v2426_v59, %v2572_v2  ;;  %v2576_v47 = vsub.f32 %v2427_v39, %v2573_v28  ;;  %v2577_v35 = vsub.f32 %v2428_v52, %v2574_v5 }
0x165a   :  { %v2695_v36 = vmul.f32 %v5451_v22, %v2575_v37  ;;  %v2696_v23 = vmul.f32 %v5454_v61, %v2576_v47  ;;  %v2697_v45 = vmul.f32 %v5457_v60, %v2577_v35 }
0x165c   :  { %v2698_v16 = vsel %vm759_vm15, %v2695_v36, 0.0  ;;  %v2699_v15 = vsel %vm759_vm15, %v2696_v23, 0.0  ;;  %v2701_v31 = vsel %vm763_vm0, %v2697_v45, 0.0 }
0x165d   :  { %v2700_v30 = vadd.f32 %v2699_v15, %v2698_v16  ;;  %v6491_v15 = vld [vmem:[#allocation70_spill] sm:$0xff] }
0x165f   :  { %v2702_v18 = vadd.f32 %v2701_v31, %v2700_v30  ;;  %v6492_v30 = vld [vmem:[#allocation72_spill] sm:$0xff] }
0x1661   :  { %v2703_v7 = vrot.slane %v2702_v18, 4 }
0x1663   :  { %v2704_v25 = vadd.f32 %v2703_v7, %v2702_v18  ;;  %v6493_v18 = vld [vmem:[#allocation71_spill] sm:$0xff] }
0x1665   :  { %v2705_v11 = vrot.slane %v2704_v25, 2 }
0x1667   :  { %v2706_v59 = vadd.f32 %v2705_v11, %v2704_v25 }
0x1669   :  { %v2707_v39 = vrot.slane %v2706_v59, 1 }
0x166b   :  { %v2708_v52 = vadd.f32 %v2707_v39, %v2706_v59 }
0x166d   :  { %v2721_v22 = vmul.f32 %v6486_v34, %v2708_v52  ;;  %v2722_v61 = vmul.f32 %v6487_v50, %v2708_v52  ;;  %v2723_v60 = vmul.f32 %v6488_v3, %v2708_v52 }
0x166f   :  { %v2724_v1 = vsub.f32 %v2575_v37, %v2721_v22  ;;  %v2725_v32 = vsub.f32 %v2576_v47, %v2722_v61  ;;  %v2726_v54 = vsub.f32 %v2577_v35, %v2723_v60 }
0x1671   :  { %v2844_v14 = vmul.f32 %v5552_v29, %v2724_v1  ;;  %v2845_v21 = vmul.f32 %v6489_v53, %v2725_v32  ;;  %v2846_v2 = vmul.f32 %v6490_v6, %v2726_v54 }
0x1673   :  { %v2847_v55 = vsel %vm759_vm15, %v2844_v14, 0.0  ;;  %v2848_v28 = vsel %vm759_vm15, %v2845_v21, 0.0  ;;  %v2850_v5 = vsel %vm763_vm0, %v2846_v2, 0.0 }
0x1674   :  { %v2849_v19 = vadd.f32 %v2848_v28, %v2847_v55 }
0x1676   :  { %v2851_v36 = vadd.f32 %v2850_v5, %v2849_v19 }
0x1678   :  { %v2852_v23 = vrot.slane %v2851_v36, 4 }
0x167a   :  { %v2853_v45 = vadd.f32 %v2852_v23, %v2851_v36 }
0x167c   :  { %v2854_v16 = vrot.slane %v2853_v45, 2 }
0x167e   :  { %v2855_v37 = vadd.f32 %v2854_v16, %v2853_v45 }
0x1680   :  { %v2856_v47 = vrot.slane %v2855_v37, 1 }
0x1682   :  { %v2857_v35 = vadd.f32 %v2856_v47, %v2855_v37  ;;  %v6011_v37 = vadd.f32 %v5862_v41, %v5814_v49 }
0x1684   :  { %v2870_v29 = vmul.f32 %v6491_v15, %v2857_v35  ;;  %v2871_v31 = vmul.f32 %v6492_v30, %v2857_v35  ;;  %v2872_v7 = vmul.f32 %v6493_v18, %v2857_v35  ;;  %vm3210_vm10 = vcmp.gt.f32.partialorder %v6011_v37, 0.5 }
0x1686   :  { %v2873_v25 = vsub.f32 %v2724_v1, %v2870_v29  ;;  %v2874_v11 = vsub.f32 %v2725_v32, %v2871_v31  ;;  %v2875_v59 = vsub.f32 %v2726_v54, %v2872_v7 }
0x1688   :  { %v2993_v39 = vmul.f32 %v5673_v0, %v2873_v25  ;;  %v2994_v52 = vmul.f32 %v5676_v4, %v2874_v11  ;;  %v2995_v34 = vmul.f32 %v5679_v27, %v2875_v59 }
0x168a   :  { %v2996_v22 = vsel %vm759_vm15, %v2993_v39, 0.0  ;;  %v2997_v50 = vsel %vm759_vm15, %v2994_v52, 0.0  ;;  %v2999_v3 = vsel %vm763_vm0, %v2995_v34, 0.0 }
0x168b   :  { %v2998_v61 = vadd.f32 %v2997_v50, %v2996_v22 }
0x168d   :  { %v3000_v60 = vadd.f32 %v2999_v3, %v2998_v61 }
0x168f   :  { %v3001_v14 = vrot.slane %v3000_v60, 4 }
0x1691   :  { %v3002_v53 = vadd.f32 %v3001_v14, %v3000_v60 }
0x1693   :  { %v3003_v21 = vrot.slane %v3002_v53, 2 }
0x1695   :  { %v3004_v1 = vadd.f32 %v3003_v21, %v3002_v53 }
0x1697   :  { %v3005_v32 = vrot.slane %v3004_v1, 1 }
0x1699   :  { %v3006_v54 = vadd.f32 %v3005_v32, %v3004_v1 }
0x169b   :  { %v3020_v0 = vmul.f32 %v5737_v46, %v3006_v54  ;;  %v3019_v4 = vmul.f32 %v5731_v26, %v3006_v54  ;;  %v3021_v2 = vmul.f32 %v5735_v44, %v3006_v54  ;;  %v5999_v46 = vadd.f32 %v5859_v43, %v5810_v38 }
0x169c   :  { %v6003_v26 = vadd.f32 %v5856_v24, %v5806_v51 }
0x169d   :  { %v3023_v6 = vsub.f32 %v2874_v11, %v3020_v0  ;;  %v5987_v27 = vsub.f32 %v2873_v25, %v3019_v4  ;;  %v3024_v36 = vsub.f32 %v2875_v59, %v3021_v2  ;;  %vm3209_vm8 = vcmp.gt.f32.partialorder %v5999_v46, 0.5 }
0x169e   :  { %vm3208_vm9 = vcmp.gt.f32.partialorder %v6003_v26, 0.5 }
0x169f   :  { %v3142_v28 = vmul.f32 %v5856_v24, %v5987_v27  ;;  %v3143_v19 = vmul.f32 %v5859_v43, %v3023_v6  ;;  %v3144_v47 = vmul.f32 %v5862_v41, %v3024_v36 }
0x16a1   :  { %v3145_v45 = vsel %vm759_vm15, %v3142_v28, 0.0  ;;  %v3146_v16 = vsel %vm759_vm15, %v3143_v19, 0.0  ;;  %v3148_v15 = vsel %vm763_vm0, %v3144_v47, 0.0 }
0x16a2   :  { %v5990_v55 = vpop.xlane.xlu2 %3200  ;;  %v5995_v5 = vpop.xlane.xlu1 %3203  ;;  %v3147_v51 = vadd.f32 %v3146_v16, %v3145_v45 }
0x16a3   :  { %v3212_v44 = vand.u32 2147483647, %v5995_v5  ;;  %v3211_v23 = vand.u32 2147483647, %v5990_v55 }
0x16a4   :  { %v3149_v30 = vadd.f32 %v3148_v15, %v3147_v51 }
0x16a5   :  { %v3215_v38 = vsel %vm3209_vm8, -1.0, %v3212_v44  ;;  %v3214_v24 = vsel %vm3208_vm9, -1.0, %v3211_v23 }
0x16a6   :  { %v3218_v29 = vmax.f32 %v3214_v24, %v3215_v38  ;;  %v3150_v7 = vrot.slane %v3149_v30, 4 }
0x16a8   :  { %v3151_v59 = vadd.f32 %v3150_v7, %v3149_v30 }
0x16aa   :  { %v6016_v43 = vpop.xlane.xlu2 %3206  ;;  %v3152_v34 = vrot.slane %v3151_v59, 2 }
0x16ab   :  { %v3213_v35 = vand.u32 2147483647, %v6016_v43 }
0x16ac   :  { %v3153_v50 = vadd.f32 %v3152_v34, %v3151_v59 }
0x16ad   :  { %v3216_v49 = vsel %vm3210_vm10, -1.0, %v3213_v35 }
0x16ae   :  { %v3217_v41 = vsel %vm322_vm2, %v3216_v49, -inf  ;;  %v3154_v1 = vrot.slane %v3153_v50, 1 }
0x16af   :  { %v3219_v31 = vmax.f32 %v3218_v29, %v3217_v41 }
0x16b0   :  { %v3155_v0 = vadd.f32 %v3154_v1, %v3153_v50 }
0x16b1   :  { %v3220_v18 = vrot.slane %v3219_v31, 4 }
0x16b2   :  { %v3170_v28 = vmul.f32 %v5916_v58, %v3155_v0  ;;  %v3169_v19 = vmul.f32 %v5909_v42, %v3155_v0  ;;  %v3168_v23 = vmul.f32 %v5911_v13, %v3155_v0 }
0x16b3   :  { %v3221_v25 = vmax.f32 %v3219_v31, %v3220_v18 }
0x16b4   :  { %v6029_v16 = vsub.f32 %v3024_v36, %v3170_v28  ;;  %v6031_v47 = vsub.f32 %v3023_v6, %v3169_v19  ;;  %v6037_v51 = vsub.f32 %v5987_v27, %v3168_v23 }
0x16b5   :  { %v3222_v11 = vrot.slane %v3221_v25, 2 }
0x16b7   :  { %v3223_v39 = vmax.f32 %v3221_v25, %v3222_v11 }
0x16b9   :  { %v3224_v52 = vrot.slane %v3223_v39, 1 }
0x16bb   :  { %v3225_v22 = vmax.f32 %v3223_v39, %v3224_v52 }
0x16bd   :  { %vm3226_vm11 = vcmp.eq.f32.partialorder %v3214_v24, %v3225_v22  ;;  %vm3227_vm12 = vcmp.eq.f32.partialorder %v3215_v38, %v3225_v22  ;;  %vm3228_vm13 = vcmp.eq.f32.partialorder %v3216_v49, %v3225_v22 }
0x16be   :  { %v3229_v61 = vsel %vm3226_vm11, %v4152_v8, 20.0  ;;  %v3230_v3 = vsel %vm3227_vm12, %v4155_v9, 20.0  ;;  %v3231_v60 = vsel %vm3228_vm13, %v4158_v10, 20.0  ;;  %vm3344_vm12 = vcmp.eq.s32.totalorder %v3961_v17, 18 }
0x16bf   :  { %v3232_v14 = vsel %vm322_vm2, %v3231_v60, inf  ;;  %v3233_v53 = vmin.f32 %v3229_v61, %v3230_v3  ;;  %v3784_v61 = vsel %vm3325_vm7, 1.0, %v6370_v56 }
0x16c1   :  { %v3234_v21 = vmin.f32 %v3233_v53, %v3232_v14 }
0x16c3   :  { %v3235_v32 = vrot.slane %v3234_v21, 4 }
0x16c5   :  { %v3236_v54 = vmin.f32 %v3234_v21, %v3235_v32 }
0x16c7   :  { %v3237_v4 = vrot.slane %v3236_v54, 2 }
0x16c9   :  { %v3238_v2 = vmin.f32 %v3236_v54, %v3237_v4 }
0x16cb   :  { %v3239_v44 = vrot.slane %v3238_v2, 1 }
0x16cd   :  { %v3240_v45 = vmin.f32 %v3238_v2, %v3239_v44 }
0x16cf   :  { %vm3241_vm14 = vcmp.eq.f32.partialorder %v4152_v8, %v3240_v45  ;;  %vm3242_vm1 = vcmp.eq.f32.partialorder %v4155_v9, %v3240_v45  ;;  %vm3243_vm3 = vcmp.eq.f32.partialorder %v4158_v10, %v3240_v45  ;;  %vm3332_vm4 = vcmp.eq.f32.partialorder %v4246_v63, %v3240_v45 }
0x16d0   :  { %v6040_v58 = vsel %vm3241_vm14, 1.0, %v6370_v56  ;;  %v6043_v42 = vsel %vm3242_vm1, 1.0, %v6370_v56  ;;  %v6046_v13 = vsel %vm3243_vm3, 1.0, %v6370_v56  ;;  %v3785_v59 = vsel %vm3332_vm4, 1.0, %v6370_v56 }
0x16d1   :  { %v3250_v6 = vmul.f32 %v6040_v58, %v5990_v55  ;;  %v3251_v36 = vmul.f32 %v6043_v42, %v5995_v5  ;;  %v3252_v38 = vmul.f32 %v6046_v13, %v6016_v43  ;;  %v3277_v27 = vmul.f32 %v6040_v58, %v5925_v33 }
0x16d2   :  { %v3278_v24 = vmul.f32 %v6043_v42, %v5922_v12  ;;  %v3291_v35 = vmul.f32 %v6040_v58, %v6037_v51  ;;  %v3292_v15 = vmul.f32 %v6043_v42, %v6031_v47  ;;  %v3293_v30 = vmul.f32 %v6046_v13, %v6029_v16 }
0x16d3   :  { %v3253_v29 = vadd.f32 %v3251_v36, %v3250_v6  ;;  %v3254_v49 = vsel %vm322_vm2, %v3252_v38, 0.0  ;;  %v3280_v41 = vsel %vm164_vm5, %v3277_v27, 0.0  ;;  %v3279_v39 = vmul.f32 %v6046_v13, %v5943_v57 }
0x16d4   :  { %v3281_v31 = vsel %vm164_vm5, %v3278_v24, 0.0  ;;  %v3294_v18 = vsel %vm759_vm15, %v3291_v35, 0.0  ;;  %v3295_v7 = vsel %vm759_vm15, %v3292_v15, 0.0  ;;  %v3297_v52 = vsel %vm763_vm0, %v3293_v30, 0.0 }
0x16d5   :  { %v3255_v25 = vadd.f32 %v3254_v49, %v3253_v29  ;;  %v3296_v11 = vadd.f32 %v3295_v7, %v3294_v18  ;;  %v3282_v22 = vadd.f32 %v3281_v31, %v3280_v41  ;;  %v3335_v3 = vmul.f32 0.0, %v3785_v59 }
0x16d6   :  { %v3283_v14 = vsel %vm171_vm6, %v3279_v39, 0.0  ;;  %v3337_v1 = vmul.f32 %v3785_v59, %v3784_v61  ;;  %v3307_v31 = vsub.f32 %v6016_v43, %v6046_v13  ;;  %v3306_v7 = vsub.f32 %v5995_v5, %v6043_v42 }
0x16d7   :  { %v3256_v34 = vrot.slane %v3255_v25, 4  ;;  %v3298_v50 = vadd.f32 %v3297_v52, %v3296_v11  ;;  %v6078_v53 = vadd.f32 %v3335_v3, %v5885_v62  ;;  %v6081_v21 = vadd.f32 %v3335_v3, %v5888_v48 }
0x16d8   :  { %v3284_v54 = vadd.f32 %v3283_v14, %v3282_v22  ;;  %v6084_v0 = vadd.f32 %v3337_v1, %v5891_v20 }
0x16d9   :  { %v3257_v60 = vadd.f32 %v3256_v34, %v3255_v25  ;;  %v3299_v19 = vrot.slane %v3298_v50, 4  ;;  %v3305_v25 = vsub.f32 %v5990_v55, %v6040_v58 }
0x16da   :  { %v3285_v28 = vrot.slane %v3284_v54, 4 }
0x16db   :  { %v3258_v32 = vrot.slane %v3257_v60, 2  ;;  %v3300_v45 = vadd.f32 %v3299_v19, %v3298_v50  ;;  %v6118_v19 = vadd.f32 %v6040_v58, %v6003_v26 }
0x16dc   :  { %v3286_v23 = vadd.f32 %v3285_v28, %v3284_v54 }
0x16dd   :  { %v3259_v4 = vadd.f32 %v3258_v32, %v3257_v60  ;;  %v3301_v62 = vrot.slane %v3300_v45, 2  ;;  %vm3357_vm1 = vcmp.gt.f32.partialorder %v6118_v19, 0.5 }
0x16de   :  { %v3287_v6 = vrot.slane %v3286_v23, 2 }
0x16df   :  { %v3260_v2 = vrot.slane %v3259_v4, 1  ;;  %v3302_v24 = vadd.f32 %v3301_v62, %v3300_v45 }
0x16e0   :  { %v3288_v48 = vadd.f32 %v3287_v6, %v3286_v23 }
0x16e1   :  { %v3261_v44 = vadd.f32 %v3260_v2, %v3259_v4  ;;  %v3303_v30 = vrot.slane %v3302_v24, 1 }
0x16e2   :  { %v3289_v29 = vrot.slane %v3288_v48, 1 }
0x16e3   :  { %3864 = vrcp.f32 %v3261_v44  ;;  %v3273_v35 = vand.u32 2147483648, %v3261_v44  ;;  %v3271_v20 = vand.u32 2147483647, %v3261_v44  ;;  %vm3267_vm9 = vweird.f32 %v3261_v44 }
0x16e4   :  { %v3290_v59 = vadd.f32 %v3289_v29, %v3288_v48  ;;  %v3304_v39 = vadd.f32 %v3303_v30, %v3302_v24 }
0x16e5   :  { %v3274_v41 = vor.u32 1.1754944e-38, %v3273_v35  ;;  %vm3272_vm11 = vcmp.eq.f32.partialorder %v3271_v20, 8.507059e+37 }
0x16e9   :  { %v3865_v36 = vpop.eup %3864 }
0x16ea   :  { %v3263_v38 = vmul.f32 %v3865_v36, %v3261_v44  ;;  %vm3268_vm8 = vweird.f32 %v3865_v36 }
0x16eb   :  { %vm3269_vm10 = vmor %vm3267_vm9, %vm3268_vm8 }
0x16ec   :  { %v3264_v27 = vsub.f32 1.0, %v3263_v38 }
0x16ee   :  { %v3265_v15 = vmul.f32 %v3865_v36, %v3264_v27 }
0x16f0   :  { %v3266_v49 = vadd.f32 %v3865_v36, %v3265_v15 }
0x16f2   :  { %v3270_v18 = vsel %vm3269_vm10, %v3865_v36, %v3266_v49 }
0x16f3   :  { %v3275_v11 = vsel %vm3272_vm11, %v3274_v41, %v3270_v18 }
0x16f4   :  { %v3310_v52 = vmul.f32 %v3307_v31, %v3275_v11  ;;  %v3309_v34 = vmul.f32 %v3306_v7, %v3275_v11  ;;  %v3308_v22 = vmul.f32 %v3305_v25, %v3275_v11 }
0x16f6   :  { %v3313_v50 = vmul.f32 %v3310_v52, %v3290_v59  ;;  %v3319_v61 = vmul.f32 %v3310_v52, %v3304_v39  ;;  %v3312_v3 = vmul.f32 %v3309_v34, %v3290_v59  ;;  %v3318_v60 = vmul.f32 %v3309_v34, %v3304_v39 }
0x16f7   :  { %v3311_v43 = vmul.f32 %v3308_v22, %v3290_v59  ;;  %v3317_v14 = vmul.f32 %v3308_v22, %v3304_v39 }
0x16f8   :  { %v6094_v1 = vsub.f32 %v5943_v57, %v3313_v50  ;;  %v6097_v5 = vsub.f32 %v5922_v12, %v3312_v3  ;;  %v6110_v12 = vadd.f32 %v6046_v13, %v6011_v37  ;;  %v6138_v52 = vsub.f32 %v6029_v16, %v3319_v61 }
0x16f9   :  { %v6100_v55 = vsub.f32 %v5925_v33, %v3311_v43  ;;  %v6114_v33 = vadd.f32 %v6043_v42, %v5999_v46  ;;  %v6141_v34 = vsub.f32 %v6031_v47, %v3318_v60  ;;  %v6144_v22 = vsub.f32 %v6037_v51, %v3317_v14 }
0x16fa   :  { %v3347_v32 = vsel %vm3344_vm12, %v6094_v1, 0.0  ;;  %v3346_v54 = vsel %vm3344_vm12, %v6097_v5, 0.0  ;;  %vm3359_vm13 = vcmp.gt.f32.partialorder %v6110_v12, 0.5 }
0x16fb   :  { %v3354_v4 = vsel %vm171_vm6, %v3347_v32, 0.0  ;;  %v3351_v2 = vsel %vm164_vm5, %v3346_v54, 0.0  ;;  %v3345_v28 = vsel %vm3344_vm12, %v6100_v55, 0.0  ;;  %vm3358_vm14 = vcmp.gt.f32.partialorder %v6114_v33, 0.5 }
0x16fc   :  { %3355 = vadd.xlane.f32.xlu0 %v3354_v4  ;;  %3352 = vadd.xlane.f32.xlu2 %v3351_v2  ;;  %v3348_v57 = vsel %vm164_vm5, %v3345_v28, 0.0  ;;  %vm3474_vm12 = vcmp.eq.s32.totalorder %v6464_v40, 18 }
0x16fd   :  { %3349 = vadd.xlane.f32.xlu1 %v3348_v57 }
0x176f   :  { %v6120_v44 = vpop.xlane.xlu0 %3355  ;;  %v6122_v23 = vpop.xlane.xlu2 %3352 }
0x1770   :  { %v3362_v45 = vand.u32 2147483647, %v6120_v44  ;;  %v3361_v6 = vand.u32 2147483647, %v6122_v23  ;;  %v6126_v62 = vpop.xlane.xlu1 %3349 }
0x1771   :  { %v3360_v46 = vand.u32 2147483647, %v6126_v62 }
0x1772   :  { %v3365_v37 = vsel %vm3359_vm13, -1.0, %v3362_v45  ;;  %v3364_v42 = vsel %vm3358_vm14, -1.0, %v3361_v6 }
0x1773   :  { %v3366_v26 = vsel %vm322_vm2, %v3365_v37, -inf  ;;  %v3363_v58 = vsel %vm3357_vm1, -1.0, %v3360_v46 }
0x1774   :  { %v3367_v13 = vmax.f32 %v3363_v58, %v3364_v42 }
0x1776   :  { %v3368_v36 = vmax.f32 %v3367_v13, %v3366_v26 }
0x1778   :  { %v3369_v38 = vrot.slane %v3368_v36, 4 }
0x177a   :  { %v3370_v48 = vmax.f32 %v3368_v36, %v3369_v38  ;;  %v3789_v38 = vsel %vm3474_vm12, 1.0, %v6370_v56  ;;  %vm3603_vm12 = vcmp.eq.s32.totalorder %v6464_v40, 19 }
0x177c   :  { %v3371_v27 = vrot.slane %v3370_v48, 2 }
0x177e   :  { %v3372_v24 = vmax.f32 %v3370_v48, %v3371_v27 }
0x1780   :  { %v3373_v35 = vrot.slane %v3372_v24, 1 }
0x1782   :  { %v3374_v15 = vmax.f32 %v3372_v24, %v3373_v35 }
0x1784   :  { %vm3375_vm3 = vcmp.eq.f32.partialorder %v3363_v58, %v3374_v15  ;;  %vm3376_vm4 = vcmp.eq.f32.partialorder %v3364_v42, %v3374_v15  ;;  %vm3377_vm7 = vcmp.eq.f32.partialorder %v3365_v37, %v3374_v15 }
0x1785   :  { %v3378_v20 = vsel %vm3375_vm3, %v4152_v8, 20.0  ;;  %v3379_v29 = vsel %vm3376_vm4, %v4155_v9, 20.0  ;;  %v3380_v49 = vsel %vm3377_vm7, %v4158_v10, 20.0  ;;  %vm3493_vm4 = vcmp.eq.s32.totalorder %v3961_v17, 19 }
0x1786   :  { %v3381_v30 = vsel %vm322_vm2, %v3380_v49, inf  ;;  %v3382_v41 = vmin.f32 %v3378_v20, %v3379_v29 }
0x1788   :  { %v3383_v31 = vmin.f32 %v3382_v41, %v3381_v30 }
0x178a   :  { %v3384_v18 = vrot.slane %v3383_v31, 4 }
0x178c   :  { %v3385_v7 = vmin.f32 %v3383_v31, %v3384_v18 }
0x178e   :  { %v3386_v25 = vrot.slane %v3385_v7, 2 }
0x1790   :  { %v3387_v11 = vmin.f32 %v3385_v7, %v3386_v25 }
0x1792   :  { %v3388_v59 = vrot.slane %v3387_v11, 1 }
0x1794   :  { %v3389_v39 = vmin.f32 %v3387_v11, %v3388_v59 }
0x1796   :  { %vm3390_vm8 = vcmp.eq.f32.partialorder %v4152_v8, %v3389_v39  ;;  %vm3391_vm9 = vcmp.eq.f32.partialorder %v4155_v9, %v3389_v39  ;;  %vm3392_vm10 = vcmp.eq.f32.partialorder %v4158_v10, %v3389_v39  ;;  %vm3481_vm11 = vcmp.eq.f32.partialorder %v4246_v63, %v3389_v39 }
0x1797   :  { %v6150_v50 = vsel %vm3390_vm8, 1.0, %v6370_v56  ;;  %v6153_v3 = vsel %vm3391_vm9, 1.0, %v6370_v56  ;;  %v6156_v16 = vsel %vm3392_vm10, 1.0, %v6370_v56  ;;  %v3790_v45 = vsel %vm3481_vm11, 1.0, %v6370_v56 }
0x1798   :  { %v3399_v47 = vmul.f32 %v6150_v50, %v6126_v62  ;;  %v3400_v51 = vmul.f32 %v6153_v3, %v6122_v23  ;;  %v3401_v61 = vmul.f32 %v6156_v16, %v6120_v44  ;;  %v3426_v60 = vmul.f32 %v6150_v50, %v6100_v55 }
0x1799   :  { %v3427_v43 = vmul.f32 %v6153_v3, %v6097_v5  ;;  %v3440_v14 = vmul.f32 %v6150_v50, %v6144_v22  ;;  %v3441_v32 = vmul.f32 %v6153_v3, %v6141_v34  ;;  %v3442_v54 = vmul.f32 %v6156_v16, %v6138_v52 }
0x179a   :  { %v3402_v4 = vadd.f32 %v3400_v51, %v3399_v47  ;;  %v3403_v2 = vsel %vm322_vm2, %v3401_v61, 0.0  ;;  %v3429_v46 = vsel %vm164_vm5, %v3426_v60, 0.0  ;;  %v3428_v36 = vmul.f32 %v6156_v16, %v6094_v1 }
0x179b   :  { %v3443_v28 = vsel %vm759_vm15, %v3440_v14, 0.0  ;;  %v3444_v57 = vsel %vm759_vm15, %v3441_v32, 0.0  ;;  %v3430_v42 = vsel %vm164_vm5, %v3427_v43, 0.0  ;;  %v3446_v26 = vsel %vm763_vm0, %v3442_v54, 0.0 }
0x179c   :  { %v3404_v6 = vadd.f32 %v3403_v2, %v3402_v4  ;;  %v3445_v37 = vadd.f32 %v3444_v57, %v3443_v28  ;;  %v3431_v48 = vadd.f32 %v3430_v42, %v3429_v46  ;;  %v3484_v27 = vmul.f32 0.0, %v3790_v45 }
0x179d   :  { %v3486_v20 = vmul.f32 %v3790_v45, %v3789_v38  ;;  %v3432_v49 = vsel %vm171_vm6, %v3428_v36, 0.0  ;;  %v3454_v57 = vsub.f32 %v6126_v62, %v6150_v50  ;;  %v3455_v46 = vsub.f32 %v6122_v23, %v6153_v3 }
0x179e   :  { %v3405_v58 = vrot.slane %v3404_v6, 4  ;;  %v3447_v13 = vadd.f32 %v3446_v26, %v3445_v37  ;;  %v6187_v35 = vadd.f32 %v3484_v27, %v6078_v53  ;;  %v6190_v15 = vadd.f32 %v3484_v27, %v6081_v21 }
0x179f   :  { %v3433_v30 = vadd.f32 %v3432_v49, %v3431_v48  ;;  %v6194_v41 = vadd.f32 %v3486_v20, %v6084_v0 }
0x17a0   :  { %v3406_v24 = vadd.f32 %v3405_v58, %v3404_v6  ;;  %v3448_v7 = vrot.slane %v3447_v13, 4  ;;  %v3456_v6 = vsub.f32 %v6120_v44, %v6156_v16 }
0x17a1   :  { %v3434_v25 = vrot.slane %v3433_v30, 4 }
0x17a2   :  { %v3407_v29 = vrot.slane %v3406_v24, 2  ;;  %v3449_v59 = vadd.f32 %v3448_v7, %v3447_v13 }
0x17a3   :  { %v3435_v53 = vadd.f32 %v3434_v25, %v3433_v30 }
0x17a4   :  { %v3408_v31 = vadd.f32 %v3407_v29, %v3406_v24  ;;  %v3450_v39 = vrot.slane %v3449_v59, 2 }
0x17a5   :  { %v3436_v47 = vrot.slane %v3435_v53, 2 }
0x17a6   :  { %v3409_v18 = vrot.slane %v3408_v31, 1  ;;  %v3451_v61 = vadd.f32 %v3450_v39, %v3449_v59 }
0x17a7   :  { %v3437_v43 = vadd.f32 %v3436_v47, %v3435_v53 }
0x17a8   :  { %v3410_v11 = vadd.f32 %v3409_v18, %v3408_v31  ;;  %v3452_v54 = vrot.slane %v3451_v61, 1 }
0x17a9   :  { %v3438_v2 = vrot.slane %v3437_v43, 1 }
0x17aa   :  { %3866 = vrcp.f32 %v3410_v11  ;;  %v3422_v14 = vand.u32 2147483648, %v3410_v11  ;;  %v3420_v0 = vand.u32 2147483647, %v3410_v11  ;;  %vm3416_vm14 = vweird.f32 %v3410_v11 }
0x17ab   :  { %v3453_v42 = vadd.f32 %v3452_v54, %v3451_v61  ;;  %v3439_v58 = vadd.f32 %v3438_v2, %v3437_v43 }
0x17ac   :  { %v3423_v28 = vor.u32 1.1754944e-38, %v3422_v14  ;;  %vm3421_vm3 = vcmp.eq.f32.partialorder %v3420_v0, 8.507059e+37 }
0x17b0   :  { %v3867_v21 = vpop.eup %3866 }
0x17b1   :  { %v3412_v51 = vmul.f32 %v3867_v21, %v3410_v11  ;;  %vm3417_vm13 = vweird.f32 %v3867_v21 }
0x17b2   :  { %vm3418_vm1 = vmor %vm3416_vm14, %vm3417_vm13 }
0x17b3   :  { %v3413_v60 = vsub.f32 1.0, %v3412_v51 }
0x17b5   :  { %v3414_v32 = vmul.f32 %v3867_v21, %v3413_v60 }
0x17b7   :  { %v3415_v4 = vadd.f32 %v3867_v21, %v3414_v32 }
0x17b9   :  { %v3419_v45 = vsel %vm3418_vm1, %v3867_v21, %v3415_v4 }
0x17ba   :  { %v3424_v37 = vsel %vm3421_vm3, %v3423_v28, %v3419_v45 }
0x17bb   :  { %v3457_v26 = vmul.f32 %v3454_v57, %v3424_v37  ;;  %v3459_v13 = vmul.f32 %v3456_v6, %v3424_v37  ;;  %v3458_v36 = vmul.f32 %v3455_v46, %v3424_v37 }
0x17bd   :  { %v3466_v38 = vmul.f32 %v3457_v26, %v3453_v42  ;;  %v3462_v48 = vmul.f32 %v3459_v13, %v3439_v58  ;;  %v3461_v27 = vmul.f32 %v3458_v36, %v3439_v58  ;;  %v3467_v24 = vmul.f32 %v3458_v36, %v3453_v42 }
0x17be   :  { %v3460_v62 = vmul.f32 %v3457_v26, %v3439_v58  ;;  %v3468_v20 = vmul.f32 %v3459_v13, %v3453_v42  ;;  %v3794_v26 = vsel %vm3603_vm12, 1.0, %v6370_v56 }
0x17bf   :  { %v3465_v29 = vsub.f32 %v6094_v1, %v3462_v48  ;;  %v3464_v44 = vsub.f32 %v6097_v5, %v3461_v27  ;;  %v6206_v23 = vsub.f32 %v6141_v34, %v3467_v24  ;;  %v6209_v49 = vsub.f32 %v6144_v22, %v3466_v38 }
0x17c0   :  { %v3463_v30 = vsub.f32 %v6100_v55, %v3460_v62  ;;  %v6213_v31 = vsub.f32 %v6138_v52, %v3468_v20  ;;  %v3492_v34 = vadd.f32 %v6156_v16, %v6110_v12  ;;  %v3491_v55 = vadd.f32 %v6153_v3, %v6114_v33 }
0x17c1   :  { %v3496_v18 = vsel %vm3493_vm4, %v3465_v29, 0.0  ;;  %v3495_v7 = vsel %vm3493_vm4, %v3464_v44, 0.0  ;;  %v3490_v52 = vadd.f32 %v6150_v50, %v6118_v19 }
0x17c2   :  { %v3503_v17 = vsel %vm171_vm6, %v3496_v18, 0.0  ;;  %v3500_v25 = vsel %vm164_vm5, %v3495_v7, 0.0  ;;  %v3494_v1 = vsel %vm3493_vm4, %v3463_v30, 0.0  ;;  %vm3508_vm6 = vcmp.gt.f32.partialorder %v3492_v34, 0.5 }
0x17c3   :  { %3504 = vadd.xlane.f32.xlu0 %v3503_v17  ;;  %3501 = vadd.xlane.f32.xlu2 %v3500_v25  ;;  %v3497_v5 = vsel %vm164_vm5, %v3494_v1, 0.0  ;;  %vm3507_vm7 = vcmp.gt.f32.partialorder %v3491_v55, 0.5  ;;  %vm3506_vm8 = vcmp.gt.f32.partialorder %v3490_v52, 0.5 }
0x17c4   :  { %3498 = vadd.xlane.f32.xlu1 %v3497_v5 }
0x1836   :  { %v6224_v22 = vpop.xlane.xlu0 %3504  ;;  %v6226_v11 = vpop.xlane.xlu2 %3501 }
0x1837   :  { %v3511_v59 = vand.u32 2147483647, %v6224_v22  ;;  %v3510_v53 = vand.u32 2147483647, %v6226_v11  ;;  %v6230_v39 = vpop.xlane.xlu1 %3498 }
0x1838   :  { %v3509_v12 = vand.u32 2147483647, %v6230_v39 }
0x1839   :  { %v3514_v16 = vsel %vm3508_vm6, -1.0, %v3511_v59  ;;  %v3513_v47 = vsel %vm3507_vm7, -1.0, %v3510_v53 }
0x183a   :  { %v3515_v33 = vsel %vm322_vm2, %v3514_v16, -inf  ;;  %v3512_v19 = vsel %vm3506_vm8, -1.0, %v3509_v12 }
0x183b   :  { %v3516_v50 = vmax.f32 %v3512_v19, %v3513_v47 }
0x183d   :  { %v3517_v3 = vmax.f32 %v3516_v50, %v3515_v33 }
0x183f   :  { %v3518_v21 = vrot.slane %v3517_v3, 4 }
0x1841   :  { %v3519_v51 = vmax.f32 %v3517_v3, %v3518_v21 }
0x1843   :  { %v3520_v61 = vrot.slane %v3519_v51, 2 }
0x1845   :  { %v3521_v60 = vmax.f32 %v3519_v51, %v3520_v61 }
0x1847   :  { %v3522_v43 = vrot.slane %v3521_v60, 1 }
0x1849   :  { %v3523_v14 = vmax.f32 %v3521_v60, %v3522_v43 }
0x184b   :  { %vm3524_vm9 = vcmp.eq.f32.partialorder %v3512_v19, %v3523_v14  ;;  %vm3525_vm10 = vcmp.eq.f32.partialorder %v3513_v47, %v3523_v14  ;;  %vm3526_vm11 = vcmp.eq.f32.partialorder %v3514_v16, %v3523_v14 }
0x184c   :  { %v3527_v32 = vsel %vm3524_vm9, %v4152_v8, 20.0  ;;  %v3528_v0 = vsel %vm3525_vm10, %v4155_v9, 20.0  ;;  %v3529_v54 = vsel %vm3526_vm11, %v4158_v10, 20.0 }
0x184d   :  { %v3530_v4 = vsel %vm322_vm2, %v3529_v54, inf  ;;  %v3531_v2 = vmin.f32 %v3527_v32, %v3528_v0 }
0x184f   :  { %v3532_v28 = vmin.f32 %v3531_v2, %v3530_v4 }
0x1851   :  { %v3533_v57 = vrot.slane %v3532_v28, 4 }
0x1853   :  { %v3534_v45 = vmin.f32 %v3532_v28, %v3533_v57 }
0x1855   :  { %v3535_v6 = vrot.slane %v3534_v45, 2 }
0x1857   :  { %v3536_v46 = vmin.f32 %v3534_v45, %v3535_v6 }
0x1859   :  { %v3537_v37 = vrot.slane %v3536_v46, 1 }
0x185b   :  { %v3538_v42 = vmin.f32 %v3536_v46, %v3537_v37 }
0x185d   :  { %vm3539_vm13 = vcmp.eq.f32.partialorder %v4152_v8, %v3538_v42  ;;  %vm3540_vm14 = vcmp.eq.f32.partialorder %v4155_v9, %v3538_v42  ;;  %vm3541_vm1 = vcmp.eq.f32.partialorder %v4158_v10, %v3538_v42  ;;  %vm3610_vm3 = vcmp.eq.f32.partialorder %v4246_v63, %v3538_v42 }
0x185e   :  { %v3791_v58 = vsel %vm3539_vm13, 1.0, %v6370_v56  ;;  %v3792_v13 = vsel %vm3540_vm14, 1.0, %v6370_v56  ;;  %v3793_v36 = vsel %vm3541_vm1, 1.0, %v6370_v56  ;;  %v3795_v38 = vsel %vm3610_vm3, 1.0, %v6370_v56 }
0x185f   :  { %v3548_v40 = vmul.f32 %v3791_v58, %v6230_v39  ;;  %v3549_v48 = vmul.f32 %v3792_v13, %v6226_v11  ;;  %v3550_v8 = vmul.f32 %v3793_v36, %v6224_v22  ;;  %v3575_v9 = vmul.f32 %v3791_v58, %v6209_v49 }
0x1860   :  { %v3576_v10 = vmul.f32 %v3792_v13, %v6206_v23  ;;  %v3589_v63 = vsub.f32 %v6230_v39, %v3791_v58  ;;  %v3577_v27 = vmul.f32 %v3793_v36, %v6213_v31  ;;  %v3591_v24 = vsub.f32 %v6224_v22, %v3793_v36 }
0x1861   :  { %v3551_v62 = vadd.f32 %v3549_v48, %v3548_v40  ;;  %v3552_v20 = vsel %vm322_vm2, %v3550_v8, 0.0  ;;  %v3578_v56 = vsel %vm759_vm15, %v3575_v9, 0.0  ;;  %v3590_v29 = vsub.f32 %v6226_v11, %v3792_v13 }
0x1862   :  { %v3579_v44 = vsel %vm759_vm15, %v3576_v10, 0.0  ;;  %v3613_v30 = vmul.f32 0.0, %v3795_v38  ;;  %v3615_v18 = vmul.f32 %v3795_v38, %v3794_v26  ;;  %v3581_v25 = vsel %vm763_vm0, %v3577_v27, 0.0 }
0x1863   :  { %v3553_v7 = vadd.f32 %v3552_v20, %v3551_v62  ;;  %v3580_v17 = vadd.f32 %v3579_v44, %v3578_v56 }
0x1864   :  { %v3616_v1 = vadd.f32 %v3613_v30, %v6187_v35  ;;  %v3617_v5 = vadd.f32 %v3613_v30, %v6190_v15  ;;  %v3618_v34 = vadd.f32 %v3615_v18, %v6194_v41 }
0x1865   :  { %v3554_v55 = vrot.slane %v3553_v7, 4  ;;  %v3582_v52 = vadd.f32 %v3581_v25, %v3580_v17 }
0x1867   :  { %v3555_v22 = vadd.f32 %v3554_v55, %v3553_v7  ;;  %v3583_v39 = vrot.slane %v3582_v52, 4 }
0x1869   :  { %v3556_v59 = vrot.slane %v3555_v22, 2  ;;  %v3584_v16 = vadd.f32 %v3583_v39, %v3582_v52 }
0x186b   :  { %v3557_v53 = vadd.f32 %v3556_v59, %v3555_v22  ;;  %v3585_v47 = vrot.slane %v3584_v16, 2 }
0x186d   :  { %v3558_v11 = vrot.slane %v3557_v53, 1  ;;  %v3586_v3 = vadd.f32 %v3585_v47, %v3584_v16 }
0x186f   :  { %v3559_v12 = vadd.f32 %v3558_v11, %v3557_v53  ;;  %v3587_v51 = vrot.slane %v3586_v3, 1 }
0x1871   :  { %3868 = vrcp.f32 %v3559_v12  ;;  %v3571_v35 = vand.u32 2147483648, %v3559_v12  ;;  %v3569_v15 = vand.u32 2147483647, %v3559_v12  ;;  %vm3565_vm6 = vweird.f32 %v3559_v12 }
0x1872   :  { %v3588_v32 = vadd.f32 %v3587_v51, %v3586_v3 }
0x1873   :  { %v3572_v61 = vor.u32 1.1754944e-38, %v3571_v35  ;;  %vm3570_vm8 = vcmp.eq.f32.partialorder %v3569_v15, 8.507059e+37 }
0x1877   :  { %v3869_v33 = vpop.eup %3868 }
0x1878   :  { %v3561_v19 = vmul.f32 %v3869_v33, %v3559_v12  ;;  %vm3566_vm4 = vweird.f32 %v3869_v33 }
0x1879   :  { %vm3567_vm7 = vmor %vm3565_vm6, %vm3566_vm4 }
0x187a   :  { %v3562_v50 = vsub.f32 1.0, %v3561_v19 }
0x187c   :  { %v3563_v21 = vmul.f32 %v3869_v33, %v3562_v50 }
0x187e   :  { %v3564_v41 = vadd.f32 %v3869_v33, %v3563_v21 }
0x1880   :  { %v3568_v60 = vsel %vm3567_vm7, %v3869_v33, %v3564_v41 }
0x1881   :  { %v3573_v43 = vsel %vm3570_vm8, %v3572_v61, %v3568_v60 }
0x1882   :  { %v3592_v14 = vmul.f32 %v3589_v63, %v3573_v43  ;;  %v3594_v0 = vmul.f32 %v3591_v24, %v3573_v43  ;;  %v3593_v54 = vmul.f32 %v3590_v29, %v3573_v43 }
0x1884   :  { %v3597_v4 = vmul.f32 %v3594_v0, %v3588_v32  ;;  %v3596_v2 = vmul.f32 %v3593_v54, %v3588_v32  ;;  %v3595_v28 = vmul.f32 %v3592_v14, %v3588_v32 }
0x1886   :  { %v3600_v57 = vsub.f32 %v6213_v31, %v3597_v4  ;;  %v3599_v45 = vsub.f32 %v6206_v23, %v3596_v2  ;;  %v3598_v6 = vsub.f32 %v6209_v49, %v3595_v28 }
0x1888   :  { %3796 = vmatpush.msk.msrb.mxu2 %vm322_vm2, %v3600_v57 }
0x188a   :  { %3645 = vmatpush.msrb.mxu2 %v3599_v45 }
0x188c   :  { %3646 = vmatpush.msrb.mxu2 %v3598_v6 }
0x188d   :  { %3797 = vmatmul.msk.f32.vlgmr.msrb.gmra.mxu2 %vm164_vm5, %v3616_v1 }
0x1895   :  { %3798 = vmatmul.msk.f32.gmra.mxu2 %vm164_vm5, %v3617_v5 }
0x189d   :  { %3799 = vmatmul.msk.f32.gmra.mxu2 %vm164_vm5, %v3618_v34 }
0x1910   :  { %v3648_v46 = vpop.f32.mrf.mxu2 }
0x1911   :  { %3657 = vst.msk [vmem:[%s6288_s5] sm:$0xff] %vm759_vm15, %v3648_v46 }
0x1918   :  { %v3651_v31 = vpop.f32.mrf.mxu2 }
0x1919   :  { %3658 = vst.msk [vmem:[%s6288_s5 + $0x8] sm:$0xff] %vm759_vm15, %v3651_v31 }
0x1920   :  { %v3654_v23 = vpop.f32.mrf.mxu2 }
0x1921   :  { %3659 = vst.msk [vmem:[%s6288_s5 + $0x10] sm:$0xf] %vm763_vm0, %v3654_v23 }
0x1922   :  { %3664 = vsyncpa [#allocation4], 1 }

</bundles_post_ra>
